<compile_context>
chip_gen: v7x
topology: tpu7x:2x2x1
jax: 0.10.0
libtpu: 0.0.40
codegen_flags: <defaults>
</compile_context>

<pallas_src>
import functools

import jax
import jax.numpy as jnp
import numpy as np
from jax import lax
from jax.experimental import pallas as pl
from jax.experimental.pallas import tpu as pltpu

LANE = 128                      # vreg lane width: channel dims padded to this
_POOL_K = 5                     # chained 5x5 pools == 5/9/13 for stride-1 max
_POOL_R = _POOL_K // 2          # per-stage halo radius (2)
_HALO_W = 16                    # left W halo -> bf16 sublane-aligned center store
VMEM_LIMIT = 32 * 1024 * 1024   # safe scoped-VMEM cap on v5e/v6e/v7x


def _round_up(x, m):
    return (x + m - 1) // m * m


# --------------------------------------------------------------------------
# Kernel 1: fused 1x1 conv + folded BatchNorm + LeakyReLU(0.1), tiled over M.
# --------------------------------------------------------------------------
def _conv_bn_act_kernel(x_ref, w_ref, s_ref, b_ref, o_ref):
    y = jnp.dot(x_ref[...], w_ref[...],                  # bf16 in, f32 acc
                preferred_element_type=jnp.float32)
    y = y * s_ref[...] + b_ref[...]                      # folded BN (f32)
    y = jnp.where(y > 0, y, 0.1 * y)                     # LeakyReLU(0.1)
    o_ref[...] = y.astype(o_ref.dtype)


def conv_bn_act(x_flat, w, scale, bias, *, tm=512):
    """x_flat: (M, Cin) bf16, w: (Cin, Coutp) bf16 -> (M, Coutp) bf16."""
    M, cin = x_flat.shape
    coutp = w.shape[1]
    mp = _round_up(M, tm)
    if mp != M:
        x_flat = jnp.pad(x_flat, ((0, mp - M), (0, 0)))
    bytes_acc = mp * cin * 2 + cin * coutp * 2 + mp * coutp * 2 + 2 * coutp * 4
    cost = pl.CostEstimate(flops=2 * mp * cin * coutp, transcendentals=0,
                           bytes_accessed=int(bytes_acc))
    out = pl.pallas_call(
        _conv_bn_act_kernel,
        grid=(mp // tm,),
        in_specs=[
            pl.BlockSpec((tm, cin), lambda i: (i, 0)),
            pl.BlockSpec((cin, coutp), lambda i: (0, 0)),    # resident weights
            pl.BlockSpec((1, coutp), lambda i: (0, 0)),
            pl.BlockSpec((1, coutp), lambda i: (0, 0)),
        ],
        out_specs=pl.BlockSpec((tm, coutp), lambda i: (i, 0)),
        out_shape=jax.ShapeDtypeStruct((mp, coutp), jnp.bfloat16),
        compiler_params=pltpu.CompilerParams(
            dimension_semantics=("parallel",),
            vmem_limit_bytes=VMEM_LIMIT),
        cost_estimate=cost,
    )(x_flat, w, scale.reshape(1, coutp), bias.reshape(1, coutp))
    return out[:M] if mp != M else out


# --------------------------------------------------------------------------
# Kernel 2: fused pool5-chain (== pools 5/9/13) + concat + 1x1 conv + BN + act.
# One image per grid step; everything stays in VMEM.
# --------------------------------------------------------------------------
def _sppf_tail_kernel(x1_ref, w2_ref, s_ref, b_ref, o_ref, pad_ref, *, H, W):
    k, r = _POOL_K, _POOL_R
    RH, WL = _POOL_R, _HALO_W                 # row halo / left column halo
    C = x1_ref.shape[-1]
    coutp = o_ref.shape[-1]
    hp, wp = pad_ref.shape[0], pad_ref.shape[1]

    x1 = x1_ref[0]                                       # (H, W, C) bf16
    # conv2 partial matmul for the un-pooled branch of the concat.
    acc = jnp.dot(x1.reshape(H * W, C), w2_ref[0],
                  preferred_element_type=jnp.float32)    # (H*W, Coutp) f32

    # -inf border strips only (the center is refreshed every stage, the border
    # is never overwritten).  Do NOT guard with program_id==0: under megacore
    # sharding each core owns its own scratch and must initialize it.
    pad_ref[0:RH, :, :] = jnp.full((RH, wp, C), -jnp.inf, pad_ref.dtype)
    pad_ref[RH + H:hp, :, :] = jnp.full((hp - RH - H, wp, C), -jnp.inf,
                                        pad_ref.dtype)
    pad_ref[RH:RH + H, 0:WL, :] = jnp.full((H, WL, C), -jnp.inf, pad_ref.dtype)
    pad_ref[RH:RH + H, WL + W:wp, :] = jnp.full((H, wp - WL - W, C), -jnp.inf,
                                                pad_ref.dtype)

    cur = x1                                             # bf16 pool chain
    for stage in range(3):                               # pool5 chain: 5, 9, 13
        pad_ref[RH:RH + H, WL:WL + W, :] = cur           # aligned center store
        # Separable 5-wide max; shifted windows read straight from the ref.
        # Width pass covers exactly the H+2r rows the height pass consumes.
        col = pad_ref[:, WL - r:WL - r + W, :]           # (H+2r, W, C)
        for dx in range(1, k):
            col = jnp.maximum(col, pad_ref[:, WL - r + dx:WL - r + dx + W, :])
        nxt = col[0:H]
        for dy in range(1, k):
            nxt = jnp.maximum(nxt, col[dy:dy + H])
        # conv2 partial matmul for this pooled branch (bf16 in, f32 acc).
        acc = acc + jnp.dot(nxt.reshape(H * W, C), w2_ref[stage + 1],
                            preferred_element_type=jnp.float32)
        cur = nxt

    y = acc * s_ref[...] + b_ref[...]                    # folded BN (f32)
    y = jnp.where(y > 0, y, 0.1 * y)                     # LeakyReLU(0.1)
    o_ref[0] = y.reshape(H, W, coutp).astype(o_ref.dtype)


def sppf_tail(x1, w2_chunks, scale, bias):
    """x1: (N,H,W,Cp) bf16, w2_chunks: (4,Cp,Coutp) bf16 -> (N,H,W,Coutp) bf16."""
    N, H, W, C = x1.shape
    coutp = w2_chunks.shape[-1]
    hp = H + 2 * _POOL_R
    wp = _HALO_W + W + _POOL_R
    flops = N * (4 * 2 * H * W * C * coutp
                 + 3 * 2 * (_POOL_K - 1) * hp * W * C)
    bytes_acc = (x1.size + w2_chunks.size + N * H * W * coutp) * 2 \
        + 2 * coutp * 4
    cost = pl.CostEstimate(flops=int(flops), transcendentals=0,
                           bytes_accessed=int(bytes_acc))
    kernel = functools.partial(_sppf_tail_kernel, H=H, W=W)
    return pl.pallas_call(
        kernel,
        grid=(N,),
        in_specs=[
            pl.BlockSpec((1, H, W, C), lambda n: (n, 0, 0, 0)),
            pl.BlockSpec((4, C, coutp), lambda n: (0, 0, 0)),  # resident w2
            pl.BlockSpec((1, coutp), lambda n: (0, 0)),
            pl.BlockSpec((1, coutp), lambda n: (0, 0)),
        ],
        out_specs=pl.BlockSpec((1, H, W, coutp), lambda n: (n, 0, 0, 0)),
        out_shape=jax.ShapeDtypeStruct((N, H, W, coutp), jnp.bfloat16),
        scratch_shapes=[pltpu.VMEM((hp, wp, C), jnp.bfloat16)],
        compiler_params=pltpu.CompilerParams(
            dimension_semantics=("parallel",),
            vmem_limit_bytes=VMEM_LIMIT),
        cost_estimate=cost,
    )(x1, w2_chunks, scale.reshape(1, coutp), bias.reshape(1, coutp))


# --------------------------------------------------------------------------
# Parameters. BatchNorm is folded into (scale, bias) (eval-mode semantics).
# --------------------------------------------------------------------------
def make_params(key, in_channels, out_channels):
    cmid = in_channels // 2
    ccat = in_channels * 2
    ks = jax.random.split(key, 10)

    def bn_fold(kg, kb, km, kv, c):
        gamma = jax.random.uniform(kg, (c,), jnp.float32, 0.5, 1.5)
        beta = 0.1 * jax.random.normal(kb, (c,), jnp.float32)
        mean = 0.1 * jax.random.normal(km, (c,), jnp.float32)
        var = jax.random.uniform(kv, (c,), jnp.float32, 0.5, 1.5)
        scale = gamma / jnp.sqrt(var + 1e-5)
        bias = beta - mean * scale
        return scale, bias

    w1 = 0.3 * jax.random.normal(ks[0], (in_channels, cmid), jnp.float32)
    s1, b1 = bn_fold(ks[1], ks[2], ks[3], ks[4], cmid)
    w2 = 0.3 * jax.random.normal(ks[5], (ccat, out_channels), jnp.float32)
    s2, b2 = bn_fold(ks[6], ks[7], ks[8], ks[9], out_channels)
    return dict(w1=w1, s1=s1, b1=b1, w2=w2, s2=s2, b2=b2)


def prepare_kernel_params(params, in_channels, out_channels):
    """Pad channel dims to the 128-lane width; cast weights to bf16.

    Padded conv1 outputs get scale=bias=0 -> exactly-zero activations;
    padded conv2 weight rows/cols are zero -> padded channels never
    contribute, so results equal the unpadded math.
    """
    cmid = in_channels // 2
    cmid_p = _round_up(cmid, LANE)
    cout_p = _round_up(out_channels, LANE)

    w1 = jnp.zeros((in_channels, cmid_p), jnp.bfloat16)
    w1 = w1.at[:, :cmid].set(params["w1"].astype(jnp.bfloat16))
    s1 = jnp.zeros((cmid_p,), jnp.float32).at[:cmid].set(params["s1"])
    b1 = jnp.zeros((cmid_p,), jnp.float32).at[:cmid].set(params["b1"])

    w2 = params["w2"].astype(jnp.bfloat16)               # (4*cmid, out)
    w2c = jnp.zeros((4, cmid_p, cout_p), jnp.bfloat16)
    for j in range(4):                                   # concat chunk order
        w2c = w2c.at[j, :cmid, :out_channels].set(
            w2[j * cmid:(j + 1) * cmid, :])
    s2 = jnp.zeros((cout_p,), jnp.float32).at[:out_channels].set(params["s2"])
    b2 = jnp.zeros((cout_p,), jnp.float32).at[:out_channels].set(params["b2"])
    return dict(w1=w1, s1=s1, b1=b1, w2=w2c, s2=s2, b2=b2)


# --------------------------------------------------------------------------
# SPPF forward: x (N, C, H, W) -> (N, out_channels, H, W)
# --------------------------------------------------------------------------
def sppf_forward(x_nchw, kparams, out_channels):
    N, C, H, W = x_nchw.shape
    cmid_p = kparams["w1"].shape[1]
    # bf16 cast fused into the NCHW->NHWC boundary transpose (half the bytes).
    x = jnp.transpose(x_nchw, (0, 2, 3, 1)).astype(jnp.bfloat16)
    x_flat = x.reshape(N * H * W, C)

    x1 = conv_bn_act(x_flat, kparams["w1"], kparams["s1"], kparams["b1"])
    x1 = x1.reshape(N, H, W, cmid_p)                              # bf16

    out_p = sppf_tail(x1, kparams["w2"], kparams["s2"], kparams["b2"])
    out = jnp.transpose(out_p[..., :out_channels], (0, 3, 1, 2))  # bf16 NCHW
    return out.astype(jnp.float32)


# --------------------------------------------------------------------------
# Pure-JAX reference (independent k=5/9/13 pools, exactly as the PyTorch
# module). `storage_dtype=bf16` applies the same storage rounding as the
# kernels so the check is tight; pass jnp.float32 for exact f32 math.
# --------------------------------------------------------------------------
def sppf_reference(x_nchw, params, storage_dtype=jnp.bfloat16):
    def rnd(a):
        return a.astype(storage_dtype).astype(jnp.float32)

    N, C, H, W = x_nchw.shape
    cmid = C // 2
    x = jnp.transpose(x_nchw, (0, 2, 3, 1)).astype(jnp.float32)

    def cba(xf, w, s, b):
        y = rnd(xf) @ rnd(w) * s + b
        return jnp.where(y > 0, y, 0.1 * y)

    x1 = cba(x.reshape(N * H * W, C), params["w1"], params["s1"],
             params["b1"]).reshape(N, H, W, cmid)
    x1 = rnd(x1)

    def pool(a, k):
        r = k // 2
        return lax.reduce_window(a, -jnp.inf, lax.max, (1, k, k, 1),
                                 (1, 1, 1, 1),
                                 [(0, 0), (r, r), (r, r), (0, 0)])

    cat = jnp.concatenate([x1, pool(x1, 5), pool(x1, 9), pool(x1, 13)],
                          axis=-1)
    out = cba(cat.reshape(N * H * W, 2 * C), params["w2"], params["s2"],
              params["b2"])
    out = rnd(out)                                       # kernel stores bf16
    return jnp.transpose(out.reshape(N, H, W, -1), (0, 3, 1, 2))


if __name__ == "__main__":
    in_channels, out_channels = 4, 8
    N, H, W = 2, 16, 16

    key = jax.random.PRNGKey(0)
    kx, kp = jax.random.split(key)
    x = jax.random.normal(kx, (N, in_channels, H, W), jnp.float32)
    params = make_params(kp, in_channels, out_channels)
    kparams = prepare_kernel_params(params, in_channels, out_channels)

    fwd = jax.jit(lambda xx: sppf_forward(xx, kparams, out_channels))
    out = jax.block_until_ready(fwd(x))
    ref = jax.block_until_ready(sppf_reference(x, params))

    assert out.shape == (N, out_channels, H, W), out.shape
    np.testing.assert_allclose(np.asarray(out), np.asarray(ref),
                               rtol=2e-2, atol=2e-2)
    print("KERNEL_OK")
</pallas_src>

<mosaic_0001>
module attributes {stable_mosaic.version = 11 : i64} {
  func.func @_sppf_tail_kernel(%arg0: i32, %arg1: memref<1x16x16x128xbf16, #tpu.memory_space<vmem>>, %arg2: memref<4x128x128xbf16, #tpu.memory_space<vmem>>, %arg3: memref<1x128xf32, #tpu.memory_space<vmem>>, %arg4: memref<1x128xf32, #tpu.memory_space<vmem>>, %arg5: memref<1x16x16x128xbf16, #tpu.memory_space<vmem>>, %arg6: memref<20x34x128xbf16, #tpu.memory_space<vmem>>) attributes {dimension_semantics = [#tpu.dimension_semantics<parallel>], iteration_bounds = array<i64: 2>, scalar_prefetch = 0 : i64, scratch_operands = 1 : i64, tpu.core_type = #tpu.core_type<tc>, window_params = [{transform_indices = @transform_0, window_bounds = array<i64: 1, 16, 16, 128>}, {pipeline_mode = #tpu.pipeline_mode<synchronous>, transform_indices = @transform_1, window_bounds = array<i64: 4, 128, 128>}, {pipeline_mode = #tpu.pipeline_mode<synchronous>, transform_indices = @transform_2, window_bounds = array<i64: 1, 128>}, {pipeline_mode = #tpu.pipeline_mode<synchronous>, transform_indices = @transform_3, window_bounds = array<i64: 1, 128>}, {transform_indices = @transform_4, window_bounds = array<i64: 1, 16, 16, 128>}]} {
    %c0 = arith.constant 0 : index
    %c0_0 = arith.constant 0 : index
    %c0_1 = arith.constant 0 : index
    %c0_2 = arith.constant 0 : index
    %0 = vector.load %arg1[%c0, %c0_0, %c0_1, %c0_2] : memref<1x16x16x128xbf16, #tpu.memory_space<vmem>>, vector<1x16x16x128xbf16>
    %1 = vector.shape_cast %0 : vector<1x16x16x128xbf16> to vector<16x16x128xbf16>
    %2 = vector.shape_cast %1 : vector<16x16x128xbf16> to vector<256x128xbf16>
    %c0_3 = arith.constant 0 : index
    %c0_4 = arith.constant 0 : index
    %c0_5 = arith.constant 0 : index
    %3 = vector.load %arg2[%c0_3, %c0_4, %c0_5] : memref<4x128x128xbf16, #tpu.memory_space<vmem>>, vector<1x128x128xbf16>
    %4 = vector.shape_cast %3 : vector<1x128x128xbf16> to vector<128x128xbf16>
    %cst = arith.constant dense<0.000000e+00> : vector<256x128xf32>
    %5 = tpu.matmul %2, %4, %cst {dimension_numbers = #tpu.dot_dimension_numbers<[1], [0], [0], [1], [0, 0, 1, 1], [], []>} : vector<256x128xbf16>, vector<128x128xbf16>, vector<256x128xf32> -> vector<256x128xf32>
    %cst_6 = arith.constant 0xFF80 : bf16
    %6 = vector.broadcast %cst_6 : bf16 to vector<2x34x128xbf16>
    %c0_7 = arith.constant 0 : index
    %c0_8 = arith.constant 0 : index
    %c0_9 = arith.constant 0 : index
    %7 = vector.load %arg6[%c0_7, %c0_8, %c0_9] : memref<20x34x128xbf16, #tpu.memory_space<vmem>>, vector<2x34x128xbf16>
    tpu.vector_store %arg6[%c0_7, %c0_8, %c0_9], %6 {strides = array<i32>} : memref<20x34x128xbf16, #tpu.memory_space<vmem>>, vector<2x34x128xbf16>,
    %cst_10 = arith.constant 0xFF80 : bf16
    %8 = vector.broadcast %cst_10 : bf16 to vector<2x34x128xbf16>
    %c18 = arith.constant 18 : index
    %c0_11 = arith.constant 0 : index
    %c0_12 = arith.constant 0 : index
    %9 = vector.load %arg6[%c18, %c0_11, %c0_12] : memref<20x34x128xbf16, #tpu.memory_space<vmem>>, vector<2x34x128xbf16>
    tpu.vector_store %arg6[%c18, %c0_11, %c0_12], %8 {strides = array<i32>} : memref<20x34x128xbf16, #tpu.memory_space<vmem>>, vector<2x34x128xbf16>,
    %cst_13 = arith.constant 0xFF80 : bf16
    %10 = vector.broadcast %cst_13 : bf16 to vector<16x16x128xbf16>
    %c2 = arith.constant 2 : index
    %c0_14 = arith.constant 0 : index
    %c0_15 = arith.constant 0 : index
    %11 = vector.load %arg6[%c2, %c0_14, %c0_15] : memref<20x34x128xbf16, #tpu.memory_space<vmem>>, vector<16x16x128xbf16>
    tpu.vector_store %arg6[%c2, %c0_14, %c0_15], %10 {strides = array<i32>} : memref<20x34x128xbf16, #tpu.memory_space<vmem>>, vector<16x16x128xbf16>,
    %cst_16 = arith.constant 0xFF80 : bf16
    %12 = vector.broadcast %cst_16 : bf16 to vector<16x2x128xbf16>
    %c2_17 = arith.constant 2 : index
    %c32 = arith.constant 32 : index
    %c0_18 = arith.constant 0 : index
    %13 = vector.load %arg6[%c2_17, %c32, %c0_18] : memref<20x34x128xbf16, #tpu.memory_space<vmem>>, vector<16x2x128xbf16>
    tpu.vector_store %arg6[%c2_17, %c32, %c0_18], %12 {strides = array<i32>} : memref<20x34x128xbf16, #tpu.memory_space<vmem>>, vector<16x2x128xbf16>,
    %c2_19 = arith.constant 2 : index
    %c16 = arith.constant 16 : index
    %c0_20 = arith.constant 0 : index
    %14 = vector.load %arg6[%c2_19, %c16, %c0_20] : memref<20x34x128xbf16, #tpu.memory_space<vmem>>, vector<16x16x128xbf16>
    tpu.vector_store %arg6[%c2_19, %c16, %c0_20], %1 {strides = array<i32>} : memref<20x34x128xbf16, #tpu.memory_space<vmem>>, vector<16x16x128xbf16>,
    %c0_21 = arith.constant 0 : index
    %c14 = arith.constant 14 : index
    %c0_22 = arith.constant 0 : index
    %15 = vector.load %arg6[%c0_21, %c14, %c0_22] : memref<20x34x128xbf16, #tpu.memory_space<vmem>>, vector<20x16x128xbf16>
    %c0_23 = arith.constant 0 : index
    %c15 = arith.constant 15 : index
    %c0_24 = arith.constant 0 : index
    %16 = vector.load %arg6[%c0_23, %c15, %c0_24] : memref<20x34x128xbf16, #tpu.memory_space<vmem>>, vector<20x16x128xbf16>
    %17 = arith.maximumf %15, %16 : vector<20x16x128xbf16>
    %c0_25 = arith.constant 0 : index
    %c16_26 = arith.constant 16 : index
    %c0_27 = arith.constant 0 : index
    %18 = vector.load %arg6[%c0_25, %c16_26, %c0_27] : memref<20x34x128xbf16, #tpu.memory_space<vmem>>, vector<20x16x128xbf16>
    %19 = arith.maximumf %17, %18 : vector<20x16x128xbf16>
    %c0_28 = arith.constant 0 : index
    %c17 = arith.constant 17 : index
    %c0_29 = arith.constant 0 : index
    %20 = vector.load %arg6[%c0_28, %c17, %c0_29] : memref<20x34x128xbf16, #tpu.memory_space<vmem>>, vector<20x16x128xbf16>
    %21 = arith.maximumf %19, %20 : vector<20x16x128xbf16>
    %c0_30 = arith.constant 0 : index
    %c18_31 = arith.constant 18 : index
    %c0_32 = arith.constant 0 : index
    %22 = vector.load %arg6[%c0_30, %c18_31, %c0_32] : memref<20x34x128xbf16, #tpu.memory_space<vmem>>, vector<20x16x128xbf16>
    %23 = arith.maximumf %21, %22 : vector<20x16x128xbf16>
    %24 = vector.extract_strided_slice %23 {offsets = [0, 0, 0], sizes = [16, 16, 128], strides = [1, 1, 1]} : vector<20x16x128xbf16> to vector<16x16x128xbf16>
    %25 = vector.extract_strided_slice %23 {offsets = [1, 0, 0], sizes = [16, 16, 128], strides = [1, 1, 1]} : vector<20x16x128xbf16> to vector<16x16x128xbf16>
    %26 = arith.maximumf %24, %25 : vector<16x16x128xbf16>
    %27 = vector.extract_strided_slice %23 {offsets = [2, 0, 0], sizes = [16, 16, 128], strides = [1, 1, 1]} : vector<20x16x128xbf16> to vector<16x16x128xbf16>
    %28 = arith.maximumf %26, %27 : vector<16x16x128xbf16>
    %29 = vector.extract_strided_slice %23 {offsets = [3, 0, 0], sizes = [16, 16, 128], strides = [1, 1, 1]} : vector<20x16x128xbf16> to vector<16x16x128xbf16>
    %30 = arith.maximumf %28, %29 : vector<16x16x128xbf16>
    %31 = vector.extract_strided_slice %23 {offsets = [4, 0, 0], sizes = [16, 16, 128], strides = [1, 1, 1]} : vector<20x16x128xbf16> to vector<16x16x128xbf16>
    %32 = arith.maximumf %30, %31 : vector<16x16x128xbf16>
    %33 = vector.shape_cast %32 : vector<16x16x128xbf16> to vector<256x128xbf16>
    %c1 = arith.constant 1 : index
    %c0_33 = arith.constant 0 : index
    %c0_34 = arith.constant 0 : index
    %34 = vector.load %arg2[%c1, %c0_33, %c0_34] : memref<4x128x128xbf16, #tpu.memory_space<vmem>>, vector<1x128x128xbf16>
    %35 = vector.shape_cast %34 : vector<1x128x128xbf16> to vector<128x128xbf16>
    %cst_35 = arith.constant dense<0.000000e+00> : vector<256x128xf32>
    %36 = tpu.matmul %33, %35, %cst_35 {dimension_numbers = #tpu.dot_dimension_numbers<[1], [0], [0], [1], [0, 0, 1, 1], [], []>} : vector<256x128xbf16>, vector<128x128xbf16>, vector<256x128xf32> -> vector<256x128xf32>
    %37 = arith.addf %5, %36 : vector<256x128xf32>
    %c2_36 = arith.constant 2 : index
    %c16_37 = arith.constant 16 : index
    %c0_38 = arith.constant 0 : index
    %38 = vector.load %arg6[%c2_36, %c16_37, %c0_38] : memref<20x34x128xbf16, #tpu.memory_space<vmem>>, vector<16x16x128xbf16>
    tpu.vector_store %arg6[%c2_36, %c16_37, %c0_38], %32 {strides = array<i32>} : memref<20x34x128xbf16, #tpu.memory_space<vmem>>, vector<16x16x128xbf16>,
    %c0_39 = arith.constant 0 : index
    %c14_40 = arith.constant 14 : index
    %c0_41 = arith.constant 0 : index
    %39 = vector.load %arg6[%c0_39, %c14_40, %c0_41] : memref<20x34x128xbf16, #tpu.memory_space<vmem>>, vector<20x16x128xbf16>
    %c0_42 = arith.constant 0 : index
    %c15_43 = arith.constant 15 : index
    %c0_44 = arith.constant 0 : index
    %40 = vector.load %arg6[%c0_42, %c15_43, %c0_44] : memref<20x34x128xbf16, #tpu.memory_space<vmem>>, vector<20x16x128xbf16>
    %41 = arith.maximumf %39, %40 : vector<20x16x128xbf16>
    %c0_45 = arith.constant 0 : index
    %c16_46 = arith.constant 16 : index
    %c0_47 = arith.constant 0 : index
    %42 = vector.load %arg6[%c0_45, %c16_46, %c0_47] : memref<20x34x128xbf16, #tpu.memory_space<vmem>>, vector<20x16x128xbf16>
    %43 = arith.maximumf %41, %42 : vector<20x16x128xbf16>
    %c0_48 = arith.constant 0 : index
    %c17_49 = arith.constant 17 : index
    %c0_50 = arith.constant 0 : index
    %44 = vector.load %arg6[%c0_48, %c17_49, %c0_50] : memref<20x34x128xbf16, #tpu.memory_space<vmem>>, vector<20x16x128xbf16>
    %45 = arith.maximumf %43, %44 : vector<20x16x128xbf16>
    %c0_51 = arith.constant 0 : index
    %c18_52 = arith.constant 18 : index
    %c0_53 = arith.constant 0 : index
    %46 = vector.load %arg6[%c0_51, %c18_52, %c0_53] : memref<20x34x128xbf16, #tpu.memory_space<vmem>>, vector<20x16x128xbf16>
    %47 = arith.maximumf %45, %46 : vector<20x16x128xbf16>
    %48 = vector.extract_strided_slice %47 {offsets = [0, 0, 0], sizes = [16, 16, 128], strides = [1, 1, 1]} : vector<20x16x128xbf16> to vector<16x16x128xbf16>
    %49 = vector.extract_strided_slice %47 {offsets = [1, 0, 0], sizes = [16, 16, 128], strides = [1, 1, 1]} : vector<20x16x128xbf16> to vector<16x16x128xbf16>
    %50 = arith.maximumf %48, %49 : vector<16x16x128xbf16>
    %51 = vector.extract_strided_slice %47 {offsets = [2, 0, 0], sizes = [16, 16, 128], strides = [1, 1, 1]} : vector<20x16x128xbf16> to vector<16x16x128xbf16>
    %52 = arith.maximumf %50, %51 : vector<16x16x128xbf16>
    %53 = vector.extract_strided_slice %47 {offsets = [3, 0, 0], sizes = [16, 16, 128], strides = [1, 1, 1]} : vector<20x16x128xbf16> to vector<16x16x128xbf16>
    %54 = arith.maximumf %52, %53 : vector<16x16x128xbf16>
    %55 = vector.extract_strided_slice %47 {offsets = [4, 0, 0], sizes = [16, 16, 128], strides = [1, 1, 1]} : vector<20x16x128xbf16> to vector<16x16x128xbf16>
    %56 = arith.maximumf %54, %55 : vector<16x16x128xbf16>
    %57 = vector.shape_cast %56 : vector<16x16x128xbf16> to vector<256x128xbf16>
    %c2_54 = arith.constant 2 : index
    %c0_55 = arith.constant 0 : index
    %c0_56 = arith.constant 0 : index
    %58 = vector.load %arg2[%c2_54, %c0_55, %c0_56] : memref<4x128x128xbf16, #tpu.memory_space<vmem>>, vector<1x128x128xbf16>
    %59 = vector.shape_cast %58 : vector<1x128x128xbf16> to vector<128x128xbf16>
    %cst_57 = arith.constant dense<0.000000e+00> : vector<256x128xf32>
    %60 = tpu.matmul %57, %59, %cst_57 {dimension_numbers = #tpu.dot_dimension_numbers<[1], [0], [0], [1], [0, 0, 1, 1], [], []>} : vector<256x128xbf16>, vector<128x128xbf16>, vector<256x128xf32> -> vector<256x128xf32>
    %61 = arith.addf %37, %60 : vector<256x128xf32>
    %c2_58 = arith.constant 2 : index
    %c16_59 = arith.constant 16 : index
    %c0_60 = arith.constant 0 : index
    %62 = vector.load %arg6[%c2_58, %c16_59, %c0_60] : memref<20x34x128xbf16, #tpu.memory_space<vmem>>, vector<16x16x128xbf16>
    tpu.vector_store %arg6[%c2_58, %c16_59, %c0_60], %56 {strides = array<i32>} : memref<20x34x128xbf16, #tpu.memory_space<vmem>>, vector<16x16x128xbf16>,
    %c0_61 = arith.constant 0 : index
    %c14_62 = arith.constant 14 : index
    %c0_63 = arith.constant 0 : index
    %63 = vector.load %arg6[%c0_61, %c14_62, %c0_63] : memref<20x34x128xbf16, #tpu.memory_space<vmem>>, vector<20x16x128xbf16>
    %c0_64 = arith.constant 0 : index
    %c15_65 = arith.constant 15 : index
    %c0_66 = arith.constant 0 : index
    %64 = vector.load %arg6[%c0_64, %c15_65, %c0_66] : memref<20x34x128xbf16, #tpu.memory_space<vmem>>, vector<20x16x128xbf16>
    %65 = arith.maximumf %63, %64 : vector<20x16x128xbf16>
    %c0_67 = arith.constant 0 : index
    %c16_68 = arith.constant 16 : index
    %c0_69 = arith.constant 0 : index
    %66 = vector.load %arg6[%c0_67, %c16_68, %c0_69] : memref<20x34x128xbf16, #tpu.memory_space<vmem>>, vector<20x16x128xbf16>
    %67 = arith.maximumf %65, %66 : vector<20x16x128xbf16>
    %c0_70 = arith.constant 0 : index
    %c17_71 = arith.constant 17 : index
    %c0_72 = arith.constant 0 : index
    %68 = vector.load %arg6[%c0_70, %c17_71, %c0_72] : memref<20x34x128xbf16, #tpu.memory_space<vmem>>, vector<20x16x128xbf16>
    %69 = arith.maximumf %67, %68 : vector<20x16x128xbf16>
    %c0_73 = arith.constant 0 : index
    %c18_74 = arith.constant 18 : index
    %c0_75 = arith.constant 0 : index
    %70 = vector.load %arg6[%c0_73, %c18_74, %c0_75] : memref<20x34x128xbf16, #tpu.memory_space<vmem>>, vector<20x16x128xbf16>
    %71 = arith.maximumf %69, %70 : vector<20x16x128xbf16>
    %72 = vector.extract_strided_slice %71 {offsets = [0, 0, 0], sizes = [16, 16, 128], strides = [1, 1, 1]} : vector<20x16x128xbf16> to vector<16x16x128xbf16>
    %73 = vector.extract_strided_slice %71 {offsets = [1, 0, 0], sizes = [16, 16, 128], strides = [1, 1, 1]} : vector<20x16x128xbf16> to vector<16x16x128xbf16>
    %74 = arith.maximumf %72, %73 : vector<16x16x128xbf16>
    %75 = vector.extract_strided_slice %71 {offsets = [2, 0, 0], sizes = [16, 16, 128], strides = [1, 1, 1]} : vector<20x16x128xbf16> to vector<16x16x128xbf16>
    %76 = arith.maximumf %74, %75 : vector<16x16x128xbf16>
    %77 = vector.extract_strided_slice %71 {offsets = [3, 0, 0], sizes = [16, 16, 128], strides = [1, 1, 1]} : vector<20x16x128xbf16> to vector<16x16x128xbf16>
    %78 = arith.maximumf %76, %77 : vector<16x16x128xbf16>
    %79 = vector.extract_strided_slice %71 {offsets = [4, 0, 0], sizes = [16, 16, 128], strides = [1, 1, 1]} : vector<20x16x128xbf16> to vector<16x16x128xbf16>
    %80 = arith.maximumf %78, %79 : vector<16x16x128xbf16>
    %81 = vector.shape_cast %80 : vector<16x16x128xbf16> to vector<256x128xbf16>
    %c3 = arith.constant 3 : index
    %c0_76 = arith.constant 0 : index
    %c0_77 = arith.constant 0 : index
    %82 = vector.load %arg2[%c3, %c0_76, %c0_77] : memref<4x128x128xbf16, #tpu.memory_space<vmem>>, vector<1x128x128xbf16>
    %83 = vector.shape_cast %82 : vector<1x128x128xbf16> to vector<128x128xbf16>
    %cst_78 = arith.constant dense<0.000000e+00> : vector<256x128xf32>
    %84 = tpu.matmul %81, %83, %cst_78 {dimension_numbers = #tpu.dot_dimension_numbers<[1], [0], [0], [1], [0, 0, 1, 1], [], []>} : vector<256x128xbf16>, vector<128x128xbf16>, vector<256x128xf32> -> vector<256x128xf32>
    %85 = arith.addf %61, %84 : vector<256x128xf32>
    %c0_79 = arith.constant 0 : index
    %c0_80 = arith.constant 0 : index
    %86 = vector.load %arg3[%c0_79, %c0_80] : memref<1x128xf32, #tpu.memory_space<vmem>>, vector<1x128xf32>
    %87 = vector.broadcast %86 : vector<1x128xf32> to vector<256x128xf32>
    %88 = arith.mulf %85, %87 : vector<256x128xf32>
    %c0_81 = arith.constant 0 : index
    %c0_82 = arith.constant 0 : index
    %89 = vector.load %arg4[%c0_81, %c0_82] : memref<1x128xf32, #tpu.memory_space<vmem>>, vector<1x128xf32>
    %90 = vector.broadcast %89 : vector<1x128xf32> to vector<256x128xf32>
    %91 = arith.addf %88, %90 : vector<256x128xf32>
    %cst_83 = arith.constant 0.000000e+00 : f32
    %92 = vector.broadcast %cst_83 : f32 to vector<256x128xf32>
    %93 = arith.cmpf ogt, %91, %92 : vector<256x128xf32>
    %cst_84 = arith.constant 1.000000e-01 : f32
    %94 = vector.broadcast %cst_84 : f32 to vector<256x128xf32>
    %95 = arith.mulf %94, %91 : vector<256x128xf32>
    %96 = arith.select %93, %91, %95 : vector<256x128xi1>, vector<256x128xf32>
    %97 = vector.shape_cast %96 : vector<256x128xf32> to vector<16x16x128xf32>
    %98 = arith.truncf %97 : vector<16x16x128xf32> to vector<16x16x128xbf16>
    %c0_85 = arith.constant 0 : index
    %c0_86 = arith.constant 0 : index
    %c0_87 = arith.constant 0 : index
    %c0_88 = arith.constant 0 : index
    %99 = vector.load %arg5[%c0_85, %c0_86, %c0_87, %c0_88] : memref<1x16x16x128xbf16, #tpu.memory_space<vmem>>, vector<1x16x16x128xbf16>
    %100 = vector.shape_cast %99 : vector<1x16x16x128xbf16> to vector<16x16x128xbf16>
    %101 = vector.shape_cast %98 : vector<16x16x128xbf16> to vector<1x16x16x128xbf16>
    tpu.vector_store %arg5[%c0_85, %c0_86, %c0_87, %c0_88], %101 {strides = array<i32>} : memref<1x16x16x128xbf16, #tpu.memory_space<vmem>>, vector<1x16x16x128xbf16>,
    return
  }
  func.func @transform_0(%arg0: i32) -> (i32, i32, i32, i32) {
    %c0_i32 = arith.constant 0 : i32
    %c0_i32_0 = arith.constant 0 : i32
    %c0_i32_1 = arith.constant 0 : i32
    %c0_i32_2 = arith.constant 0 : i32
    return %arg0, %c0_i32, %c0_i32_0, %c0_i32_1 : i32, i32, i32, i32
  }
  func.func @transform_1(%arg0: i32) -> (i32, i32, i32) {
    %c0_i32 = arith.constant 0 : i32
    %c0_i32_0 = arith.constant 0 : i32
    %c0_i32_1 = arith.constant 0 : i32
    %c0_i32_2 = arith.constant 0 : i32
    return %c0_i32, %c0_i32_0, %c0_i32_1 : i32, i32, i32
  }
  func.func @transform_2(%arg0: i32) -> (i32, i32) {
    %c0_i32 = arith.constant 0 : i32
    %c0_i32_0 = arith.constant 0 : i32
    %c0_i32_1 = arith.constant 0 : i32
    return %c0_i32, %c0_i32_0 : i32, i32
  }
  func.func @transform_3(%arg0: i32) -> (i32, i32) {
    %c0_i32 = arith.constant 0 : i32
    %c0_i32_0 = arith.constant 0 : i32
    %c0_i32_1 = arith.constant 0 : i32
    return %c0_i32, %c0_i32_0 : i32, i32
  }
  func.func @transform_4(%arg0: i32) -> (i32, i32, i32, i32) {
    %c0_i32 = arith.constant 0 : i32
    %c0_i32_0 = arith.constant 0 : i32
    %c0_i32_1 = arith.constant 0 : i32
    %c0_i32_2 = arith.constant 0 : i32
    return %arg0, %c0_i32, %c0_i32_0, %c0_i32_1 : i32, i32, i32, i32
  }
}

module attributes {stable_mosaic.version = 11 : i64} {
  func.func @_conv_bn_act_kernel(%arg0: i32, %arg1: memref<512x4xbf16, #tpu.memory_space<vmem>>, %arg2: memref<4x128xbf16, #tpu.memory_space<vmem>>, %arg3: memref<1x128xf32, #tpu.memory_space<vmem>>, %arg4: memref<1x128xf32, #tpu.memory_space<vmem>>, %arg5: memref<512x128xbf16, #tpu.memory_space<vmem>>) attributes {dimension_semantics = [#tpu.dimension_semantics<parallel>], iteration_bounds = array<i64: 1>, scalar_prefetch = 0 : i64, scratch_operands = 0 : i64, tpu.core_type = #tpu.core_type<tc>, window_params = [{transform_indices = @transform_0, window_bounds = array<i64: 512, 4>}, {pipeline_mode = #tpu.pipeline_mode<synchronous>, transform_indices = @transform_1, window_bounds = array<i64: 4, 128>}, {pipeline_mode = #tpu.pipeline_mode<synchronous>, transform_indices = @transform_2, window_bounds = array<i64: 1, 128>}, {pipeline_mode = #tpu.pipeline_mode<synchronous>, transform_indices = @transform_3, window_bounds = array<i64: 1, 128>}, {transform_indices = @transform_4, window_bounds = array<i64: 512, 128>}]} {
    %c0 = arith.constant 0 : index
    %c0_0 = arith.constant 0 : index
    %0 = vector.load %arg1[%c0, %c0_0] : memref<512x4xbf16, #tpu.memory_space<vmem>>, vector<512x4xbf16>
    %c0_1 = arith.constant 0 : index
    %c0_2 = arith.constant 0 : index
    %1 = vector.load %arg2[%c0_1, %c0_2] : memref<4x128xbf16, #tpu.memory_space<vmem>>, vector<4x128xbf16>
    %cst = arith.constant dense<0.000000e+00> : vector<512x128xf32>
    %2 = tpu.matmul %0, %1, %cst {dimension_numbers = #tpu.dot_dimension_numbers<[1], [0], [0], [1], [0, 0, 1, 1], [], []>} : vector<512x4xbf16>, vector<4x128xbf16>, vector<512x128xf32> -> vector<512x128xf32>
    %c0_3 = arith.constant 0 : index
    %c0_4 = arith.constant 0 : index
    %3 = vector.load %arg3[%c0_3, %c0_4] : memref<1x128xf32, #tpu.memory_space<vmem>>, vector<1x128xf32>
    %4 = vector.broadcast %3 : vector<1x128xf32> to vector<512x128xf32>
    %5 = arith.mulf %2, %4 : vector<512x128xf32>
    %c0_5 = arith.constant 0 : index
    %c0_6 = arith.constant 0 : index
    %6 = vector.load %arg4[%c0_5, %c0_6] : memref<1x128xf32, #tpu.memory_space<vmem>>, vector<1x128xf32>
    %7 = vector.broadcast %6 : vector<1x128xf32> to vector<512x128xf32>
    %8 = arith.addf %5, %7 : vector<512x128xf32>
    %cst_7 = arith.constant 0.000000e+00 : f32
    %9 = vector.broadcast %cst_7 : f32 to vector<512x128xf32>
    %10 = arith.cmpf ogt, %8, %9 : vector<512x128xf32>
    %cst_8 = arith.constant 1.000000e-01 : f32
    %11 = vector.broadcast %cst_8 : f32 to vector<512x128xf32>
    %12 = arith.mulf %11, %8 : vector<512x128xf32>
    %13 = arith.select %10, %8, %12 : vector<512x128xi1>, vector<512x128xf32>
    %14 = arith.truncf %13 : vector<512x128xf32> to vector<512x128xbf16>
    %c0_9 = arith.constant 0 : index
    %c0_10 = arith.constant 0 : index
    %15 = vector.load %arg5[%c0_9, %c0_10] : memref<512x128xbf16, #tpu.memory_space<vmem>>, vector<512x128xbf16>
    tpu.vector_store %arg5[%c0_9, %c0_10], %14 {strides = array<i32>} : memref<512x128xbf16, #tpu.memory_space<vmem>>, vector<512x128xbf16>,
    return
  }
  func.func @transform_0(%arg0: i32) -> (i32, i32) {
    %c0_i32 = arith.constant 0 : i32
    %c0_i32_0 = arith.constant 0 : i32
    return %arg0, %c0_i32 : i32, i32
  }
  func.func @transform_1(%arg0: i32) -> (i32, i32) {
    %c0_i32 = arith.constant 0 : i32
    %c0_i32_0 = arith.constant 0 : i32
    %c0_i32_1 = arith.constant 0 : i32
    return %c0_i32, %c0_i32_0 : i32, i32
  }
  func.func @transform_2(%arg0: i32) -> (i32, i32) {
    %c0_i32 = arith.constant 0 : i32
    %c0_i32_0 = arith.constant 0 : i32
    %c0_i32_1 = arith.constant 0 : i32
    return %c0_i32, %c0_i32_0 : i32, i32
  }
  func.func @transform_3(%arg0: i32) -> (i32, i32) {
    %c0_i32 = arith.constant 0 : i32
    %c0_i32_0 = arith.constant 0 : i32
    %c0_i32_1 = arith.constant 0 : i32
    return %c0_i32, %c0_i32_0 : i32, i32
  }
  func.func @transform_4(%arg0: i32) -> (i32, i32) {
    %c0_i32 = arith.constant 0 : i32
    %c0_i32_0 = arith.constant 0 : i32
    return %arg0, %c0_i32 : i32, i32
  }
}

</mosaic_0001>

<bundles_post_ra>
// kernel: _lambda_.2
= control target key start
LH: loop header
LB: loop body
LE: loop exit
PB: predicated region body
PF: predicated region fallthrough
CT: control target
= control target key end

     0   :  { %vm340_vm0 = vcmask 1041408   ;;  %vm243_vm1 = vcmask 31744   ;;  %s2298_s1 = inlined_call_operand.vmem [shape: bf16[4,128], index: 1, kind: input, shape index: {}]   ;;  %s2299_s0 = inlined_call_operand.vmem [shape: bf16[512,4], index: 0, kind: input, shape index: {}]   ;;  %s2300_s2 = inlined_call_operand.vmem [shape: f32[1,128], index: 2, kind: input, shape index: {}]   ;;  %s2301_s3 = inlined_call_operand.vmem [shape: f32[1,128], index: 3, kind: input, shape index: {}]   ;;  %s2302_s4 = inlined_call_operand.vmem [shape: bf16[512,128], index: 4, kind: output, shape index: {}]  }
   0x1   :  { %v82_v0 = vld [vmem:[%s2298_s1] sm:$0x3]  ;;  %v1781_v4 = vld [vmem:[%s2299_s0 + $0x8] sm:$0xff]   ;;  %v1783_v6 = vld [vmem:[%s2299_s0 + $0x10] sm:$0xff]  }
   0x2   :  { %1777 = vmatprep.subr.msk.bf16.mxu0 %vm340_vm0, %v82_v0  ;;  %1778 = vmatprep.subr.msk.bf16.mxu1 %vm340_vm0, %v82_v0  ;;  %v342_v1 = vsel %vm340_vm0, %v82_v0, 0  ;;  %v1779_v2 = vld [vmem:[%s2299_s0] sm:$0xff]   ;;  %v1782_v5 = vld [vmem:[%s2299_s0 + $0x88] sm:$0xff]   ;;  %v1784_v7 = vld [vmem:[%s2299_s0 + $0x90] sm:$0xff]  }
   0x3   :  { %1710 = vmatpush3.bf16.msra.mxu0 %v342_v1  ;;  %1776 = vmatpush3.bf16.msra.mxu1 %v342_v1  ;;  %v1780_v3 = vld [vmem:[%s2299_s0 + $0x80] sm:$0xff]   ;;  %v1785_v8 = vld [vmem:[%s2299_s0 + $0x18] sm:$0xff]   ;;  %v1789_v12 = vld [vmem:[%s2299_s0 + $0x28] sm:$0xff]  }
   0x4   :  { %1711 = vmatprep.mubr.msk.bf16.mxu0 %vm243_vm1, %v1779_v2  ;;  %1743 = vmatprep.mubr.msk.bf16.mxu1 %vm243_vm1, %v1780_v3  ;;  %v1786_v9 = vld [vmem:[%s2299_s0 + $0x98] sm:$0xff]   ;;  %v1787_v10 = vld [vmem:[%s2299_s0 + $0x20] sm:$0xff]   ;;  %v1790_v13 = vld [vmem:[%s2299_s0 + $0xa8] sm:$0xff]  }
   0x5   :  { %v1788_v11 = vld [vmem:[%s2299_s0 + $0xa0] sm:$0xff]   ;;  %v1791_v14 = vld [vmem:[%s2299_s0 + $0x30] sm:$0xff]   ;;  %v1793_v16 = vld [vmem:[%s2299_s0 + $0x38] sm:$0xff]  }
   0x6   :  { %1712 = vmatmul.mubr.msk.bf16.vlgmr.msra.gmra.mrb[0].mxu0 %vm243_vm1, %v1781_v4  ;;  %1744 = vmatmul.mubr.msk.bf16.vlgmr.msra.gmra.mrb[0].mxu1 %vm243_vm1, %v1782_v5  ;;  %v1792_v15 = vld [vmem:[%s2299_s0 + $0xb0] sm:$0xff]   ;;  %v1794_v17 = vld [vmem:[%s2299_s0 + $0xb8] sm:$0xff]   ;;  %v1795_v18 = vld [vmem:[%s2299_s0 + $0x40] sm:$0xff]  }
   0x7   :  { %1715 = vmatprep.mubr.msk.bf16.mxu0 %vm243_vm1, %v1783_v6  ;;  %1747 = vmatprep.mubr.msk.bf16.mxu1 %vm243_vm1, %v1784_v7  ;;  %v1796_v19 = vld [vmem:[%s2299_s0 + $0xc0] sm:$0xff]   ;;  %v1797_v20 = vld [vmem:[%s2299_s0 + $0x48] sm:$0xff]   ;;  %v1799_v22 = vld [vmem:[%s2299_s0 + $0x50] sm:$0xff]  }
   0x8   :  { %v1798_v21 = vld [vmem:[%s2299_s0 + $0xc8] sm:$0xff]   ;;  %v1800_v23 = vld [vmem:[%s2299_s0 + $0xd0] sm:$0xff]   ;;  %v1801_v24 = vld [vmem:[%s2299_s0 + $0x58] sm:$0xff]  }
   0x9   :  { %v1802_v25 = vld [vmem:[%s2299_s0 + $0xd8] sm:$0xff]   ;;  %v1803_v26 = vld [vmem:[%s2299_s0 + $0x60] sm:$0xff]   ;;  %v1805_v28 = vld [vmem:[%s2299_s0 + $0x68] sm:$0xff]  }
   0xa   :  { %v1804_v27 = vld [vmem:[%s2299_s0 + $0xe0] sm:$0xff]   ;;  %v1806_v29 = vld [vmem:[%s2299_s0 + $0xe8] sm:$0xff]   ;;  %v1807_v30 = vld [vmem:[%s2299_s0 + $0x70] sm:$0xff]  }
   0xb   :  { %v1808_v31 = vld [vmem:[%s2299_s0 + $0xf0] sm:$0xff]   ;;  %v1809_v32 = vld [vmem:[%s2299_s0 + $0x78] sm:$0xff]   ;;  %v1970_v34 = vld [vmem:[%s2300_s2] ss:$0 sm:$0xff] }
   0xc   :  { %v1810_v33 = vld [vmem:[%s2299_s0 + $0xf8] sm:$0xff]   ;;  %v1975_v36 = vld [vmem:[%s2301_s3] ss:$0 sm:$0xff] }
   0xe   :  { %1716 = vmatmul.mubr.msk.bf16.gmra.mrb[4].mxu0 %vm243_vm1, %v1785_v8  ;;  %1748 = vmatmul.mubr.msk.bf16.gmra.mrb[4].mxu1 %vm243_vm1, %v1786_v9 }
   0xf   :  { %1719 = vmatprep.mubr.msk.bf16.mxu0 %vm243_vm1, %v1787_v10  ;;  %1751 = vmatprep.mubr.msk.bf16.mxu1 %vm243_vm1, %v1788_v11 }
  0x16   :  { %1720 = vmatmul.mubr.msk.bf16.gmra.mrb[8].mxu0 %vm243_vm1, %v1789_v12  ;;  %1752 = vmatmul.mubr.msk.bf16.gmra.mrb[8].mxu1 %vm243_vm1, %v1790_v13 }
  0x17   :  { %1723 = vmatprep.mubr.msk.bf16.mxu0 %vm243_vm1, %v1791_v14  ;;  %1755 = vmatprep.mubr.msk.bf16.mxu1 %vm243_vm1, %v1792_v15 }
  0x1e   :  { %1724 = vmatmul.mubr.msk.bf16.gmra.mrb[12].mxu0 %vm243_vm1, %v1793_v16  ;;  %1756 = vmatmul.mubr.msk.bf16.gmra.mrb[12].mxu1 %vm243_vm1, %v1794_v17 }
  0x1f   :  { %1727 = vmatprep.mubr.msk.bf16.mxu0 %vm243_vm1, %v1795_v18  ;;  %1759 = vmatprep.mubr.msk.bf16.mxu1 %vm243_vm1, %v1796_v19 }
  0x26   :  { %1728 = vmatmul.mubr.msk.bf16.gmra.mrb[16].mxu0 %vm243_vm1, %v1797_v20  ;;  %1760 = vmatmul.mubr.msk.bf16.gmra.mrb[16].mxu1 %vm243_vm1, %v1798_v21 }
  0x27   :  { %1731 = vmatprep.mubr.msk.bf16.mxu0 %vm243_vm1, %v1799_v22  ;;  %1763 = vmatprep.mubr.msk.bf16.mxu1 %vm243_vm1, %v1800_v23 }
  0x2e   :  { %1732 = vmatmul.mubr.msk.bf16.gmra.mrb[20].mxu0 %vm243_vm1, %v1801_v24  ;;  %1764 = vmatmul.mubr.msk.bf16.gmra.mrb[20].mxu1 %vm243_vm1, %v1802_v25 }
  0x2f   :  { %1735 = vmatprep.mubr.msk.bf16.mxu0 %vm243_vm1, %v1803_v26  ;;  %1767 = vmatprep.mubr.msk.bf16.mxu1 %vm243_vm1, %v1804_v27 }
  0x36   :  { %1736 = vmatmul.mubr.msk.bf16.gmra.mrb[24].mxu0 %vm243_vm1, %v1805_v28  ;;  %1768 = vmatmul.mubr.msk.bf16.gmra.mrb[24].mxu1 %vm243_vm1, %v1806_v29 }
  0x37   :  { %1739 = vmatprep.mubr.msk.bf16.mxu0 %vm243_vm1, %v1807_v30  ;;  %1771 = vmatprep.mubr.msk.bf16.mxu1 %vm243_vm1, %v1808_v31 }
  0x3e   :  { %1740 = vmatmul.mubr.msk.bf16.gmra.mrb[28].mxu0 %vm243_vm1, %v1809_v32  ;;  %1772 = vmatmul.mubr.msk.bf16.gmra.mrb[28].mxu1 %vm243_vm1, %v1810_v33 }
  0xd9   :  { %v1713_v35 = vpop.f32.mrb[0].mxu0  ;;  %v1745_v38 = vpop.f32.mrb[0].mxu1 }
  0xda   :  { %v642_v37 = vmul.f32 %v1713_v35, %v1970_v34  ;;  %v378_v39 = vpop.f32.mrb[1].mxu0  ;;  %v674_v40 = vmul.f32 %v1745_v38, %v1970_v34  ;;  %v506_v42 = vpop.f32.mrb[1].mxu1 }
  0xdb   :  { %v640_v41 = vmul.f32 %v1970_v34, %v378_v39  ;;  %v1714_v43 = vpop.f32.mrb[2].mxu0  ;;  %v672_v45 = vmul.f32 %v1970_v34, %v506_v42  ;;  %v1746_v47 = vpop.f32.mrb[2].mxu1 }
  0xdc   :  { %v713_v44 = vadd.f32 %v1975_v36, %v642_v37  ;;  %v643_v46 = vmul.f32 %v1714_v43, %v1970_v34  ;;  %v381_v48 = vpop.f32.mrb[3].mxu0  ;;  %v745_v49 = vadd.f32 %v1975_v36, %v674_v40  ;;  %v675_v51 = vmul.f32 %v1746_v47, %v1970_v34  ;;  %v509_v53 = vpop.f32.mrb[3].mxu1 }
  0xdd   :  { %v711_v50 = vadd.f32 %v1975_v36, %v640_v41  ;;  %v641_v52 = vmul.f32 %v1970_v34, %v381_v48  ;;  %v743_v55 = vadd.f32 %v1975_v36, %v672_v45  ;;  %v673_v4 = vmul.f32 %v1970_v34, %v509_v53 }
  0xde   :  { %vm777_vm2 = vcmp.gt.f32.partialorder %v713_v44, 0.0  ;;  %v841_v54 = vmul.f32 0.1, %v713_v44  ;;  %v714_v56 = vadd.f32 %v1975_v36, %v643_v46  ;;  %vm809_vm3 = vcmp.gt.f32.partialorder %v745_v49, 0.0 }
  0xdf   :  { %v873_v57 = vmul.f32 0.1, %v745_v49  ;;  %vm775_vm4 = vcmp.gt.f32.partialorder %v711_v50, 0.0  ;;  %v839_v58 = vmul.f32 0.1, %v711_v50  ;;  %vm807_vm5 = vcmp.gt.f32.partialorder %v743_v55, 0.0 }
  0xe0   :  { %v905_v59 = vsel %vm777_vm2, %v713_v44, %v841_v54  ;;  %v871_v60 = vmul.f32 0.1, %v743_v55  ;;  %vm778_vm6 = vcmp.gt.f32.partialorder %v714_v56, 0.0  ;;  %v842_v63 = vmul.f32 0.1, %v714_v56 }
  0xe1   :  { %v937_v61 = vsel %vm809_vm3, %v745_v49, %v873_v57  ;;  %v903_v62 = vsel %vm775_vm4, %v711_v50, %v839_v58  ;;  %v746_v0 = vadd.f32 %v1975_v36, %v675_v51  ;;  %v1717_v1 = vpop.f32.mrb[4].mxu0  ;;  %v712_v3 = vadd.f32 %v1975_v36, %v641_v52  ;;  %v1749_v6 = vpop.f32.mrb[4].mxu1 }
  0xe2   :  { %v935_v2 = vsel %vm807_vm5, %v743_v55, %v871_v60  ;;  %v646_v5 = vmul.f32 %v1717_v1, %v1970_v34  ;;  %v394_v7 = vpop.f32.mrb[5].mxu0  ;;  %v906_v8 = vsel %vm778_vm6, %v714_v56, %v842_v63  ;;  %v678_v10 = vmul.f32 %v1749_v6, %v1970_v34  ;;  %v522_v11 = vpop.f32.mrb[5].mxu1 }
  0xe3   :  { %vm810_vm7 = vcmp.gt.f32.partialorder %v746_v0, 0.0  ;;  %v874_v9 = vmul.f32 0.1, %v746_v0  ;;  %v1718_v12 = vpop.f32.mrb[6].mxu0  ;;  %v1493_v13 = vpack.c.bf16 %v906_v8, %v905_v59  ;;  %vm776_vm8 = vcmp.gt.f32.partialorder %v712_v3, 0.0  ;;  %v1750_v16 = vpop.f32.mrb[6].mxu1 }
  0xe4   :  { %v840_v14 = vmul.f32 0.1, %v712_v3  ;;  %v744_v15 = vadd.f32 %v1975_v36, %v673_v4  ;;  %v397_v17 = vpop.f32.mrb[7].mxu0  ;;  %v717_v19 = vadd.f32 %v1975_v36, %v646_v5  ;;  %v749_v20 = vadd.f32 %v1975_v36, %v678_v10  ;;  %v525_v22 = vpop.f32.mrb[7].mxu1 }
  0xe5   :  { %v938_v18 = vsel %vm810_vm7, %v746_v0, %v874_v9  ;;  %v644_v21 = vmul.f32 %v1970_v34, %v394_v7  ;;  %1645 = vst [vmem:[%s2302_s4 + $0x8] sm:$0xff] %v1493_v13   ;;  %v676_v31 = vmul.f32 %v1970_v34, %v522_v11  ;;  %v647_v35 = vmul.f32 %v1718_v12, %v1970_v34 }
  0xe6   :  { %v1573_v23 = vpack.c.bf16 %v938_v18, %v937_v61  ;;  %v904_v24 = vsel %vm776_vm8, %v712_v3, %v840_v14  ;;  %vm808_vm9 = vcmp.gt.f32.partialorder %v744_v15, 0.0  ;;  %v872_v25 = vmul.f32 0.1, %v744_v15 }
  0xe7   :  { %v1488_v26 = vpack.c.bf16 %v904_v24, %v903_v62  ;;  %vm781_vm10 = vcmp.gt.f32.partialorder %v717_v19, 0.0  ;;  %v845_v27 = vmul.f32 0.1, %v717_v19  ;;  %vm813_vm11 = vcmp.gt.f32.partialorder %v749_v20, 0.0 }
  0xe8   :  { %1661 = vst [vmem:[%s2302_s4 + $0x88] sm:$0xff] %v1573_v23   ;;  %v936_v28 = vsel %vm808_vm9, %v744_v15, %v872_v25  ;;  %v877_v29 = vmul.f32 0.1, %v749_v20  ;;  %v715_v30 = vadd.f32 %v1975_v36, %v644_v21  ;;  %v679_v37 = vmul.f32 %v1750_v16, %v1970_v34 }
  0xe9   :  { %1489 = vst [vmem:[%s2302_s4] sm:$0xff] %v1488_v26   ;;  %v1568_v32 = vpack.c.bf16 %v936_v28, %v935_v2  ;;  %v909_v33 = vsel %vm781_vm10, %v717_v19, %v845_v27  ;;  %v1721_v38 = vpop.f32.mrb[8].mxu0  ;;  %v747_v41 = vadd.f32 %v1975_v36, %v676_v31  ;;  %v1753_v42 = vpop.f32.mrb[8].mxu1  ;;  %v718_v44 = vadd.f32 %v1975_v36, %v647_v35 }
  0xea   :  { %v941_v39 = vsel %vm813_vm11, %v749_v20, %v877_v29  ;;  %vm779_vm12 = vcmp.gt.f32.partialorder %v715_v30, 0.0  ;;  %v843_v40 = vmul.f32 0.1, %v715_v30  ;;  %v410_v43 = vpop.f32.mrb[9].mxu0  ;;  %v750_v45 = vadd.f32 %v1975_v36, %v679_v37  ;;  %v538_v48 = vpop.f32.mrb[9].mxu1 }
  0xeb   :  { %1660 = vst [vmem:[%s2302_s4 + $0x80] sm:$0xff] %v1568_v32   ;;  %v645_v46 = vmul.f32 %v1970_v34, %v397_v17  ;;  %v677_v47 = vmul.f32 %v1970_v34, %v525_v22  ;;  %v1722_v49 = vpop.f32.mrb[10].mxu0  ;;  %vm811_vm13 = vcmp.gt.f32.partialorder %v747_v41, 0.0  ;;  %v875_v51 = vmul.f32 0.1, %v747_v41  ;;  %v1754_v53 = vpop.f32.mrb[10].mxu1 }
  0xec   :  { %v907_v50 = vsel %vm779_vm12, %v715_v30, %v843_v40  ;;  %v650_v52 = vmul.f32 %v1721_v38, %v1970_v34  ;;  %v413_v54 = vpop.f32.mrb[11].mxu0  ;;  %vm782_vm14 = vcmp.gt.f32.partialorder %v718_v44, 0.0  ;;  %v846_v55 = vmul.f32 0.1, %v718_v44  ;;  %v541_v61 = vpop.f32.mrb[11].mxu1 }
  0xed   :  { %vm814_vm15 = vcmp.gt.f32.partialorder %v750_v45, 0.0  ;;  %v878_v56 = vmul.f32 0.1, %v750_v45  ;;  %v939_v57 = vsel %vm811_vm13, %v747_v41, %v875_v51  ;;  %v716_v58 = vadd.f32 %v1975_v36, %v645_v46 }
  0xee   :  { %v748_v59 = vadd.f32 %v1975_v36, %v677_v47  ;;  %v721_v60 = vadd.f32 %v1975_v36, %v650_v52  ;;  %v910_v62 = vsel %vm782_vm14, %v718_v44, %v846_v55  ;;  %v682_v0 = vmul.f32 %v1753_v42, %v1970_v34 }
  0xef   :  { %v942_v63 = vsel %vm814_vm15, %v750_v45, %v878_v56  ;;  %v648_v1 = vmul.f32 %v1970_v34, %v410_v43  ;;  %v1503_v2 = vpack.c.bf16 %v910_v62, %v909_v33  ;;  %vm780_vm0 = vcmp.gt.f32.partialorder %v716_v58, 0.0 }
  0xf0   :  { %v1583_v3 = vpack.c.bf16 %v942_v63, %v941_v39  ;;  %v844_v4 = vmul.f32 0.1, %v716_v58  ;;  %vm812_vm1 = vcmp.gt.f32.partialorder %v748_v59, 0.0  ;;  %v876_v5 = vmul.f32 0.1, %v748_v59 }
  0xf1   :  { %vm785_vm2 = vcmp.gt.f32.partialorder %v721_v60, 0.0  ;;  %v849_v6 = vmul.f32 0.1, %v721_v60  ;;  %1647 = vst [vmem:[%s2302_s4 + $0x18] sm:$0xff] %v1503_v2   ;;  %v753_v8 = vadd.f32 %v1975_v36, %v682_v0  ;;  %v719_v9 = vadd.f32 %v1975_v36, %v648_v1  ;;  %v1725_v11 = vpop.f32.mrb[12].mxu0  ;;  %v1757_v12 = vpop.f32.mrb[12].mxu1 }
  0xf2   :  { %1663 = vst [vmem:[%s2302_s4 + $0x98] sm:$0xff] %v1583_v3   ;;  %v908_v7 = vsel %vm780_vm0, %v716_v58, %v844_v4  ;;  %v680_v10 = vmul.f32 %v1970_v34, %v538_v48  ;;  %v940_v14 = vsel %vm812_vm1, %v748_v59, %v876_v5  ;;  %v651_v16 = vmul.f32 %v1722_v49, %v1970_v34  ;;  %v426_v17 = vpop.f32.mrb[13].mxu0  ;;  %v2035_v18 = vpop.f32.mrb[13].mxu1 }
  0xf3   :  { %v1498_v13 = vpack.c.bf16 %v908_v7, %v907_v50  ;;  %v913_v15 = vsel %vm785_vm2, %v721_v60, %v849_v6  ;;  %v1578_v19 = vpack.c.bf16 %v940_v14, %v939_v57  ;;  %vm817_vm3 = vcmp.gt.f32.partialorder %v753_v8, 0.0  ;;  %v1726_v21 = vpop.f32.mrb[14].mxu0  ;;  %v1758_v22 = vpop.f32.mrb[14].mxu1 }
  0xf4   :  { %v881_v20 = vmul.f32 0.1, %v753_v8  ;;  %vm783_vm4 = vcmp.gt.f32.partialorder %v719_v9, 0.0  ;;  %v847_v23 = vmul.f32 0.1, %v719_v9  ;;  %v751_v24 = vadd.f32 %v1975_v36, %v680_v10  ;;  %v429_v27 = vpop.f32.mrb[15].mxu0 }
  0xf5   :  { %1646 = vst [vmem:[%s2302_s4 + $0x10] sm:$0xff] %v1498_v13   ;;  %v722_v25 = vadd.f32 %v1975_v36, %v651_v16  ;;  %v683_v26 = vmul.f32 %v1754_v53, %v1970_v34  ;;  %v557_v28 = vpop.f32.mrb[15].mxu1  ;;  %1662 = vst [vmem:[%s2302_s4 + $0x90] sm:$0xff] %v1578_v19   ;;  %v649_v30 = vmul.f32 %v1970_v34, %v413_v54 }
  0xf6   :  { %v945_v29 = vsel %vm817_vm3, %v753_v8, %v881_v20  ;;  %v681_v31 = vmul.f32 %v1970_v34, %v541_v61  ;;  %v654_v32 = vmul.f32 %v1725_v11, %v1970_v34  ;;  %v911_v33 = vsel %vm783_vm4, %v719_v9, %v847_v23 }
  0xf7   :  { %vm815_vm5 = vcmp.gt.f32.partialorder %v751_v24, 0.0  ;;  %v879_v35 = vmul.f32 0.1, %v751_v24  ;;  %vm786_vm6 = vcmp.gt.f32.partialorder %v722_v25, 0.0  ;;  %v850_v37 = vmul.f32 0.1, %v722_v25 }
  0xf8   :  { %v754_v38 = vadd.f32 %v1975_v36, %v683_v26  ;;  %v720_v39 = vadd.f32 %v1975_v36, %v649_v30  ;;  %v752_v40 = vadd.f32 %v1975_v36, %v681_v31  ;;  %v725_v42 = vadd.f32 %v1975_v36, %v654_v32 }
  0xf9   :  { %v943_v41 = vsel %vm815_vm5, %v751_v24, %v879_v35  ;;  %v686_v43 = vmul.f32 %v1757_v12, %v1970_v34  ;;  %v652_v44 = vmul.f32 %v1970_v34, %v426_v17  ;;  %v1729_v45 = vpop.f32.mrb[16].mxu0  ;;  %v914_v46 = vsel %vm786_vm6, %v722_v25, %v850_v37  ;;  %v1761_v48 = vpop.f32.mrb[16].mxu1 }
  0xfa   :  { %vm818_vm7 = vcmp.gt.f32.partialorder %v754_v38, 0.0  ;;  %v882_v47 = vmul.f32 0.1, %v754_v38  ;;  %vm784_vm8 = vcmp.gt.f32.partialorder %v720_v39, 0.0  ;;  %v2055_v49 = vpop.f32.mrb[17].mxu0  ;;  %v1513_v50 = vpack.c.bf16 %v914_v46, %v913_v15  ;;  %v2057_v53 = vpop.f32.mrb[17].mxu1 }
  0xfb   :  { %v848_v51 = vmul.f32 0.1, %v720_v39  ;;  %vm816_vm9 = vcmp.gt.f32.partialorder %v752_v40, 0.0  ;;  %v880_v52 = vmul.f32 0.1, %v752_v40  ;;  %vm789_vm10 = vcmp.gt.f32.partialorder %v725_v42, 0.0 }
  0xfc   :  { %v946_v54 = vsel %vm818_vm7, %v754_v38, %v882_v47  ;;  %v853_v55 = vmul.f32 0.1, %v725_v42  ;;  %v757_v56 = vadd.f32 %v1975_v36, %v686_v43  ;;  %v2060_v57 = vpop.f32.mrb[18].mxu0  ;;  %v2062_v58 = vpop.f32.mrb[18].mxu1  ;;  %1649 = vst [vmem:[%s2302_s4 + $0x28] sm:$0xff] %v1513_v50   ;;  %v723_v62 = vadd.f32 %v1975_v36, %v652_v44 }
  0xfd   :  { %v1593_v59 = vpack.c.bf16 %v946_v54, %v945_v29  ;;  %v912_v60 = vsel %vm784_vm8, %v720_v39, %v848_v51  ;;  %v944_v61 = vsel %vm816_vm9, %v752_v40, %v880_v52  ;;  %v2069_v63 = vpop.f32.mrb[19].mxu0  ;;  %v2071_v0 = vpop.f32.mrb[19].mxu1  ;;  %v684_v6 = vmul.f32 %v1970_v34, %v2035_v18 }
  0xfe   :  { %v1508_v1 = vpack.c.bf16 %v912_v60, %v911_v33  ;;  %v1588_v2 = vpack.c.bf16 %v944_v61, %v943_v41  ;;  %v917_v3 = vsel %vm789_vm10, %v725_v42, %v853_v55  ;;  %vm821_vm11 = vcmp.gt.f32.partialorder %v757_v56, 0.0 }
  0xff   :  { %1665 = vst [vmem:[%s2302_s4 + $0xa8] sm:$0xff] %v1593_v59   ;;  %v885_v4 = vmul.f32 0.1, %v757_v56  ;;  %vm787_vm12 = vcmp.gt.f32.partialorder %v723_v62, 0.0  ;;  %v851_v5 = vmul.f32 0.1, %v723_v62  ;;  %v655_v7 = vmul.f32 %v1726_v21, %v1970_v34 }
 0x100   :  { %1648 = vst [vmem:[%s2302_s4 + $0x20] sm:$0xff] %v1508_v1   ;;  %1664 = vst [vmem:[%s2302_s4 + $0xa0] sm:$0xff] %v1588_v2   ;;  %v687_v8 = vmul.f32 %v1758_v22, %v1970_v34  ;;  %v653_v9 = vmul.f32 %v1970_v34, %v429_v27  ;;  %v685_v10 = vmul.f32 %v1970_v34, %v557_v28 }
 0x101   :  { %v949_v11 = vsel %vm821_vm11, %v757_v56, %v885_v4  ;;  %v915_v12 = vsel %vm787_vm12, %v723_v62, %v851_v5  ;;  %v755_v13 = vadd.f32 %v1975_v36, %v684_v6  ;;  %v658_v14 = vmul.f32 %v1729_v45, %v1970_v34  ;;  %v2090_v15 = vpop.f32.mrb[20].mxu0  ;;  %v2096_v20 = vpop.f32.mrb[20].mxu1 }
 0x102   :  { %v726_v16 = vadd.f32 %v1975_v36, %v655_v7  ;;  %v758_v17 = vadd.f32 %v1975_v36, %v687_v8  ;;  %v724_v18 = vadd.f32 %v1975_v36, %v653_v9  ;;  %v756_v19 = vadd.f32 %v1975_v36, %v685_v10  ;;  %v2098_v21 = vpop.f32.mrb[21].mxu0  ;;  %v2102_v25 = vpop.f32.mrb[21].mxu1 }
 0x103   :  { %vm819_vm13 = vcmp.gt.f32.partialorder %v755_v13, 0.0  ;;  %v883_v22 = vmul.f32 0.1, %v755_v13  ;;  %v729_v23 = vadd.f32 %v1975_v36, %v658_v14  ;;  %v690_v24 = vmul.f32 %v1761_v48, %v1970_v34  ;;  %v2104_v26 = vpop.f32.mrb[22].mxu0  ;;  %v2106_v31 = vpop.f32.mrb[22].mxu1 }
 0x104   :  { %vm790_vm14 = vcmp.gt.f32.partialorder %v726_v16, 0.0  ;;  %v854_v27 = vmul.f32 0.1, %v726_v16  ;;  %vm822_vm15 = vcmp.gt.f32.partialorder %v758_v17, 0.0  ;;  %v886_v28 = vmul.f32 0.1, %v758_v17 }
 0x105   :  { %v947_v29 = vsel %vm819_vm13, %v755_v13, %v883_v22  ;;  %vm788_vm0 = vcmp.gt.f32.partialorder %v724_v18, 0.0  ;;  %v852_v30 = vmul.f32 0.1, %v724_v18  ;;  %vm820_vm1 = vcmp.gt.f32.partialorder %v756_v19, 0.0  ;;  %v2108_v32 = vpop.f32.mrb[23].mxu0  ;;  %v2110_v38 = vpop.f32.mrb[23].mxu1 }
 0x106   :  { %v918_v33 = vsel %vm790_vm14, %v726_v16, %v854_v27  ;;  %v950_v35 = vsel %vm822_vm15, %v758_v17, %v886_v28  ;;  %v884_v37 = vmul.f32 0.1, %v756_v19  ;;  %vm793_vm2 = vcmp.gt.f32.partialorder %v729_v23, 0.0 }
 0x107   :  { %v1523_v39 = vpack.c.bf16 %v918_v33, %v917_v3  ;;  %v1603_v40 = vpack.c.bf16 %v950_v35, %v949_v11  ;;  %v916_v41 = vsel %vm788_vm0, %v724_v18, %v852_v30  ;;  %v857_v42 = vmul.f32 0.1, %v729_v23 }
 0x108   :  { %v1518_v43 = vpack.c.bf16 %v916_v41, %v915_v12  ;;  %v948_v44 = vsel %vm820_vm1, %v756_v19, %v884_v37  ;;  %v761_v45 = vadd.f32 %v1975_v36, %v690_v24  ;;  %v656_v46 = vmul.f32 %v1970_v34, %v2055_v49 }
 0x109   :  { %1651 = vst [vmem:[%s2302_s4 + $0x38] sm:$0xff] %v1523_v39   ;;  %1667 = vst [vmem:[%s2302_s4 + $0xb8] sm:$0xff] %v1603_v40   ;;  %v1598_v47 = vpack.c.bf16 %v948_v44, %v947_v29  ;;  %v921_v48 = vsel %vm793_vm2, %v729_v23, %v857_v42  ;;  %v688_v50 = vmul.f32 %v1970_v34, %v2057_v53  ;;  %v2125_v52 = vpop.f32.mrb[24].mxu0  ;;  %v2133_v56 = vpop.f32.mrb[24].mxu1 }
 0x10a   :  { %v659_v51 = vmul.f32 %v2060_v57, %v1970_v34  ;;  %1650 = vst [vmem:[%s2302_s4 + $0x30] sm:$0xff] %v1518_v43   ;;  %vm825_vm3 = vcmp.gt.f32.partialorder %v761_v45, 0.0  ;;  %v889_v49 = vmul.f32 0.1, %v761_v45  ;;  %v727_v54 = vadd.f32 %v1975_v36, %v656_v46  ;;  %v2135_v59 = vpop.f32.mrb[25].mxu0  ;;  %v2146_v62 = vpop.f32.mrb[25].mxu1 }
 0x10b   :  { %v691_v55 = vmul.f32 %v2062_v58, %v1970_v34  ;;  %1666 = vst [vmem:[%s2302_s4 + $0xb0] sm:$0xff] %v1598_v47   ;;  %v759_v53 = vadd.f32 %v1975_v36, %v688_v50  ;;  %v657_v60 = vmul.f32 %v1970_v34, %v2069_v63  ;;  %v689_v61 = vmul.f32 %v1970_v34, %v2071_v0  ;;  %v2148_v58 = vpop.f32.mrb[26].mxu0  ;;  %v2151_v4 = vpop.f32.mrb[26].mxu1 }
 0x10c   :  { %v730_v57 = vadd.f32 %v1975_v36, %v659_v51  ;;  %v953_v1 = vsel %vm825_vm3, %v761_v45, %v889_v49  ;;  %vm791_vm4 = vcmp.gt.f32.partialorder %v727_v54, 0.0  ;;  %v855_v2 = vmul.f32 0.1, %v727_v54  ;;  %v2153_v5 = vpop.f32.mrb[27].mxu0  ;;  %v2156_v9 = vpop.f32.mrb[27].mxu1 }
 0x10d   :  { %v762_v3 = vadd.f32 %v1975_v36, %v691_v55  ;;  %vm823_vm5 = vcmp.gt.f32.partialorder %v759_v53, 0.0  ;;  %v887_v6 = vmul.f32 0.1, %v759_v53  ;;  %v728_v8 = vadd.f32 %v1975_v36, %v657_v60 }
 0x10e   :  { %vm794_vm6 = vcmp.gt.f32.partialorder %v730_v57, 0.0  ;;  %v858_v63 = vmul.f32 0.1, %v730_v57  ;;  %v919_v7 = vsel %vm791_vm4, %v727_v54, %v855_v2  ;;  %v760_v12 = vadd.f32 %v1975_v36, %v689_v61 }
 0x10f   :  { %vm826_vm7 = vcmp.gt.f32.partialorder %v762_v3, 0.0  ;;  %v890_v0 = vmul.f32 0.1, %v762_v3  ;;  %v951_v10 = vsel %vm823_vm5, %v759_v53, %v887_v6  ;;  %v662_v13 = vmul.f32 %v2090_v15, %v1970_v34 }
 0x110   :  { %v922_v11 = vsel %vm794_vm6, %v730_v57, %v858_v63  ;;  %vm792_vm8 = vcmp.gt.f32.partialorder %v728_v8, 0.0  ;;  %v856_v17 = vmul.f32 0.1, %v728_v8  ;;  %vm824_vm9 = vcmp.gt.f32.partialorder %v760_v12, 0.0 }
 0x111   :  { %v1533_v14 = vpack.c.bf16 %v922_v11, %v921_v48  ;;  %v954_v16 = vsel %vm826_vm7, %v762_v3, %v890_v0  ;;  %v888_v19 = vmul.f32 0.1, %v760_v12  ;;  %v733_v22 = vadd.f32 %v1975_v36, %v662_v13  ;;  %v2162_v23 = vpop.f32.mrb[28].mxu0  ;;  %v2173_v29 = vpop.f32.mrb[28].mxu1 }
 0x112   :  { %v1613_v18 = vpack.c.bf16 %v954_v16, %v953_v1  ;;  %v920_v24 = vsel %vm792_vm8, %v728_v8, %v856_v17  ;;  %v694_v27 = vmul.f32 %v2096_v20, %v1970_v34  ;;  %v660_v15 = vmul.f32 %v1970_v34, %v2098_v21  ;;  %v2175_v30 = vpop.f32.mrb[29].mxu0  ;;  %v2180_v39 = vpop.f32.mrb[29].mxu1 }
 0x113   :  { %1653 = vst [vmem:[%s2302_s4 + $0x48] sm:$0xff] %v1533_v14   ;;  %v692_v28 = vmul.f32 %v1970_v34, %v2102_v25  ;;  %v1528_v33 = vpack.c.bf16 %v920_v24, %v919_v7  ;;  %v952_v35 = vsel %vm824_vm9, %v760_v12, %v888_v19  ;;  %vm797_vm10 = vcmp.gt.f32.partialorder %v733_v22, 0.0  ;;  %v2182_v20 = vpop.f32.mrb[30].mxu0  ;;  %v2187_v42 = vpop.f32.mrb[30].mxu1 }
 0x114   :  { %1669 = vst [vmem:[%s2302_s4 + $0xc8] sm:$0xff] %v1613_v18   ;;  %v861_v37 = vmul.f32 0.1, %v733_v22  ;;  %v1608_v21 = vpack.c.bf16 %v952_v35, %v951_v10  ;;  %v765_v40 = vadd.f32 %v1975_v36, %v694_v27  ;;  %v731_v25 = vadd.f32 %v1975_v36, %v660_v15  ;;  %v2189_v43 = vpop.f32.mrb[31].mxu0  ;;  %v2200_v48 = vpop.f32.mrb[31].mxu1 }
 0x115   :  { %v763_v41 = vadd.f32 %v1975_v36, %v692_v28  ;;  %1652 = vst [vmem:[%s2302_s4 + $0x40] sm:$0xff] %v1528_v33   ;;  %v663_v45 = vmul.f32 %v2104_v26, %v1970_v34  ;;  %v695_v46 = vmul.f32 %v2106_v31, %v1970_v34  ;;  %v661_v47 = vmul.f32 %v1970_v34, %v2108_v32 }
 0x116   :  { %v925_v44 = vsel %vm797_vm10, %v733_v22, %v861_v37  ;;  %1668 = vst [vmem:[%s2302_s4 + $0xc0] sm:$0xff] %v1608_v21   ;;  %vm829_vm11 = vcmp.gt.f32.partialorder %v765_v40, 0.0  ;;  %v893_v50 = vmul.f32 0.1, %v765_v40  ;;  %vm795_vm12 = vcmp.gt.f32.partialorder %v731_v25, 0.0 }
 0x117   :  { %v859_v51 = vmul.f32 0.1, %v731_v25  ;;  %vm827_vm13 = vcmp.gt.f32.partialorder %v763_v41, 0.0  ;;  %v891_v49 = vmul.f32 0.1, %v763_v41  ;;  %v734_v26 = vadd.f32 %v1975_v36, %v663_v45 }
 0x118   :  { %v766_v54 = vadd.f32 %v1975_v36, %v695_v46  ;;  %v957_v31 = vsel %vm829_vm11, %v765_v40, %v893_v50  ;;  %v732_v32 = vadd.f32 %v1975_v36, %v661_v47  ;;  %v693_v53 = vmul.f32 %v1970_v34, %v2110_v38 }
 0x119   :  { %v923_v55 = vsel %vm795_vm12, %v731_v25, %v859_v51  ;;  %v955_v57 = vsel %vm827_vm13, %v763_v41, %v891_v49  ;;  %vm798_vm14 = vcmp.gt.f32.partialorder %v734_v26, 0.0  ;;  %v862_v60 = vmul.f32 0.1, %v734_v26 }
 0x11a   :  { %vm830_vm15 = vcmp.gt.f32.partialorder %v766_v54, 0.0  ;;  %v894_v61 = vmul.f32 0.1, %v766_v54  ;;  %vm796_vm0 = vcmp.gt.f32.partialorder %v732_v32, 0.0  ;;  %v860_v1 = vmul.f32 0.1, %v732_v32 }
 0x11b   :  { %v764_v2 = vadd.f32 %v1975_v36, %v693_v53  ;;  %v926_v3 = vsel %vm798_vm14, %v734_v26, %v862_v60  ;;  %v666_v6 = vmul.f32 %v2125_v52, %v1970_v34  ;;  %v698_v63 = vmul.f32 %v2133_v56, %v1970_v34 }
 0x11c   :  { %v664_v7 = vmul.f32 %v1970_v34, %v2135_v59  ;;  %v1543_v38 = vpack.c.bf16 %v926_v3, %v925_v44  ;;  %v958_v0 = vsel %vm830_vm15, %v766_v54, %v894_v61  ;;  %v924_v8 = vsel %vm796_vm0, %v732_v32, %v860_v1 }
 0x11d   :  { %vm828_vm1 = vcmp.gt.f32.partialorder %v764_v2, 0.0  ;;  %v1623_v10 = vpack.c.bf16 %v958_v0, %v957_v31  ;;  %v1538_v11 = vpack.c.bf16 %v924_v8, %v923_v55  ;;  %v892_v12 = vmul.f32 0.1, %v764_v2 }
 0x11e   :  { %v737_v13 = vadd.f32 %v1975_v36, %v666_v6  ;;  %1655 = vst [vmem:[%s2302_s4 + $0x58] sm:$0xff] %v1543_v38   ;;  %v769_v52 = vadd.f32 %v1975_v36, %v698_v63  ;;  %v735_v56 = vadd.f32 %v1975_v36, %v664_v7  ;;  %v696_v59 = vmul.f32 %v1970_v34, %v2146_v62 }
 0x11f   :  { %v667_v14 = vmul.f32 %v2148_v58, %v1970_v34  ;;  %1671 = vst [vmem:[%s2302_s4 + $0xd8] sm:$0xff] %v1623_v10   ;;  %1654 = vst [vmem:[%s2302_s4 + $0x50] sm:$0xff] %v1538_v11   ;;  %v956_v16 = vsel %vm828_vm1, %v764_v2, %v892_v12  ;;  %v699_v18 = vmul.f32 %v2151_v4, %v1970_v34 }
 0x120   :  { %vm801_vm2 = vcmp.gt.f32.partialorder %v737_v13, 0.0  ;;  %v865_v17 = vmul.f32 0.1, %v737_v13  ;;  %v1618_v19 = vpack.c.bf16 %v956_v16, %v955_v57  ;;  %vm833_vm3 = vcmp.gt.f32.partialorder %v769_v52, 0.0 }
 0x121   :  { %v897_v62 = vmul.f32 0.1, %v769_v52  ;;  %vm799_vm4 = vcmp.gt.f32.partialorder %v735_v56, 0.0  ;;  %v863_v58 = vmul.f32 0.1, %v735_v56  ;;  %v767_v24 = vadd.f32 %v1975_v36, %v696_v59 }
 0x122   :  { %v929_v22 = vsel %vm801_vm2, %v737_v13, %v865_v17  ;;  %v738_v27 = vadd.f32 %v1975_v36, %v667_v14  ;;  %1670 = vst [vmem:[%s2302_s4 + $0xd0] sm:$0xff] %v1618_v19   ;;  %v770_v28 = vadd.f32 %v1975_v36, %v699_v18  ;;  %v665_v4 = vmul.f32 %v1970_v34, %v2153_v5 }
 0x123   :  { %v961_v15 = vsel %vm833_vm3, %v769_v52, %v897_v62  ;;  %v697_v33 = vmul.f32 %v1970_v34, %v2156_v9  ;;  %v927_v35 = vsel %vm799_vm4, %v735_v56, %v863_v58  ;;  %vm831_vm5 = vcmp.gt.f32.partialorder %v767_v24, 0.0 }
 0x124   :  { %v895_v37 = vmul.f32 0.1, %v767_v24  ;;  %vm802_vm6 = vcmp.gt.f32.partialorder %v738_v27, 0.0  ;;  %v866_v21 = vmul.f32 0.1, %v738_v27  ;;  %vm834_vm7 = vcmp.gt.f32.partialorder %v770_v28, 0.0 }
 0x125   :  { %v898_v40 = vmul.f32 0.1, %v770_v28  ;;  %v736_v25 = vadd.f32 %v1975_v36, %v665_v4  ;;  %v768_v44 = vadd.f32 %v1975_v36, %v697_v33  ;;  %v670_v45 = vmul.f32 %v2162_v23, %v1970_v34 }
 0x126   :  { %v959_v41 = vsel %vm831_vm5, %v767_v24, %v895_v37  ;;  %v702_v5 = vmul.f32 %v2173_v29, %v1970_v34  ;;  %v930_v46 = vsel %vm802_vm6, %v738_v27, %v866_v21  ;;  %v668_v55 = vmul.f32 %v1970_v34, %v2175_v30 }
 0x127   :  { %v962_v9 = vsel %vm834_vm7, %v770_v28, %v898_v40  ;;  %vm800_vm8 = vcmp.gt.f32.partialorder %v736_v25, 0.0  ;;  %v864_v47 = vmul.f32 0.1, %v736_v25  ;;  %v1553_v50 = vpack.c.bf16 %v930_v46, %v929_v22 }
 0x128   :  { %v1633_v51 = vpack.c.bf16 %v962_v9, %v961_v15  ;;  %vm832_vm9 = vcmp.gt.f32.partialorder %v768_v44, 0.0  ;;  %v896_v49 = vmul.f32 0.1, %v768_v44  ;;  %v741_v54 = vadd.f32 %v1975_v36, %v670_v45 }
 0x129   :  { %v928_v26 = vsel %vm800_vm8, %v736_v25, %v864_v47  ;;  %v773_v31 = vadd.f32 %v1975_v36, %v702_v5  ;;  %1657 = vst [vmem:[%s2302_s4 + $0x68] sm:$0xff] %v1553_v50   ;;  %v700_v32 = vmul.f32 %v1970_v34, %v2180_v39  ;;  %v671_v53 = vmul.f32 %v2182_v20, %v1970_v34 }
 0x12a   :  { %1673 = vst [vmem:[%s2302_s4 + $0xe8] sm:$0xff] %v1633_v51   ;;  %v1548_v23 = vpack.c.bf16 %v928_v26, %v927_v35  ;;  %v960_v29 = vsel %vm832_vm9, %v768_v44, %v896_v49  ;;  %vm805_vm10 = vcmp.gt.f32.partialorder %v741_v54, 0.0  ;;  %v869_v60 = vmul.f32 0.1, %v741_v54 }
 0x12b   :  { %v1628_v57 = vpack.c.bf16 %v960_v29, %v959_v41  ;;  %v739_v30 = vadd.f32 %v1975_v36, %v668_v55  ;;  %v771_v61 = vadd.f32 %v1975_v36, %v700_v32  ;;  %v742_v1 = vadd.f32 %v1975_v36, %v671_v53 }
 0x12c   :  { %1656 = vst [vmem:[%s2302_s4 + $0x60] sm:$0xff] %v1548_v23   ;;  %v703_v39 = vmul.f32 %v2187_v42, %v1970_v34  ;;  %v669_v20 = vmul.f32 %v1970_v34, %v2189_v43  ;;  %v701_v2 = vmul.f32 %v1970_v34, %v2200_v48  ;;  %v933_v3 = vsel %vm805_vm10, %v741_v54, %v869_v60 }
 0x12d   :  { %1672 = vst [vmem:[%s2302_s4 + $0xe0] sm:$0xff] %v1628_v57   ;;  %vm837_vm11 = vcmp.gt.f32.partialorder %v773_v31, 0.0  ;;  %v901_v6 = vmul.f32 0.1, %v773_v31  ;;  %vm803_vm12 = vcmp.gt.f32.partialorder %v739_v30, 0.0  ;;  %vm806_vm13 = vcmp.gt.f32.partialorder %v742_v1, 0.0 }
 0x12e   :  { %v870_v63 = vmul.f32 0.1, %v742_v1  ;;  %v774_v7 = vadd.f32 %v1975_v36, %v703_v39  ;;  %v867_v38 = vmul.f32 0.1, %v739_v30  ;;  %vm835_vm14 = vcmp.gt.f32.partialorder %v771_v61, 0.0 }
 0x12f   :  { %v740_v0 = vadd.f32 %v1975_v36, %v669_v20  ;;  %v772_v42 = vadd.f32 %v1975_v36, %v701_v2  ;;  %v899_v8 = vmul.f32 0.1, %v771_v61  ;;  %v965_v48 = vsel %vm837_vm11, %v773_v31, %v901_v6 }
 0x130   :  { %v934_v10 = vsel %vm806_vm13, %v742_v1, %v870_v63  ;;  %vm838_vm15 = vcmp.gt.f32.partialorder %v774_v7, 0.0  ;;  %v902_v43 = vmul.f32 0.1, %v774_v7  ;;  %v931_v52 = vsel %vm803_vm12, %v739_v30, %v867_v38 }
 0x131   :  { %v1563_v11 = vpack.c.bf16 %v934_v10, %v933_v3  ;;  %vm804_vm0 = vcmp.gt.f32.partialorder %v740_v0, 0.0  ;;  %v868_v34 = vmul.f32 0.1, %v740_v0  ;;  %vm836_vm1 = vcmp.gt.f32.partialorder %v772_v42, 0.0 }
 0x132   :  { %v966_v12 = vsel %vm838_vm15, %v774_v7, %v902_v43  ;;  %v900_v13 = vmul.f32 0.1, %v772_v42  ;;  %v963_v59 = vsel %vm835_vm14, %v771_v61, %v899_v8 }
 0x133   :  { %1659 = vst [vmem:[%s2302_s4 + $0x78] sm:$0xff] %v1563_v11   ;;  %v1643_v56 = vpack.c.bf16 %v966_v12, %v965_v48  ;;  %v932_v36 = vsel %vm804_vm0, %v740_v0, %v868_v34 }
 0x134   :  { %v1558_v14 = vpack.c.bf16 %v932_v36, %v931_v52  ;;  %v964_v16 = vsel %vm836_vm1, %v772_v42, %v900_v13 }
 0x135   :  { %1675 = vst [vmem:[%s2302_s4 + $0xf8] sm:$0xff] %v1643_v56   ;;  %v1638_v17 = vpack.c.bf16 %v964_v16, %v963_v59 }
 0x136   :  { %1658 = vst [vmem:[%s2302_s4 + $0x70] sm:$0xff] %v1558_v14  }
 0x137   :  { %1674 = vst [vmem:[%s2302_s4 + $0xf0] sm:$0xff] %v1638_v17  }

// kernel: _lambda_.3
= control target key start
LH: loop header
LB: loop body
LE: loop exit
PB: predicated region body
PF: predicated region fallthrough
CT: control target
= control target key end

     0   :  { %s9179_s15 = smov 0   ;;  %s13085_s0 = inlined_call_operand.vmem [shape: bf16[2,16,16,128], index: 0, kind: input, shape index: {}]   ;;  %s13086_s1 = inlined_call_operand.vmem [shape: bf16[4,128,128], index: 1, kind: input, shape index: {}]   ;;  %s13087_s2 = inlined_call_operand.vmem [shape: f32[1,128], index: 2, kind: input, shape index: {}]   ;;  %s13088_s3 = inlined_call_operand.vmem [shape: f32[1,128], index: 3, kind: input, shape index: {}]   ;;  %s13089_s4 = inlined_call_operand.vmem [shape: bf16[2,16,16,128], index: 4, kind: output, shape index: {}]  }
   0x1 LB: > { %s8277_s16 = sadd.s32 4294967295, %s9151_s15   ;;  %p8281_p0 = scmp.ge.s32.totalorder %s9151_s15, 1  ;;  %s9151_s15 = sphi %s9179_s15, %s14_s15  }
   0x2   : > { %p162_p1 = scmp.lt.s32.totalorder %s9151_s15, 3 }
   0x4   : > { %p163_p2 = pnand %p8281_p0, %p162_p1 }
   0x6   : > { %166 = sbr.rel (%p163_p2) target bundleno = 1289 (0x509), region = 36 }
   0xd   : > { %v9096_v0 = vld [vmem:[%s13086_s1 + $0x40] sm:$0xff]   ;;  %p188_p3 = scmp.lt.s32.totalorder %s8277_s16, 1  ;;  %v9097_v1 = vld [vmem:[%s13086_s1 + $0x48] sm:$0xff]   ;;  %v9098_v2 = vld [vmem:[%s13086_s1 + $0x50] sm:$0xff]   ;;  %v9153_v10 = vmov 4286644096  }
   0xe   : > { %8799 = vmatprep.subr.bf16.mxu1 %v9096_v0  ;;  %v9209_v3 = vld [vmem:[%s13086_s1 + $0x58] sm:$0xff]   ;;  %249 = vst [vmem:[#allocation2 + $0x4] sm:$0xf] %v9153_v10  ;;  %250 = vst [vmem:[#allocation2 + $0x8] sm:$0xf] %v9153_v10  ;;  %v9104_v11 = vld [vmem:[%s13086_s1 + $0x80] sm:$0xff]  }
   0xf   : > { %s13385_s16 = smov (!%p188_p3, %s8277_s16), 1  ;;  %8800 = vmatpush3.bf16.msra.mxu1 %v9096_v0  ;;  %251 = vst [vmem:[#allocation2 + $0xc] sm:$0xf] %v9153_v10  ;;  %252 = vst [vmem:[#allocation2 + $0x10] sm:$0x1] %v9153_v10  ;;  %v9100_v12 = vld [vmem:[%s13086_s1 + $0x60] sm:$0xff]   ;;  %8895 = vmatprep.subr.bf16.mxu0 %v9104_v11 }
  0x10   : > { %8801 = vmatprep.subr.bf16.mxu1 %v9097_v1  ;;  %s8574_s23 = sshll.u32 %s13385_s16, 7  ;;  %254 = vst [vmem:[#allocation2 + $0x18] sm:$0xf] %v9153_v10  ;;  %255 = vst [vmem:[#allocation2 + $0x1c] sm:$0xf] %v9153_v10  ;;  %8896 = vmatpush3.bf16.msra.mxu0 %v9104_v11  ;;  %v9105_v15 = vld [vmem:[%s13086_s1 + $0x88] sm:$0xff]  }
  0x11   : > { %s9204_s26 = scalar_lea.vmem %s13085_s0, %s8574_s23  ;;  %256 = vst [vmem:[#allocation2 + $0x20] sm:$0xf] %v9153_v10  ;;  %257 = vst [vmem:[#allocation2 + $0x24] sm:$0x1] %v9153_v10  ;;  %v9101_v18 = vld [vmem:[%s13086_s1 + $0x68] sm:$0xff]   ;;  %8897 = vmatprep.subr.bf16.mxu0 %v9105_v15  ;;  %v9102_v19 = vld [vmem:[%s13086_s1 + $0x70] sm:$0xff]   ;;  %s12970_s24 = scalar_lea.vmem %s13089_s4, %s8574_s23 }
  0x12   : > { %v9212_v4 = vld [vmem:[%s9204_s26] sm:$0xf]  ;;  %v9215_v5 = vld [vmem:[%s9204_s26 + $0x4] sm:$0xf]  ;;  %v9218_v6 = vld [vmem:[%s9204_s26 + $0x8] sm:$0xf] }
  0x13   : > { %8802 = vmatpush3.bf16.msra.mxu1 %v9097_v1  ;;  %13192 = vst [vmem:[#allocation3_spill] sm:$0xff] %v9212_v4  ;;  %13193 = vst [vmem:[#allocation4_spill] sm:$0xff] %v9215_v5  ;;  %v9221_v7 = vld [vmem:[%s9204_s26 + $0xc] sm:$0xf]  ;;  %v9224_v8 = vld [vmem:[%s9204_s26 + $0x10] sm:$0xf] }
  0x14   : > { %8803 = vmatprep.subr.bf16.mxu1 %v9098_v2  ;;  %13194 = vst [vmem:[#allocation5_spill] sm:$0xff] %v9218_v6  ;;  %13195 = vst [vmem:[#allocation6_spill] sm:$0xff] %v9221_v7  ;;  %v9227_v9 = vld [vmem:[%s9204_s26 + $0x14] sm:$0xf]  ;;  %v9243_v13 = vld [vmem:[%s9204_s26 + $0x18] sm:$0xf]  ;;  %8898 = vmatpush3.bf16.msra.mxu0 %v9105_v15 }
  0x15   : > { %13196 = vst [vmem:[#allocation7_spill] sm:$0xff] %v9224_v8  ;;  %13197 = vst [vmem:[#allocation8_spill] sm:$0xff] %v9227_v9  ;;  %v9246_v14 = vld [vmem:[%s9204_s26 + $0x1c] sm:$0xf]  ;;  %v9255_v16 = vld [vmem:[%s9204_s26 + $0x20] sm:$0xf] }
  0x16   : > { %318 = vst [vmem:[#allocation2 + $0x30] sm:$0xf] %v9212_v4  ;;  %319 = vst [vmem:[#allocation2 + $0x34] sm:$0xf] %v9215_v5  ;;  %v9258_v17 = vld [vmem:[%s9204_s26 + $0x24] sm:$0xf] }
  0x17   : > { %320 = vst [vmem:[#allocation2 + $0x44] sm:$0xf] %v9218_v6  ;;  %321 = vst [vmem:[#allocation2 + $0x48] sm:$0xf] %v9221_v7  ;;  %8804 = vmatpush3.bf16.msra.mxu1 %v9098_v2  ;;  %v9268_v20 = vld [vmem:[#allocation2 + $0x4] sm:$0x8] }
  0x18   : > { %322 = vst [vmem:[#allocation2 + $0x58] sm:$0xf] %v9224_v8  ;;  %323 = vst [vmem:[#allocation2 + $0x5c] sm:$0xf] %v9227_v9  ;;  %8805 = vmatprep.subr.bf16.mxu1 %v9209_v3  ;;  %v9270_v21 = vld [vmem:[#allocation2 + $0x8] sm:$0xf] }
  0x19   : > { %271 = vst [vmem:[#allocation2 + $0x2c] sm:$0xf] %v9153_v10  ;;  %273 = vst [vmem:[#allocation2 + $0x40] sm:$0xf] %v9153_v10  ;;  %v9272_v22 = vld [vmem:[#allocation2 + $0x18] sm:$0x8] }
  0x1a   : > { %275 = vst [vmem:[#allocation2 + $0x54] sm:$0xf] %v9153_v10  ;;  %302 = vst [vmem:[#allocation2 + $0x38] sm:$0x1] %v9153_v10  ;;  %vm430_vm0 = vsmask.f32 3328 }
  0x1b   : > { %303 = vst [vmem:[#allocation2 + $0x4c] sm:$0x1] %v9153_v10  ;;  %304 = vst [vmem:[#allocation2 + $0x60] sm:$0x1] %v9153_v10  ;;  %8806 = vmatpush3.bf16.msra.mxu1 %v9209_v3  ;;  %vm431_vm1 = vsmask.f32 7440 }
  0x1c   : > { %260 = vst [vmem:[#allocation2 + $0x16c] sm:$0xf] %v9153_v10  ;;  %261 = vst [vmem:[#allocation2 + $0x170] sm:$0xf] %v9153_v10  ;;  %8807 = vmatprep.subr.bf16.mxu1 %v9100_v12  ;;  %v9274_v23 = vld [vmem:[#allocation2 + $0x1c] sm:$0xf] }
  0x1d   : > { %262 = vst [vmem:[#allocation2 + $0x174] sm:$0xf] %v9153_v10  ;;  %263 = vst [vmem:[#allocation2 + $0x178] sm:$0x1] %v9153_v10  ;;  %v9276_v24 = vld [vmem:[#allocation2 + $0xc] sm:$0xf] }
  0x1e   : > { %265 = vst [vmem:[#allocation2 + $0x180] sm:$0xf] %v9153_v10  ;;  %266 = vst [vmem:[#allocation2 + $0x184] sm:$0xf] %v9153_v10  ;;  %v9278_v25 = vld [vmem:[#allocation2 + $0x20] sm:$0xf] }
  0x1f   : > { %267 = vst [vmem:[#allocation2 + $0x188] sm:$0xf] %v9153_v10  ;;  %268 = vst [vmem:[#allocation2 + $0x18c] sm:$0x1] %v9153_v10  ;;  %8808 = vmatpush3.bf16.msra.mxu1 %v9100_v12  ;;  %v434_v26 = vshrl.u32 %v9268_v20, 16  ;;  %v13108_v27 = vshll.u32 %v9270_v21, 16 }
  0x20   : > { %277 = vst [vmem:[#allocation2 + $0x68] sm:$0xf] %v9153_v10  ;;  %279 = vst [vmem:[#allocation2 + $0x7c] sm:$0xf] %v9153_v10  ;;  %8809 = vmatprep.subr.bf16.mxu1 %v9101_v18  ;;  %v9103_v28 = vld [vmem:[%s13086_s1 + $0x78] sm:$0xff]   ;;  %v13109_v30 = vshrl.u32 %v9270_v21, 16 }
  0x21   : > { %281 = vst [vmem:[#allocation2 + $0x90] sm:$0xf] %v9153_v10  ;;  %283 = vst [vmem:[#allocation2 + $0xa4] sm:$0xf] %v9153_v10  ;;  %v13106_v31 = vshll.u32 %v9276_v24, 16  ;;  %v13107_v32 = vshrl.u32 %v9276_v24, 16 }
  0x22   : > { %285 = vst [vmem:[#allocation2 + $0xb8] sm:$0xf] %v9153_v10  ;;  %287 = vst [vmem:[#allocation2 + $0xcc] sm:$0xf] %v9153_v10  ;;  %v459_v33 = vshrl.u32 %v9272_v22, 16  ;;  %v441_v35 = vrot.slane %v13108_v27, 5 }
  0x23   : > { %289 = vst [vmem:[#allocation2 + $0xe0] sm:$0xf] %v9153_v10  ;;  %291 = vst [vmem:[#allocation2 + $0xf4] sm:$0xf] %v9153_v10  ;;  %8810 = vmatpush3.bf16.msra.mxu1 %v9101_v18  ;;  %v9293_v34 = vld [vmem:[#allocation2 + $0x2c] sm:$0x8] }
  0x24   : > { %293 = vst [vmem:[#allocation2 + $0x108] sm:$0xf] %v9153_v10  ;;  %295 = vst [vmem:[#allocation2 + $0x11c] sm:$0xf] %v9153_v10  ;;  %8811 = vmatprep.subr.bf16.mxu1 %v9102_v19  ;;  %v13104_v36 = vshll.u32 %v9274_v23, 16  ;;  %v13105_v37 = vshrl.u32 %v9274_v23, 16 }
  0x25   : > { %297 = vst [vmem:[#allocation2 + $0x130] sm:$0xf] %v9153_v10  ;;  %299 = vst [vmem:[#allocation2 + $0x144] sm:$0xf] %v9153_v10  ;;  %v13100_v38 = vshll.u32 %v9278_v25, 16  ;;  %v445_v40 = vrot.slane %v13109_v30, 4 }
  0x26   : > { %301 = vst [vmem:[#allocation2 + $0x158] sm:$0xf] %v9153_v10  ;;  %305 = vst [vmem:[#allocation2 + $0x74] sm:$0x1] %v9153_v10  ;;  %v9300_v39 = vld [vmem:[#allocation2 + $0x30] sm:$0xf] }
  0x27   : > { %306 = vst [vmem:[#allocation2 + $0x88] sm:$0x1] %v9153_v10  ;;  %307 = vst [vmem:[#allocation2 + $0x9c] sm:$0x1] %v9153_v10  ;;  %v9306_v41 = vrot.slane %v13106_v31, 5  ;;  %v455_v42 = vrot.slane %v13107_v32, 4  ;;  %8812 = vmatpush3.bf16.msra.mxu1 %v9102_v19  ;;  %v446_v50 = vor.u32 %v445_v40, %v441_v35 }
  0x28   : > { %308 = vst [vmem:[#allocation2 + $0xb0] sm:$0x1] %v9153_v10  ;;  %309 = vst [vmem:[#allocation2 + $0xc4] sm:$0x1] %v9153_v10  ;;  %v13101_v43 = vshrl.u32 %v9278_v25, 16  ;;  %v466_v46 = vrot.slane %v13104_v36, 5  ;;  %8813 = vmatprep.subr.bf16.mxu1 %v9103_v28 }
  0x29   : > { %310 = vst [vmem:[#allocation2 + $0xd8] sm:$0x1] %v9153_v10  ;;  %311 = vst [vmem:[#allocation2 + $0xec] sm:$0x1] %v9153_v10  ;;  %v9311_v44 = vld [vmem:[#allocation2 + $0x34] sm:$0xf]  ;;  %v456_v51 = vor.u32 %v455_v42, %v9306_v41 }
  0x2a   : > { %312 = vst [vmem:[#allocation2 + $0x100] sm:$0x1] %v9153_v10  ;;  %313 = vst [vmem:[#allocation2 + $0x114] sm:$0x1] %v9153_v10  ;;  %v470_v47 = vrot.slane %v13105_v37, 4  ;;  %v9323_v48 = vrot.slane %v13100_v38, 5 }
  0x2b   : > { %314 = vst [vmem:[#allocation2 + $0x128] sm:$0x1] %v9153_v10  ;;  %315 = vst [vmem:[#allocation2 + $0x13c] sm:$0x1] %v9153_v10  ;;  %v9106_v49 = vld [vmem:[%s13086_s1 + $0x90] sm:$0xff]   ;;  %v480_v52 = vrot.slane %v13101_v43, 4  ;;  %8814 = vmatpush3.bf16.msra.mxu1 %v9103_v28 }
  0x2c   : > { %316 = vst [vmem:[#allocation2 + $0x150] sm:$0x1] %v9153_v10  ;;  %317 = vst [vmem:[#allocation2 + $0x164] sm:$0x1] %v9153_v10  ;;  %v484_v53 = vshrl.u32 %v9293_v34, 16  ;;  %v471_v57 = vor.u32 %v470_v47, %v466_v46  ;;  %v13097_v58 = vshll.u32 %v9300_v39, 16  ;;  %8899 = vmatprep.subr.bf16.mxu0 %v9106_v49 }
  0x2d   : > { %13198 = vst [vmem:[#allocation9_spill] sm:$0xff] %v9243_v13  ;;  %13199 = vst [vmem:[#allocation10_spill] sm:$0xff] %v9246_v14  ;;  %v9332_v54 = vld [vmem:[#allocation2 + $0x40] sm:$0x8]  ;;  %v9334_v55 = vld [vmem:[#allocation2 + $0x44] sm:$0xf]  ;;  %v481_v63 = vor.u32 %v480_v52, %v9323_v48  ;;  %8900 = vmatpush3.bf16.msra.mxu0 %v9106_v49 }
  0x2e   : > { %324 = vst [vmem:[#allocation2 + $0x6c] sm:$0xf] %v9243_v13  ;;  %325 = vst [vmem:[#allocation2 + $0x70] sm:$0xf] %v9246_v14  ;;  %v13099_v59 = vshrl.u32 %v9300_v39, 16  ;;  %v447_v61 = vrot.slane %v446_v50, 4 }
  0x2f   : > { %13200 = vst [vmem:[#allocation11_spill] sm:$0xff] %v9255_v16  ;;  %13201 = vst [vmem:[#allocation12_spill] sm:$0xff] %v9258_v17  ;;  %v9342_v60 = vld [vmem:[#allocation2 + $0x58] sm:$0xf]  ;;  %v9344_v62 = vrot.slane %v456_v51, 4  ;;  %v13094_v0 = vshll.u32 %v9311_v44, 16 }
  0x30   : > { %326 = vst [vmem:[#allocation2 + $0x80] sm:$0xf] %v9255_v16  ;;  %327 = vst [vmem:[#allocation2 + $0x84] sm:$0xf] %v9258_v17  ;;  %v9107_v1 = vld [vmem:[%s13086_s1 + $0x98] sm:$0xff]   ;;  %v472_v3 = vrot.slane %v471_v57, 4 }
  0x31   : > { %vm9285_vm2 = vmor %vm430_vm0, %vm431_vm1  ;;  %v9351_v2 = vld [vmem:[#allocation2 + $0x48] sm:$0xf]  ;;  %v491_v10 = vrot.slane %v13097_v58, 5  ;;  %v495_v11 = vrot.slane %v13099_v59, 4  ;;  %v13096_v12 = vshrl.u32 %v9311_v44, 16  ;;  %v9363_v19 = vrot.slane %v481_v63, 4  ;;  %8901 = vmatprep.subr.bf16.mxu0 %v9107_v1 }
  0x32   : > { %v9315_v45 = vsel %vm9285_vm2, %v434_v26, %v441_v35  ;;  %v9338_v56 = vsel %vm9285_vm2, %v459_v33, %v466_v46  ;;  %v9358_v15 = vld [vmem:[#allocation2 + $0x54] sm:$0x8]  ;;  %v452_v18 = vsel %vm9285_vm2, %v447_v61, %v9306_v41  ;;  %v501_v26 = vrot.slane %v13094_v0, 5  ;;  %8902 = vmatpush3.bf16.msra.mxu0 %v9107_v1  ;;  %v9381_v50 = vld [vmem:[#allocation2 + $0x5c] sm:$0xf] }
  0x33   : > { %v509_v33 = vshrl.u32 %v9332_v54, 16  ;;  %v477_v35 = vsel %vm9285_vm2, %v472_v3, %v9323_v48  ;;  %v9373_v28 = vsel %vm9285_vm2, %v484_v53, %v491_v10  ;;  %v496_v40 = vor.u32 %v495_v11, %v491_v10  ;;  %v9407_v0 = vld [vmem:[#allocation2 + $0x20] sm:$0x7]  ;;  %v9436_v43 = vld [vmem:[%s9204_s26 + $0x28] sm:$0xf] }
  0x34   : > { %v505_v41 = vrot.slane %v13096_v12, 4  ;;  %v13090_v42 = vshll.u32 %v9334_v55, 16  ;;  %v13092_v46 = vshrl.u32 %v9334_v55, 16  ;;  %v13091_v47 = vshll.u32 %v9351_v2, 16  ;;  %13204 = vst [vmem:[#allocation13_spill] sm:$0xff] %v9436_v43 }
  0x35   : > { %v13093_v49 = vshrl.u32 %v9351_v2, 16  ;;  %v497_v48 = vrot.slane %v496_v40, 4  ;;  %v534_v52 = vshrl.u32 %v9358_v15, 16  ;;  %v13095_v53 = vshll.u32 %v9342_v60, 16  ;;  %328 = vst [vmem:[#allocation2 + $0x94] sm:$0xf] %v9436_v43 }
  0x36   : > { %v506_v51 = vor.u32 %v505_v41, %v501_v26  ;;  %vm1093_vm3 = vcmask 1042432   ;;  %vm1094_vm4 = vcmask 1046532   ;;  %v516_v57 = vrot.slane %v13090_v42, 5  ;;  %v9400_v41 = vld [vmem:[#allocation2 + $0xc] sm:$0x7] }
  0x37   : > { %v520_v61 = vrot.slane %v13092_v46, 4  ;;  %v526_v63 = vrot.slane %v13091_v47, 5  ;;  %v530_v1 = vrot.slane %v13093_v49, 4  ;;  %v502_v3 = vsel %vm9285_vm2, %v497_v48, %v501_v26  ;;  %v9409_v26 = vld [vmem:[#allocation2 + $0x34] sm:$0x7]  ;;  %vm9485_vm5 = vmor %vm1093_vm3, %vm1094_vm4 }
  0x38   : > { %v9395_v10 = vrot.slane %v506_v51, 4  ;;  %v541_v11 = vrot.slane %v13095_v53, 5  ;;  %v13098_v40 = vshrl.u32 %v9342_v60, 16  ;;  %v9404_v42 = vsel %vm9285_vm2, %v509_v33, %v516_v57  ;;  %v9499_v36 = vld [vmem:[%s9204_s26 + $0x3c] sm:$0xf] }
  0x39   : > { %v521_v47 = vor.u32 %v520_v61, %v516_v57  ;;  %v531_v46 = vor.u32 %v530_v1, %v526_v63  ;;  %v13102_v49 = vshll.u32 %v9381_v50, 16  ;;  %v13103_v33 = vshrl.u32 %v9381_v50, 16  ;;  %v9420_v61 = vld [vmem:[#allocation2 + $0x48] sm:$0x7]  ;;  %13211 = vst [vmem:[#allocation18_spill] sm:$0xff] %v9499_v36 }
  0x3a   : > { %v9413_v48 = vsel %vm9285_vm2, %v534_v52, %v541_v11  ;;  %v545_v51 = vrot.slane %v13098_v40, 4  ;;  %v9427_v58 = vmax.bf16 %v452_v18, %v9270_v21  ;;  %v995_v59 = vmax.bf16 %v9344_v62, %v9400_v41  ;;  %333 = vst [vmem:[#allocation2 + $0xc0] sm:$0xf] %v9499_v36  ;;  %v9589_v36 = vld [vmem:[#allocation2 + $0x38] sm:$0x1] }
  0x3b   : > { %v522_v1 = vrot.slane %v521_v47, 4  ;;  %v9422_v53 = vrot.slane %v531_v46, 4  ;;  %v551_v12 = vrot.slane %v13102_v49, 5  ;;  %v555_v40 = vrot.slane %v13103_v33, 4  ;;  %v9439_v46 = vld [vmem:[%s9204_s26 + $0x2c] sm:$0xf] }
  0x3c   : > { %v546_v52 = vor.u32 %v545_v51, %v541_v11  ;;  %v996_v38 = vmax.bf16 %v9338_v56, %v9272_v22  ;;  %13205 = vst [vmem:[#allocation14_spill] sm:$0xff] %v9439_v46  ;;  %v9441_v47 = vld [vmem:[#allocation2 + $0x5c] sm:$0x7]  ;;  %v9446_v11 = vmax.bf16 %v477_v35, %v9274_v23  ;;  %v998_v62 = vmax.bf16 %v9363_v19, %v9407_v0  ;;  %v9629_v13 = vld [vmem:[%s9204_s26 + $0x48] sm:$0xf] }
  0x3d   : > { %v527_v18 = vsel %vm9285_vm2, %v522_v1, %v526_v63  ;;  %v999_v22 = vmax.bf16 %v9373_v28, %v9293_v34  ;;  %329 = vst [vmem:[#allocation2 + $0x98] sm:$0xf] %v9439_v46  ;;  %v556_v41 = vor.u32 %v555_v40, %v551_v12  ;;  %v9455_v51 = vmax.bf16 %v502_v3, %v9300_v39  ;;  %v9469_v28 = vld [vmem:[%s9204_s26 + $0x30] sm:$0xf]  ;;  %v9472_v40 = vld [vmem:[%s9204_s26 + $0x34] sm:$0xf] }
  0x3e   : > { %v547_v56 = vrot.slane %v546_v52, 4  ;;  %v1001_v63 = vmax.bf16 %v9395_v10, %v9409_v26  ;;  %v1002_v35 = vmax.bf16 %v9404_v42, %v9332_v54  ;;  %v9462_v0 = vmax.bf16 %v527_v18, %v9334_v55  ;;  %13206 = vst [vmem:[#allocation15_spill] sm:$0xff] %v9469_v28  ;;  %13207 = vst [vmem:[#allocation16_spill] sm:$0xff] %v9472_v40 }
  0x3f   : > { %v1004_v34 = vmax.bf16 %v9422_v53, %v9420_v61  ;;  %v1005_v19 = vmax.bf16 %v9413_v48, %v9358_v15  ;;  %v557_v10 = vrot.slane %v556_v41, 4  ;;  %v1096_v54 = vrot.slane %v9270_v21, 5  ;;  %330 = vst [vmem:[#allocation2 + $0xa8] sm:$0xf] %v9469_v28  ;;  %331 = vst [vmem:[#allocation2 + $0xac] sm:$0xf] %v9472_v40 }
  0x40   : > { %v552_v3 = vsel %vm9285_vm2, %v547_v56, %v551_v12  ;;  %v1098_v42 = vrot.slane %v9276_v24, 5  ;;  %v1101_v12 = vrot.slane %v9274_v23, 5  ;;  %v1103_v26 = vrot.slane %v9278_v25, 5  ;;  %v9495_v56 = vld [vmem:[%s9204_s26 + $0x38] sm:$0xf]  ;;  %13229 = vst [vmem:[#allocation21_spill] sm:$0xff] %v9629_v13 }
  0x41   : > { %v9481_v53 = vmax.bf16 %v552_v3, %v9342_v60  ;;  %v1106_v48 = vrot.slane %v9300_v39, 5  ;;  %v1007_v61 = vmax.bf16 %v557_v10, %v9441_v47  ;;  %v1097_v1 = vrot.slane %v1096_v54, 4  ;;  %13210 = vst [vmem:[#allocation17_spill] sm:$0xff] %v9495_v56  ;;  %332 = vst [vmem:[#allocation2 + $0xbc] sm:$0xf] %v9495_v56 }
  0x42   : > { %v1100_v52 = vrot.slane %v1098_v42, 4  ;;  %v1108_v18 = vrot.slane %v9311_v44, 5  ;;  %v1102_v41 = vrot.slane %v1101_v12, 4  ;;  %v1105_v3 = vrot.slane %v1103_v26, 4  ;;  %336 = vst [vmem:[#allocation2 + $0xe4] sm:$0xf] %v9629_v13 }
  0x43   : > { %v1107_v49 = vrot.slane %v1106_v48, 4  ;;  %v1111_v33 = vrot.slane %v9334_v55, 5  ;;  %vm1336_vm6 = vsmask.f32 2304  ;;  %vm1337_vm7 = vsmask.f32 6416 }
  0x44   : > { %v9504_v47 = vsel %vm9485_vm5, %v1097_v1, %v1098_v42  ;;  %v1110_v10 = vrot.slane %v1108_v18, 4  ;;  %v1113_v37 = vrot.slane %v9351_v2, 5  ;;  %v1116_v31 = vrot.slane %v9342_v60, 5  ;;  %vm9593_vm8 = vmor %vm1336_vm6, %vm1337_vm7 }
  0x45   : > { %v9511_v32 = vsel %vm9485_vm5, %v1102_v41, %v1103_v26  ;;  %v9515_v27 = vsel %vm9485_vm5, %v1107_v49, %v1108_v18  ;;  %v1112_v30 = vrot.slane %v1111_v33, 4  ;;  %v1118_v57 = vrot.slane %v9381_v50, 5 }
  0x46   : > { %v1115_v42 = vrot.slane %v1113_v37, 4  ;;  %v1117_v1 = vrot.slane %v1116_v31, 4  ;;  %v13212_v56 = vmax.bf16 %v9315_v45, %v9268_v20  ;;  %v9529_v49 = vmax.bf16 %v1100_v52, %v995_v59  ;;  %v9587_v20 = vld [vmem:[%s9204_s26 + $0x44] sm:$0xf] }
  0x47   : > { %v9527_v26 = vsel %vm9485_vm5, %v1112_v30, %v1113_v37  ;;  %v1120_v41 = vrot.slane %v1118_v57, 4  ;;  %v9531_v18 = vmax.bf16 %v1101_v12, %v996_v38  ;;  %v9539_v45 = vmax.bf16 %v1105_v3, %v998_v62  ;;  %13222 = vst [vmem:[#allocation20_spill] sm:$0xff] %v9587_v20  ;;  %335 = vst [vmem:[#allocation2 + $0xd4] sm:$0xf] %v9587_v20 }
  0x48   : > { %v9521_v28 = vmax.bf16 %v1096_v54, %v13212_v56  ;;  %v9535_v40 = vsel %vm9485_vm5, %v1117_v1, %v1118_v57  ;;  %v9541_v54 = vmax.bf16 %v1106_v48, %v999_v22  ;;  %v9543_v56 = vld [vmem:[#allocation2 + $0x10] sm:$0x1]  ;;  %v9547_v37 = vmax.bf16 %v1110_v10, %v1001_v63  ;;  %v9561_v48 = vld [vmem:[#allocation2 + $0x24] sm:$0x1] }
  0x49   : > { %v9549_v38 = vmax.bf16 %v1111_v33, %v1002_v35  ;;  %v9553_v57 = vmax.bf16 %v1115_v42, %v1004_v34  ;;  %v9555_v12 = vmax.bf16 %v1116_v31, %v1005_v19  ;;  %v9559_v22 = vmax.bf16 %v1120_v41, %v1007_v61 }
  0x4a   : > { %v13213_v63 = vshrl.u32 %v9270_v21, 16  ;;  %v13214_v35 = vshll.u32 %v9270_v21, 16  ;;  %v13215_v34 = vshrl.u32 %v9276_v24, 16  ;;  %v13216_v31 = vshll.u32 %v9276_v24, 16 }
  0x4b   : > { %v1349_v10 = vshll.u32 %v9543_v56, 16  ;;  %v13217_v42 = vshrl.u32 %v9274_v23, 16  ;;  %v13218_v1 = vshll.u32 %v9274_v23, 16  ;;  %v13219_v62 = vshrl.u32 %v9278_v25, 16 }
  0x4c   : > { %v1339_v33 = vrot.slane %v13213_v63, 5  ;;  %v1340_v52 = vrot.slane %v13214_v35, 6  ;;  %v1343_v3 = vrot.slane %v13215_v34, 5  ;;  %v1344_v19 = vrot.slane %v13216_v31, 6  ;;  %v9584_v31 = vld [vmem:[%s9204_s26 + $0x40] sm:$0xf] }
  0x4d   : > { %v1353_v61 = vrot.slane %v13217_v42, 5  ;;  %v1354_v41 = vrot.slane %v13218_v1, 6  ;;  %v1357_v63 = vrot.slane %v13219_v62, 5  ;;  %v13220_v35 = vshll.u32 %v9278_v25, 16  ;;  %13221 = vst [vmem:[#allocation19_spill] sm:$0xff] %v9584_v31 }
  0x4e   : > { %v9578_v59 = vor.u32 %v1340_v52, %v1339_v33  ;;  %v1345_v21 = vor.u32 %v1344_v19, %v1343_v3  ;;  %v1363_v30 = vshll.u32 %v9561_v48, 16  ;;  %v1351_v62 = vrot.slane %v1349_v10, 6  ;;  %334 = vst [vmem:[#allocation2 + $0xd0] sm:$0xf] %v9584_v31  ;;  %v9108_v10 = vld [vmem:[%s13086_s1 + $0xa0] sm:$0xff]  }
  0x4f   : > { %v1358_v34 = vrot.slane %v13220_v35, 6  ;;  %v9597_v33 = vor.u32 %v1354_v41, %v1353_v61  ;;  %v13225_v52 = vshrl.u32 %v9300_v39, 16  ;;  %v13226_v19 = vshll.u32 %v9300_v39, 16  ;;  %v9109_v39 = vld [vmem:[%s13086_s1 + $0xa8] sm:$0xff]   ;;  %8903 = vmatprep.subr.bf16.mxu0 %v9108_v10 }
  0x50   : > { %v1342_v1 = vrot.slane %v9578_v59, 4  ;;  %v1347_v35 = vrot.slane %v1345_v21, 4  ;;  %v1365_v46 = vrot.slane %v1363_v30, 6  ;;  %v9612_v61 = vld [vmem:[#allocation2 + $0x4c] sm:$0x1]  ;;  %v1377_v17 = vshll.u32 %v9589_v36, 16  ;;  %8904 = vmatpush3.bf16.msra.mxu0 %v9108_v10 }
  0x51   : > { %v1367_v3 = vrot.slane %v13225_v52, 5  ;;  %v1368_v42 = vrot.slane %v13226_v19, 6  ;;  %v1359_v43 = vor.u32 %v1358_v34, %v1357_v63  ;;  %v1356_v41 = vrot.slane %v9597_v33, 4  ;;  %8905 = vmatprep.subr.bf16.mxu0 %v9109_v39 }
  0x52   : > { %v13227_v19 = vshrl.u32 %v9311_v44, 16  ;;  %v13228_v63 = vshll.u32 %v9311_v44, 16  ;;  %v1346_v34 = vsel %vm9593_vm8, %v1342_v1, %v1345_v21  ;;  %v9625_v20 = vsel %vm9593_vm8, %v1347_v35, %v1351_v62 }
  0x53   : > { %v9615_v52 = vor.u32 %v1368_v42, %v1367_v3  ;;  %v1361_v16 = vrot.slane %v1359_v43, 4  ;;  %v9632_v3 = vld [vmem:[%s9204_s26 + $0x4c] sm:$0xf]  ;;  %v9634_v42 = vld [vmem:[#allocation2 + $0x60] sm:$0x1]  ;;  %v13231_v1 = vshrl.u32 %v9334_v55, 16 }
  0x54   : > { %v1371_v31 = vrot.slane %v13227_v19, 5  ;;  %v1372_v30 = vrot.slane %v13228_v63, 6  ;;  %13230 = vst [vmem:[#allocation22_spill] sm:$0xff] %v9632_v3  ;;  %v1360_v19 = vsel %vm9593_vm8, %v1356_v41, %v1359_v43  ;;  %337 = vst [vmem:[#allocation2 + $0xe8] sm:$0xf] %v9632_v3  ;;  %v1379_v14 = vrot.slane %v1377_v17, 6  ;;  %8906 = vmatpush3.bf16.msra.mxu0 %v9109_v39 }
  0x55   : > { %v1370_v63 = vrot.slane %v9615_v52, 4  ;;  %v1381_v62 = vrot.slane %v13231_v1, 5  ;;  %v9645_v35 = vsel %vm9593_vm8, %v1361_v16, %v1365_v46  ;;  %v13232_v8 = vshll.u32 %v9334_v55, 16  ;;  %v9684_v39 = vld [vmem:[%s9204_s26 + $0x50] sm:$0xf] }
  0x56   : > { %v1373_v21 = vor.u32 %v1372_v30, %v1371_v31  ;;  %v13233_v43 = vshrl.u32 %v9351_v2, 16  ;;  %vm1799_vm9 = vcmask 1041408   ;;  %vm1800_vm10 = vcmask 1045508   ;;  %13240 = vst [vmem:[#allocation23_spill] sm:$0xff] %v9684_v39  ;;  %338 = vst [vmem:[#allocation2 + $0xf8] sm:$0xf] %v9684_v39 }
  0x57   : > { %v1382_v9 = vrot.slane %v13232_v8, 6  ;;  %v13234_v30 = vshll.u32 %v9351_v2, 16  ;;  %v1391_v16 = vshll.u32 %v9612_v61, 16  ;;  %v13235_v17 = vshrl.u32 %v9342_v60, 16  ;;  %vm9738_vm11 = vmor %vm1799_vm9, %vm1800_vm10 }
  0x58   : > { %v1385_v41 = vrot.slane %v13233_v43, 5  ;;  %v1374_v31 = vsel %vm9593_vm8, %v1370_v63, %v1373_v21  ;;  %v1375_v10 = vrot.slane %v1373_v21, 4  ;;  %v13236_v55 = vshll.u32 %v9342_v60, 16 }
  0x59   : > { %v1386_v1 = vrot.slane %v13234_v30, 6  ;;  %v9656_v46 = vor.u32 %v1382_v9, %v1381_v62  ;;  %v1395_v8 = vrot.slane %v13235_v17, 5  ;;  %v13237_v13 = vshrl.u32 %v9381_v50, 16 }
  0x5a   : > { %v1396_v43 = vrot.slane %v13236_v55, 6  ;;  %v9666_v63 = vsel %vm9593_vm8, %v1375_v10, %v1379_v14  ;;  %v1393_v30 = vrot.slane %v1391_v16, 6  ;;  %v13238_v6 = vshll.u32 %v9381_v50, 16 }
  0x5b   : > { %v1399_v3 = vrot.slane %v13237_v13, 5  ;;  %v1387_v21 = vor.u32 %v1386_v1, %v1385_v41  ;;  %v1384_v62 = vrot.slane %v9656_v46, 4  ;;  %v1405_v60 = vshll.u32 %v9634_v42, 16 }
  0x5c   : > { %v1400_v9 = vrot.slane %v13238_v6, 6  ;;  %v9671_v17 = vor.u32 %v1396_v43, %v1395_v8  ;;  %v1679_v55 = vmax.bf16 %v9578_v59, %v9521_v28  ;;  %v13239_v14 = vmax.bf16 %v9504_v47, %v9427_v58  ;;  %v1739_v8 = vld [vmem:[#allocation2 + $0x8] sm:$0xe]  ;;  %v1740_v43 = vld [vmem:[#allocation2 + $0x1c] sm:$0xe] }
  0x5d   : > { %v1389_v13 = vrot.slane %v1387_v21, 4  ;;  %v1681_v6 = vmax.bf16 %v9625_v20, %v9529_v49  ;;  %v1388_v10 = vsel %vm9593_vm8, %v1384_v62, %v1387_v21  ;;  %v1407_v16 = vrot.slane %v1405_v60, 6  ;;  %v9703_v62 = vld [vmem:[#allocation2 + $0x30] sm:$0xe]  ;;  %v9706_v60 = vld [vmem:[%s9204_s26 + $0x54] sm:$0xf] }
  0x5e   : > { %v1401_v7 = vor.u32 %v1400_v9, %v1399_v3  ;;  %v9679_v41 = vmax.bf16 %v1346_v34, %v13239_v14  ;;  %v1398_v1 = vrot.slane %v9671_v17, 4  ;;  %v13241_v34 = vmax.bf16 %v9511_v32, %v9446_v11  ;;  %13242 = vst [vmem:[#allocation24_spill] sm:$0xff] %v9706_v60  ;;  %339 = vst [vmem:[#allocation2 + $0xfc] sm:$0xf] %v9706_v60  ;;  %v365_v28 = vld [vmem:[#allocation2 + $0x68] sm:$0x8] }
  0x5f   : > { %v9694_v58 = vsel %vm9593_vm8, %v1389_v13, %v1393_v30  ;;  %v1684_v21 = vmax.bf16 %v9645_v35, %v9539_v45  ;;  %v1685_v30 = vmax.bf16 %v9615_v52, %v9541_v54  ;;  %v13243_v13 = vmax.bf16 %v9515_v27, %v9455_v51  ;;  %v1742_v51 = vld [vmem:[#allocation2 + $0x44] sm:$0xe]  ;;  %v9785_v59 = vld [vmem:[#allocation2 + $0x6c] sm:$0xf] }
  0x60   : > { %v1403_v47 = vrot.slane %v1401_v7, 4  ;;  %v9699_v9 = vmax.bf16 %v1360_v19, %v13241_v34  ;;  %v1402_v14 = vsel %vm9593_vm8, %v1398_v1, %v1401_v7  ;;  %v1687_v32 = vmax.bf16 %v9666_v63, %v9547_v37  ;;  %v1743_v34 = vld [vmem:[#allocation2 + $0x58] sm:$0xe] }
  0x61   : > { %v1686_v3 = vmax.bf16 %v1374_v31, %v13243_v13  ;;  %v1688_v19 = vmax.bf16 %v9656_v46, %v9549_v38  ;;  %v13244_v7 = vmax.bf16 %v9527_v26, %v9462_v0  ;;  %v1690_v27 = vmax.bf16 %v9694_v58, %v9553_v57  ;;  %v9759_v13 = vld [vmem:[%s9204_s26 + $0x58] sm:$0xf]  ;;  %v12937_v0 = vld [vmem:[%s13088_s3] ss:$0 sm:$0xff] }
  0x62   : > { %v9720_v11 = vsel %vm9593_vm8, %v1403_v47, %v1407_v16  ;;  %v1691_v52 = vmax.bf16 %v9671_v17, %v9555_v12  ;;  %v13245_v31 = vmax.bf16 %v9535_v40, %v9481_v53  ;;  %v1802_v47 = vrot.slane %v1739_v8, 6  ;;  %13248 = vst [vmem:[#allocation25_spill] sm:$0xff] %v9759_v13  ;;  %340 = vst [vmem:[#allocation2 + $0x10c] sm:$0xf] %v9759_v13 }
  0x63   : > { %v1689_v54 = vmax.bf16 %v1388_v10, %v13244_v7  ;;  %v1693_v16 = vmax.bf16 %v9720_v11, %v9559_v22  ;;  %v1804_v26 = vrot.slane %v9276_v24, 6  ;;  %v1807_v38 = vrot.slane %v9543_v56, 6 }
  0x64   : > { %v1692_v1 = vmax.bf16 %v1402_v14, %v13245_v31  ;;  %v1809_v57 = vrot.slane %v1740_v43, 6  ;;  %v1811_v12 = vrot.slane %v9278_v25, 6  ;;  %v1803_v46 = vrot.slane %v1802_v47, 4 }
  0x65   : > { %v1814_v40 = vrot.slane %v9561_v48, 6  ;;  %v1816_v53 = vrot.slane %v9703_v62, 6  ;;  %v1818_v22 = vrot.slane %v9311_v44, 6  ;;  %v1806_v17 = vrot.slane %v1804_v26, 4 }
  0x66   : > { %v1810_v10 = vrot.slane %v1809_v57, 4  ;;  %v1813_v8 = vrot.slane %v1811_v12, 4  ;;  %v1821_v58 = vrot.slane %v9589_v36, 6  ;;  %v1805_v24 = vsel %vm9738_vm11, %v1803_v46, %v1804_v26 }
  0x67   : > { %v1817_v56 = vrot.slane %v1816_v53, 4  ;;  %v1820_v43 = vrot.slane %v1818_v22, 4  ;;  %v1823_v25 = vrot.slane %v1742_v51, 6  ;;  %v1808_v48 = vsel %vm9738_vm11, %v1806_v17, %v1807_v38 }
  0x68   : > { %v1812_v62 = vsel %vm9738_vm11, %v1810_v10, %v1811_v12  ;;  %v1815_v44 = vsel %vm9738_vm11, %v1813_v8, %v1814_v40  ;;  %v1825_v14 = vrot.slane %v9351_v2, 6  ;;  %v1828_v51 = vrot.slane %v9612_v61, 6 }
  0x69   : > { %v1819_v36 = vsel %vm9738_vm11, %v1817_v56, %v1818_v22  ;;  %v1822_v11 = vsel %vm9738_vm11, %v1820_v43, %v1821_v58  ;;  %v1824_v7 = vrot.slane %v1823_v25, 4  ;;  %v1830_v26 = vrot.slane %v1743_v34, 6 }
  0x6a   : > { %v1827_v31 = vrot.slane %v1825_v14, 4  ;;  %v1832_v38 = vrot.slane %v9381_v50, 6  ;;  %v1835_v2 = vrot.slane %v9634_v42, 6  ;;  %v2002_v46 = vmax.bf16 %v1802_v47, %v1679_v55  ;;  %v9787_v55 = vld [vmem:[#allocation2 + $0x70] sm:$0xf] }
  0x6b   : > { %v1826_v12 = vsel %vm9738_vm11, %v1824_v7, %v1825_v14  ;;  %v2003_v40 = vmax.bf16 %v1805_v24, %v9679_v41  ;;  %v2004_v61 = vmax.bf16 %v1808_v48, %v1681_v6  ;;  %v1831_v17 = vrot.slane %v1830_v26, 4  ;;  %v9790_v41 = vld [vmem:[%s9204_s26 + $0x5c] sm:$0xf] }
  0x6c   : > { %v1829_v22 = vsel %vm9738_vm11, %v1827_v31, %v1828_v51  ;;  %v1834_v50 = vrot.slane %v1832_v38, 4  ;;  %v13249_v42 = vmax.bf16 %v9597_v33, %v9531_v18  ;;  %vm2302_vm12 = vcmask 1040384   ;;  %13250 = vst [vmem:[#allocation26_spill] sm:$0xff] %v9790_v41  ;;  %341 = vst [vmem:[#allocation2 + $0x110] sm:$0xf] %v9790_v41 }
  0x6d   : > { %vm2303_vm13 = vcmask 1044484   ;;  %v9793_v49 = vmax.bf16 %v1812_v62, %v9699_v9  ;;  %v9798_v20 = vmax.bf16 %v1815_v44, %v1684_v21  ;;  %v9800_v18 = vmax.bf16 %v1816_v53, %v1685_v30 }
  0x6e   : > { %v9783_v10 = vmax.bf16 %v1809_v57, %v13249_v42  ;;  %v9802_v33 = vmax.bf16 %v1819_v36, %v1686_v3  ;;  %v1833_v6 = vsel %vm9738_vm11, %v1831_v17, %v1832_v38  ;;  %v1836_v47 = vsel %vm9738_vm11, %v1834_v50, %v1835_v2  ;;  %vm9848_vm14 = vmor %vm2302_vm12, %vm2303_vm13  ;;  %v367_v2 = vld [vmem:[#allocation2 + $0x70] sm:$0x7] }
  0x6f   : > { %v9812_v9 = vmax.bf16 %v1822_v11, %v1687_v32  ;;  %v9814_v45 = vmax.bf16 %v1823_v25, %v1688_v19  ;;  %v9816_v35 = vmax.bf16 %v1826_v12, %v1689_v54  ;;  %v9818_v21 = vmax.bf16 %v1829_v22, %v1690_v27  ;;  %v1321_v22 = vld [vmem:[#allocation2 + $0x74] sm:$0x1] }
  0x70   : > { %v9820_v3 = vmax.bf16 %v1830_v26, %v1691_v52  ;;  %v9822_v30 = vmax.bf16 %v1833_v6, %v1692_v1  ;;  %v9824_v57 = vmax.bf16 %v1836_v47, %v1693_v16  ;;  %v2062_v53 = vmax.bf16 %v9783_v10, %v2002_v46  ;;  %v9110_v47 = vld [vmem:[%s13086_s1 + $0xb0] sm:$0xff]  }
  0x71   : > { %v2063_v8 = vmax.bf16 %v9793_v49, %v2003_v40  ;;  %v2064_v37 = vmax.bf16 %v9798_v20, %v2004_v61  ;;  %v559_v63 = vshrl.u32 %v365_v28, 16  ;;  %v564_v32 = vshll.u32 %v9785_v59, 16  ;;  %8907 = vmatprep.subr.bf16.mxu0 %v9110_v47 }
  0x72   : > { %v568_v19 = vshrl.u32 %v9785_v59, 16  ;;  %v574_v54 = vshll.u32 %v9787_v55, 16  ;;  %v2110_v27 = vmax.bf16 %v2062_v53, %v9800_v18  ;;  %v578_v16 = vshrl.u32 %v9787_v55, 16  ;;  %v9111_v53 = vld [vmem:[%s13086_s1 + $0xb8] sm:$0xff]   ;;  %8908 = vmatpush3.bf16.msra.mxu0 %v9110_v47 }
  0x73   : > { %v2111_v52 = vmax.bf16 %v2063_v8, %v9802_v33  ;;  %v2112_v1 = vmax.bf16 %v2064_v37, %v9812_v9  ;;  %v566_v58 = vrot.slane %v564_v32, 5  ;;  %v1121_v56 = vrot.slane %v9785_v59, 5  ;;  %8909 = vmatprep.subr.bf16.mxu0 %v9111_v53 }
  0x74   : > { %v570_v34 = vrot.slane %v568_v19, 4  ;;  %v576_v24 = vrot.slane %v574_v54, 5  ;;  %v2158_v43 = vmax.bf16 %v2110_v27, %v9814_v45  ;;  %v580_v62 = vrot.slane %v578_v16, 4  ;;  %v1744_v27 = vld [vmem:[#allocation2 + $0x6c] sm:$0xe] }
  0x75   : > { %v2159_v25 = vmax.bf16 %v2111_v52, %v9816_v35  ;;  %v2160_v48 = vmax.bf16 %v2112_v1, %v9818_v21  ;;  %v567_v44 = vsel %vm9285_vm2, %v559_v63, %v566_v58  ;;  %v1122_v36 = vrot.slane %v1121_v56, 4 }
  0x76   : > { %v571_v14 = vor.u32 %v570_v34, %v566_v58  ;;  %v1123_v11 = vrot.slane %v9787_v55, 5  ;;  %v2206_v7 = vmax.bf16 %v2158_v43, %v9820_v3  ;;  %v581_v26 = vor.u32 %v580_v62, %v576_v24  ;;  %8910 = vmatpush3.bf16.msra.mxu0 %v9111_v53 }
  0x77   : > { %v2207_v51 = vmax.bf16 %v2159_v25, %v9822_v30  ;;  %v2208_v31 = vmax.bf16 %v2160_v48, %v9824_v57  ;;  %v1008_v46 = vmax.bf16 %v567_v44, %v365_v28  ;;  %v1409_v37 = vrot.slane %v568_v19, 5 }
  0x78   : > { %v572_v12 = vrot.slane %v571_v14, 4  ;;  %v1124_v40 = vsel %vm9485_vm5, %v1122_v36, %v1123_v11  ;;  %v1125_v61 = vrot.slane %v1123_v11, 4  ;;  %v8306_v17 = vrot.slane %v2206_v7, 11 }
  0x79   : > { %v2307_v50 = vrot.slane %v2207_v51, 7  ;;  %v2310_v42 = vrot.slane %v2208_v31, 7  ;;  %v582_v6 = vrot.slane %v581_v26, 4  ;;  %v1271_v8 = vmax.bf16 %v1121_v56, %v1008_v46 }
  0x7a   : > { %v577_v28 = vsel %vm9285_vm2, %v572_v12, %v576_v24  ;;  %v1410_v63 = vrot.slane %v564_v32, 6  ;;  %v1413_v25 = vrot.slane %v578_v16, 5  ;;  %v1414_v48 = vrot.slane %v574_v54, 6  ;;  %v368_v12 = vld [vmem:[#allocation2 + $0x7c] sm:$0x8] }
  0x7b   : > { %v2308_v52 = vsel %vm9848_vm14, %v8306_v17, %v2307_v50  ;;  %v2309_v1 = vrot.slane %v2307_v50, 4  ;;  %v1009_v58 = vmax.bf16 %v577_v28, %v9785_v59  ;;  %v1010_v34 = vmax.bf16 %v582_v6, %v367_v2 }
  0x7c   : > { %3044 = vst [vmem:[#allocation2 + $0x30] sm:$0xf] %v2308_v52  ;;  %v1411_v43 = vor.u32 %v1410_v63, %v1409_v37  ;;  %v1419_v62 = vshll.u32 %v1321_v22, 16  ;;  %v1837_v56 = vrot.slane %v1744_v27, 6  ;;  %v1415_v36 = vor.u32 %v1414_v48, %v1413_v25 }
  0x7d   : > { %v2311_v24 = vsel %vm9848_vm14, %v2309_v1, %v2310_v42  ;;  %v1272_v19 = vmax.bf16 %v1124_v40, %v1009_v58  ;;  %v1273_v32 = vmax.bf16 %v1125_v61, %v1010_v34  ;;  %v1839_v51 = vrot.slane %v9787_v55, 6  ;;  %v9884_v42 = vld [vmem:[#allocation2 + $0x84] sm:$0xf] }
  0x7e   : > { %v8338_v44 = vcombine.low %v2308_v52, %v2311_v24  ;;  %3045 = vst [vmem:[#allocation2 + $0x34] sm:$0xf] %v2311_v24  ;;  %v1412_v14 = vrot.slane %v1411_v43, 4  ;;  %v1421_v59 = vrot.slane %v1419_v62, 6  ;;  %v1694_v11 = vmax.bf16 %v1411_v43, %v1271_v8 }
  0x7f   : > { %v1838_v7 = vrot.slane %v1837_v56, 4  ;;  %v1842_v16 = vrot.slane %v1321_v22, 6  ;;  %v1417_v31 = vrot.slane %v1415_v36, 4  ;;  %v2065_v26 = vmax.bf16 %v9800_v18, %v9783_v10  ;;  %v369_v22 = vld [vmem:[#allocation2 + $0x80] sm:$0xf] }
  0x80   : > { %8815 = vmatprep.mubr.bf16.mxu1 %v8338_v44  ;;  %v1416_v54 = vsel %vm9593_vm8, %v1412_v14, %v1415_v36  ;;  %v2066_v2 = vmax.bf16 %v9802_v33, %v9793_v49  ;;  %v1841_v61 = vrot.slane %v1839_v51, 4  ;;  %v9876_v55 = vmax.bf16 %v1837_v56, %v1694_v11 }
  0x81   : > { %v1695_v46 = vmax.bf16 %v1416_v54, %v1272_v19  ;;  %v1840_v40 = vsel %vm9738_vm11, %v1838_v7, %v1839_v51  ;;  %v1422_v17 = vsel %vm9593_vm8, %v1417_v31, %v1421_v59  ;;  %v2067_v50 = vmax.bf16 %v9812_v9, %v9798_v20 }
  0x82   : > { %v2113_v10 = vmax.bf16 %v2065_v26, %v9814_v45  ;;  %v2114_v49 = vmax.bf16 %v2066_v2, %v9816_v35  ;;  %v1696_v6 = vmax.bf16 %v1422_v17, %v1273_v32  ;;  %v1843_v47 = vsel %vm9738_vm11, %v1841_v61, %v1842_v16  ;;  %v370_v26 = vld [vmem:[#allocation2 + $0x84] sm:$0x7]  ;;  %v1322_v17 = vld [vmem:[#allocation2 + $0x88] sm:$0x1] }
  0x83   : > { %v9888_v53 = vmax.bf16 %v1840_v40, %v1695_v46  ;;  %v584_v28 = vshrl.u32 %v368_v12, 16  ;;  %v2115_v8 = vmax.bf16 %v2067_v50, %v9818_v21  ;;  %v589_v20 = vshll.u32 %v369_v22, 16 }
  0x84   : > { %v2161_v37 = vmax.bf16 %v2113_v10, %v9820_v3  ;;  %v2162_v63 = vmax.bf16 %v2114_v49, %v9822_v30  ;;  %v9893_v27 = vmax.bf16 %v1843_v47, %v1696_v6  ;;  %v593_v52 = vshrl.u32 %v369_v22, 16  ;;  %v1745_v47 = vld [vmem:[#allocation2 + $0x80] sm:$0xe] }
  0x85   : > { %v599_v1 = vshll.u32 %v9884_v42, 16  ;;  %v603_v58 = vshrl.u32 %v9884_v42, 16  ;;  %v2163_v34 = vmax.bf16 %v2115_v8, %v9824_v57  ;;  %v591_v48 = vrot.slane %v589_v20, 5  ;;  %v10433_v39 = vld [vmem:[#allocation2 + $0x34] sm:$0x7] }
  0x86   : > { %v2209_v43 = vmax.bf16 %v2161_v37, %v9876_v55  ;;  %v2210_v25 = vmax.bf16 %v2162_v63, %v9888_v53  ;;  %v595_v62 = vrot.slane %v593_v52, 4  ;;  %v1126_v32 = vrot.slane %v369_v22, 5 }
  0x87   : > { %v601_v24 = vrot.slane %v599_v1, 5  ;;  %v605_v19 = vrot.slane %v603_v58, 4  ;;  %v2211_v56 = vmax.bf16 %v2163_v34, %v9893_v27  ;;  %v592_v36 = vsel %vm9285_vm2, %v584_v28, %v591_v48 }
  0x88   : > { %v8307_v44 = vrot.slane %v2209_v43, 11  ;;  %v2314_v14 = vrot.slane %v2210_v25, 7  ;;  %v596_v59 = vor.u32 %v595_v62, %v591_v48  ;;  %v1011_v7 = vmax.bf16 %v592_v36, %v368_v12 }
  0x89   : > { %v606_v11 = vor.u32 %v605_v19, %v601_v24  ;;  %v1127_v51 = vrot.slane %v1126_v32, 4  ;;  %v2317_v31 = vrot.slane %v2211_v56, 7  ;;  %v1128_v2 = vrot.slane %v9884_v42, 5 }
  0x8a   : > { %v2315_v16 = vsel %vm9848_vm14, %v8307_v44, %v2314_v14  ;;  %v2316_v54 = vrot.slane %v2314_v14, 4  ;;  %v597_v46 = vrot.slane %v596_v59, 4  ;;  %v1274_v61 = vmax.bf16 %v1126_v32, %v1011_v7  ;;  %v371_v7 = vld [vmem:[#allocation2 + $0x90] sm:$0x8] }
  0x8b   : > { %3046 = vst [vmem:[#allocation2 + $0x44] sm:$0xf] %v2315_v16  ;;  %v607_v40 = vrot.slane %v606_v11, 4  ;;  %v1423_v50 = vrot.slane %v593_v52, 5  ;;  %v1129_v12 = vsel %vm9485_vm5, %v1127_v51, %v1128_v2  ;;  %v1130_v49 = vrot.slane %v1128_v2, 4 }
  0x8c   : > { %v2318_v10 = vsel %vm9848_vm14, %v2316_v54, %v2317_v31  ;;  %v1424_v6 = vrot.slane %v589_v20, 6  ;;  %v602_v8 = vsel %vm9285_vm2, %v597_v46, %v601_v24  ;;  %v1427_v63 = vrot.slane %v603_v58, 5  ;;  %v372_v51 = vld [vmem:[#allocation2 + $0x94] sm:$0xf]  ;;  %v9932_v46 = vld [vmem:[#allocation2 + $0x98] sm:$0xf] }
  0x8d   : > { %v8339_v28 = vcombine.low %v2315_v16, %v2318_v10  ;;  %3047 = vst [vmem:[#allocation2 + $0x48] sm:$0xf] %v2318_v10  ;;  %v1013_v37 = vmax.bf16 %v607_v40, %v370_v26  ;;  %v1012_v34 = vmax.bf16 %v602_v8, %v369_v22  ;;  %v1428_v25 = vrot.slane %v599_v1, 6 }
  0x8e   : > { %v1425_v43 = vor.u32 %v1424_v6, %v1423_v50  ;;  %v1433_v52 = vshll.u32 %v1322_v17, 16  ;;  %v1844_v62 = vrot.slane %v1745_v47, 6  ;;  %v1846_v19 = vrot.slane %v9884_v42, 6 }
  0x8f   : > { %8816 = vmatmul.mubr.bf16.vlgmr.msra.gmra.mrb[0].mxu1 %v8339_v28  ;;  %v1276_v48 = vmax.bf16 %v1130_v49, %v1013_v37  ;;  %v1849_v32 = vrot.slane %v1322_v17, 6  ;;  %v1275_v56 = vmax.bf16 %v1129_v12, %v1012_v34  ;;  %v1429_v44 = vor.u32 %v1428_v25, %v1427_v63 }
  0x90   : > { %v1426_v20 = vrot.slane %v1425_v43, 4  ;;  %v1435_v14 = vrot.slane %v1433_v52, 6  ;;  %v1697_v36 = vmax.bf16 %v1425_v43, %v1274_v61  ;;  %v1845_v59 = vrot.slane %v1844_v62, 4 }
  0x91   : > { %v1848_v11 = vrot.slane %v1846_v19, 4  ;;  %v2068_v58 = vmax.bf16 %v9814_v45, %v9800_v18  ;;  %v1431_v1 = vrot.slane %v1429_v44, 4  ;;  %v2069_v24 = vmax.bf16 %v9816_v35, %v9802_v33 }
  0x92   : > { %v1430_v22 = vsel %vm9593_vm8, %v1426_v20, %v1429_v44  ;;  %v2070_v42 = vmax.bf16 %v9818_v21, %v9812_v9  ;;  %v1847_v54 = vsel %vm9738_vm11, %v1845_v59, %v1846_v19  ;;  %v9925_v18 = vmax.bf16 %v1844_v62, %v1697_v36 }
  0x93   : > { %v1698_v16 = vmax.bf16 %v1430_v22, %v1275_v56  ;;  %v1850_v31 = vsel %vm9738_vm11, %v1848_v11, %v1849_v32  ;;  %v1436_v26 = vsel %vm9593_vm8, %v1431_v1, %v1435_v14  ;;  %v2116_v2 = vmax.bf16 %v2068_v58, %v9820_v3  ;;  %v1323_v58 = vld [vmem:[#allocation2 + $0x9c] sm:$0x1] }
  0x94   : > { %v2117_v33 = vmax.bf16 %v2069_v24, %v9822_v30  ;;  %v2118_v9 = vmax.bf16 %v2070_v42, %v9824_v57  ;;  %v1699_v40 = vmax.bf16 %v1436_v26, %v1276_v48  ;;  %v609_v17 = vshrl.u32 %v371_v7, 16  ;;  %v373_v24 = vld [vmem:[#allocation2 + $0x98] sm:$0x7] }
  0x95   : > { %v9934_v61 = vmax.bf16 %v1847_v54, %v1698_v16  ;;  %v614_v50 = vshll.u32 %v372_v51, 16  ;;  %v2164_v10 = vmax.bf16 %v2116_v2, %v9876_v55  ;;  %v618_v6 = vshrl.u32 %v372_v51, 16  ;;  %v9112_v54 = vld [vmem:[%s13086_s1] sm:$0xff]  }
  0x96   : > { %v2165_v12 = vmax.bf16 %v2117_v33, %v9888_v53  ;;  %v2166_v49 = vmax.bf16 %v2118_v9, %v9893_v27  ;;  %v9939_v47 = vmax.bf16 %v1850_v31, %v1699_v40  ;;  %v624_v8 = vshll.u32 %v9932_v46, 16  ;;  %v1746_v33 = vld [vmem:[#allocation2 + $0x94] sm:$0xe]  ;;  %8847 = vmatprep.subr.bf16.mxu1 %v9112_v54 }
  0x97   : > { %v616_v28 = vrot.slane %v614_v50, 5  ;;  %v628_v37 = vshrl.u32 %v9932_v46, 16  ;;  %v2212_v63 = vmax.bf16 %v2164_v10, %v9925_v18  ;;  %v620_v43 = vrot.slane %v618_v6, 4  ;;  %8848 = vmatpush3.bf16.msra.mxu1 %v9112_v54 }
  0x98   : > { %v2213_v34 = vmax.bf16 %v2165_v12, %v9934_v61  ;;  %v1131_v25 = vrot.slane %v372_v51, 5  ;;  %v2214_v52 = vmax.bf16 %v2166_v49, %v9939_v47  ;;  %v626_v62 = vrot.slane %v624_v8, 5 }
  0x99   : > { %v617_v48 = vsel %vm9285_vm2, %v609_v17, %v616_v28  ;;  %v630_v19 = vrot.slane %v628_v37, 4  ;;  %v8308_v32 = vrot.slane %v2212_v63, 11  ;;  %v621_v20 = vor.u32 %v620_v43, %v616_v28 }
  0x9a   : > { %v2321_v56 = vrot.slane %v2213_v34, 7  ;;  %v1014_v44 = vmax.bf16 %v617_v48, %v371_v7  ;;  %v2324_v14 = vrot.slane %v2214_v52, 7  ;;  %v1132_v59 = vrot.slane %v1131_v25, 4 }
  0x9b   : > { %v631_v36 = vor.u32 %v630_v19, %v626_v62  ;;  %v1133_v11 = vrot.slane %v9932_v46, 5  ;;  %v622_v42 = vrot.slane %v621_v20, 4  ;;  %v1437_v2 = vrot.slane %v618_v6, 5 }
  0x9c   : > { %v2322_v22 = vsel %vm9848_vm14, %v8308_v32, %v2321_v56  ;;  %v2323_v1 = vrot.slane %v2321_v56, 4  ;;  %v1277_v16 = vmax.bf16 %v1131_v25, %v1014_v44  ;;  %v1438_v17 = vrot.slane %v614_v50, 6 }
  0x9d   : > { %3048 = vst [vmem:[#allocation2 + $0x58] sm:$0xf] %v2322_v22  ;;  %v632_v31 = vrot.slane %v631_v36, 4  ;;  %v1134_v7 = vsel %vm9485_vm5, %v1132_v59, %v1133_v11  ;;  %v1135_v26 = vrot.slane %v1133_v11, 4  ;;  %v627_v40 = vsel %vm9285_vm2, %v622_v42, %v626_v62 }
  0x9e   : > { %v2325_v9 = vsel %vm9848_vm14, %v2323_v1, %v2324_v14  ;;  %v1441_v10 = vrot.slane %v628_v37, 5  ;;  %v1015_v49 = vmax.bf16 %v627_v40, %v372_v51  ;;  %v1442_v63 = vrot.slane %v624_v8, 6  ;;  %v374_v14 = vld [vmem:[#allocation2 + $0xa4] sm:$0x8] }
  0x9f   : > { %v8340_v12 = vcombine.low %v2322_v22, %v2325_v9  ;;  %3049 = vst [vmem:[#allocation2 + $0x5c] sm:$0xf] %v2325_v9  ;;  %v1016_v28 = vmax.bf16 %v632_v31, %v373_v24  ;;  %v1439_v34 = vor.u32 %v1438_v17, %v1437_v2  ;;  %v1447_v43 = vshll.u32 %v1323_v58, 16  ;;  %v9978_v24 = vld [vmem:[#allocation2 + $0xac] sm:$0xf] }
  0xa0   : > { %v1851_v25 = vrot.slane %v1746_v33, 6  ;;  %v1853_v6 = vrot.slane %v9932_v46, 6  ;;  %v1278_v52 = vmax.bf16 %v1134_v7, %v1015_v49  ;;  %v1443_v19 = vor.u32 %v1442_v63, %v1441_v10 }
  0xa1   : > { %8819 = vmatprep.mubr.bf16.mxu1 %v8340_v12  ;;  %v1279_v48 = vmax.bf16 %v1135_v26, %v1016_v28  ;;  %v1856_v32 = vrot.slane %v1323_v58, 6  ;;  %v1440_v62 = vrot.slane %v1439_v34, 4  ;;  %v1449_v50 = vrot.slane %v1447_v43, 6  ;;  %v375_v58 = vld [vmem:[#allocation2 + $0xa8] sm:$0xf] }
  0xa2   : > { %v1700_v37 = vmax.bf16 %v1439_v34, %v1277_v16  ;;  %v1852_v56 = vrot.slane %v1851_v25, 4  ;;  %v1445_v20 = vrot.slane %v1443_v19, 4  ;;  %v1855_v44 = vrot.slane %v1853_v6, 4 }
  0xa3   : > { %v2071_v51 = vmax.bf16 %v9820_v3, %v9814_v45  ;;  %v2072_v8 = vmax.bf16 %v9822_v30, %v9816_v35  ;;  %v1444_v46 = vsel %vm9593_vm8, %v1440_v62, %v1443_v19  ;;  %v2073_v11 = vmax.bf16 %v9824_v57, %v9818_v21 }
  0xa4   : > { %v1854_v36 = vsel %vm9738_vm11, %v1852_v56, %v1853_v6  ;;  %v9969_v59 = vmax.bf16 %v1851_v25, %v1700_v37  ;;  %v1450_v22 = vsel %vm9593_vm8, %v1445_v20, %v1449_v50  ;;  %v1701_v45 = vmax.bf16 %v1444_v46, %v1278_v52 }
  0xa5   : > { %v1857_v35 = vsel %vm9738_vm11, %v1855_v44, %v1856_v32  ;;  %v2119_v1 = vmax.bf16 %v2071_v51, %v9876_v55  ;;  %v1702_v42 = vmax.bf16 %v1450_v22, %v1279_v48  ;;  %v2120_v16 = vmax.bf16 %v2072_v8, %v9888_v53  ;;  %v1324_v22 = vld [vmem:[#allocation2 + $0xb0] sm:$0x1] }
  0xa6   : > { %v2121_v54 = vmax.bf16 %v2073_v11, %v9893_v27  ;;  %v634_v31 = vshrl.u32 %v374_v14, 16  ;;  %v9982_v7 = vmax.bf16 %v1854_v36, %v1701_v45  ;;  %v639_v26 = vshll.u32 %v375_v58, 16  ;;  %v376_v36 = vld [vmem:[#allocation2 + $0xac] sm:$0x7] }
  0xa7   : > { %v2167_v21 = vmax.bf16 %v2119_v1, %v9925_v18  ;;  %v643_v2 = vshrl.u32 %v375_v58, 16  ;;  %v9985_v33 = vmax.bf16 %v1857_v35, %v1702_v42  ;;  %v2168_v9 = vmax.bf16 %v2120_v16, %v9934_v61  ;;  %v1747_v16 = vld [vmem:[#allocation2 + $0xa8] sm:$0xe] }
  0xa8   : > { %v2169_v40 = vmax.bf16 %v2121_v54, %v9939_v47  ;;  %v649_v17 = vshll.u32 %v9978_v24, 16  ;;  %v641_v12 = vrot.slane %v639_v26, 5  ;;  %v653_v28 = vshrl.u32 %v9978_v24, 16 }
  0xa9   : > { %v2215_v10 = vmax.bf16 %v2167_v21, %v9969_v59  ;;  %v645_v49 = vrot.slane %v643_v2, 4  ;;  %v2216_v63 = vmax.bf16 %v2168_v9, %v9982_v7  ;;  %v1136_v25 = vrot.slane %v375_v58, 5 }
  0xaa   : > { %v2217_v34 = vmax.bf16 %v2169_v40, %v9985_v33  ;;  %v651_v43 = vrot.slane %v649_v17, 5  ;;  %v642_v52 = vsel %vm9285_vm2, %v634_v31, %v641_v12  ;;  %v655_v19 = vrot.slane %v653_v28, 4 }
  0xab   : > { %v8309_v6 = vrot.slane %v2215_v10, 11  ;;  %v646_v48 = vor.u32 %v645_v49, %v641_v12  ;;  %v2328_v32 = vrot.slane %v2216_v63, 7  ;;  %v1017_v50 = vmax.bf16 %v642_v52, %v374_v14 }
  0xac   : > { %v2331_v62 = vrot.slane %v2217_v34, 7  ;;  %v1137_v37 = vrot.slane %v1136_v25, 4  ;;  %v656_v20 = vor.u32 %v655_v19, %v651_v43  ;;  %v1138_v44 = vrot.slane %v9978_v24, 5 }
  0xad   : > { %v647_v56 = vrot.slane %v646_v48, 4  ;;  %v1451_v51 = vrot.slane %v643_v2, 5  ;;  %v2329_v8 = vsel %vm9848_vm14, %v8309_v6, %v2328_v32  ;;  %v2330_v46 = vrot.slane %v2328_v32, 4  ;;  %v377_v32 = vld [vmem:[#allocation2 + $0xb8] sm:$0x8] }
  0xae   : > { %v1280_v11 = vmax.bf16 %v1136_v25, %v1017_v50  ;;  %v1452_v45 = vrot.slane %v639_v26, 6  ;;  %3050 = vst [vmem:[#allocation2 + $0x6c] sm:$0xf] %v2329_v8  ;;  %v657_v1 = vrot.slane %v656_v20, 4  ;;  %v1139_v14 = vsel %vm9485_vm5, %v1137_v37, %v1138_v44 }
  0xaf   : > { %v652_v35 = vsel %vm9285_vm2, %v647_v56, %v651_v43  ;;  %v1140_v42 = vrot.slane %v1138_v44, 4  ;;  %v2332_v54 = vsel %vm9848_vm14, %v2330_v46, %v2331_v62  ;;  %v1455_v2 = vrot.slane %v653_v28, 5 }
  0xb0   : > { %v1018_v31 = vmax.bf16 %v652_v35, %v375_v58  ;;  %v1453_v21 = vor.u32 %v1452_v45, %v1451_v51  ;;  %v8341_v9 = vcombine.low %v2329_v8, %v2332_v54  ;;  %3051 = vst [vmem:[#allocation2 + $0x70] sm:$0xf] %v2332_v54  ;;  %v1019_v40 = vmax.bf16 %v657_v1, %v376_v36  ;;  %v378_v51 = vld [vmem:[#allocation2 + $0xbc] sm:$0xf] }
  0xb1   : > { %v1456_v26 = vrot.slane %v649_v17, 6  ;;  %v1461_v10 = vshll.u32 %v1324_v22, 16  ;;  %v1858_v34 = vrot.slane %v1747_v16, 6  ;;  %v1860_v52 = vrot.slane %v9978_v24, 6 }
  0xb2   : > { %v1281_v12 = vmax.bf16 %v1139_v14, %v1018_v31  ;;  %v1454_v49 = vrot.slane %v1453_v21, 4  ;;  %v1703_v63 = vmax.bf16 %v1453_v21, %v1280_v11  ;;  %8820 = vmatmul.mubr.bf16.gmra.mrb[4].mxu1 %v8341_v9  ;;  %v1282_v43 = vmax.bf16 %v1140_v42, %v1019_v40 }
  0xb3   : > { %v1457_v25 = vor.u32 %v1456_v26, %v1455_v2  ;;  %v1463_v6 = vrot.slane %v1461_v10, 6  ;;  %v1859_v48 = vrot.slane %v1858_v34, 4  ;;  %v1863_v19 = vrot.slane %v1324_v22, 6 }
  0xb4   : > { %v10006_v58 = vmax.bf16 %v1858_v34, %v1703_v63  ;;  %v2074_v28 = vmax.bf16 %v9876_v55, %v9820_v3  ;;  %v1862_v50 = vrot.slane %v1860_v52, 4  ;;  %v2075_v37 = vmax.bf16 %v9888_v53, %v9822_v30  ;;  %v10019_v3 = vld [vmem:[#allocation2 + $0xc0] sm:$0xf] }
  0xb5   : > { %v1458_v17 = vsel %vm9593_vm8, %v1454_v49, %v1457_v25  ;;  %v1459_v62 = vrot.slane %v1457_v25, 4  ;;  %v1861_v24 = vsel %vm9738_vm11, %v1859_v48, %v1860_v52  ;;  %v2076_v20 = vmax.bf16 %v9893_v27, %v9824_v57 }
  0xb6   : > { %v1704_v56 = vmax.bf16 %v1458_v17, %v1281_v12  ;;  %v2122_v44 = vmax.bf16 %v2074_v28, %v9925_v18  ;;  %v1864_v46 = vsel %vm9738_vm11, %v1862_v50, %v1863_v19  ;;  %v2123_v30 = vmax.bf16 %v2075_v37, %v9934_v61  ;;  %v379_v50 = vld [vmem:[#allocation2 + $0xc0] sm:$0x7] }
  0xb7   : > { %v1464_v8 = vsel %vm9593_vm8, %v1459_v62, %v1463_v6  ;;  %v659_v36 = vshrl.u32 %v377_v32, 16  ;;  %v2124_v45 = vmax.bf16 %v2076_v20, %v9939_v47  ;;  %v664_v1 = vshll.u32 %v378_v51, 16 }
  0xb8   : > { %v1705_v11 = vmax.bf16 %v1464_v8, %v1282_v43  ;;  %v10026_v22 = vmax.bf16 %v1861_v24, %v1704_v56  ;;  %v2170_v57 = vmax.bf16 %v2122_v44, %v9969_v59  ;;  %v2171_v35 = vmax.bf16 %v2123_v30, %v9982_v7  ;;  %v1325_v8 = vld [vmem:[#allocation2 + $0xc4] sm:$0x1]  ;;  %v1748_v30 = vld [vmem:[#allocation2 + $0xbc] sm:$0xe] }
  0xb9   : > { %v668_v14 = vshrl.u32 %v378_v51, 16  ;;  %v674_v42 = vshll.u32 %v10019_v3, 16  ;;  %v2172_v54 = vmax.bf16 %v2124_v45, %v9985_v33  ;;  %v678_v21 = vshrl.u32 %v10019_v3, 16 }
  0xba   : > { %v10032_v16 = vmax.bf16 %v1864_v46, %v1705_v11  ;;  %v2218_v31 = vmax.bf16 %v2170_v57, %v10006_v58  ;;  %v2219_v2 = vmax.bf16 %v2171_v35, %v10026_v22  ;;  %v666_v9 = vrot.slane %v664_v1, 5 }
  0xbb   : > { %v670_v40 = vrot.slane %v668_v14, 4  ;;  %v676_v26 = vrot.slane %v674_v42, 5  ;;  %v680_v49 = vrot.slane %v678_v21, 4  ;;  %v1141_v63 = vrot.slane %v378_v51, 5 }
  0xbc   : > { %v2220_v10 = vmax.bf16 %v2172_v54, %v10032_v16  ;;  %v8310_v12 = vrot.slane %v2218_v31, 11  ;;  %v2335_v34 = vrot.slane %v2219_v2, 7  ;;  %v667_v43 = vsel %vm9285_vm2, %v659_v36, %v666_v9 }
  0xbd   : > { %v671_v25 = vor.u32 %v670_v40, %v666_v9  ;;  %v1143_v6 = vrot.slane %v10019_v3, 5  ;;  %v681_v48 = vor.u32 %v680_v49, %v676_v26  ;;  %v1020_v19 = vmax.bf16 %v667_v43, %v377_v32 }
  0xbe   : > { %v2338_v52 = vrot.slane %v2220_v10, 7  ;;  %v1142_v28 = vrot.slane %v1141_v63, 4  ;;  %v2336_v17 = vsel %vm9848_vm14, %v8310_v12, %v2335_v34  ;;  %v2337_v62 = vrot.slane %v2335_v34, 4 }
  0xbf   : > { %v672_v37 = vrot.slane %v671_v25, 4  ;;  %v1145_v56 = vrot.slane %v1143_v6, 4  ;;  %3052 = vst [vmem:[#allocation2 + $0x80] sm:$0xf] %v2336_v17  ;;  %v682_v24 = vrot.slane %v681_v48, 4  ;;  %v1283_v44 = vmax.bf16 %v1141_v63, %v1020_v19 }
  0xc0   : > { %v1144_v20 = vsel %vm9485_vm5, %v1142_v28, %v1143_v6  ;;  %v1465_v46 = vrot.slane %v668_v14, 5  ;;  %v2339_v32 = vsel %vm9848_vm14, %v2337_v62, %v2338_v52  ;;  %v1466_v11 = vrot.slane %v664_v1, 6  ;;  %v380_v6 = vld [vmem:[#allocation2 + $0xcc] sm:$0x8]  ;;  %v381_v28 = vld [vmem:[#allocation2 + $0xd0] sm:$0xf] }
  0xc1   : > { %v677_v36 = vsel %vm9285_vm2, %v672_v37, %v676_v26  ;;  %v1469_v45 = vrot.slane %v678_v21, 5  ;;  %v8342_v57 = vcombine.low %v2336_v17, %v2339_v32  ;;  %3053 = vst [vmem:[#allocation2 + $0x84] sm:$0xf] %v2339_v32  ;;  %v1022_v54 = vmax.bf16 %v682_v24, %v379_v50  ;;  %v10068_v50 = vld [vmem:[#allocation2 + $0xd4] sm:$0xf] }
  0xc2   : > { %v1021_v35 = vmax.bf16 %v677_v36, %v378_v51  ;;  %v1470_v31 = vrot.slane %v674_v42, 6  ;;  %v1467_v2 = vor.u32 %v1466_v11, %v1465_v46  ;;  %v1475_v9 = vshll.u32 %v1325_v8, 16 }
  0xc3   : > { %v1865_v40 = vrot.slane %v1748_v30, 6  ;;  %v1867_v10 = vrot.slane %v10019_v3, 6  ;;  %8823 = vmatprep.mubr.bf16.mxu1 %v8342_v57  ;;  %v1285_v12 = vmax.bf16 %v1145_v56, %v1022_v54  ;;  %v1870_v63 = vrot.slane %v1325_v8, 6 }
  0xc4   : > { %v1284_v14 = vmax.bf16 %v1144_v20, %v1021_v35  ;;  %v1471_v49 = vor.u32 %v1470_v31, %v1469_v45  ;;  %v1468_v34 = vrot.slane %v1467_v2, 4  ;;  %v1477_v43 = vrot.slane %v1475_v9, 6 }
  0xc5   : > { %v1706_v26 = vmax.bf16 %v1467_v2, %v1283_v44  ;;  %v1866_v1 = vrot.slane %v1865_v40, 4  ;;  %v1869_v25 = vrot.slane %v1867_v10, 4  ;;  %v2077_v51 = vmax.bf16 %v9925_v18, %v9876_v55 }
  0xc6   : > { %v1473_v21 = vrot.slane %v1471_v49, 4  ;;  %v2078_v42 = vmax.bf16 %v9934_v61, %v9888_v53  ;;  %v1472_v3 = vsel %vm9593_vm8, %v1468_v34, %v1471_v49  ;;  %v2079_v19 = vmax.bf16 %v9939_v47, %v9893_v27 }
  0xc7   : > { %v1868_v52 = vsel %vm9738_vm11, %v1866_v1, %v1867_v10  ;;  %v10059_v48 = vmax.bf16 %v1865_v40, %v1706_v26  ;;  %v1707_v55 = vmax.bf16 %v1472_v3, %v1284_v14  ;;  %v1871_v53 = vsel %vm9738_vm11, %v1869_v25, %v1870_v63  ;;  %v10087_v63 = vld [vmem:[%s9204_s26 + $0x60] sm:$0xf] }
  0xc8   : > { %v1478_v17 = vsel %vm9593_vm8, %v1473_v21, %v1477_v43  ;;  %v2125_v62 = vmax.bf16 %v2077_v51, %v9969_v59  ;;  %v2126_v56 = vmax.bf16 %v2078_v42, %v9982_v7  ;;  %v2127_v24 = vmax.bf16 %v2079_v19, %v9985_v33  ;;  %13253 = vst [vmem:[#allocation27_spill] sm:$0xff] %v10087_v63  ;;  %v382_v19 = vld [vmem:[#allocation2 + $0xd4] sm:$0x7] }
  0xc9   : > { %v1708_v37 = vmax.bf16 %v1478_v17, %v1285_v12  ;;  %v684_v20 = vshrl.u32 %v380_v6, 16  ;;  %v10072_v44 = vmax.bf16 %v1868_v52, %v1707_v55  ;;  %v689_v8 = vshll.u32 %v381_v28, 16  ;;  %342 = vst [vmem:[#allocation2 + $0x120] sm:$0xf] %v10087_v63  ;;  %v1326_v55 = vld [vmem:[#allocation2 + $0xd8] sm:$0x1] }
  0xca   : > { %v2173_v27 = vmax.bf16 %v2125_v62, %v10006_v58  ;;  %v693_v46 = vshrl.u32 %v381_v28, 16  ;;  %v2174_v32 = vmax.bf16 %v2126_v56, %v10026_v22  ;;  %v2175_v36 = vmax.bf16 %v2127_v24, %v10032_v16  ;;  %v1749_v24 = vld [vmem:[#allocation2 + $0xd0] sm:$0xe] }
  0xcb   : > { %v10075_v30 = vmax.bf16 %v1871_v53, %v1708_v37  ;;  %v699_v11 = vshll.u32 %v10068_v50, 16  ;;  %v691_v57 = vrot.slane %v689_v8, 5  ;;  %v703_v54 = vshrl.u32 %v10068_v50, 16 }
  0xcc   : > { %v2221_v45 = vmax.bf16 %v2173_v27, %v10059_v48  ;;  %v695_v35 = vrot.slane %v693_v46, 4  ;;  %v2222_v31 = vmax.bf16 %v2174_v32, %v10072_v44  ;;  %v1146_v40 = vrot.slane %v381_v28, 5 }
  0xcd   : > { %v2223_v2 = vmax.bf16 %v2175_v36, %v10075_v30  ;;  %v701_v9 = vrot.slane %v699_v11, 5  ;;  %v692_v14 = vsel %vm9285_vm2, %v684_v20, %v691_v57  ;;  %v705_v49 = vrot.slane %v703_v54, 4  ;;  %v10098_v20 = vld [vmem:[%s9204_s26 + $0x64] sm:$0xf] }
  0xce   : > { %v8311_v10 = vrot.slane %v2221_v45, 11  ;;  %v696_v12 = vor.u32 %v695_v35, %v691_v57  ;;  %v2342_v34 = vrot.slane %v2222_v31, 7  ;;  %v1023_v26 = vmax.bf16 %v692_v14, %v380_v6  ;;  %13254 = vst [vmem:[#allocation28_spill] sm:$0xff] %v10098_v20  ;;  %343 = vst [vmem:[#allocation2 + $0x124] sm:$0xf] %v10098_v20 }
  0xcf   : > { %v2345_v43 = vrot.slane %v2223_v2, 7  ;;  %v1147_v1 = vrot.slane %v1146_v40, 4  ;;  %v706_v25 = vor.u32 %v705_v49, %v701_v9  ;;  %v1148_v51 = vrot.slane %v10068_v50, 5  ;;  %v10419_v20 = vld [vmem:[#allocation2 + $0xc] sm:$0x7] }
  0xd0   : > { %v697_v21 = vrot.slane %v696_v12, 4  ;;  %v1479_v42 = vrot.slane %v693_v46, 5  ;;  %v2343_v3 = vsel %vm9848_vm14, %v8311_v10, %v2342_v34  ;;  %v2344_v52 = vrot.slane %v2342_v34, 4 }
  0xd1   : > { %v1286_v17 = vmax.bf16 %v1146_v40, %v1023_v26  ;;  %v1480_v53 = vrot.slane %v689_v8, 6  ;;  %3054 = vst [vmem:[#allocation2 + $0x94] sm:$0xf] %v2343_v3  ;;  %v707_v62 = vrot.slane %v706_v25, 4  ;;  %v1149_v37 = vsel %vm9485_vm5, %v1147_v1, %v1148_v51  ;;  %v383_v26 = vld [vmem:[#allocation2 + $0xe0] sm:$0x8] }
  0xd2   : > { %v702_v6 = vsel %vm9285_vm2, %v697_v21, %v701_v9  ;;  %v1150_v56 = vrot.slane %v1148_v51, 4  ;;  %v2346_v27 = vsel %vm9848_vm14, %v2344_v52, %v2345_v43  ;;  %v1483_v36 = vrot.slane %v703_v54, 5  ;;  %v384_v52 = vld [vmem:[#allocation2 + $0xe4] sm:$0xf] }
  0xd3   : > { %v1024_v46 = vmax.bf16 %v702_v6, %v381_v28  ;;  %v1481_v32 = vor.u32 %v1480_v53, %v1479_v42  ;;  %v8343_v8 = vcombine.low %v2343_v3, %v2346_v27  ;;  %3055 = vst [vmem:[#allocation2 + $0x98] sm:$0xf] %v2346_v27  ;;  %v1025_v45 = vmax.bf16 %v707_v62, %v382_v19 }
  0xd4   : > { %v1484_v57 = vrot.slane %v699_v11, 6  ;;  %v1489_v35 = vshll.u32 %v1326_v55, 16  ;;  %v1872_v40 = vrot.slane %v1749_v24, 6  ;;  %v1874_v49 = vrot.slane %v10068_v50, 6 }
  0xd5   : > { %v1287_v31 = vmax.bf16 %v1149_v37, %v1024_v46  ;;  %v1482_v2 = vrot.slane %v1481_v32, 4  ;;  %v1709_v9 = vmax.bf16 %v1481_v32, %v1286_v17  ;;  %8824 = vmatmul.mubr.bf16.gmra.mrb[8].mxu1 %v8343_v8  ;;  %v1288_v10 = vmax.bf16 %v1150_v56, %v1025_v45 }
  0xd6   : > { %v1485_v14 = vor.u32 %v1484_v57, %v1483_v36  ;;  %v1491_v12 = vrot.slane %v1489_v35, 6  ;;  %v1873_v28 = vrot.slane %v1872_v40, 4  ;;  %v1877_v34 = vrot.slane %v1326_v55, 6 }
  0xd7   : > { %v10104_v54 = vmax.bf16 %v1872_v40, %v1709_v9  ;;  %v2080_v43 = vmax.bf16 %v9969_v59, %v9925_v18  ;;  %v1876_v21 = vrot.slane %v1874_v49, 4  ;;  %v2081_v25 = vmax.bf16 %v9982_v7, %v9934_v61  ;;  %v10117_v18 = vld [vmem:[#allocation2 + $0xe8] sm:$0xf] }
  0xd8   : > { %v1486_v11 = vsel %vm9593_vm8, %v1482_v2, %v1485_v14  ;;  %v1487_v1 = vrot.slane %v1485_v14, 4  ;;  %v1875_v50 = vsel %vm9738_vm11, %v1873_v28, %v1874_v49  ;;  %v2082_v42 = vmax.bf16 %v9985_v33, %v9939_v47 }
  0xd9   : > { %v1710_v51 = vmax.bf16 %v1486_v11, %v1287_v31  ;;  %v2128_v3 = vmax.bf16 %v2080_v43, %v10006_v58  ;;  %v1878_v17 = vsel %vm9738_vm11, %v1876_v21, %v1877_v34  ;;  %v2129_v61 = vmax.bf16 %v2081_v25, %v10026_v22  ;;  %v385_v43 = vld [vmem:[#allocation2 + $0xe8] sm:$0x7] }
  0xda   : > { %v1492_v19 = vsel %vm9593_vm8, %v1487_v1, %v1491_v12  ;;  %v709_v55 = vshrl.u32 %v383_v26, 16  ;;  %v2130_v62 = vmax.bf16 %v2082_v42, %v10032_v16  ;;  %v714_v56 = vshll.u32 %v384_v52, 16 }
  0xdb   : > { %v1711_v53 = vmax.bf16 %v1492_v19, %v1288_v10  ;;  %v10124_v6 = vmax.bf16 %v1875_v50, %v1710_v51  ;;  %v2176_v47 = vmax.bf16 %v2128_v3, %v10059_v48  ;;  %v2177_v37 = vmax.bf16 %v2129_v61, %v10072_v44  ;;  %v1327_v3 = vld [vmem:[#allocation2 + $0xec] sm:$0x1]  ;;  %v9113_v19 = vld [vmem:[%s13086_s1 + $0xc0] sm:$0xff]  }
  0xdc   : > { %v718_v24 = vshrl.u32 %v384_v52, 16  ;;  %v724_v27 = vshll.u32 %v10117_v18, 16  ;;  %v2178_v32 = vmax.bf16 %v2130_v62, %v10075_v30  ;;  %v728_v8 = vshrl.u32 %v10117_v18, 16  ;;  %v10148_v62 = vld [vmem:[%s9204_s26 + $0x68] sm:$0xf]  ;;  %8943 = vmatprep.subr.bf16.mxu0 %v9113_v19 }
  0xdd   : > { %13255 = vst [vmem:[#allocation29_spill] sm:$0xff] %v10124_v6  ;;  %v10130_v46 = vmax.bf16 %v1878_v17, %v1711_v53  ;;  %v2224_v36 = vmax.bf16 %v2176_v47, %v10104_v54  ;;  %v2225_v45 = vmax.bf16 %v2177_v37, %v10124_v6  ;;  %v716_v57 = vrot.slane %v714_v56, 5  ;;  %13257 = vst [vmem:[#allocation31_spill] sm:$0xff] %v10148_v62 }
  0xde   : > { %v720_v35 = vrot.slane %v718_v24, 4  ;;  %v726_v31 = vrot.slane %v724_v27, 5  ;;  %v730_v40 = vrot.slane %v728_v8, 4  ;;  %v1151_v10 = vrot.slane %v384_v52, 5  ;;  %344 = vst [vmem:[#allocation2 + $0x134] sm:$0xf] %v10148_v62 }
  0xdf   : > { %13256 = vst [vmem:[#allocation30_spill] sm:$0xff] %v10130_v46  ;;  %v2226_v2 = vmax.bf16 %v2178_v32, %v10130_v46  ;;  %v8312_v9 = vrot.slane %v2224_v36, 11  ;;  %v2349_v14 = vrot.slane %v2225_v45, 7  ;;  %v717_v12 = vsel %vm9285_vm2, %v709_v55, %v716_v57  ;;  %v10401_v62 = vld [vmem:[#allocation2 + $0x5c] sm:$0xf] }
  0xe0   : > { %v721_v49 = vor.u32 %v720_v35, %v716_v57  ;;  %v1153_v28 = vrot.slane %v10117_v18, 5  ;;  %v731_v11 = vor.u32 %v730_v40, %v726_v31  ;;  %v1026_v1 = vmax.bf16 %v717_v12, %v383_v26  ;;  %v1750_v26 = vld [vmem:[#allocation2 + $0xe4] sm:$0xe] }
  0xe1   : > { %v2352_v34 = vrot.slane %v2226_v2, 7  ;;  %v1152_v21 = vrot.slane %v1151_v10, 4  ;;  %v2350_v25 = vsel %vm9848_vm14, %v8312_v9, %v2349_v14  ;;  %v2351_v51 = vrot.slane %v2349_v14, 4  ;;  %v10157_v14 = vld [vmem:[%s9204_s26 + $0x6c] sm:$0xf] }
  0xe2   : > { %v722_v50 = vrot.slane %v721_v49, 4  ;;  %v1155_v42 = vrot.slane %v1153_v28, 4  ;;  %3056 = vst [vmem:[#allocation2 + $0xa8] sm:$0xf] %v2350_v25  ;;  %v732_v17 = vrot.slane %v731_v11, 4  ;;  %v1289_v55 = vmax.bf16 %v1151_v10, %v1026_v1  ;;  %13258 = vst [vmem:[#allocation32_spill] sm:$0xff] %v10157_v14 }
  0xe3   : > { %v1154_v61 = vsel %vm9485_vm5, %v1152_v21, %v1153_v28  ;;  %v1493_v53 = vrot.slane %v718_v24, 5  ;;  %v2353_v47 = vsel %vm9848_vm14, %v2351_v51, %v2352_v34  ;;  %v1494_v32 = vrot.slane %v714_v56, 6  ;;  %345 = vst [vmem:[#allocation2 + $0x138] sm:$0xf] %v10157_v14  ;;  %v386_v1 = vld [vmem:[#allocation2 + $0xf4] sm:$0x8] }
  0xe4   : > { %v727_v37 = vsel %vm9285_vm2, %v722_v50, %v726_v31  ;;  %v1497_v36 = vrot.slane %v728_v8, 5  ;;  %v8344_v45 = vcombine.low %v2350_v25, %v2353_v47  ;;  %3057 = vst [vmem:[#allocation2 + $0xac] sm:$0xf] %v2353_v47  ;;  %v1028_v35 = vmax.bf16 %v732_v17, %v385_v43  ;;  %v10177_v17 = vld [vmem:[#allocation2 + $0xfc] sm:$0xf] }
  0xe5   : > { %v1027_v57 = vmax.bf16 %v727_v37, %v384_v52  ;;  %v1498_v24 = vrot.slane %v724_v27, 6  ;;  %v1495_v2 = vor.u32 %v1494_v32, %v1493_v53  ;;  %v1503_v9 = vshll.u32 %v1327_v3, 16 }
  0xe6   : > { %v1879_v40 = vrot.slane %v1750_v26, 6  ;;  %v1881_v10 = vrot.slane %v10117_v18, 6  ;;  %8827 = vmatprep.mubr.bf16.mxu1 %v8344_v45  ;;  %v1291_v31 = vmax.bf16 %v1155_v42, %v1028_v35  ;;  %v1884_v8 = vrot.slane %v1327_v3, 6  ;;  %v387_v42 = vld [vmem:[#allocation2 + $0xf8] sm:$0xf] }
  0xe7   : > { %v1290_v12 = vmax.bf16 %v1154_v61, %v1027_v57  ;;  %v1499_v56 = vor.u32 %v1498_v24, %v1497_v36  ;;  %v1496_v49 = vrot.slane %v1495_v2, 4  ;;  %v1505_v28 = vrot.slane %v1503_v9, 6 }
  0xe8   : > { %v1712_v34 = vmax.bf16 %v1495_v2, %v1289_v55  ;;  %v1880_v52 = vrot.slane %v1879_v40, 4  ;;  %v1883_v27 = vrot.slane %v1881_v10, 4  ;;  %v2083_v11 = vmax.bf16 %v10006_v58, %v9969_v59 }
  0xe9   : > { %v1501_v43 = vrot.slane %v1499_v56, 4  ;;  %v2084_v18 = vmax.bf16 %v10026_v22, %v9982_v7  ;;  %v1500_v21 = vsel %vm9593_vm8, %v1496_v49, %v1499_v56  ;;  %v2085_v50 = vmax.bf16 %v10032_v16, %v9985_v33 }
  0xea   : > { %v1882_v25 = vsel %vm9738_vm11, %v1880_v52, %v1881_v10  ;;  %v10168_v51 = vmax.bf16 %v1879_v40, %v1712_v34  ;;  %v1713_v59 = vmax.bf16 %v1500_v21, %v1290_v12  ;;  %v1885_v7 = vsel %vm9738_vm11, %v1883_v27, %v1884_v8  ;;  %v9114_v52 = vld [vmem:[%s13086_s1 + $0x8] sm:$0xff]  }
  0xeb   : > { %v1506_v3 = vsel %vm9593_vm8, %v1501_v43, %v1505_v28  ;;  %v2131_v19 = vmax.bf16 %v2083_v11, %v10059_v48  ;;  %v2132_v55 = vmax.bf16 %v2084_v18, %v10072_v44  ;;  %v2133_v53 = vmax.bf16 %v2085_v50, %v10075_v30  ;;  %8849 = vmatprep.subr.bf16.mxu1 %v9114_v52 }
  0xec   : > { %13259 = vst [vmem:[#allocation33_spill] sm:$0xff] %v10168_v51  ;;  %v1714_v61 = vmax.bf16 %v1506_v3, %v1291_v31  ;;  %v734_v26 = vshrl.u32 %v386_v1, 16  ;;  %v10181_v47 = vmax.bf16 %v1882_v25, %v1713_v59  ;;  %v739_v37 = vshll.u32 %v387_v42, 16  ;;  %8850 = vmatpush3.bf16.msra.mxu1 %v9114_v52 }
  0xed   : > { %v2179_v33 = vmax.bf16 %v2131_v19, %v10104_v54  ;;  %v743_v32 = vshrl.u32 %v387_v42, 16  ;;  %v2180_v45 = vmax.bf16 %v2132_v55, %v10124_v6  ;;  %v2181_v57 = vmax.bf16 %v2133_v53, %v10130_v46  ;;  %v388_v19 = vld [vmem:[#allocation2 + $0xfc] sm:$0x7]  ;;  %v1328_v55 = vld [vmem:[#allocation2 + $0x100] sm:$0x1] }
  0xee   : > { %13260 = vst [vmem:[#allocation34_spill] sm:$0xff] %v10181_v47  ;;  %v10184_v36 = vmax.bf16 %v1885_v7, %v1714_v61  ;;  %v749_v35 = vshll.u32 %v10177_v17, 16  ;;  %v741_v2 = vrot.slane %v739_v37, 5  ;;  %v753_v40 = vshrl.u32 %v10177_v17, 16 }
  0xef   : > { %v2227_v24 = vmax.bf16 %v2179_v33, %v10168_v51  ;;  %v745_v9 = vrot.slane %v743_v32, 4  ;;  %v2228_v10 = vmax.bf16 %v2180_v45, %v10181_v47  ;;  %v1156_v56 = vrot.slane %v387_v42, 5 }
  0xf0   : > { %13261 = vst [vmem:[#allocation35_spill] sm:$0xff] %v10184_v36  ;;  %v2229_v12 = vmax.bf16 %v2181_v57, %v10184_v36  ;;  %v751_v31 = vrot.slane %v749_v35, 5  ;;  %v742_v49 = vsel %vm9285_vm2, %v734_v26, %v741_v2  ;;  %v755_v34 = vrot.slane %v753_v40, 4 }
  0xf1   : > { %v8313_v8 = vrot.slane %v2227_v24, 11  ;;  %v746_v28 = vor.u32 %v745_v9, %v741_v2  ;;  %v2356_v43 = vrot.slane %v2228_v10, 7  ;;  %v1029_v11 = vmax.bf16 %v742_v49, %v386_v1 }
  0xf2   : > { %v2359_v27 = vrot.slane %v2229_v12, 7  ;;  %v1157_v18 = vrot.slane %v1156_v56, 4  ;;  %v756_v25 = vor.u32 %v755_v34, %v751_v31  ;;  %v1158_v50 = vrot.slane %v10177_v17, 5 }
  0xf3   : > { %v747_v21 = vrot.slane %v746_v28, 4  ;;  %v1507_v3 = vrot.slane %v743_v32, 5  ;;  %v2357_v59 = vsel %vm9848_vm14, %v8313_v8, %v2356_v43  ;;  %v2358_v7 = vrot.slane %v2356_v43, 4  ;;  %v1751_v32 = vld [vmem:[#allocation2 + $0xf8] sm:$0xe] }
  0xf4   : > { %v1292_v61 = vmax.bf16 %v1156_v56, %v1029_v11  ;;  %v1508_v53 = vrot.slane %v739_v37, 6  ;;  %3058 = vst [vmem:[#allocation2 + $0xbc] sm:$0xf] %v2357_v59  ;;  %v757_v26 = vrot.slane %v756_v25, 4  ;;  %v1159_v33 = vsel %vm9485_vm5, %v1157_v18, %v1158_v50 }
  0xf5   : > { %v752_v1 = vsel %vm9285_vm2, %v747_v21, %v751_v31  ;;  %v1160_v45 = vrot.slane %v1158_v50, 4  ;;  %v2360_v57 = vsel %vm9848_vm14, %v2358_v7, %v2359_v27  ;;  %v1511_v9 = vrot.slane %v753_v40, 5  ;;  %v389_v21 = vld [vmem:[#allocation2 + $0x108] sm:$0x8] }
  0xf6   : > { %v1030_v24 = vmax.bf16 %v752_v1, %v387_v42  ;;  %v1509_v2 = vor.u32 %v1508_v53, %v1507_v3  ;;  %v8345_v10 = vcombine.low %v2357_v59, %v2360_v57  ;;  %3059 = vst [vmem:[#allocation2 + $0xc0] sm:$0xf] %v2360_v57  ;;  %v1031_v37 = vmax.bf16 %v757_v26, %v388_v19 }
  0xf7   : > { %v1512_v12 = vrot.slane %v749_v35, 6  ;;  %v1517_v56 = vshll.u32 %v1328_v55, 16  ;;  %v1886_v28 = vrot.slane %v1751_v32, 6  ;;  %v1888_v11 = vrot.slane %v10177_v17, 6 }
  0xf8   : > { %v1293_v8 = vmax.bf16 %v1159_v33, %v1030_v24  ;;  %v1510_v49 = vrot.slane %v1509_v2, 4  ;;  %v1715_v31 = vmax.bf16 %v1509_v2, %v1292_v61  ;;  %8828 = vmatmul.mubr.bf16.gmra.mrb[12].mxu1 %v8345_v10  ;;  %v1294_v34 = vmax.bf16 %v1160_v45, %v1031_v37  ;;  %v390_v61 = vld [vmem:[#allocation2 + $0x10c] sm:$0xf] }
  0xf9   : > { %v1513_v52 = vor.u32 %v1512_v12, %v1511_v9  ;;  %v1519_v43 = vrot.slane %v1517_v56, 6  ;;  %v1887_v18 = vrot.slane %v1886_v28, 4  ;;  %v1891_v27 = vrot.slane %v1328_v55, 6 }
  0xfa   : > { %v10208_v42 = vmax.bf16 %v1886_v28, %v1715_v31  ;;  %v2086_v40 = vmax.bf16 %v10059_v48, %v10006_v58  ;;  %v1890_v50 = vrot.slane %v1888_v11, 4  ;;  %v2087_v3 = vmax.bf16 %v10072_v44, %v10026_v22  ;;  %v10221_v58 = vld [vmem:[#allocation2 + $0x110] sm:$0xf] }
  0xfb   : > { %v1514_v35 = vsel %vm9593_vm8, %v1510_v49, %v1513_v52  ;;  %v1515_v25 = vrot.slane %v1513_v52, 4  ;;  %v1889_v17 = vsel %vm9738_vm11, %v1887_v18, %v1888_v11  ;;  %v2088_v7 = vmax.bf16 %v10075_v30, %v10032_v16 }
  0xfc   : > { %13262 = vst [vmem:[#allocation36_spill] sm:$0xff] %v10208_v42  ;;  %v1716_v59 = vmax.bf16 %v1514_v35, %v1293_v8  ;;  %v2134_v19 = vmax.bf16 %v2086_v40, %v10104_v54  ;;  %v1892_v53 = vsel %vm9738_vm11, %v1890_v50, %v1891_v27  ;;  %v2135_v22 = vmax.bf16 %v2087_v3, %v10124_v6 }
  0xfd   : > { %v1520_v55 = vsel %vm9593_vm8, %v1515_v25, %v1519_v43  ;;  %v759_v1 = vshrl.u32 %v389_v21, 16  ;;  %v2136_v45 = vmax.bf16 %v2088_v7, %v10130_v46  ;;  %v764_v57 = vshll.u32 %v390_v61, 16  ;;  %v391_v7 = vld [vmem:[#allocation2 + $0x110] sm:$0x7] }
  0xfe   : > { %v1717_v26 = vmax.bf16 %v1520_v55, %v1294_v34  ;;  %v10228_v33 = vmax.bf16 %v1889_v17, %v1716_v59  ;;  %v2182_v16 = vmax.bf16 %v2134_v19, %v10168_v51  ;;  %v2183_v32 = vmax.bf16 %v2135_v22, %v10181_v47 }
  0xff   : > { %v768_v24 = vshrl.u32 %v390_v61, 16  ;;  %v774_v2 = vshll.u32 %v10221_v58, 16  ;;  %v2184_v10 = vmax.bf16 %v2136_v45, %v10184_v36  ;;  %v778_v12 = vshrl.u32 %v10221_v58, 16 }
 0x100   : > { %13263 = vst [vmem:[#allocation37_spill] sm:$0xff] %v10228_v33  ;;  %v10234_v9 = vmax.bf16 %v1892_v53, %v1717_v26  ;;  %v2230_v37 = vmax.bf16 %v2182_v16, %v10208_v42  ;;  %v2231_v56 = vmax.bf16 %v2183_v32, %v10228_v33  ;;  %v766_v8 = vrot.slane %v764_v57, 5  ;;  %v1329_v26 = vld [vmem:[#allocation2 + $0x114] sm:$0x1]  ;;  %v1752_v16 = vld [vmem:[#allocation2 + $0x10c] sm:$0xe] }
 0x101   : > { %v770_v49 = vrot.slane %v768_v24, 4  ;;  %v776_v31 = vrot.slane %v774_v2, 5  ;;  %v780_v52 = vrot.slane %v778_v12, 4  ;;  %v1161_v43 = vrot.slane %v390_v61, 5 }
 0x102   : > { %13264 = vst [vmem:[#allocation38_spill] sm:$0xff] %v10234_v9  ;;  %v2232_v28 = vmax.bf16 %v2184_v10, %v10234_v9  ;;  %v8314_v34 = vrot.slane %v2230_v37, 11  ;;  %v2363_v11 = vrot.slane %v2231_v56, 7  ;;  %v767_v18 = vsel %vm9285_vm2, %v759_v1, %v766_v8 }
 0x103   : > { %v771_v27 = vor.u32 %v770_v49, %v766_v8  ;;  %v1163_v40 = vrot.slane %v10221_v58, 5  ;;  %v781_v25 = vor.u32 %v780_v52, %v776_v31  ;;  %v1032_v50 = vmax.bf16 %v767_v18, %v389_v21 }
 0x104   : > { %v2366_v35 = vrot.slane %v2232_v28, 7  ;;  %v1162_v3 = vrot.slane %v1161_v43, 4  ;;  %v2364_v59 = vsel %vm9848_vm14, %v8314_v34, %v2363_v11  ;;  %v2365_v17 = vrot.slane %v2363_v11, 4 }
 0x105   : > { %v772_v19 = vrot.slane %v771_v27, 4  ;;  %v1165_v55 = vrot.slane %v1163_v40, 4  ;;  %3060 = vst [vmem:[#allocation2 + $0xd0] sm:$0xf] %v2364_v59  ;;  %v782_v53 = vrot.slane %v781_v25, 4  ;;  %v1295_v1 = vmax.bf16 %v1161_v43, %v1032_v50 }
 0x106   : > { %v1164_v22 = vsel %vm9485_vm5, %v1162_v3, %v1163_v40  ;;  %v1521_v45 = vrot.slane %v768_v24, 5  ;;  %v2367_v21 = vsel %vm9848_vm14, %v2365_v17, %v2366_v35  ;;  %v1522_v10 = vrot.slane %v764_v57, 6  ;;  %v10257_v3 = vld [vmem:[#allocation2 + $0x4] sm:$0x8] }
 0x107   : > { %v777_v32 = vsel %vm9285_vm2, %v772_v19, %v776_v31  ;;  %v1525_v37 = vrot.slane %v778_v12, 5  ;;  %v8346_v56 = vcombine.low %v2364_v59, %v2367_v21  ;;  %3061 = vst [vmem:[#allocation2 + $0xd4] sm:$0xf] %v2367_v21  ;;  %v1034_v49 = vmax.bf16 %v782_v53, %v391_v7  ;;  %v10267_v19 = vld [vmem:[#allocation2 + $0x8] sm:$0xf] }
 0x108   : > { %v1033_v8 = vmax.bf16 %v777_v32, %v390_v61  ;;  %v1526_v28 = vrot.slane %v774_v2, 6  ;;  %v1523_v34 = vor.u32 %v1522_v10, %v1521_v45  ;;  %v1531_v52 = vshll.u32 %v1329_v26, 16  ;;  %v10282_v32 = vld [vmem:[#allocation2 + $0x18] sm:$0x8] }
 0x109   : > { %v1893_v11 = vrot.slane %v1752_v16, 6  ;;  %v1895_v43 = vrot.slane %v10221_v58, 6  ;;  %8831 = vmatprep.mubr.bf16.mxu1 %v8346_v56  ;;  %v1297_v18 = vmax.bf16 %v1165_v55, %v1034_v49  ;;  %v1898_v40 = vrot.slane %v1329_v26, 6 }
 0x10a   : > { %v1296_v24 = vmax.bf16 %v1164_v22, %v1033_v8  ;;  %v1527_v27 = vor.u32 %v1526_v28, %v1525_v37  ;;  %v1524_v35 = vrot.slane %v1523_v34, 4  ;;  %v1533_v25 = vrot.slane %v1531_v52, 6  ;;  %v10274_v22 = vld [vmem:[#allocation2 + $0xc] sm:$0xf]  ;;  %v10292_v52 = vld [vmem:[#allocation2 + $0x1c] sm:$0xf] }
 0x10b   : > { %v1718_v31 = vmax.bf16 %v1523_v34, %v1295_v1  ;;  %v1894_v57 = vrot.slane %v1893_v11, 4  ;;  %v1897_v50 = vrot.slane %v1895_v43, 4  ;;  %v2089_v61 = vmax.bf16 %v10104_v54, %v10059_v48 }
 0x10c   : > { %v1529_v12 = vrot.slane %v1527_v27, 4  ;;  %v2090_v2 = vmax.bf16 %v10124_v6, %v10072_v44  ;;  %v1528_v58 = vsel %vm9593_vm8, %v1524_v35, %v1527_v27  ;;  %v2091_v7 = vmax.bf16 %v10130_v46, %v10075_v30 }
 0x10d   : > { %v1896_v59 = vsel %vm9738_vm11, %v1894_v57, %v1895_v43  ;;  %v10263_v17 = vmax.bf16 %v1893_v11, %v1718_v31  ;;  %v1719_v55 = vmax.bf16 %v1528_v58, %v1296_v24  ;;  %v1899_v44 = vsel %vm9738_vm11, %v1897_v50, %v1898_v40  ;;  %v10301_v40 = vld [vmem:[#allocation2 + $0x20] sm:$0xf]  ;;  %v10308_v57 = vld [vmem:[#allocation2 + $0x2c] sm:$0x8] }
 0x10e   : > { %v1534_v48 = vsel %vm9593_vm8, %v1529_v12, %v1533_v25  ;;  %v2137_v53 = vmax.bf16 %v2089_v61, %v10168_v51  ;;  %v2138_v26 = vmax.bf16 %v2090_v2, %v10181_v47  ;;  %v2139_v45 = vmax.bf16 %v2091_v7, %v10184_v36  ;;  %v10617_v47 = vld [vmem:[#allocation2 + $0x60] sm:$0x1] }
 0x10f   : > { %13265 = vst [vmem:[#allocation39_spill] sm:$0xff] %v10263_v17  ;;  %v1720_v1 = vmax.bf16 %v1534_v48, %v1297_v18  ;;  %v3157_v30 = vshrl.u32 %v10257_v3, 16  ;;  %v10279_v16 = vmax.bf16 %v1896_v59, %v1719_v55  ;;  %v13134_v10 = vshll.u32 %v10267_v19, 16  ;;  %v10316_v59 = vld [vmem:[#allocation2 + $0x30] sm:$0xf] }
 0x110   : > { %v2185_v21 = vmax.bf16 %v2137_v53, %v10208_v42  ;;  %v13135_v37 = vshrl.u32 %v10267_v19, 16  ;;  %v2186_v8 = vmax.bf16 %v2138_v26, %v10228_v33  ;;  %v2187_v49 = vmax.bf16 %v2139_v45, %v10234_v9  ;;  %v9115_v55 = vld [vmem:[%s13086_s1 + $0x10] sm:$0xff]  }
 0x111   : > { %13266 = vst [vmem:[#allocation40_spill] sm:$0xff] %v10279_v16  ;;  %v10286_v56 = vmax.bf16 %v1899_v44, %v1720_v1  ;;  %v13131_v28 = vshll.u32 %v10274_v22, 16  ;;  %v3164_v11 = vrot.slane %v13134_v10, 5  ;;  %v13133_v24 = vshrl.u32 %v10274_v22, 16  ;;  %v10329_v45 = vld [vmem:[%s9204_s26 + $0x70] sm:$0xf]  ;;  %8851 = vmatprep.subr.bf16.mxu1 %v9115_v55 }
 0x112   : > { %v2233_v34 = vmax.bf16 %v2185_v21, %v10263_v17  ;;  %v3168_v43 = vrot.slane %v13135_v37, 4  ;;  %v2234_v18 = vmax.bf16 %v2186_v8, %v10279_v16  ;;  %v3182_v25 = vshrl.u32 %v10282_v32, 16  ;;  %13268 = vst [vmem:[#allocation42_spill] sm:$0xff] %v10329_v45  ;;  %v10333_v8 = vld [vmem:[#allocation2 + $0x34] sm:$0xf]  ;;  %8852 = vmatpush3.bf16.msra.mxu1 %v9115_v55 }
 0x113   : > { %13267 = vst [vmem:[#allocation41_spill] sm:$0xff] %v10286_v56  ;;  %v2235_v27 = vmax.bf16 %v2187_v49, %v10286_v56  ;;  %v10305_v35 = vrot.slane %v13131_v28, 5  ;;  %v10312_v12 = vsel %vm9285_vm2, %v3157_v30, %v3164_v11  ;;  %v3178_v61 = vrot.slane %v13133_v24, 4  ;;  %346 = vst [vmem:[#allocation2 + $0x148] sm:$0xf] %v10329_v45 }
 0x114   : > { %v8315_v31 = vrot.slane %v2233_v34, 11  ;;  %v3169_v50 = vor.u32 %v3168_v43, %v3164_v11  ;;  %v2370_v2 = vrot.slane %v2234_v18, 7  ;;  %v13128_v7 = vshll.u32 %v10292_v52, 16  ;;  %v10340_v11 = vld [vmem:[#allocation2 + $0x40] sm:$0x8] }
 0x115   : > { %v2373_v58 = vrot.slane %v2235_v27, 7  ;;  %v13129_v48 = vshrl.u32 %v10292_v52, 16  ;;  %v3179_v53 = vor.u32 %v3178_v61, %v10305_v35  ;;  %v13130_v1 = vshll.u32 %v10301_v40, 16  ;;  %v10356_v61 = vld [vmem:[#allocation2 + $0x44] sm:$0xf] }
 0x116   : > { %v10323_v44 = vrot.slane %v3169_v50, 4  ;;  %v13132_v26 = vshrl.u32 %v10301_v40, 16  ;;  %v2371_v30 = vsel %vm9848_vm14, %v8315_v31, %v2370_v2  ;;  %v2372_v21 = vrot.slane %v2370_v2, 4 }
 0x117   : > { %v3189_v49 = vrot.slane %v13128_v7, 5  ;;  %v3193_v34 = vrot.slane %v13129_v48, 4  ;;  %3062 = vst [vmem:[#allocation2 + $0xe4] sm:$0xf] %v2371_v30  ;;  %v10346_v18 = vrot.slane %v3179_v53, 4  ;;  %v10350_v27 = vrot.slane %v13130_v1, 5 }
 0x118   : > { %v3203_v31 = vrot.slane %v13132_v26, 4  ;;  %v2374_v50 = vsel %vm9848_vm14, %v2372_v21, %v2373_v58  ;;  %v3207_v53 = vshrl.u32 %v10308_v57, 16  ;;  %v10364_v48 = vld [vmem:[%s9204_s26 + $0x74] sm:$0xf]  ;;  %v13136_v55 = vshll.u32 %v10316_v59, 16 }
 0x119   : > { %v10360_v2 = vsel %vm9285_vm2, %v3182_v25, %v3189_v49  ;;  %v3194_v7 = vor.u32 %v3193_v34, %v3189_v49  ;;  %13269 = vst [vmem:[#allocation43_spill] sm:$0xff] %v10364_v48  ;;  %v8347_v1 = vcombine.low %v2371_v30, %v2374_v50  ;;  %3063 = vst [vmem:[#allocation2 + $0xe8] sm:$0xf] %v2374_v50  ;;  %v13137_v26 = vshrl.u32 %v10316_v59, 16  ;;  %v10370_v58 = vld [vmem:[#allocation2 + $0x48] sm:$0xf] }
 0x11a   : > { %v3204_v28 = vor.u32 %v3203_v31, %v10350_v27  ;;  %347 = vst [vmem:[#allocation2 + $0x14c] sm:$0xf] %v10364_v48  ;;  %v13141_v25 = vshll.u32 %v10333_v8, 16  ;;  %v13142_v49 = vshrl.u32 %v10333_v8, 16  ;;  %v3232_v34 = vshrl.u32 %v10340_v11, 16 }
 0x11b   : > { %v3195_v21 = vrot.slane %v3194_v7, 4  ;;  %8832 = vmatmul.mubr.bf16.gmra.mrb[16].mxu1 %v8347_v1  ;;  %v10375_v30 = vld [vmem:[#allocation2 + $0x54] sm:$0x8]  ;;  %v3214_v31 = vrot.slane %v13136_v55, 5  ;;  %v3218_v24 = vrot.slane %v13137_v26, 4  ;;  %v13144_v10 = vshll.u32 %v10356_v61, 16 }
 0x11c   : > { %v10377_v50 = vrot.slane %v3204_v28, 4  ;;  %v10384_v7 = vld [vmem:[#allocation2 + $0x58] sm:$0xf]  ;;  %v3224_v1 = vrot.slane %v13141_v25, 5  ;;  %v3228_v28 = vrot.slane %v13142_v49, 4  ;;  %v13145_v43 = vshrl.u32 %v10356_v61, 16 }
 0x11d   : > { %v3200_v37 = vsel %vm9285_vm2, %v3195_v21, %v10350_v27  ;;  %v10396_v55 = vsel %vm9285_vm2, %v3207_v53, %v3214_v31  ;;  %v3219_v26 = vor.u32 %v3218_v24, %v3214_v31  ;;  %v3239_v45 = vrot.slane %v13144_v10, 5 }
 0x11e   : > { %v13148_v48 = vshll.u32 %v10370_v58, 16  ;;  %v3229_v27 = vor.u32 %v3228_v28, %v3224_v1  ;;  %v3243_v21 = vrot.slane %v13145_v43, 4  ;;  %v13150_v25 = vshrl.u32 %v10370_v58, 16 }
 0x11f   : > { %v3257_v49 = vshrl.u32 %v10375_v30, 16  ;;  %v3220_v14 = vrot.slane %v3219_v26, 4  ;;  %v10409_v53 = vsel %vm9285_vm2, %v3232_v34, %v3239_v45  ;;  %v13153_v31 = vshll.u32 %v10384_v7, 16 }
 0x120   : > { %v3249_v24 = vrot.slane %v13148_v48, 5  ;;  %v10414_v10 = vrot.slane %v3229_v27, 4  ;;  %v3244_v28 = vor.u32 %v3243_v21, %v3239_v45  ;;  %v3253_v43 = vrot.slane %v13150_v25, 4  ;;  %v10427_v27 = vld [vmem:[#allocation2 + $0x20] sm:$0x7] }
 0x121   : > { %v13154_v63 = vshrl.u32 %v10384_v7, 16  ;;  %v3225_v26 = vsel %vm9285_vm2, %v3220_v14, %v3224_v1  ;;  %v3264_v34 = vrot.slane %v13153_v31, 5  ;;  %v13155_v48 = vshll.u32 %v10401_v62, 16 }
 0x122   : > { %v13156_v13 = vshrl.u32 %v10401_v62, 16  ;;  %v3245_v45 = vrot.slane %v3244_v28, 4  ;;  %v3254_v21 = vor.u32 %v3253_v43, %v3249_v24  ;;  %v3716_v41 = vmax.bf16 %v10312_v12, %v10257_v3  ;;  %v10451_v3 = vld [vmem:[#allocation2 + $0x48] sm:$0x7] }
 0x123   : > { %v3268_v25 = vrot.slane %v13154_v63, 4  ;;  %v10437_v14 = vsel %vm9285_vm2, %v3257_v49, %v3264_v34  ;;  %v3274_v1 = vrot.slane %v13155_v48, 5  ;;  %v13270_v43 = vsel %vm9285_vm2, %v10323_v44, %v10305_v35  ;;  %v3090_v44 = vld [vmem:[#allocation2 + $0x5c] sm:$0x7] }
 0x124   : > { %v3278_v31 = vrot.slane %v13156_v13, 4  ;;  %v10449_v28 = vmax.bf16 %v13270_v43, %v10267_v19  ;;  %v3250_v12 = vsel %vm9285_vm2, %v3245_v45, %v3249_v24  ;;  %v3255_v49 = vrot.slane %v3254_v21, 4 }
 0x125   : > { %v3269_v63 = vor.u32 %v3268_v25, %v3264_v34  ;;  %v3718_v48 = vmax.bf16 %v10346_v18, %v10419_v20  ;;  %v3719_v60 = vmax.bf16 %v10360_v2, %v10282_v32  ;;  %v10460_v4 = vmax.bf16 %v3200_v37, %v10292_v52 }
 0x126   : > { %v3279_v13 = vor.u32 %v3278_v31, %v3274_v1  ;;  %v3721_v35 = vmax.bf16 %v10377_v50, %v10427_v27  ;;  %v3722_v24 = vmax.bf16 %v10396_v55, %v10308_v57  ;;  %v10467_v25 = vmax.bf16 %v3225_v26, %v10316_v59  ;;  %v10478_v50 = vld [vmem:[%s9204_s26 + $0x78] sm:$0xf] }
 0x127   : > { %v3270_v43 = vrot.slane %v3269_v63, 4  ;;  %v3724_v20 = vmax.bf16 %v10414_v10, %v10433_v39  ;;  %v3725_v32 = vmax.bf16 %v10409_v53, %v10340_v11  ;;  %v10474_v37 = vmax.bf16 %v3250_v12, %v10356_v61  ;;  %13271 = vst [vmem:[#allocation44_spill] sm:$0xff] %v10478_v50  ;;  %348 = vst [vmem:[#allocation2 + $0x15c] sm:$0xf] %v10478_v50 }
 0x128   : > { %v3280_v18 = vrot.slane %v3279_v13, 4  ;;  %v3727_v2 = vmax.bf16 %v3255_v49, %v10451_v3  ;;  %v3728_v57 = vmax.bf16 %v10437_v14, %v10375_v30  ;;  %v3816_v39 = vrot.slane %v10267_v19, 5 }
 0x129   : > { %v3275_v63 = vsel %vm9285_vm2, %v3270_v43, %v3274_v1  ;;  %v3818_v13 = vrot.slane %v10274_v22, 5  ;;  %v3821_v55 = vrot.slane %v10292_v52, 5  ;;  %v3823_v53 = vrot.slane %v10301_v40, 5  ;;  %v10497_v1 = vld [vmem:[%s9204_s26 + $0x7c] sm:$0xf] }
 0x12a   : > { %v10488_v10 = vmax.bf16 %v3275_v63, %v10384_v7  ;;  %v3730_v11 = vmax.bf16 %v3280_v18, %v3090_v44  ;;  %v3817_v31 = vrot.slane %v3816_v39, 4  ;;  %v3826_v34 = vrot.slane %v10316_v59, 5  ;;  %13272 = vst [vmem:[#allocation45_spill] sm:$0xff] %v10497_v1  ;;  %349 = vst [vmem:[#allocation2 + $0x160] sm:$0xf] %v10497_v1 }
 0x12b   : > { %v3820_v26 = vrot.slane %v3818_v13, 4  ;;  %v3828_v30 = vrot.slane %v10333_v8, 5  ;;  %v3822_v27 = vrot.slane %v3821_v55, 4  ;;  %v3825_v45 = vrot.slane %v3823_v53, 4 }
 0x12c   : > { %v3831_v21 = vrot.slane %v10356_v61, 5  ;;  %v3833_v14 = vrot.slane %v10370_v58, 5  ;;  %v10501_v3 = vsel %vm9485_vm5, %v3817_v31, %v3818_v13  ;;  %v3827_v12 = vrot.slane %v3826_v34, 4 }
 0x12d   : > { %v3830_v49 = vrot.slane %v3828_v30, 4  ;;  %v3836_v44 = vrot.slane %v10384_v7, 5  ;;  %v10507_v43 = vsel %vm9485_vm5, %v3822_v27, %v3823_v53  ;;  %v3838_v50 = vrot.slane %v10401_v62, 5 }
 0x12e   : > { %v3832_v18 = vrot.slane %v3831_v21, 4  ;;  %v3835_v63 = vrot.slane %v3833_v14, 4  ;;  %v10512_v5 = vsel %vm9485_vm5, %v3827_v12, %v3828_v30  ;;  %v10514_v31 = vmax.bf16 %v3816_v39, %v3716_v41 }
 0x12f   : > { %v3837_v13 = vrot.slane %v3836_v44, 4  ;;  %v3840_v53 = vrot.slane %v3838_v50, 4  ;;  %v10522_v27 = vmax.bf16 %v3820_v26, %v3718_v48  ;;  %v10524_v16 = vmax.bf16 %v3821_v55, %v3719_v60  ;;  %v10544_v55 = vld [vmem:[#allocation2 + $0x10] sm:$0x1] }
 0x130   : > { %v10520_v1 = vsel %vm9485_vm5, %v3832_v18, %v3833_v14  ;;  %v10532_v39 = vmax.bf16 %v3825_v45, %v3721_v35  ;;  %v10534_v30 = vmax.bf16 %v3826_v34, %v3722_v24  ;;  %v10538_v12 = vmax.bf16 %v3830_v49, %v3724_v20  ;;  %v10554_v34 = vld [vmem:[#allocation2 + $0x24] sm:$0x1] }
 0x131   : > { %v10528_v17 = vsel %vm9485_vm5, %v3837_v13, %v3838_v50  ;;  %v10540_v48 = vmax.bf16 %v3831_v21, %v3725_v32  ;;  %v10546_v50 = vmax.bf16 %v3835_v63, %v3727_v2  ;;  %v10548_v26 = vmax.bf16 %v3836_v44, %v3728_v57 }
 0x132   : > { %v10552_v24 = vmax.bf16 %v3840_v53, %v3730_v11  ;;  %v13273_v20 = vshrl.u32 %v10267_v19, 16  ;;  %v13274_v45 = vshll.u32 %v10267_v19, 16  ;;  %v13275_v49 = vshrl.u32 %v10274_v22, 16 }
 0x133   : > { %v13276_v2 = vshll.u32 %v10274_v22, 16  ;;  %v4066_v44 = vshll.u32 %v10544_v55, 16  ;;  %v13277_v63 = vshrl.u32 %v10292_v52, 16  ;;  %v13278_v13 = vshll.u32 %v10292_v52, 16 }
 0x134   : > { %v4056_v32 = vrot.slane %v13273_v20, 5  ;;  %v4057_v21 = vrot.slane %v13274_v45, 6  ;;  %v4060_v18 = vrot.slane %v13275_v49, 5  ;;  %v13279_v35 = vshrl.u32 %v10301_v40, 16 }
 0x135   : > { %v4061_v57 = vrot.slane %v13276_v2, 6  ;;  %v4070_v11 = vrot.slane %v13277_v63, 5  ;;  %v4071_v53 = vrot.slane %v13278_v13, 6  ;;  %v13280_v45 = vshll.u32 %v10301_v40, 16  ;;  %v10576_v2 = vld [vmem:[#allocation2 + $0x38] sm:$0x1] }
 0x136   : > { %v4074_v20 = vrot.slane %v13279_v35, 5  ;;  %v10571_v60 = vor.u32 %v4057_v21, %v4056_v32  ;;  %v4080_v14 = vshll.u32 %v10554_v34, 16  ;;  %v4068_v41 = vrot.slane %v4066_v44, 6 }
 0x137   : > { %v4062_v19 = vor.u32 %v4061_v57, %v4060_v18  ;;  %v4075_v49 = vrot.slane %v13280_v45, 6  ;;  %v10578_v56 = vor.u32 %v4071_v53, %v4070_v11  ;;  %v13281_v63 = vshrl.u32 %v10316_v59, 16  ;;  %v9117_v57 = vld [vmem:[%s13086_s1 + $0x18] sm:$0xff]  }
 0x138   : > { %v13282_v13 = vshll.u32 %v10316_v59, 16  ;;  %v4059_v35 = vrot.slane %v10571_v60, 4  ;;  %v4082_v18 = vrot.slane %v4080_v14, 6  ;;  %v13283_v11 = vshrl.u32 %v10333_v8, 16  ;;  %8853 = vmatprep.subr.bf16.mxu1 %v9117_v57 }
 0x139   : > { %v4084_v52 = vrot.slane %v13281_v63, 5  ;;  %v4064_v32 = vrot.slane %v4062_v19, 4  ;;  %v4076_v21 = vor.u32 %v4075_v49, %v4074_v20  ;;  %v4073_v45 = vrot.slane %v10578_v56, 4  ;;  %8854 = vmatpush3.bf16.msra.mxu1 %v9117_v57 }
 0x13a   : > { %v4085_v9 = vrot.slane %v13282_v13, 6  ;;  %v4088_v53 = vrot.slane %v13283_v11, 5  ;;  %v13284_v63 = vshll.u32 %v10333_v8, 16  ;;  %v10595_v13 = vld [vmem:[#allocation2 + $0x4c] sm:$0x1]  ;;  %v4063_v20 = vsel %vm9593_vm8, %v4059_v35, %v4062_v19 }
 0x13b   : > { %v10601_v14 = vsel %vm9593_vm8, %v4064_v32, %v4068_v41  ;;  %v4078_v49 = vrot.slane %v4076_v21, 4  ;;  %v4094_v33 = vshll.u32 %v10576_v2, 16  ;;  %v13286_v35 = vshll.u32 %v10356_v61, 16 }
 0x13c   : > { %v10589_v44 = vor.u32 %v4085_v9, %v4084_v52  ;;  %v4089_v59 = vrot.slane %v13284_v63, 6  ;;  %v4077_v9 = vsel %vm9593_vm8, %v4073_v45, %v4076_v21  ;;  %v13285_v63 = vshrl.u32 %v10356_v61, 16 }
 0x13d   : > { %v10611_v19 = vsel %vm9593_vm8, %v4078_v49, %v4082_v18  ;;  %v4096_v41 = vrot.slane %v4094_v33, 6  ;;  %v4099_v32 = vrot.slane %v13286_v35, 6  ;;  %v13287_v36 = vshrl.u32 %v10370_v58, 16 }
 0x13e   : > { %v4087_v52 = vrot.slane %v10589_v44, 4  ;;  %v4090_v11 = vor.u32 %v4089_v59, %v4088_v53  ;;  %v4098_v42 = vrot.slane %v13285_v63, 5  ;;  %v13288_v53 = vshll.u32 %v10370_v58, 16 }
 0x13f   : > { %v4102_v46 = vrot.slane %v13287_v36, 5  ;;  %v4108_v59 = vshll.u32 %v10595_v13, 16  ;;  %v13289_v33 = vshrl.u32 %v10384_v7, 16  ;;  %v13290_v49 = vshll.u32 %v10384_v7, 16 }
 0x140   : > { %v4091_v21 = vsel %vm9593_vm8, %v4087_v52, %v4090_v11  ;;  %v4092_v45 = vrot.slane %v4090_v11, 4  ;;  %v4103_v57 = vrot.slane %v13288_v53, 6  ;;  %v10624_v18 = vor.u32 %v4099_v32, %v4098_v42 }
 0x141   : > { %v4112_v61 = vrot.slane %v13289_v33, 5  ;;  %v4113_v63 = vrot.slane %v13290_v49, 6  ;;  %v13291_v36 = vshrl.u32 %v10401_v62, 16  ;;  %v4110_v6 = vrot.slane %v4108_v59, 6 }
 0x142   : > { %v10634_v52 = vsel %vm9593_vm8, %v4092_v45, %v4096_v41  ;;  %v4104_v11 = vor.u32 %v4103_v57, %v4102_v46  ;;  %v13292_v53 = vshll.u32 %v10401_v62, 16  ;;  %v4101_v42 = vrot.slane %v10624_v18, 4 }
 0x143   : > { %v4116_v35 = vrot.slane %v13291_v36, 5  ;;  %v10639_v32 = vor.u32 %v4113_v63, %v4112_v61  ;;  %v4122_v33 = vshll.u32 %v10617_v47, 16  ;;  %v4396_v7 = vmax.bf16 %v10571_v60, %v10514_v31  ;;  %v4456_v60 = vld [vmem:[#allocation2 + $0x8] sm:$0xe] }
 0x144   : > { %v4117_v51 = vrot.slane %v13292_v53, 6  ;;  %v4106_v49 = vrot.slane %v4104_v11, 4  ;;  %v13293_v41 = vmax.bf16 %v10501_v3, %v10449_v28  ;;  %v4398_v46 = vmax.bf16 %v10601_v14, %v10522_v27 }
 0x145   : > { %v4105_v57 = vsel %vm9593_vm8, %v4101_v42, %v4104_v11  ;;  %v4115_v59 = vrot.slane %v10639_v32, 4  ;;  %v4124_v61 = vrot.slane %v4122_v33, 6  ;;  %v4399_v63 = vmax.bf16 %v10578_v56, %v10524_v16 }
 0x146   : > { %v4118_v36 = vor.u32 %v4117_v51, %v4116_v35  ;;  %v10647_v45 = vmax.bf16 %v4063_v20, %v13293_v41  ;;  %v10658_v51 = vsel %vm9593_vm8, %v4106_v49, %v4110_v6  ;;  %v13294_v28 = vmax.bf16 %v10507_v43, %v10460_v4  ;;  %v4457_v35 = vld [vmem:[#allocation2 + $0x1c] sm:$0xe] }
 0x147   : > { %v4401_v27 = vmax.bf16 %v10611_v19, %v10532_v39  ;;  %v4402_v14 = vmax.bf16 %v10589_v44, %v10534_v30  ;;  %v13295_v16 = vmax.bf16 %v10512_v5, %v10467_v25  ;;  %v4404_v56 = vmax.bf16 %v10634_v52, %v10538_v12  ;;  %v4458_v5 = vld [vmem:[#allocation2 + $0x30] sm:$0xe] }
 0x148   : > { %v4120_v31 = vrot.slane %v4118_v36, 4  ;;  %v4400_v3 = vmax.bf16 %v4077_v9, %v13294_v28  ;;  %v4119_v20 = vsel %vm9593_vm8, %v4115_v59, %v4118_v36  ;;  %v4405_v43 = vmax.bf16 %v10624_v18, %v10540_v48  ;;  %v4459_v48 = vld [vmem:[#allocation2 + $0x44] sm:$0xe] }
 0x149   : > { %v4403_v6 = vmax.bf16 %v4091_v21, %v13295_v16  ;;  %v13296_v39 = vmax.bf16 %v10520_v1, %v10474_v37  ;;  %v4407_v30 = vmax.bf16 %v10658_v51, %v10546_v50  ;;  %v4408_v25 = vmax.bf16 %v10639_v32, %v10548_v26  ;;  %v4460_v32 = vld [vmem:[#allocation2 + $0x58] sm:$0xe] }
 0x14a   : > { %v10676_v4 = vsel %vm9593_vm8, %v4120_v31, %v4124_v61  ;;  %v13297_v12 = vmax.bf16 %v10528_v17, %v10488_v10  ;;  %v4516_v21 = vrot.slane %v4456_v60, 6  ;;  %v4518_v18 = vrot.slane %v10274_v22, 6 }
 0x14b   : > { %v4406_v9 = vmax.bf16 %v4105_v57, %v13296_v39  ;;  %v4410_v19 = vmax.bf16 %v10676_v4, %v10552_v24  ;;  %v4521_v37 = vrot.slane %v10544_v55, 6  ;;  %v4523_v1 = vrot.slane %v4457_v35, 6 }
 0x14c   : > { %v4409_v44 = vmax.bf16 %v4119_v20, %v13297_v12  ;;  %v4525_v50 = vrot.slane %v10301_v40, 6  ;;  %v4517_v52 = vrot.slane %v4516_v21, 4  ;;  %v4528_v11 = vrot.slane %v10554_v34, 6 }
 0x14d   : > { %v4530_v26 = vrot.slane %v4458_v5, 6  ;;  %v4532_v53 = vrot.slane %v10333_v8, 6  ;;  %v4520_v17 = vrot.slane %v4518_v18, 4  ;;  %v4524_v10 = vrot.slane %v4523_v1, 4 }
 0x14e   : > { %v4527_v42 = vrot.slane %v4525_v50, 4  ;;  %v4535_v24 = vrot.slane %v10576_v2, 6  ;;  %v4519_v22 = vsel %vm9738_vm11, %v4517_v52, %v4518_v18  ;;  %v4537_v49 = vrot.slane %v4459_v48, 6  ;;  %v3092_v48 = vld [vmem:[#allocation2 + $0x6c] sm:$0xf] }
 0x14f   : > { %v4531_v33 = vrot.slane %v4530_v26, 4  ;;  %v4534_v55 = vrot.slane %v4532_v53, 4  ;;  %v4522_v40 = vsel %vm9738_vm11, %v4520_v17, %v4521_v37  ;;  %v4526_v34 = vsel %vm9738_vm11, %v4524_v10, %v4525_v50 }
 0x150   : > { %v4529_v8 = vsel %vm9738_vm11, %v4527_v42, %v4528_v11  ;;  %v4539_v36 = vrot.slane %v10370_v58, 6  ;;  %v4538_v57 = vrot.slane %v4537_v49, 4  ;;  %v4542_v59 = vrot.slane %v10595_v13, 6 }
 0x151   : > { %v4533_v2 = vsel %vm9738_vm11, %v4531_v33, %v4532_v53  ;;  %v4536_v41 = vsel %vm9738_vm11, %v4534_v55, %v4535_v24  ;;  %v4544_v51 = vrot.slane %v4460_v32, 6  ;;  %v4546_v31 = vrot.slane %v10401_v62, 6 }
 0x152   : > { %v4541_v61 = vrot.slane %v4539_v36, 4  ;;  %v4549_v28 = vrot.slane %v10617_v47, 6  ;;  %v4540_v60 = vsel %vm9738_vm11, %v4538_v57, %v4539_v36  ;;  %v4716_v20 = vmax.bf16 %v4516_v21, %v4396_v7 }
 0x153   : > { %v4717_v58 = vmax.bf16 %v4519_v22, %v10647_v45  ;;  %v4718_v16 = vmax.bf16 %v4522_v40, %v4398_v46  ;;  %v4545_v4 = vrot.slane %v4544_v51, 4  ;;  %v4548_v39 = vrot.slane %v4546_v31, 4 }
 0x154   : > { %v4543_v35 = vsel %vm9738_vm11, %v4541_v61, %v4542_v59  ;;  %v10719_v5 = vmax.bf16 %v4523_v1, %v4399_v63  ;;  %v10721_v13 = vmax.bf16 %v4526_v34, %v4400_v3  ;;  %v10723_v12 = vmax.bf16 %v4529_v8, %v4401_v27  ;;  %v3091_v63 = vld [vmem:[#allocation2 + $0x68] sm:$0x8]  ;;  %v10737_v3 = vld [vmem:[#allocation2 + $0x70] sm:$0xf] }
 0x155   : > { %v10725_v62 = vmax.bf16 %v4530_v26, %v4402_v14  ;;  %v10727_v47 = vmax.bf16 %v4533_v2, %v4403_v6  ;;  %v4547_v7 = vsel %vm9738_vm11, %v4545_v4, %v4546_v31  ;;  %v4550_v45 = vsel %vm9738_vm11, %v4548_v39, %v4549_v28  ;;  %v4041_v31 = vld [vmem:[#allocation2 + $0x74] sm:$0x1] }
 0x156   : > { %v10733_v46 = vmax.bf16 %v4536_v41, %v4404_v56  ;;  %v10735_v21 = vmax.bf16 %v4537_v49, %v4405_v43  ;;  %v10739_v27 = vmax.bf16 %v4540_v60, %v4406_v9  ;;  %v10741_v14 = vmax.bf16 %v4543_v35, %v4407_v30  ;;  %v3093_v41 = vld [vmem:[#allocation2 + $0x70] sm:$0x7] }
 0x157   : > { %v10743_v6 = vmax.bf16 %v4544_v51, %v4408_v25  ;;  %v10745_v18 = vmax.bf16 %v4547_v7, %v4409_v44  ;;  %v10747_v37 = vmax.bf16 %v4550_v45, %v4410_v19  ;;  %v4776_v1 = vmax.bf16 %v10719_v5, %v4716_v20  ;;  %v4461_v45 = vld [vmem:[#allocation2 + $0x6c] sm:$0xe] }
 0x158   : > { %v4777_v56 = vmax.bf16 %v10721_v13, %v4717_v58  ;;  %v4778_v43 = vmax.bf16 %v10723_v12, %v4718_v16  ;;  %v3282_v50 = vshrl.u32 %v3091_v63, 16  ;;  %v3287_v52 = vshll.u32 %v3092_v48, 16  ;;  %v9118_v16 = vld [vmem:[%s13086_s1 + $0x20] sm:$0xff]  }
 0x159   : > { %v3291_v11 = vshrl.u32 %v3092_v48, 16  ;;  %v3297_v9 = vshll.u32 %v10737_v3, 16  ;;  %v4824_v30 = vmax.bf16 %v4776_v1, %v10725_v62  ;;  %v3301_v19 = vshrl.u32 %v10737_v3, 16  ;;  %8855 = vmatprep.subr.bf16.mxu1 %v9118_v16 }
 0x15a   : > { %v4825_v25 = vmax.bf16 %v4777_v56, %v10727_v47  ;;  %v4826_v44 = vmax.bf16 %v4778_v43, %v10733_v46  ;;  %v3289_v26 = vrot.slane %v3287_v52, 5  ;;  %v3841_v10 = vrot.slane %v3092_v48, 5  ;;  %8856 = vmatpush3.bf16.msra.mxu1 %v9118_v16 }
 0x15b   : > { %v3293_v53 = vrot.slane %v3291_v11, 4  ;;  %v3299_v17 = vrot.slane %v3297_v9, 5  ;;  %v4872_v42 = vmax.bf16 %v4824_v30, %v10735_v21  ;;  %v3303_v22 = vrot.slane %v3301_v19, 4 }
 0x15c   : > { %v4873_v24 = vmax.bf16 %v4825_v25, %v10739_v27  ;;  %v4874_v32 = vmax.bf16 %v4826_v44, %v10741_v14  ;;  %v3290_v33 = vsel %vm9285_vm2, %v3282_v50, %v3289_v26  ;;  %v3842_v49 = vrot.slane %v3841_v10, 4 }
 0x15d   : > { %v3294_v55 = vor.u32 %v3293_v53, %v3289_v26  ;;  %v3843_v40 = vrot.slane %v10737_v3, 5  ;;  %v4920_v34 = vmax.bf16 %v4872_v42, %v10743_v6  ;;  %v3304_v2 = vor.u32 %v3303_v22, %v3299_v17 }
 0x15e   : > { %v4921_v8 = vmax.bf16 %v4873_v24, %v10745_v18  ;;  %v4922_v36 = vmax.bf16 %v4874_v32, %v10747_v37  ;;  %v3731_v59 = vmax.bf16 %v3290_v33, %v3091_v63  ;;  %v4126_v39 = vrot.slane %v3291_v11, 5 }
 0x15f   : > { %v3295_v57 = vrot.slane %v3294_v55, 4  ;;  %v3844_v61 = vsel %vm9485_vm5, %v3842_v49, %v3843_v40  ;;  %v3845_v51 = vrot.slane %v3843_v40, 4  ;;  %v8406_v28 = vrot.slane %v4920_v34, 11  ;;  %v392_v40 = vld [vmem:[#allocation2 + $0x11c] sm:$0x8] }
 0x160   : > { %v5018_v60 = vrot.slane %v4921_v8, 7  ;;  %v5021_v20 = vrot.slane %v4922_v36, 7  ;;  %v3305_v58 = vrot.slane %v3304_v2, 4  ;;  %v3991_v4 = vmax.bf16 %v3841_v10, %v3731_v59 }
 0x161   : > { %v3300_v35 = vsel %vm9285_vm2, %v3295_v57, %v3299_v17  ;;  %v4127_v7 = vrot.slane %v3287_v52, 6  ;;  %v4130_v30 = vrot.slane %v3301_v19, 5  ;;  %v4131_v25 = vrot.slane %v3297_v9, 6 }
 0x162   : > { %v5019_v63 = vsel %vm9848_vm14, %v8406_v28, %v5018_v60  ;;  %v5020_v1 = vrot.slane %v5018_v60, 4  ;;  %v3732_v56 = vmax.bf16 %v3300_v35, %v3092_v48  ;;  %v3733_v43 = vmax.bf16 %v3305_v58, %v3093_v41 }
 0x163   : > { %5482 = vst [vmem:[#allocation2 + $0x30] sm:$0xf] %v5019_v63  ;;  %v4128_v50 = vor.u32 %v4127_v7, %v4126_v39  ;;  %v4136_v44 = vshll.u32 %v4041_v31, 16  ;;  %v4551_v52 = vrot.slane %v4461_v45, 6  ;;  %v4132_v42 = vor.u32 %v4131_v25, %v4130_v30 }
 0x164   : > { %v5022_v26 = vsel %vm9848_vm14, %v5020_v1, %v5021_v20  ;;  %v3992_v53 = vmax.bf16 %v3844_v61, %v3732_v56  ;;  %v3993_v11 = vmax.bf16 %v3845_v51, %v3733_v43  ;;  %v4553_v22 = vrot.slane %v10737_v3, 6  ;;  %v393_v3 = vld [vmem:[#allocation2 + $0x120] sm:$0xf] }
 0x165   : > { %v8438_v17 = vcombine.low %v5019_v63, %v5022_v26  ;;  %5483 = vst [vmem:[#allocation2 + $0x34] sm:$0xf] %v5022_v26  ;;  %v4129_v10 = vrot.slane %v4128_v50, 4  ;;  %v4138_v24 = vrot.slane %v4136_v44, 6  ;;  %v4411_v48 = vmax.bf16 %v4128_v50, %v3991_v4 }
 0x166   : > { %v4552_v32 = vrot.slane %v4551_v52, 4  ;;  %v4556_v33 = vrot.slane %v4041_v31, 6  ;;  %v4134_v19 = vrot.slane %v4132_v42, 4  ;;  %v4779_v55 = vmax.bf16 %v10725_v62, %v10719_v5 }
 0x167   : > { %8911 = vmatprep.mubr.bf16.mxu0 %v8438_v17  ;;  %v4133_v9 = vsel %vm9593_vm8, %v4129_v10, %v4132_v42  ;;  %v4780_v49 = vmax.bf16 %v10727_v47, %v10721_v13  ;;  %v4555_v36 = vrot.slane %v4553_v22, 4  ;;  %v10786_v2 = vmax.bf16 %v4551_v52, %v4411_v48  ;;  %v10794_v13 = vld [vmem:[#allocation2 + $0x124] sm:$0xf] }
 0x168   : > { %v4412_v34 = vmax.bf16 %v4133_v9, %v3992_v53  ;;  %v4554_v8 = vsel %vm9738_vm11, %v4552_v32, %v4553_v22  ;;  %v4139_v41 = vsel %vm9593_vm8, %v4134_v19, %v4138_v24  ;;  %v4781_v57 = vmax.bf16 %v10733_v46, %v10723_v12  ;;  %v394_v32 = vld [vmem:[#allocation2 + $0x124] sm:$0x7] }
 0x169   : > { %v4827_v5 = vmax.bf16 %v4779_v55, %v10735_v21  ;;  %v4828_v59 = vmax.bf16 %v4780_v49, %v10739_v27  ;;  %v4413_v61 = vmax.bf16 %v4139_v41, %v3993_v11  ;;  %v4557_v51 = vsel %vm9738_vm11, %v4555_v36, %v4556_v33  ;;  %v1330_v55 = vld [vmem:[#allocation2 + $0x128] sm:$0x1]  ;;  %v1753_v41 = vld [vmem:[#allocation2 + $0x120] sm:$0xe] }
 0x16a   : > { %v10798_v31 = vmax.bf16 %v4554_v8, %v4412_v34  ;;  %v784_v28 = vshrl.u32 %v392_v40, 16  ;;  %v4829_v60 = vmax.bf16 %v4781_v57, %v10741_v14  ;;  %v789_v12 = vshll.u32 %v393_v3, 16 }
 0x16b   : > { %v4875_v20 = vmax.bf16 %v4827_v5, %v10743_v6  ;;  %v4876_v58 = vmax.bf16 %v4828_v59, %v10745_v18  ;;  %v10803_v16 = vmax.bf16 %v4557_v51, %v4413_v61  ;;  %v793_v35 = vshrl.u32 %v393_v3, 16  ;;  %v9116_v51 = vld [vmem:[%s13086_s1 + $0xc8] sm:$0xff]  }
 0x16c   : > { %v799_v4 = vshll.u32 %v10794_v13, 16  ;;  %v803_v39 = vshrl.u32 %v10794_v13, 16  ;;  %v4877_v7 = vmax.bf16 %v4829_v60, %v10747_v37  ;;  %v791_v1 = vrot.slane %v789_v12, 5 }
 0x16d   : > { %v4923_v45 = vmax.bf16 %v4875_v20, %v10786_v2  ;;  %v4924_v63 = vmax.bf16 %v4876_v58, %v10798_v31  ;;  %v795_v56 = vrot.slane %v793_v35, 4  ;;  %v1166_v30 = vrot.slane %v393_v3, 5 }
 0x16e   : > { %v801_v43 = vrot.slane %v799_v4, 5  ;;  %v805_v50 = vrot.slane %v803_v39, 4  ;;  %v4925_v25 = vmax.bf16 %v4877_v7, %v10803_v16  ;;  %v792_v53 = vsel %vm9285_vm2, %v784_v28, %v791_v1 }
 0x16f   : > { %v8407_v44 = vrot.slane %v4923_v45, 11  ;;  %v5025_v26 = vrot.slane %v4924_v63, 7  ;;  %v796_v11 = vor.u32 %v795_v56, %v791_v1  ;;  %v1035_v17 = vmax.bf16 %v792_v53, %v392_v40  ;;  %v9144_v63 = vld [vmem:[%s13086_s1 + $0xc0] sm:$0xff]  }
 0x170   : > { %v806_v52 = vor.u32 %v805_v50, %v801_v43  ;;  %v1167_v10 = vrot.slane %v1166_v30, 4  ;;  %v5028_v48 = vrot.slane %v4925_v25, 7  ;;  %v1168_v22 = vrot.slane %v10794_v13, 5  ;;  %v13299_v53 = vld [vmem:[#allocation29_spill] sm:$0xff] }
 0x171   : > { %v5026_v42 = vsel %vm9848_vm14, %v8407_v44, %v5025_v26  ;;  %v5027_v24 = vrot.slane %v5025_v26, 4  ;;  %v797_v33 = vrot.slane %v796_v11, 4  ;;  %v1298_v19 = vmax.bf16 %v1166_v30, %v1035_v17  ;;  %v13300_v11 = vld [vmem:[#allocation34_spill] sm:$0xff] }
 0x172   : > { %5484 = vst [vmem:[#allocation2 + $0x44] sm:$0xf] %v5026_v42  ;;  %v807_v9 = vrot.slane %v806_v52, 4  ;;  %v1535_v49 = vrot.slane %v793_v35, 5  ;;  %v1169_v40 = vsel %vm9485_vm5, %v1167_v10, %v1168_v22  ;;  %v1170_v8 = vrot.slane %v1168_v22, 4  ;;  %v13301_v17 = vld [vmem:[#allocation30_spill] sm:$0xff] }
 0x173   : > { %v5029_v34 = vsel %vm9848_vm14, %v5027_v24, %v5028_v48  ;;  %v1536_v36 = vrot.slane %v789_v12, 6  ;;  %v802_v5 = vsel %vm9285_vm2, %v797_v33, %v801_v43  ;;  %v1539_v61 = vrot.slane %v803_v39, 5  ;;  %v13302_v10 = vld [vmem:[#allocation35_spill] sm:$0xff] }
 0x174   : > { %v8439_v57 = vcombine.low %v5026_v42, %v5029_v34  ;;  %5485 = vst [vmem:[#allocation2 + $0x48] sm:$0xf] %v5029_v34  ;;  %v1037_v59 = vmax.bf16 %v807_v9, %v394_v32  ;;  %v1036_v28 = vmax.bf16 %v802_v5, %v393_v3  ;;  %v1540_v20 = vrot.slane %v799_v4, 6  ;;  %v13298_v4 = vld [vmem:[#allocation33_spill] sm:$0xff]  ;;  %v395_v24 = vld [vmem:[#allocation2 + $0x130] sm:$0x8] }
 0x175   : > { %v1537_v60 = vor.u32 %v1536_v36, %v1535_v49  ;;  %v1545_v58 = vshll.u32 %v1330_v55, 16  ;;  %v1900_v7 = vrot.slane %v1753_v41, 6  ;;  %v1902_v12 = vrot.slane %v10794_v13, 6  ;;  %v9119_v13 = vld [vmem:[%s13086_s1 + $0xd0] sm:$0xff]   ;;  %v13304_v49 = vld [vmem:[#allocation37_spill] sm:$0xff] }
 0x176   : > { %8912 = vmatmul.mubr.bf16.vlgmr.msra.gmra.mrb[0].mxu0 %v8439_v57  ;;  %v1300_v35 = vmax.bf16 %v1170_v8, %v1037_v59  ;;  %v1905_v45 = vrot.slane %v1330_v55, 6  ;;  %v1299_v39 = vmax.bf16 %v1169_v40, %v1036_v28  ;;  %v1541_v56 = vor.u32 %v1540_v20, %v1539_v61  ;;  %v396_v48 = vld [vmem:[#allocation2 + $0x134] sm:$0xf]  ;;  %v13305_v40 = vld [vmem:[#allocation38_spill] sm:$0xff]  ;;  %v10851_v36 = vld [vmem:[#allocation2 + $0x138] sm:$0xf] }
 0x177   : > { %8944 = vmatpush3.bf16.msra.mxu0 %v9144_v63  ;;  %v1538_v1 = vrot.slane %v1537_v60, 4  ;;  %v1547_v43 = vrot.slane %v1545_v58, 6  ;;  %v1721_v50 = vmax.bf16 %v1537_v60, %v1298_v19  ;;  %v1901_v3 = vrot.slane %v1900_v7, 4  ;;  %v13303_v19 = vld [vmem:[#allocation36_spill] sm:$0xff]  ;;  %v13306_v61 = vld [vmem:[#allocation39_spill] sm:$0xff]  ;;  %v13308_v58 = vld [vmem:[#allocation41_spill] sm:$0xff] }
 0x178   : > { %v1904_v30 = vrot.slane %v1902_v12, 4  ;;  %v2092_v25 = vmax.bf16 %v13298_v4, %v10104_v54  ;;  %8945 = vmatprep.subr.bf16.mxu0 %v9116_v51  ;;  %v1543_v26 = vrot.slane %v1541_v56, 4  ;;  %v2093_v52 = vmax.bf16 %v13300_v11, %v13299_v53  ;;  %v13307_v60 = vld [vmem:[#allocation40_spill] sm:$0xff] }
 0x179   : > { %v1542_v44 = vsel %vm9593_vm8, %v1538_v1, %v1541_v56  ;;  %v2094_v42 = vmax.bf16 %v13302_v10, %v13301_v17  ;;  %v1903_v54 = vsel %vm9738_vm11, %v1901_v3, %v1902_v12  ;;  %v10844_v33 = vmax.bf16 %v1900_v7, %v1721_v50 }
 0x17a   : > { %v1722_v32 = vmax.bf16 %v1542_v44, %v1299_v39  ;;  %v1906_v22 = vsel %vm9738_vm11, %v1904_v30, %v1905_v45  ;;  %v1548_v9 = vsel %vm9593_vm8, %v1543_v26, %v1547_v43  ;;  %v2140_v55 = vmax.bf16 %v2092_v25, %v13303_v19 }
 0x17b   : > { %v2141_v34 = vmax.bf16 %v2093_v52, %v13304_v49  ;;  %v2142_v8 = vmax.bf16 %v2094_v42, %v13305_v40  ;;  %8946 = vmatpush3.bf16.msra.mxu0 %v9116_v51  ;;  %v1723_v41 = vmax.bf16 %v1548_v9, %v1300_v35  ;;  %v809_v5 = vshrl.u32 %v395_v24, 16  ;;  %v397_v42 = vld [vmem:[#allocation2 + $0x138] sm:$0x7] }
 0x17c   : > { %v10853_v57 = vmax.bf16 %v1903_v54, %v1722_v32  ;;  %v814_v59 = vshll.u32 %v396_v48, 16  ;;  %8947 = vmatprep.subr.bf16.mxu0 %v9119_v13  ;;  %v2188_v28 = vmax.bf16 %v2140_v55, %v13306_v61  ;;  %v818_v12 = vshrl.u32 %v396_v48, 16 }
 0x17d   : > { %v2189_v20 = vmax.bf16 %v2141_v34, %v13307_v60  ;;  %v2190_v7 = vmax.bf16 %v2142_v8, %v13308_v58  ;;  %v10858_v45 = vmax.bf16 %v1906_v22, %v1723_v41  ;;  %v824_v39 = vshll.u32 %v10851_v36, 16  ;;  %v1331_v8 = vld [vmem:[#allocation2 + $0x13c] sm:$0x1]  ;;  %v9120_v41 = vld [vmem:[%s13086_s1 + $0x28] sm:$0xff]  }
 0x17e   : > { %v816_v63 = vrot.slane %v814_v59, 5  ;;  %v828_v51 = vshrl.u32 %v10851_v36, 16  ;;  %v2236_v35 = vmax.bf16 %v2188_v28, %v10844_v33  ;;  %v820_v56 = vrot.slane %v818_v12, 4  ;;  %8857 = vmatprep.subr.bf16.mxu1 %v9120_v41 }
 0x17f   : > { %v2237_v1 = vmax.bf16 %v2189_v20, %v10853_v57  ;;  %v1171_v43 = vrot.slane %v396_v48, 5  ;;  %8948 = vmatpush3.bf16.msra.mxu0 %v9119_v13  ;;  %v2238_v50 = vmax.bf16 %v2190_v7, %v10858_v45  ;;  %v826_v30 = vrot.slane %v824_v39, 5  ;;  %v1754_v7 = vld [vmem:[#allocation2 + $0x134] sm:$0xe]  ;;  %8858 = vmatpush3.bf16.msra.mxu1 %v9120_v41  ;;  %v3095_v41 = vld [vmem:[#allocation2 + $0x80] sm:$0xf] }
 0x180   : > { %v817_v3 = vsel %vm9285_vm2, %v809_v5, %v816_v63  ;;  %v830_v25 = vrot.slane %v828_v51, 4  ;;  %v8316_v44 = vrot.slane %v2236_v35, 11  ;;  %v821_v53 = vor.u32 %v820_v56, %v816_v63 }
 0x181   : > { %v2377_v26 = vrot.slane %v2237_v1, 7  ;;  %v1038_v52 = vmax.bf16 %v817_v3, %v395_v24  ;;  %v2380_v17 = vrot.slane %v2238_v50, 7  ;;  %v1172_v54 = vrot.slane %v1171_v43, 4 }
 0x182   : > { %v831_v32 = vor.u32 %v830_v25, %v826_v30  ;;  %v1173_v22 = vrot.slane %v10851_v36, 5  ;;  %v822_v55 = vrot.slane %v821_v53, 4  ;;  %v1549_v20 = vrot.slane %v818_v12, 5 }
 0x183   : > { %v2378_v13 = vsel %vm9848_vm14, %v8316_v44, %v2377_v26  ;;  %v2379_v9 = vrot.slane %v2377_v26, 4  ;;  %v1301_v34 = vmax.bf16 %v1171_v43, %v1038_v52  ;;  %v1550_v1 = vrot.slane %v814_v59, 6 }
 0x184   : > { %3064 = vst [vmem:[#allocation2 + $0xf8] sm:$0xf] %v2378_v13  ;;  %v832_v5 = vrot.slane %v831_v32, 4  ;;  %v1174_v24 = vsel %vm9485_vm5, %v1172_v54, %v1173_v22  ;;  %v1175_v28 = vrot.slane %v1173_v22, 4  ;;  %v827_v35 = vsel %vm9285_vm2, %v822_v55, %v826_v30 }
 0x185   : > { %v2381_v63 = vsel %vm9848_vm14, %v2379_v9, %v2380_v17  ;;  %v1553_v56 = vrot.slane %v828_v51, 5  ;;  %v1039_v50 = vmax.bf16 %v827_v35, %v396_v48  ;;  %v1554_v25 = vrot.slane %v824_v39, 6 }
 0x186   : > { %v8348_v43 = vcombine.low %v2378_v13, %v2381_v63  ;;  %3065 = vst [vmem:[#allocation2 + $0xfc] sm:$0xf] %v2381_v63  ;;  %v1040_v3 = vmax.bf16 %v832_v5, %v397_v42  ;;  %v1551_v44 = vor.u32 %v1550_v1, %v1549_v20  ;;  %v1559_v26 = vshll.u32 %v1331_v8, 16  ;;  %v3094_v42 = vld [vmem:[#allocation2 + $0x7c] sm:$0x8] }
 0x187   : > { %v1907_v53 = vrot.slane %v1754_v7, 6  ;;  %v1909_v12 = vrot.slane %v10851_v36, 6  ;;  %v1302_v52 = vmax.bf16 %v1174_v24, %v1039_v50  ;;  %v1555_v32 = vor.u32 %v1554_v25, %v1553_v56 }
 0x188   : > { %8835 = vmatprep.mubr.bf16.mxu1 %v8348_v43  ;;  %v1303_v17 = vmax.bf16 %v1175_v28, %v1040_v3  ;;  %v1912_v54 = vrot.slane %v1331_v8, 6  ;;  %v1552_v30 = vrot.slane %v1551_v44, 4  ;;  %v1561_v59 = vrot.slane %v1559_v26, 6  ;;  %v10897_v28 = vld [vmem:[#allocation2 + $0x84] sm:$0xf] }
 0x189   : > { %v1724_v51 = vmax.bf16 %v1551_v44, %v1301_v34  ;;  %v1908_v22 = vrot.slane %v1907_v53, 4  ;;  %v1557_v13 = vrot.slane %v1555_v32, 4  ;;  %v1911_v9 = vrot.slane %v1909_v12, 4 }
 0x18a   : > { %v2095_v48 = vmax.bf16 %v13303_v19, %v13298_v4  ;;  %v2096_v39 = vmax.bf16 %v13304_v49, %v13300_v11  ;;  %v1556_v36 = vsel %vm9593_vm8, %v1552_v30, %v1555_v32  ;;  %v2097_v34 = vmax.bf16 %v13305_v40, %v13302_v10 }
 0x18b   : > { %v1910_v55 = vsel %vm9738_vm11, %v1908_v22, %v1909_v12  ;;  %v10888_v8 = vmax.bf16 %v1907_v53, %v1724_v51  ;;  %v1562_v5 = vsel %vm9593_vm8, %v1557_v13, %v1561_v59  ;;  %v1725_v4 = vmax.bf16 %v1556_v36, %v1302_v52 }
 0x18c   : > { %v1913_v11 = vsel %vm9738_vm11, %v1911_v9, %v1912_v54  ;;  %v2143_v24 = vmax.bf16 %v2095_v48, %v13306_v61  ;;  %v1726_v20 = vmax.bf16 %v1562_v5, %v1303_v17  ;;  %v2144_v7 = vmax.bf16 %v2096_v39, %v13307_v60 }
 0x18d   : > { %v2145_v63 = vmax.bf16 %v2097_v34, %v13308_v58  ;;  %v3307_v35 = vshrl.u32 %v3094_v42, 16  ;;  %v10901_v1 = vmax.bf16 %v1910_v55, %v1725_v4  ;;  %v3312_v56 = vshll.u32 %v3095_v41, 16 }
 0x18e   : > { %v2191_v10 = vmax.bf16 %v2143_v24, %v10844_v33  ;;  %v3316_v43 = vshrl.u32 %v3095_v41, 16  ;;  %v10904_v50 = vmax.bf16 %v1913_v11, %v1726_v20  ;;  %v2192_v3 = vmax.bf16 %v2144_v7, %v10853_v57  ;;  %v3096_v20 = vld [vmem:[#allocation2 + $0x84] sm:$0x7] }
 0x18f   : > { %v2193_v25 = vmax.bf16 %v2145_v63, %v10858_v45  ;;  %v3322_v44 = vshll.u32 %v10897_v28, 16  ;;  %v3314_v53 = vrot.slane %v3312_v56, 5  ;;  %v3326_v52 = vshrl.u32 %v10897_v28, 16  ;;  %v4042_v63 = vld [vmem:[#allocation2 + $0x88] sm:$0x1] }
 0x190   : > { %v2239_v26 = vmax.bf16 %v2191_v10, %v10888_v8  ;;  %v3318_v12 = vrot.slane %v3316_v43, 4  ;;  %v2240_v17 = vmax.bf16 %v2192_v3, %v10901_v1  ;;  %v3846_v30 = vrot.slane %v3095_v41, 5 }
 0x191   : > { %v2241_v32 = vmax.bf16 %v2193_v25, %v10904_v50  ;;  %v3324_v54 = vrot.slane %v3322_v44, 5  ;;  %v3315_v51 = vsel %vm9285_vm2, %v3307_v35, %v3314_v53  ;;  %v3328_v13 = vrot.slane %v3326_v52, 4 }
 0x192   : > { %v8317_v59 = vrot.slane %v2239_v26, 11  ;;  %v3319_v22 = vor.u32 %v3318_v12, %v3314_v53  ;;  %v2384_v9 = vrot.slane %v2240_v17, 7  ;;  %v3734_v39 = vmax.bf16 %v3315_v51, %v3094_v42  ;;  %v4462_v26 = vld [vmem:[#allocation2 + $0x80] sm:$0xe] }
 0x193   : > { %v2387_v48 = vrot.slane %v2241_v32, 7  ;;  %v3847_v36 = vrot.slane %v3846_v30, 4  ;;  %v3329_v34 = vor.u32 %v3328_v13, %v3324_v54  ;;  %v3848_v5 = vrot.slane %v10897_v28, 5 }
 0x194   : > { %v3320_v55 = vrot.slane %v3319_v22, 4  ;;  %v4140_v4 = vrot.slane %v3316_v43, 5  ;;  %v2385_v11 = vsel %vm9848_vm14, %v8317_v59, %v2384_v9  ;;  %v2386_v24 = vrot.slane %v2384_v9, 4 }
 0x195   : > { %v3994_v7 = vmax.bf16 %v3846_v30, %v3734_v39  ;;  %v4141_v10 = vrot.slane %v3312_v56, 6  ;;  %3066 = vst [vmem:[#allocation2 + $0x10c] sm:$0xf] %v2385_v11  ;;  %v3330_v3 = vrot.slane %v3329_v34, 4  ;;  %v3849_v42 = vsel %vm9485_vm5, %v3847_v36, %v3848_v5 }
 0x196   : > { %v3325_v35 = vsel %vm9285_vm2, %v3320_v55, %v3324_v54  ;;  %v3850_v25 = vrot.slane %v3848_v5, 4  ;;  %v2388_v43 = vsel %vm9848_vm14, %v2386_v24, %v2387_v48  ;;  %v4144_v17 = vrot.slane %v3326_v52, 5  ;;  %v3097_v5 = vld [vmem:[#allocation2 + $0x90] sm:$0x8] }
 0x197   : > { %v3735_v53 = vmax.bf16 %v3325_v35, %v3095_v41  ;;  %v4142_v12 = vor.u32 %v4141_v10, %v4140_v4  ;;  %v8349_v32 = vcombine.low %v2385_v11, %v2388_v43  ;;  %3067 = vst [vmem:[#allocation2 + $0x110] sm:$0xf] %v2388_v43  ;;  %v3736_v30 = vmax.bf16 %v3330_v3, %v3096_v20  ;;  %v3098_v10 = vld [vmem:[#allocation2 + $0x94] sm:$0xf] }
 0x198   : > { %v4145_v56 = vrot.slane %v3322_v44, 6  ;;  %v4150_v59 = vshll.u32 %v4042_v63, 16  ;;  %v4558_v13 = vrot.slane %v4462_v26, 6  ;;  %v4560_v55 = vrot.slane %v10897_v28, 6 }
 0x199   : > { %v3995_v51 = vmax.bf16 %v3849_v42, %v3735_v53  ;;  %v4143_v22 = vrot.slane %v4142_v12, 4  ;;  %v4414_v54 = vmax.bf16 %v4142_v12, %v3994_v7  ;;  %8836 = vmatmul.mubr.bf16.gmra.mrb[20].mxu1 %v8349_v32  ;;  %v3996_v9 = vmax.bf16 %v3850_v25, %v3736_v30 }
 0x19a   : > { %v4146_v39 = vor.u32 %v4145_v56, %v4144_v17  ;;  %v4152_v36 = vrot.slane %v4150_v59, 6  ;;  %v4559_v34 = vrot.slane %v4558_v13, 4  ;;  %v4563_v48 = vrot.slane %v4042_v63, 6 }
 0x19b   : > { %v10925_v41 = vmax.bf16 %v4558_v13, %v4414_v54  ;;  %v4782_v52 = vmax.bf16 %v10735_v21, %v10725_v62  ;;  %v4562_v11 = vrot.slane %v4560_v55, 4  ;;  %v4783_v24 = vmax.bf16 %v10739_v27, %v10727_v47  ;;  %v10938_v62 = vld [vmem:[#allocation2 + $0x98] sm:$0xf] }
 0x19c   : > { %v4147_v44 = vsel %vm9593_vm8, %v4143_v22, %v4146_v39  ;;  %v4148_v4 = vrot.slane %v4146_v39, 4  ;;  %v4561_v28 = vsel %vm9738_vm11, %v4559_v34, %v4560_v55  ;;  %v4784_v7 = vmax.bf16 %v10741_v14, %v10733_v46 }
 0x19d   : > { %v4415_v20 = vmax.bf16 %v4147_v44, %v3995_v51  ;;  %v4830_v63 = vmax.bf16 %v4782_v52, %v10743_v6  ;;  %v4564_v3 = vsel %vm9738_vm11, %v4562_v11, %v4563_v48  ;;  %v4831_v47 = vmax.bf16 %v4783_v24, %v10745_v18 }
 0x19e   : > { %v4153_v35 = vsel %vm9593_vm8, %v4148_v4, %v4152_v36  ;;  %v3332_v42 = vshrl.u32 %v3097_v5, 16  ;;  %v4832_v43 = vmax.bf16 %v4784_v7, %v10747_v37  ;;  %v3337_v12 = vshll.u32 %v3098_v10, 16 }
 0x19f   : > { %v4416_v25 = vmax.bf16 %v4153_v35, %v3996_v9  ;;  %v10945_v26 = vmax.bf16 %v4561_v28, %v4415_v20  ;;  %v4878_v46 = vmax.bf16 %v4830_v63, %v10786_v2  ;;  %v4879_v53 = vmax.bf16 %v4831_v47, %v10798_v31  ;;  %v3099_v35 = vld [vmem:[#allocation2 + $0x98] sm:$0x7] }
 0x1a0   : > { %v3341_v17 = vshrl.u32 %v3098_v10, 16  ;;  %v3347_v32 = vshll.u32 %v10938_v62, 16  ;;  %v4880_v56 = vmax.bf16 %v4832_v43, %v10803_v16  ;;  %v3351_v51 = vshrl.u32 %v10938_v62, 16 }
 0x1a1   : > { %v10951_v30 = vmax.bf16 %v4564_v3, %v4416_v25  ;;  %v4926_v59 = vmax.bf16 %v4878_v46, %v10925_v41  ;;  %v4927_v22 = vmax.bf16 %v4879_v53, %v10945_v26  ;;  %v3339_v54 = vrot.slane %v3337_v12, 5  ;;  %v9121_v25 = vld [vmem:[%s13086_s1 + $0x30] sm:$0xff]   ;;  %v4043_v53 = vld [vmem:[#allocation2 + $0x9c] sm:$0x1] }
 0x1a2   : > { %v3343_v13 = vrot.slane %v3341_v17, 4  ;;  %v3349_v9 = vrot.slane %v3347_v32, 5  ;;  %v3353_v55 = vrot.slane %v3351_v51, 4  ;;  %v3851_v34 = vrot.slane %v3098_v10, 5  ;;  %8859 = vmatprep.subr.bf16.mxu1 %v9121_v25 }
 0x1a3   : > { %v4928_v39 = vmax.bf16 %v4880_v56, %v10951_v30  ;;  %v8408_v36 = vrot.slane %v4926_v59, 11  ;;  %v5032_v48 = vrot.slane %v4927_v22, 7  ;;  %v3340_v52 = vsel %vm9285_vm2, %v3332_v42, %v3339_v54  ;;  %v4463_v56 = vld [vmem:[#allocation2 + $0x94] sm:$0xe]  ;;  %8860 = vmatpush3.bf16.msra.mxu1 %v9121_v25 }
 0x1a4   : > { %v3344_v44 = vor.u32 %v3343_v13, %v3339_v54  ;;  %v3853_v4 = vrot.slane %v10938_v62, 5  ;;  %v3354_v24 = vor.u32 %v3353_v55, %v3349_v9  ;;  %v3737_v20 = vmax.bf16 %v3340_v52, %v3097_v5 }
 0x1a5   : > { %v5035_v11 = vrot.slane %v4928_v39, 7  ;;  %v3852_v28 = vrot.slane %v3851_v34, 4  ;;  %v5033_v7 = vsel %vm9848_vm14, %v8408_v36, %v5032_v48  ;;  %v5034_v63 = vrot.slane %v5032_v48, 4 }
 0x1a6   : > { %v3345_v3 = vrot.slane %v3344_v44, 4  ;;  %v3855_v47 = vrot.slane %v3853_v4, 4  ;;  %5486 = vst [vmem:[#allocation2 + $0x58] sm:$0xf] %v5033_v7  ;;  %v3355_v42 = vrot.slane %v3354_v24, 4  ;;  %v3997_v46 = vmax.bf16 %v3851_v34, %v3737_v20 }
 0x1a7   : > { %v3854_v43 = vsel %vm9485_vm5, %v3852_v28, %v3853_v4  ;;  %v4154_v5 = vrot.slane %v3341_v17, 5  ;;  %v5036_v59 = vsel %vm9848_vm14, %v5034_v63, %v5035_v11  ;;  %v4155_v54 = vrot.slane %v3337_v12, 6 }
 0x1a8   : > { %v3350_v22 = vsel %vm9285_vm2, %v3345_v3, %v3349_v9  ;;  %v4158_v13 = vrot.slane %v3351_v51, 5  ;;  %v8440_v39 = vcombine.low %v5033_v7, %v5036_v59  ;;  %5487 = vst [vmem:[#allocation2 + $0x5c] sm:$0xf] %v5036_v59  ;;  %v3739_v55 = vmax.bf16 %v3355_v42, %v3099_v35  ;;  %v398_v35 = vld [vmem:[#allocation2 + $0x144] sm:$0x8] }
 0x1a9   : > { %v3738_v36 = vmax.bf16 %v3350_v22, %v3098_v10  ;;  %v4159_v48 = vrot.slane %v3347_v32, 6  ;;  %v4156_v52 = vor.u32 %v4155_v54, %v4154_v5  ;;  %v4164_v34 = vshll.u32 %v4043_v53, 16  ;;  %v399_v42 = vld [vmem:[#allocation2 + $0x148] sm:$0xf] }
 0x1aa   : > { %v4565_v44 = vrot.slane %v4463_v56, 6  ;;  %v4567_v17 = vrot.slane %v10938_v62, 6  ;;  %8915 = vmatprep.mubr.bf16.mxu0 %v8440_v39  ;;  %v3999_v11 = vmax.bf16 %v3855_v47, %v3739_v55  ;;  %v4570_v20 = vrot.slane %v4043_v53, 6  ;;  %v10990_v53 = vld [vmem:[#allocation2 + $0x14c] sm:$0xf] }
 0x1ab   : > { %v3998_v4 = vmax.bf16 %v3854_v43, %v3738_v36  ;;  %v4160_v24 = vor.u32 %v4159_v48, %v4158_v13  ;;  %v4157_v9 = vrot.slane %v4156_v52, 4  ;;  %v4166_v12 = vrot.slane %v4164_v34, 6 }
 0x1ac   : > { %v4417_v51 = vmax.bf16 %v4156_v52, %v3997_v46  ;;  %v4566_v28 = vrot.slane %v4565_v44, 4  ;;  %v4569_v63 = vrot.slane %v4567_v17, 4  ;;  %v4785_v10 = vmax.bf16 %v10743_v6, %v10735_v21 }
 0x1ad   : > { %v4162_v7 = vrot.slane %v4160_v24, 4  ;;  %v4786_v32 = vmax.bf16 %v10745_v18, %v10739_v27  ;;  %v4161_v62 = vsel %vm9593_vm8, %v4157_v9, %v4160_v24  ;;  %v4787_v25 = vmax.bf16 %v10747_v37, %v10741_v14 }
 0x1ae   : > { %v4568_v3 = vsel %vm9738_vm11, %v4566_v28, %v4567_v17  ;;  %v10981_v47 = vmax.bf16 %v4565_v44, %v4417_v51  ;;  %v4418_v21 = vmax.bf16 %v4161_v62, %v3998_v4  ;;  %v4571_v27 = vsel %vm9738_vm11, %v4569_v63, %v4570_v20 }
 0x1af   : > { %v4167_v43 = vsel %vm9593_vm8, %v4162_v7, %v4166_v12  ;;  %v4833_v46 = vmax.bf16 %v4785_v10, %v10786_v2  ;;  %v4834_v56 = vmax.bf16 %v4786_v32, %v10798_v31  ;;  %v4835_v59 = vmax.bf16 %v4787_v25, %v10803_v16 }
 0x1b0   : > { %v4419_v5 = vmax.bf16 %v4167_v43, %v3999_v11  ;;  %v834_v22 = vshrl.u32 %v398_v35, 16  ;;  %v10994_v54 = vmax.bf16 %v4568_v3, %v4418_v21  ;;  %v839_v13 = vshll.u32 %v399_v42, 16 }
 0x1b1   : > { %v4881_v14 = vmax.bf16 %v4833_v46, %v10925_v41  ;;  %v843_v39 = vshrl.u32 %v399_v42, 16  ;;  %v4882_v55 = vmax.bf16 %v4834_v56, %v10945_v26  ;;  %v4883_v48 = vmax.bf16 %v4835_v59, %v10951_v30  ;;  %v400_v56 = vld [vmem:[#allocation2 + $0x14c] sm:$0x7] }
 0x1b2   : > { %v10997_v36 = vmax.bf16 %v4571_v27, %v4419_v5  ;;  %v849_v52 = vshll.u32 %v10990_v53, 16  ;;  %v841_v44 = vrot.slane %v839_v13, 5  ;;  %v853_v4 = vshrl.u32 %v10990_v53, 16  ;;  %v9122_v27 = vld [vmem:[%s13086_s1 + $0xd8] sm:$0xff]  }
 0x1b3   : > { %v4929_v34 = vmax.bf16 %v4881_v14, %v10981_v47  ;;  %v845_v17 = vrot.slane %v843_v39, 4  ;;  %v4930_v11 = vmax.bf16 %v4882_v55, %v10994_v54  ;;  %v1176_v9 = vrot.slane %v399_v42, 5  ;;  %8949 = vmatprep.subr.bf16.mxu0 %v9122_v27 }
 0x1b4   : > { %v4931_v24 = vmax.bf16 %v4883_v48, %v10997_v36  ;;  %v851_v20 = vrot.slane %v849_v52, 5  ;;  %v842_v51 = vsel %vm9285_vm2, %v834_v22, %v841_v44  ;;  %v855_v7 = vrot.slane %v853_v4, 4  ;;  %v1332_v22 = vld [vmem:[#allocation2 + $0x150] sm:$0x1]  ;;  %8950 = vmatpush3.bf16.msra.mxu0 %v9122_v27 }
 0x1b5   : > { %v8409_v12 = vrot.slane %v4929_v34, 11  ;;  %v846_v28 = vor.u32 %v845_v17, %v841_v44  ;;  %v5039_v63 = vrot.slane %v4930_v11, 7  ;;  %v1041_v32 = vmax.bf16 %v842_v51, %v398_v35  ;;  %v1755_v34 = vld [vmem:[#allocation2 + $0x148] sm:$0xe] }
 0x1b6   : > { %v5042_v10 = vrot.slane %v4931_v24, 7  ;;  %v1177_v62 = vrot.slane %v1176_v9, 4  ;;  %v856_v25 = vor.u32 %v855_v7, %v851_v20  ;;  %v1178_v43 = vrot.slane %v10990_v53, 5 }
 0x1b7   : > { %v847_v3 = vrot.slane %v846_v28, 4  ;;  %v1563_v21 = vrot.slane %v843_v39, 5  ;;  %v5040_v46 = vsel %vm9848_vm14, %v8409_v12, %v5039_v63  ;;  %v5041_v5 = vrot.slane %v5039_v63, 4 }
 0x1b8   : > { %v1304_v59 = vmax.bf16 %v1176_v9, %v1041_v32  ;;  %v1564_v14 = vrot.slane %v839_v13, 6  ;;  %5488 = vst [vmem:[#allocation2 + $0x6c] sm:$0xf] %v5040_v46  ;;  %v857_v55 = vrot.slane %v856_v25, 4  ;;  %v1179_v39 = vsel %vm9485_vm5, %v1177_v62, %v1178_v43 }
 0x1b9   : > { %v852_v35 = vsel %vm9285_vm2, %v847_v3, %v851_v20  ;;  %v1180_v48 = vrot.slane %v1178_v43, 4  ;;  %v5043_v44 = vsel %vm9848_vm14, %v5041_v5, %v5042_v10  ;;  %v1567_v24 = vrot.slane %v853_v4, 5 }
 0x1ba   : > { %v1042_v17 = vmax.bf16 %v852_v35, %v399_v42  ;;  %v1565_v11 = vor.u32 %v1564_v14, %v1563_v21  ;;  %v8441_v9 = vcombine.low %v5040_v46, %v5043_v44  ;;  %5489 = vst [vmem:[#allocation2 + $0x70] sm:$0xf] %v5043_v44  ;;  %v1043_v13 = vmax.bf16 %v857_v55, %v400_v56  ;;  %v401_v21 = vld [vmem:[#allocation2 + $0x158] sm:$0x8]  ;;  %v402_v14 = vld [vmem:[#allocation2 + $0x15c] sm:$0xf] }
 0x1bb   : > { %v1568_v12 = vrot.slane %v849_v52, 6  ;;  %v1573_v51 = vshll.u32 %v1332_v22, 16  ;;  %v1914_v63 = vrot.slane %v1755_v34, 6  ;;  %v1916_v25 = vrot.slane %v10990_v53, 6 }
 0x1bc   : > { %v1305_v20 = vmax.bf16 %v1179_v39, %v1042_v17  ;;  %v1566_v28 = vrot.slane %v1565_v11, 4  ;;  %v1727_v7 = vmax.bf16 %v1565_v11, %v1304_v59  ;;  %8916 = vmatmul.mubr.bf16.gmra.mrb[4].mxu0 %v8441_v9  ;;  %v1306_v32 = vmax.bf16 %v1180_v48, %v1043_v13 }
 0x1bd   : > { %v1569_v62 = vor.u32 %v1568_v12, %v1567_v24  ;;  %v1575_v3 = vrot.slane %v1573_v51, 6  ;;  %v1915_v10 = vrot.slane %v1914_v63, 4  ;;  %v1919_v42 = vrot.slane %v1332_v22, 6 }
 0x1be   : > { %v11021_v43 = vmax.bf16 %v1914_v63, %v1727_v7  ;;  %v2098_v4 = vmax.bf16 %v13306_v61, %v13303_v19  ;;  %v1918_v46 = vrot.slane %v1916_v25, 4  ;;  %v2099_v5 = vmax.bf16 %v13307_v60, %v13304_v49  ;;  %v11034_v19 = vld [vmem:[#allocation2 + $0x160] sm:$0xf] }
 0x1bf   : > { %v1570_v52 = vsel %vm9593_vm8, %v1566_v28, %v1569_v62  ;;  %v1571_v27 = vrot.slane %v1569_v62, 4  ;;  %v1917_v53 = vsel %vm9738_vm11, %v1915_v10, %v1916_v25  ;;  %v2100_v59 = vmax.bf16 %v13308_v58, %v13305_v40 }
 0x1c0   : > { %v1728_v56 = vmax.bf16 %v1570_v52, %v1305_v20  ;;  %v2146_v22 = vmax.bf16 %v2098_v4, %v10844_v33  ;;  %v1920_v55 = vsel %vm9738_vm11, %v1918_v46, %v1919_v42  ;;  %v2147_v49 = vmax.bf16 %v2099_v5, %v10853_v57 }
 0x1c1   : > { %v1576_v35 = vsel %vm9593_vm8, %v1571_v27, %v1575_v3  ;;  %v859_v39 = vshrl.u32 %v401_v21, 16  ;;  %v2148_v44 = vmax.bf16 %v2100_v59, %v10858_v45  ;;  %v864_v11 = vshll.u32 %v402_v14, 16 }
 0x1c2   : > { %v1729_v48 = vmax.bf16 %v1576_v35, %v1306_v32  ;;  %v11041_v34 = vmax.bf16 %v1917_v53, %v1728_v56  ;;  %v2194_v40 = vmax.bf16 %v2146_v22, %v10888_v8  ;;  %v2195_v17 = vmax.bf16 %v2147_v49, %v10901_v1  ;;  %v403_v35 = vld [vmem:[#allocation2 + $0x160] sm:$0x7] }
 0x1c3   : > { %v868_v24 = vshrl.u32 %v402_v14, 16  ;;  %v874_v9 = vshll.u32 %v11034_v19, 16  ;;  %v2196_v12 = vmax.bf16 %v2148_v44, %v10904_v50  ;;  %v878_v20 = vshrl.u32 %v11034_v19, 16 }
 0x1c4   : > { %v11047_v13 = vmax.bf16 %v1920_v55, %v1729_v48  ;;  %v2242_v51 = vmax.bf16 %v2194_v40, %v11021_v43  ;;  %v2243_v28 = vmax.bf16 %v2195_v17, %v11041_v34  ;;  %v866_v7 = vrot.slane %v864_v11, 5  ;;  %v9123_v48 = vld [vmem:[%s13086_s1 + $0x38] sm:$0xff]   ;;  %v1333_v17 = vld [vmem:[#allocation2 + $0x164] sm:$0x1] }
 0x1c5   : > { %v870_v63 = vrot.slane %v868_v24, 4  ;;  %v876_v32 = vrot.slane %v874_v9, 5  ;;  %v880_v25 = vrot.slane %v878_v20, 4  ;;  %v1181_v10 = vrot.slane %v402_v14, 5  ;;  %8861 = vmatprep.subr.bf16.mxu1 %v9123_v48 }
 0x1c6   : > { %v2244_v62 = vmax.bf16 %v2196_v12, %v11047_v13  ;;  %v8318_v3 = vrot.slane %v2242_v51, 11  ;;  %v2391_v42 = vrot.slane %v2243_v28, 7  ;;  %v867_v4 = vsel %vm9285_vm2, %v859_v39, %v866_v7  ;;  %v1756_v12 = vld [vmem:[#allocation2 + $0x15c] sm:$0xe]  ;;  %8862 = vmatpush3.bf16.msra.mxu1 %v9123_v48 }
 0x1c7   : > { %v871_v52 = vor.u32 %v870_v63, %v866_v7  ;;  %v1183_v27 = vrot.slane %v11034_v19, 5  ;;  %v881_v5 = vor.u32 %v880_v25, %v876_v32  ;;  %v1044_v56 = vmax.bf16 %v867_v4, %v401_v21 }
 0x1c8   : > { %v2394_v46 = vrot.slane %v2244_v62, 7  ;;  %v1182_v53 = vrot.slane %v1181_v10, 4  ;;  %v2392_v59 = vsel %vm9848_vm14, %v8318_v3, %v2391_v42  ;;  %v2393_v22 = vrot.slane %v2391_v42, 4 }
 0x1c9   : > { %v872_v55 = vrot.slane %v871_v52, 4  ;;  %v1185_v49 = vrot.slane %v1183_v27, 4  ;;  %3068 = vst [vmem:[#allocation2 + $0x120] sm:$0xf] %v2392_v59  ;;  %v882_v39 = vrot.slane %v881_v5, 4  ;;  %v1307_v40 = vmax.bf16 %v1181_v10, %v1044_v56 }
 0x1ca   : > { %v1184_v44 = vsel %vm9485_vm5, %v1182_v53, %v1183_v27  ;;  %v1577_v21 = vrot.slane %v868_v24, 5  ;;  %v2395_v51 = vsel %vm9848_vm14, %v2393_v22, %v2394_v46  ;;  %v1578_v7 = vrot.slane %v864_v11, 6 }
 0x1cb   : > { %v877_v28 = vsel %vm9285_vm2, %v872_v55, %v876_v32  ;;  %v1581_v63 = vrot.slane %v878_v20, 5  ;;  %v8350_v62 = vcombine.low %v2392_v59, %v2395_v51  ;;  %3069 = vst [vmem:[#allocation2 + $0x124] sm:$0xf] %v2395_v51  ;;  %v1046_v25 = vmax.bf16 %v882_v39, %v403_v35  ;;  %v3100_v35 = vld [vmem:[#allocation2 + $0xa4] sm:$0x8] }
 0x1cc   : > { %v1045_v3 = vmax.bf16 %v877_v28, %v402_v14  ;;  %v1582_v42 = vrot.slane %v874_v9, 6  ;;  %v1579_v4 = vor.u32 %v1578_v7, %v1577_v21  ;;  %v1587_v10 = vshll.u32 %v1333_v17, 16  ;;  %v3101_v39 = vld [vmem:[#allocation2 + $0xa8] sm:$0xf] }
 0x1cd   : > { %v1921_v52 = vrot.slane %v1756_v12, 6  ;;  %v1923_v24 = vrot.slane %v11034_v19, 6  ;;  %8839 = vmatprep.mubr.bf16.mxu1 %v8350_v62  ;;  %v1309_v46 = vmax.bf16 %v1185_v49, %v1046_v25  ;;  %v1926_v56 = vrot.slane %v1333_v17, 6  ;;  %v11086_v17 = vld [vmem:[#allocation2 + $0xac] sm:$0xf] }
 0x1ce   : > { %v1308_v27 = vmax.bf16 %v1184_v44, %v1045_v3  ;;  %v1583_v5 = vor.u32 %v1582_v42, %v1581_v63  ;;  %v1580_v32 = vrot.slane %v1579_v4, 4  ;;  %v1589_v11 = vrot.slane %v1587_v10, 6 }
 0x1cf   : > { %v1730_v20 = vmax.bf16 %v1579_v4, %v1307_v40  ;;  %v1922_v53 = vrot.slane %v1921_v52, 4  ;;  %v1925_v22 = vrot.slane %v1923_v24, 4  ;;  %v2101_v14 = vmax.bf16 %v10844_v33, %v13306_v61 }
 0x1d0   : > { %v1585_v59 = vrot.slane %v1583_v5, 4  ;;  %v2102_v9 = vmax.bf16 %v10853_v57, %v13307_v60  ;;  %v1584_v19 = vsel %vm9593_vm8, %v1580_v32, %v1583_v5  ;;  %v2103_v48 = vmax.bf16 %v10858_v45, %v13308_v58 }
 0x1d1   : > { %v1924_v55 = vsel %vm9738_vm11, %v1922_v53, %v1923_v24  ;;  %v11077_v49 = vmax.bf16 %v1921_v52, %v1730_v20  ;;  %v1731_v61 = vmax.bf16 %v1584_v19, %v1308_v27  ;;  %v1927_v60 = vsel %vm9738_vm11, %v1925_v22, %v1926_v56 }
 0x1d2   : > { %v1590_v44 = vsel %vm9593_vm8, %v1585_v59, %v1589_v11  ;;  %v2149_v40 = vmax.bf16 %v2101_v14, %v10888_v8  ;;  %v2150_v12 = vmax.bf16 %v2102_v9, %v10901_v1  ;;  %v2151_v51 = vmax.bf16 %v2103_v48, %v10904_v50 }
 0x1d3   : > { %v1732_v21 = vmax.bf16 %v1590_v44, %v1309_v46  ;;  %v3357_v28 = vshrl.u32 %v3100_v35, 16  ;;  %v11090_v7 = vmax.bf16 %v1924_v55, %v1731_v61  ;;  %v3362_v63 = vshll.u32 %v3101_v39, 16  ;;  %v3102_v55 = vld [vmem:[#allocation2 + $0xac] sm:$0x7] }
 0x1d4   : > { %v2197_v58 = vmax.bf16 %v2149_v40, %v11021_v43  ;;  %v3366_v62 = vshrl.u32 %v3101_v39, 16  ;;  %v2198_v25 = vmax.bf16 %v2150_v12, %v11041_v34  ;;  %v2199_v42 = vmax.bf16 %v2151_v51, %v11047_v13  ;;  %v4044_v51 = vld [vmem:[#allocation2 + $0xb0] sm:$0x1] }
 0x1d5   : > { %v11093_v3 = vmax.bf16 %v1927_v60, %v1732_v21  ;;  %v3372_v4 = vshll.u32 %v11086_v17, 16  ;;  %v3364_v52 = vrot.slane %v3362_v63, 5  ;;  %v3376_v27 = vshrl.u32 %v11086_v17, 16 }
 0x1d6   : > { %v2245_v10 = vmax.bf16 %v2197_v58, %v11077_v49  ;;  %v3368_v24 = vrot.slane %v3366_v62, 4  ;;  %v2246_v46 = vmax.bf16 %v2198_v25, %v11090_v7  ;;  %v3856_v32 = vrot.slane %v3101_v39, 5 }
 0x1d7   : > { %v2247_v5 = vmax.bf16 %v2199_v42, %v11093_v3  ;;  %v3374_v56 = vrot.slane %v3372_v4, 5  ;;  %v3365_v20 = vsel %vm9285_vm2, %v3357_v28, %v3364_v52  ;;  %v3378_v59 = vrot.slane %v3376_v27, 4  ;;  %v9126_v28 = vld [vmem:[%s13086_s1 + $0xe0] sm:$0xff]  }
 0x1d8   : > { %v8319_v11 = vrot.slane %v2245_v10, 11  ;;  %v3369_v53 = vor.u32 %v3368_v24, %v3364_v52  ;;  %v2398_v22 = vrot.slane %v2246_v46, 7  ;;  %v3740_v9 = vmax.bf16 %v3365_v20, %v3100_v35  ;;  %v4464_v10 = vld [vmem:[#allocation2 + $0xa8] sm:$0xe]  ;;  %8951 = vmatprep.subr.bf16.mxu0 %v9126_v28 }
 0x1d9   : > { %v2401_v14 = vrot.slane %v2247_v5, 7  ;;  %v3857_v19 = vrot.slane %v3856_v32, 4  ;;  %v3379_v44 = vor.u32 %v3378_v59, %v3374_v56  ;;  %v3858_v61 = vrot.slane %v11086_v17, 5  ;;  %8952 = vmatpush3.bf16.msra.mxu0 %v9126_v28  ;;  %v3104_v28 = vld [vmem:[#allocation2 + $0xbc] sm:$0xf] }
 0x1da   : > { %v3370_v48 = vrot.slane %v3369_v53, 4  ;;  %v4168_v60 = vrot.slane %v3366_v62, 5  ;;  %v2399_v40 = vsel %vm9848_vm14, %v8319_v11, %v2398_v22  ;;  %v2400_v21 = vrot.slane %v2398_v22, 4 }
 0x1db   : > { %v4000_v12 = vmax.bf16 %v3856_v32, %v3740_v9  ;;  %v4169_v58 = vrot.slane %v3362_v63, 6  ;;  %3070 = vst [vmem:[#allocation2 + $0x134] sm:$0xf] %v2399_v40  ;;  %v3380_v25 = vrot.slane %v3379_v44, 4  ;;  %v3859_v42 = vsel %vm9485_vm5, %v3857_v19, %v3858_v61 }
 0x1dc   : > { %v3375_v35 = vsel %vm9285_vm2, %v3370_v48, %v3374_v56  ;;  %v3860_v62 = vrot.slane %v3858_v61, 4  ;;  %v2402_v52 = vsel %vm9848_vm14, %v2400_v21, %v2401_v14  ;;  %v4172_v63 = vrot.slane %v3376_v27, 5 }
 0x1dd   : > { %v3741_v24 = vmax.bf16 %v3375_v35, %v3101_v39  ;;  %v4170_v46 = vor.u32 %v4169_v58, %v4168_v60  ;;  %v8351_v5 = vcombine.low %v2399_v40, %v2402_v52  ;;  %3071 = vst [vmem:[#allocation2 + $0x138] sm:$0xf] %v2402_v52  ;;  %v3742_v32 = vmax.bf16 %v3380_v25, %v3102_v55 }
 0x1de   : > { %v4173_v11 = vrot.slane %v3372_v4, 6  ;;  %v4178_v20 = vshll.u32 %v4044_v51, 16  ;;  %v4572_v22 = vrot.slane %v4464_v10, 6  ;;  %v4574_v14 = vrot.slane %v11086_v17, 6  ;;  %v3103_v4 = vld [vmem:[#allocation2 + $0xb8] sm:$0x8] }
 0x1df   : > { %v4001_v56 = vmax.bf16 %v3859_v42, %v3741_v24  ;;  %v4171_v53 = vrot.slane %v4170_v46, 4  ;;  %v4420_v59 = vmax.bf16 %v4170_v46, %v4000_v12  ;;  %8840 = vmatmul.mubr.bf16.gmra.mrb[24].mxu1 %v8351_v5  ;;  %v4002_v9 = vmax.bf16 %v3860_v62, %v3742_v32 }
 0x1e0   : > { %v4174_v19 = vor.u32 %v4173_v11, %v4172_v63  ;;  %v4180_v48 = vrot.slane %v4178_v20, 6  ;;  %v4573_v39 = vrot.slane %v4572_v22, 4  ;;  %v4577_v44 = vrot.slane %v4044_v51, 6 }
 0x1e1   : > { %v11117_v27 = vmax.bf16 %v4572_v22, %v4420_v59  ;;  %v4788_v55 = vmax.bf16 %v10786_v2, %v10743_v6  ;;  %v4576_v40 = vrot.slane %v4574_v14, 4  ;;  %v4789_v21 = vmax.bf16 %v10798_v31, %v10745_v18  ;;  %v11130_v6 = vld [vmem:[#allocation2 + $0xc0] sm:$0xf] }
 0x1e2   : > { %v4175_v61 = vsel %vm9593_vm8, %v4171_v53, %v4174_v19  ;;  %v4176_v60 = vrot.slane %v4174_v19, 4  ;;  %v4575_v17 = vsel %vm9738_vm11, %v4573_v39, %v4574_v14  ;;  %v4790_v51 = vmax.bf16 %v10803_v16, %v10747_v37 }
 0x1e3   : > { %v4421_v12 = vmax.bf16 %v4175_v61, %v4001_v56  ;;  %v4836_v58 = vmax.bf16 %v4788_v55, %v10925_v41  ;;  %v4578_v25 = vsel %vm9738_vm11, %v4576_v40, %v4577_v44  ;;  %v4837_v18 = vmax.bf16 %v4789_v21, %v10945_v26 }
 0x1e4   : > { %v4181_v35 = vsel %vm9593_vm8, %v4176_v60, %v4180_v48  ;;  %v3382_v42 = vshrl.u32 %v3103_v4, 16  ;;  %v4838_v52 = vmax.bf16 %v4790_v51, %v10951_v30  ;;  %v3387_v46 = vshll.u32 %v3104_v28, 16 }
 0x1e5   : > { %v4422_v62 = vmax.bf16 %v4181_v35, %v4002_v9  ;;  %v11137_v10 = vmax.bf16 %v4575_v17, %v4421_v12  ;;  %v4884_v37 = vmax.bf16 %v4836_v58, %v10981_v47  ;;  %v4885_v24 = vmax.bf16 %v4837_v18, %v10994_v54  ;;  %v3105_v35 = vld [vmem:[#allocation2 + $0xc0] sm:$0x7] }
 0x1e6   : > { %v3391_v63 = vshrl.u32 %v3104_v28, 16  ;;  %v3397_v5 = vshll.u32 %v11130_v6, 16  ;;  %v4886_v11 = vmax.bf16 %v4838_v52, %v10997_v36  ;;  %v3401_v56 = vshrl.u32 %v11130_v6, 16 }
 0x1e7   : > { %v11143_v32 = vmax.bf16 %v4578_v25, %v4422_v62  ;;  %v4932_v20 = vmax.bf16 %v4884_v37, %v11117_v27  ;;  %v4933_v53 = vmax.bf16 %v4885_v24, %v11137_v10  ;;  %v3389_v59 = vrot.slane %v3387_v46, 5  ;;  %v4045_v37 = vld [vmem:[#allocation2 + $0xc4] sm:$0x1] }
 0x1e8   : > { %v3393_v22 = vrot.slane %v3391_v63, 4  ;;  %v3399_v9 = vrot.slane %v3397_v5, 5  ;;  %v3403_v14 = vrot.slane %v3401_v56, 4  ;;  %v3861_v39 = vrot.slane %v3104_v28, 5 }
 0x1e9   : > { %v4934_v19 = vmax.bf16 %v4886_v11, %v11143_v32  ;;  %v8410_v48 = vrot.slane %v4932_v20, 11  ;;  %v5046_v44 = vrot.slane %v4933_v53, 7  ;;  %v3390_v55 = vsel %vm9285_vm2, %v3382_v42, %v3389_v59  ;;  %v4465_v11 = vld [vmem:[#allocation2 + $0xbc] sm:$0xe] }
 0x1ea   : > { %v3394_v61 = vor.u32 %v3393_v22, %v3389_v59  ;;  %v3863_v60 = vrot.slane %v11130_v6, 5  ;;  %v3404_v21 = vor.u32 %v3403_v14, %v3399_v9  ;;  %v3743_v12 = vmax.bf16 %v3390_v55, %v3103_v4 }
 0x1eb   : > { %v5049_v40 = vrot.slane %v4934_v19, 7  ;;  %v3862_v17 = vrot.slane %v3861_v39, 4  ;;  %v5047_v51 = vsel %vm9848_vm14, %v8410_v48, %v5046_v44  ;;  %v5048_v58 = vrot.slane %v5046_v44, 4 }
 0x1ec   : > { %v3395_v25 = vrot.slane %v3394_v61, 4  ;;  %v3865_v18 = vrot.slane %v3863_v60, 4  ;;  %5490 = vst [vmem:[#allocation2 + $0x80] sm:$0xf] %v5047_v51  ;;  %v3405_v62 = vrot.slane %v3404_v21, 4  ;;  %v4003_v42 = vmax.bf16 %v3861_v39, %v3743_v12 }
 0x1ed   : > { %v3864_v52 = vsel %vm9485_vm5, %v3862_v17, %v3863_v60  ;;  %v4182_v24 = vrot.slane %v3391_v63, 5  ;;  %v5050_v4 = vsel %vm9848_vm14, %v5048_v58, %v5049_v40  ;;  %v4183_v53 = vrot.slane %v3387_v46, 6  ;;  %v404_v58 = vld [vmem:[#allocation2 + $0x16c] sm:$0x8] }
 0x1ee   : > { %v3400_v20 = vsel %vm9285_vm2, %v3395_v25, %v3399_v9  ;;  %v4186_v59 = vrot.slane %v3401_v56, 5  ;;  %v8442_v22 = vcombine.low %v5047_v51, %v5050_v4  ;;  %5491 = vst [vmem:[#allocation2 + $0x84] sm:$0xf] %v5050_v4  ;;  %v3745_v48 = vmax.bf16 %v3405_v62, %v3105_v35  ;;  %v405_v62 = vld [vmem:[#allocation2 + $0x170] sm:$0xf] }
 0x1ef   : > { %v3744_v19 = vmax.bf16 %v3400_v20, %v3104_v28  ;;  %v4187_v14 = vrot.slane %v3397_v5, 6  ;;  %v4184_v44 = vor.u32 %v4183_v53, %v4182_v24  ;;  %v4192_v55 = vshll.u32 %v4045_v37, 16 }
 0x1f0   : > { %v4579_v61 = vrot.slane %v4465_v11, 6  ;;  %v4581_v39 = vrot.slane %v11130_v6, 6  ;;  %8919 = vmatprep.mubr.bf16.mxu0 %v8442_v22  ;;  %v4005_v60 = vmax.bf16 %v3865_v18, %v3745_v48  ;;  %v4584_v40 = vrot.slane %v4045_v37, 6  ;;  %v11179_v37 = vld [vmem:[#allocation2 + $0x174] sm:$0xf] }
 0x1f1   : > { %v4004_v63 = vmax.bf16 %v3864_v52, %v3744_v19  ;;  %v4188_v21 = vor.u32 %v4187_v14, %v4186_v59  ;;  %v4185_v12 = vrot.slane %v4184_v44, 4  ;;  %v4194_v17 = vrot.slane %v4192_v55, 6 }
 0x1f2   : > { %v4423_v9 = vmax.bf16 %v4184_v44, %v4003_v42  ;;  %v4580_v46 = vrot.slane %v4579_v61, 4  ;;  %v4583_v51 = vrot.slane %v4581_v39, 4  ;;  %v4791_v28 = vmax.bf16 %v10925_v41, %v10786_v2 }
 0x1f3   : > { %v4190_v56 = vrot.slane %v4188_v21, 4  ;;  %v4792_v5 = vmax.bf16 %v10945_v26, %v10798_v31  ;;  %v4189_v6 = vsel %vm9593_vm8, %v4185_v12, %v4188_v21  ;;  %v4793_v18 = vmax.bf16 %v10951_v30, %v10803_v16 }
 0x1f4   : > { %v4582_v35 = vsel %vm9738_vm11, %v4580_v46, %v4581_v39  ;;  %v11170_v25 = vmax.bf16 %v4579_v61, %v4423_v9  ;;  %v4424_v2 = vmax.bf16 %v4189_v6, %v4004_v63  ;;  %v4585_v31 = vsel %vm9738_vm11, %v4583_v51, %v4584_v40 }
 0x1f5   : > { %v4195_v52 = vsel %vm9593_vm8, %v4190_v56, %v4194_v17  ;;  %v4839_v42 = vmax.bf16 %v4791_v28, %v10981_v47  ;;  %v4840_v11 = vmax.bf16 %v4792_v5, %v10994_v54  ;;  %v4841_v4 = vmax.bf16 %v4793_v18, %v10997_v36 }
 0x1f6   : > { %v4425_v24 = vmax.bf16 %v4195_v52, %v4005_v60  ;;  %v884_v20 = vshrl.u32 %v404_v58, 16  ;;  %v11183_v53 = vmax.bf16 %v4582_v35, %v4424_v2  ;;  %v889_v59 = vshll.u32 %v405_v62, 16  ;;  %v406_v35 = vld [vmem:[#allocation2 + $0x174] sm:$0x7] }
 0x1f7   : > { %v4887_v16 = vmax.bf16 %v4839_v42, %v11117_v27  ;;  %v893_v22 = vshrl.u32 %v405_v62, 16  ;;  %v4888_v48 = vmax.bf16 %v4840_v11, %v11137_v10  ;;  %v4889_v14 = vmax.bf16 %v4841_v4, %v11143_v32  ;;  %v1334_v4 = vld [vmem:[#allocation2 + $0x178] sm:$0x1] }
 0x1f8   : > { %v11186_v19 = vmax.bf16 %v4585_v31, %v4425_v24  ;;  %v899_v44 = vshll.u32 %v11179_v37, 16  ;;  %v891_v61 = vrot.slane %v889_v59, 5  ;;  %v903_v63 = vshrl.u32 %v11179_v37, 16 }
 0x1f9   : > { %v4935_v55 = vmax.bf16 %v4887_v16, %v11170_v25  ;;  %v895_v39 = vrot.slane %v893_v22, 4  ;;  %v4936_v60 = vmax.bf16 %v4888_v48, %v11183_v53  ;;  %v1186_v12 = vrot.slane %v405_v62, 5 }
 0x1fa   : > { %v4937_v21 = vmax.bf16 %v4889_v14, %v11186_v19  ;;  %v901_v40 = vrot.slane %v899_v44, 5  ;;  %v892_v9 = vsel %vm9285_vm2, %v884_v20, %v891_v61  ;;  %v905_v56 = vrot.slane %v903_v63, 4  ;;  %v9129_v20 = vld [vmem:[%s13086_s1 + $0xe8] sm:$0xff]  }
 0x1fb   : > { %v8411_v17 = vrot.slane %v4935_v55, 11  ;;  %v896_v46 = vor.u32 %v895_v39, %v891_v61  ;;  %v5053_v51 = vrot.slane %v4936_v60, 7  ;;  %v1047_v5 = vmax.bf16 %v892_v9, %v404_v58  ;;  %v1757_v55 = vld [vmem:[#allocation2 + $0x170] sm:$0xe]  ;;  %8953 = vmatprep.subr.bf16.mxu0 %v9129_v20 }
 0x1fc   : > { %v5056_v28 = vrot.slane %v4937_v21, 7  ;;  %v1187_v6 = vrot.slane %v1186_v12, 4  ;;  %v906_v52 = vor.u32 %v905_v56, %v901_v40  ;;  %v1188_v2 = vrot.slane %v11179_v37, 5  ;;  %8954 = vmatpush3.bf16.msra.mxu0 %v9129_v20  ;;  %v408_v20 = vld [vmem:[#allocation2 + $0x184] sm:$0xf] }
 0x1fd   : > { %v897_v18 = vrot.slane %v896_v46, 4  ;;  %v1591_v31 = vrot.slane %v893_v22, 5  ;;  %v5054_v42 = vsel %vm9848_vm14, %v8411_v17, %v5053_v51  ;;  %v5055_v24 = vrot.slane %v5053_v51, 4 }
 0x1fe   : > { %v1310_v11 = vmax.bf16 %v1186_v12, %v1047_v5  ;;  %v1592_v16 = vrot.slane %v889_v59, 6  ;;  %5492 = vst [vmem:[#allocation2 + $0x94] sm:$0xf] %v5054_v42  ;;  %v907_v48 = vrot.slane %v906_v52, 4  ;;  %v1189_v14 = vsel %vm9485_vm5, %v1187_v6, %v1188_v2 }
 0x1ff   : > { %v902_v58 = vsel %vm9285_vm2, %v897_v18, %v901_v40  ;;  %v1190_v22 = vrot.slane %v1188_v2, 4  ;;  %v5057_v61 = vsel %vm9848_vm14, %v5055_v24, %v5056_v28  ;;  %v1595_v59 = vrot.slane %v903_v63, 5 }
 0x200   : > { %v1048_v39 = vmax.bf16 %v902_v58, %v405_v62  ;;  %v1593_v60 = vor.u32 %v1592_v16, %v1591_v31  ;;  %v8443_v21 = vcombine.low %v5054_v42, %v5057_v61  ;;  %5493 = vst [vmem:[#allocation2 + $0x98] sm:$0xf] %v5057_v61  ;;  %v1049_v12 = vmax.bf16 %v907_v48, %v406_v35 }
 0x201   : > { %v1596_v17 = vrot.slane %v899_v44, 6  ;;  %v1601_v9 = vshll.u32 %v1334_v4, 16  ;;  %v1928_v51 = vrot.slane %v1757_v55, 6  ;;  %v1930_v28 = vrot.slane %v11179_v37, 6  ;;  %v407_v44 = vld [vmem:[#allocation2 + $0x180] sm:$0x8] }
 0x202   : > { %v1311_v40 = vmax.bf16 %v1189_v14, %v1048_v39  ;;  %v1594_v46 = vrot.slane %v1593_v60, 4  ;;  %v1733_v56 = vmax.bf16 %v1593_v60, %v1310_v11  ;;  %8920 = vmatmul.mubr.bf16.gmra.mrb[8].mxu0 %v8443_v21  ;;  %v1312_v5 = vmax.bf16 %v1190_v22, %v1049_v12 }
 0x203   : > { %v1597_v6 = vor.u32 %v1596_v17, %v1595_v59  ;;  %v1603_v18 = vrot.slane %v1601_v9, 6  ;;  %v1929_v62 = vrot.slane %v1928_v51, 4  ;;  %v1933_v52 = vrot.slane %v1334_v4, 6 }
 0x204   : > { %v11210_v63 = vmax.bf16 %v1928_v51, %v1733_v56  ;;  %v2104_v35 = vmax.bf16 %v10888_v8, %v10844_v33  ;;  %v1932_v42 = vrot.slane %v1930_v28, 4  ;;  %v2105_v24 = vmax.bf16 %v10901_v1, %v10853_v57  ;;  %v11223_v33 = vld [vmem:[#allocation2 + $0x188] sm:$0xf] }
 0x205   : > { %v1598_v2 = vsel %vm9593_vm8, %v1594_v46, %v1597_v6  ;;  %v1599_v31 = vrot.slane %v1597_v6, 4  ;;  %v1931_v37 = vsel %vm9738_vm11, %v1929_v62, %v1930_v28  ;;  %v2106_v4 = vmax.bf16 %v10904_v50, %v10858_v45 }
 0x206   : > { %v1734_v11 = vmax.bf16 %v1598_v2, %v1311_v40  ;;  %v2152_v16 = vmax.bf16 %v2104_v35, %v11021_v43  ;;  %v1934_v48 = vsel %vm9738_vm11, %v1932_v42, %v1933_v52  ;;  %v2153_v57 = vmax.bf16 %v2105_v24, %v11041_v34 }
 0x207   : > { %v1604_v58 = vsel %vm9593_vm8, %v1599_v31, %v1603_v18  ;;  %v909_v14 = vshrl.u32 %v407_v44, 16  ;;  %v2154_v61 = vmax.bf16 %v2106_v4, %v11047_v13  ;;  %v914_v60 = vshll.u32 %v408_v20, 16 }
 0x208   : > { %v1735_v22 = vmax.bf16 %v1604_v58, %v1312_v5  ;;  %v11230_v55 = vmax.bf16 %v1931_v37, %v1734_v11  ;;  %v2200_v45 = vmax.bf16 %v2152_v16, %v11077_v49  ;;  %v2201_v39 = vmax.bf16 %v2153_v57, %v11090_v7  ;;  %v409_v58 = vld [vmem:[#allocation2 + $0x188] sm:$0x7] }
 0x209   : > { %v918_v59 = vshrl.u32 %v408_v20, 16  ;;  %v924_v21 = vshll.u32 %v11223_v33, 16  ;;  %v2202_v17 = vmax.bf16 %v2154_v61, %v11093_v3  ;;  %v928_v40 = vshrl.u32 %v11223_v33, 16 }
 0x20a   : > { %v11236_v12 = vmax.bf16 %v1934_v48, %v1735_v22  ;;  %v2248_v9 = vmax.bf16 %v2200_v45, %v11210_v63  ;;  %v2249_v46 = vmax.bf16 %v2201_v39, %v11230_v55  ;;  %v916_v56 = vrot.slane %v914_v60, 5  ;;  %v1335_v45 = vld [vmem:[#allocation2 + $0x18c] sm:$0x1] }
 0x20b   : > { %v920_v51 = vrot.slane %v918_v59, 4  ;;  %v926_v5 = vrot.slane %v924_v21, 5  ;;  %v930_v28 = vrot.slane %v928_v40, 4  ;;  %v1191_v62 = vrot.slane %v408_v20, 5 }
 0x20c   : > { %v2250_v6 = vmax.bf16 %v2202_v17, %v11236_v12  ;;  %v8320_v18 = vrot.slane %v2248_v9, 11  ;;  %v2405_v52 = vrot.slane %v2249_v46, 7  ;;  %v917_v35 = vsel %vm9285_vm2, %v909_v14, %v916_v56  ;;  %v1758_v17 = vld [vmem:[#allocation2 + $0x184] sm:$0xe] }
 0x20d   : > { %v921_v2 = vor.u32 %v920_v51, %v916_v56  ;;  %v1193_v31 = vrot.slane %v11223_v33, 5  ;;  %v931_v24 = vor.u32 %v930_v28, %v926_v5  ;;  %v1050_v11 = vmax.bf16 %v917_v35, %v407_v44 }
 0x20e   : > { %v2408_v42 = vrot.slane %v2250_v6, 7  ;;  %v1192_v37 = vrot.slane %v1191_v62, 4  ;;  %v2406_v4 = vsel %vm9848_vm14, %v8320_v18, %v2405_v52  ;;  %v2407_v16 = vrot.slane %v2405_v52, 4 }
 0x20f   : > { %v922_v48 = vrot.slane %v921_v2, 4  ;;  %v1195_v57 = vrot.slane %v1193_v31, 4  ;;  %3072 = vst [vmem:[#allocation2 + $0x148] sm:$0xf] %v2406_v4  ;;  %v932_v22 = vrot.slane %v931_v24, 4  ;;  %v1313_v14 = vmax.bf16 %v1191_v62, %v1050_v11 }
 0x210   : > { %v1194_v61 = vsel %vm9485_vm5, %v1192_v37, %v1193_v31  ;;  %v1605_v39 = vrot.slane %v918_v59, 5  ;;  %v2409_v44 = vsel %vm9848_vm14, %v2407_v16, %v2408_v42  ;;  %v1606_v46 = vrot.slane %v914_v60, 6  ;;  %v3106_v16 = vld [vmem:[#allocation2 + $0xcc] sm:$0x8] }
 0x211   : > { %v927_v9 = vsel %vm9285_vm2, %v922_v48, %v926_v5  ;;  %v1609_v56 = vrot.slane %v928_v40, 5  ;;  %v8352_v51 = vcombine.low %v2406_v4, %v2409_v44  ;;  %3073 = vst [vmem:[#allocation2 + $0x14c] sm:$0xf] %v2409_v44  ;;  %v1052_v18 = vmax.bf16 %v932_v22, %v409_v58  ;;  %v3107_v22 = vld [vmem:[#allocation2 + $0xd0] sm:$0xf] }
 0x212   : > { %v1051_v6 = vmax.bf16 %v927_v9, %v408_v20  ;;  %v1610_v28 = vrot.slane %v924_v21, 6  ;;  %v1607_v52 = vor.u32 %v1606_v46, %v1605_v39  ;;  %v1615_v35 = vshll.u32 %v1335_v45, 16 }
 0x213   : > { %v1935_v2 = vrot.slane %v1758_v17, 6  ;;  %v1937_v62 = vrot.slane %v11223_v33, 6  ;;  %8843 = vmatprep.mubr.bf16.mxu1 %v8352_v51  ;;  %v1315_v31 = vmax.bf16 %v1195_v57, %v1052_v18  ;;  %v1940_v42 = vrot.slane %v1335_v45, 6 }
 0x214   : > { %v1314_v59 = vmax.bf16 %v1194_v61, %v1051_v6  ;;  %v1611_v24 = vor.u32 %v1610_v28, %v1609_v56  ;;  %v1608_v11 = vrot.slane %v1607_v52, 4  ;;  %v1617_v37 = vrot.slane %v1615_v35, 6 }
 0x215   : > { %v1736_v5 = vmax.bf16 %v1607_v52, %v1313_v14  ;;  %v1936_v60 = vrot.slane %v1935_v2, 4  ;;  %v1939_v4 = vrot.slane %v1937_v62, 4  ;;  %v2107_v20 = vmax.bf16 %v11021_v43, %v10888_v8  ;;  %v11270_v43 = vld [vmem:[#allocation2 + $0xd4] sm:$0xf] }
 0x216   : > { %v1613_v40 = vrot.slane %v1611_v24, 4  ;;  %v2108_v21 = vmax.bf16 %v11041_v34, %v10901_v1  ;;  %v1612_v33 = vsel %vm9593_vm8, %v1608_v11, %v1611_v24  ;;  %v2109_v57 = vmax.bf16 %v11047_v13, %v10904_v50 }
 0x217   : > { %v1938_v58 = vsel %vm9738_vm11, %v1936_v60, %v1937_v62  ;;  %v2059_v48 = vmax.bf16 %v1935_v2, %v1736_v5  ;;  %v1737_v14 = vmax.bf16 %v1612_v33, %v1314_v59  ;;  %v1941_v8 = vsel %vm9738_vm11, %v1939_v4, %v1940_v42  ;;  %v4046_v33 = vld [vmem:[#allocation2 + $0xd8] sm:$0x1] }
 0x218   : > { %v1618_v61 = vsel %vm9593_vm8, %v1613_v40, %v1617_v37  ;;  %v2155_v1 = vmax.bf16 %v2107_v20, %v11077_v49  ;;  %v2156_v45 = vmax.bf16 %v2108_v21, %v11090_v7  ;;  %v2157_v39 = vmax.bf16 %v2109_v57, %v11093_v3  ;;  %v3108_v20 = vld [vmem:[#allocation2 + $0xd4] sm:$0x7] }
 0x219   : > { %v1738_v34 = vmax.bf16 %v1618_v61, %v1315_v31  ;;  %v3407_v17 = vshrl.u32 %v3106_v16, 16  ;;  %v2060_v44 = vmax.bf16 %v1938_v58, %v1737_v14  ;;  %v3412_v13 = vshll.u32 %v3107_v22, 16  ;;  %v4466_v14 = vld [vmem:[#allocation2 + $0xd0] sm:$0xe] }
 0x21a   : > { %v2203_v50 = vmax.bf16 %v2155_v1, %v11210_v63  ;;  %v3416_v9 = vshrl.u32 %v3107_v22, 16  ;;  %v2204_v56 = vmax.bf16 %v2156_v45, %v11230_v55  ;;  %v2205_v51 = vmax.bf16 %v2157_v39, %v11236_v12 }
 0x21b   : > { %v2061_v46 = vmax.bf16 %v1941_v8, %v1738_v34  ;;  %v3422_v49 = vshll.u32 %v11270_v43, 16  ;;  %v3414_v18 = vrot.slane %v3412_v13, 5  ;;  %v3426_v7 = vshrl.u32 %v11270_v43, 16  ;;  %v9132_v8 = vld [vmem:[%s13086_s1 + $0xf0] sm:$0xff]  }
 0x21c   : > { %v2251_v6 = vmax.bf16 %v2203_v50, %v2059_v48  ;;  %v3418_v28 = vrot.slane %v3416_v9, 4  ;;  %v2252_v52 = vmax.bf16 %v2204_v56, %v2060_v44  ;;  %v3866_v2 = vrot.slane %v3107_v22, 5  ;;  %8955 = vmatprep.subr.bf16.mxu0 %v9132_v8 }
 0x21d   : > { %v2253_v3 = vmax.bf16 %v2205_v51, %v2061_v46  ;;  %v3424_v35 = vrot.slane %v3422_v49, 5  ;;  %v3415_v63 = vsel %vm9285_vm2, %v3407_v17, %v3414_v18  ;;  %v3428_v31 = vrot.slane %v3426_v7, 4  ;;  %8956 = vmatpush3.bf16.msra.mxu0 %v9132_v8 }
 0x21e   : > { %v8321_v62 = vrot.slane %v2251_v6, 11  ;;  %v3419_v59 = vor.u32 %v3418_v28, %v3414_v18  ;;  %v2412_v55 = vrot.slane %v2252_v52, 7  ;;  %v3746_v12 = vmax.bf16 %v3415_v63, %v3106_v16 }
 0x21f   : > { %v2415_v24 = vrot.slane %v2253_v3, 7  ;;  %v3867_v42 = vrot.slane %v3866_v2, 4  ;;  %v3429_v37 = vor.u32 %v3428_v31, %v3424_v35  ;;  %v3868_v5 = vrot.slane %v11270_v43, 5 }
 0x220   : > { %v3420_v11 = vrot.slane %v3419_v59, 4  ;;  %v4196_v60 = vrot.slane %v3416_v9, 5  ;;  %v2413_v40 = vsel %vm9848_vm14, %v8321_v62, %v2412_v55  ;;  %v2414_v4 = vrot.slane %v2412_v55, 4 }
 0x221   : > { %v4006_v21 = vmax.bf16 %v3866_v2, %v3746_v12  ;;  %v4197_v58 = vrot.slane %v3412_v13, 6  ;;  %3074 = vst [vmem:[#allocation2 + $0x15c] sm:$0xf] %v2413_v40  ;;  %v3430_v57 = vrot.slane %v3429_v37, 4  ;;  %v3869_v16 = vsel %vm9485_vm5, %v3867_v42, %v3868_v5  ;;  %v3110_v12 = vld [vmem:[#allocation2 + $0xe4] sm:$0xf] }
 0x222   : > { %v3425_v48 = vsel %vm9285_vm2, %v3420_v11, %v3424_v35  ;;  %v3870_v61 = vrot.slane %v3868_v5, 4  ;;  %v2416_v1 = vsel %vm9848_vm14, %v2414_v4, %v2415_v24  ;;  %v4200_v39 = vrot.slane %v3426_v7, 5  ;;  %v3109_v35 = vld [vmem:[#allocation2 + $0xe0] sm:$0x8] }
 0x223   : > { %v3747_v34 = vmax.bf16 %v3425_v48, %v3107_v22  ;;  %v4198_v45 = vor.u32 %v4197_v58, %v4196_v60  ;;  %v8353_v17 = vcombine.low %v2413_v40, %v2416_v1  ;;  %3075 = vst [vmem:[#allocation2 + $0x160] sm:$0xf] %v2416_v1  ;;  %v3748_v44 = vmax.bf16 %v3430_v57, %v3108_v20 }
 0x224   : > { %v4201_v50 = vrot.slane %v3422_v49, 6  ;;  %v4206_v13 = vshll.u32 %v4046_v33, 16  ;;  %v4586_v51 = vrot.slane %v4466_v14, 6  ;;  %v4588_v52 = vrot.slane %v11270_v43, 6 }
 0x225   : > { %v4007_v9 = vmax.bf16 %v3869_v16, %v3747_v34  ;;  %v4199_v46 = vrot.slane %v4198_v45, 4  ;;  %v4426_v56 = vmax.bf16 %v4198_v45, %v4006_v21  ;;  %8844 = vmatmul.mubr.bf16.gmra.mrb[28].mxu1 %v8353_v17  ;;  %v4008_v6 = vmax.bf16 %v3870_v61, %v3748_v44 }
 0x226   : > { %v4202_v18 = vor.u32 %v4201_v50, %v4200_v39  ;;  %v4208_v28 = vrot.slane %v4206_v13, 6  ;;  %v4587_v22 = vrot.slane %v4586_v51, 4  ;;  %v4591_v3 = vrot.slane %v4046_v33, 6 }
 0x227   : > { %v11294_v7 = vmax.bf16 %v4586_v51, %v4426_v56  ;;  %v4794_v49 = vmax.bf16 %v10981_v47, %v10925_v41  ;;  %v4590_v63 = vrot.slane %v4588_v52, 4  ;;  %v4795_v59 = vmax.bf16 %v10994_v54, %v10945_v26  ;;  %v11307_v41 = vld [vmem:[#allocation2 + $0xe8] sm:$0xf] }
 0x228   : > { %v4203_v2 = vsel %vm9593_vm8, %v4199_v46, %v4202_v18  ;;  %v4204_v62 = vrot.slane %v4202_v18, 4  ;;  %v4589_v43 = vsel %vm9738_vm11, %v4587_v22, %v4588_v52  ;;  %v4796_v55 = vmax.bf16 %v10997_v36, %v10951_v30  ;;  %v3111_v52 = vld [vmem:[#allocation2 + $0xe8] sm:$0x7] }
 0x229   : > { %v4427_v31 = vmax.bf16 %v4203_v2, %v4007_v9  ;;  %v4842_v24 = vmax.bf16 %v4794_v49, %v11117_v27  ;;  %v4592_v11 = vsel %vm9738_vm11, %v4590_v63, %v4591_v3  ;;  %v4843_v26 = vmax.bf16 %v4795_v59, %v11137_v10  ;;  %v4047_v63 = vld [vmem:[#allocation2 + $0xec] sm:$0x1] }
 0x22a   : > { %v4209_v42 = vsel %vm9593_vm8, %v4204_v62, %v4208_v28  ;;  %v3432_v37 = vshrl.u32 %v3109_v35, 16  ;;  %v4844_v40 = vmax.bf16 %v4796_v55, %v11143_v32  ;;  %v3437_v20 = vshll.u32 %v3110_v12, 16 }
 0x22b   : > { %v4428_v5 = vmax.bf16 %v4209_v42, %v4008_v6  ;;  %v11314_v60 = vmax.bf16 %v4589_v43, %v4427_v31  ;;  %v4890_v30 = vmax.bf16 %v4842_v24, %v11170_v25  ;;  %v4891_v4 = vmax.bf16 %v4843_v26, %v11183_v53  ;;  %v4467_v31 = vld [vmem:[#allocation2 + $0xe4] sm:$0xe] }
 0x22c   : > { %v3441_v21 = vshrl.u32 %v3110_v12, 16  ;;  %v3447_v33 = vshll.u32 %v11307_v41, 16  ;;  %v4892_v48 = vmax.bf16 %v4844_v40, %v11186_v19  ;;  %v3451_v16 = vshrl.u32 %v11307_v41, 16 }
 0x22d   : > { %v11320_v58 = vmax.bf16 %v4592_v11, %v4428_v5  ;;  %v4938_v57 = vmax.bf16 %v4890_v30, %v11294_v7  ;;  %v4939_v61 = vmax.bf16 %v4891_v4, %v11314_v60  ;;  %v3439_v14 = vrot.slane %v3437_v20, 5 }
 0x22e   : > { %v3443_v8 = vrot.slane %v3441_v21, 4  ;;  %v3449_v1 = vrot.slane %v3447_v33, 5  ;;  %v3453_v39 = vrot.slane %v3451_v16, 4  ;;  %v3871_v17 = vrot.slane %v3110_v12, 5 }
 0x22f   : > { %v4940_v34 = vmax.bf16 %v4892_v48, %v11320_v58  ;;  %v8412_v45 = vrot.slane %v4938_v57, 11  ;;  %v5060_v44 = vrot.slane %v4939_v61, 7  ;;  %v3440_v50 = vsel %vm9285_vm2, %v3432_v37, %v3439_v14 }
 0x230   : > { %v3444_v13 = vor.u32 %v3443_v8, %v3439_v14  ;;  %v3873_v9 = vrot.slane %v11307_v41, 5  ;;  %v3454_v56 = vor.u32 %v3453_v39, %v3449_v1  ;;  %v3749_v51 = vmax.bf16 %v3440_v50, %v3109_v35 }
 0x231   : > { %v5063_v46 = vrot.slane %v4940_v34, 7  ;;  %v3872_v6 = vrot.slane %v3871_v17, 4  ;;  %v5061_v18 = vsel %vm9848_vm14, %v8412_v45, %v5060_v44  ;;  %v5062_v28 = vrot.slane %v5060_v44, 4  ;;  %v3112_v44 = vld [vmem:[#allocation2 + $0xf4] sm:$0x8] }
 0x232   : > { %v3445_v22 = vrot.slane %v3444_v13, 4  ;;  %v3875_v3 = vrot.slane %v3873_v9, 4  ;;  %5494 = vst [vmem:[#allocation2 + $0xa8] sm:$0xf] %v5061_v18  ;;  %v3455_v49 = vrot.slane %v3454_v56, 4  ;;  %v4009_v62 = vmax.bf16 %v3871_v17, %v3749_v51 }
 0x233   : > { %v3874_v2 = vsel %vm9485_vm5, %v3872_v6, %v3873_v9  ;;  %v4210_v59 = vrot.slane %v3441_v21, 5  ;;  %v5064_v35 = vsel %vm9848_vm14, %v5062_v28, %v5063_v46  ;;  %v4211_v55 = vrot.slane %v3437_v20, 6  ;;  %v3113_v9 = vld [vmem:[#allocation2 + $0xf8] sm:$0xf] }
 0x234   : > { %v3450_v43 = vsel %vm9285_vm2, %v3445_v22, %v3449_v1  ;;  %v4214_v24 = vrot.slane %v3451_v16, 5  ;;  %v8444_v42 = vcombine.low %v5061_v18, %v5064_v35  ;;  %5495 = vst [vmem:[#allocation2 + $0xac] sm:$0xf] %v5064_v35  ;;  %v3751_v26 = vmax.bf16 %v3455_v49, %v3111_v52  ;;  %v13309_v6 = vld [vmem:[#allocation4_spill] sm:$0xff]  ;;  %v13310_v18 = vld [vmem:[#allocation3_spill] sm:$0xff]  ;;  %v13312_v49 = vld [vmem:[#allocation5_spill] sm:$0xff] }
 0x235   : > { %v3750_v11 = vmax.bf16 %v3450_v43, %v3110_v12  ;;  %v4215_v37 = vrot.slane %v3447_v33, 6  ;;  %v4212_v5 = vor.u32 %v4211_v55, %v4210_v59  ;;  %v4220_v40 = vshll.u32 %v4047_v63, 16 }
 0x236   : > { %v4593_v30 = vrot.slane %v4467_v31, 6  ;;  %v4595_v4 = vrot.slane %v11307_v41, 6  ;;  %8923 = vmatprep.mubr.bf16.mxu0 %v8444_v42  ;;  %v4011_v48 = vmax.bf16 %v3875_v3, %v3751_v26  ;;  %v4598_v61 = vrot.slane %v4047_v63, 6  ;;  %v13311_v3 = vld [vmem:[#allocation6_spill] sm:$0xff] }
 0x237   : > { %v4010_v21 = vmax.bf16 %v3874_v2, %v3750_v11  ;;  %v4216_v57 = vor.u32 %v4215_v37, %v4214_v24  ;;  %v4213_v14 = vrot.slane %v4212_v5, 4  ;;  %v4222_v8 = vrot.slane %v4220_v40, 6 }
 0x238   : > { %v4429_v1 = vmax.bf16 %v4212_v5, %v4009_v62  ;;  %v4594_v20 = vrot.slane %v4593_v30, 4  ;;  %v4597_v34 = vrot.slane %v4595_v4, 4  ;;  %v4797_v12 = vmax.bf16 %v11117_v27, %v10981_v47 }
 0x239   : > { %v4218_v16 = vrot.slane %v4216_v57, 4  ;;  %v4798_v33 = vmax.bf16 %v11137_v10, %v10994_v54  ;;  %v4217_v41 = vsel %vm9593_vm8, %v4213_v14, %v4216_v57  ;;  %v4799_v17 = vmax.bf16 %v11143_v32, %v10997_v36  ;;  %v11360_v36 = vld [vmem:[#allocation2 + $0xfc] sm:$0xf] }
 0x23a   : > { %v4596_v45 = vsel %vm9738_vm11, %v4594_v20, %v4595_v4  ;;  %v11347_v39 = vmax.bf16 %v4593_v30, %v4429_v1  ;;  %v4430_v13 = vmax.bf16 %v4217_v41, %v4010_v21  ;;  %v4599_v47 = vsel %vm9738_vm11, %v4597_v34, %v4598_v61 }
 0x23b   : > { %v4223_v50 = vsel %vm9593_vm8, %v4218_v16, %v4222_v8  ;;  %v4845_v54 = vmax.bf16 %v4797_v12, %v11170_v25  ;;  %v4846_v56 = vmax.bf16 %v4798_v33, %v11183_v53  ;;  %v4847_v51 = vmax.bf16 %v4799_v17, %v11186_v19  ;;  %v3114_v33 = vld [vmem:[#allocation2 + $0xfc] sm:$0x7] }
 0x23c   : > { %v4431_v46 = vmax.bf16 %v4223_v50, %v4011_v48  ;;  %v8362_v28 = vcombine.low %v13310_v18, %v13309_v6  ;;  %v11362_v52 = vmax.bf16 %v4596_v45, %v4430_v13  ;;  %v8363_v2 = vcombine.low %v13312_v49, %v13311_v3  ;;  %v4468_v18 = vld [vmem:[#allocation2 + $0xf8] sm:$0xe] }
 0x23d   : > { %v4893_v22 = vmax.bf16 %v4845_v54, %v11294_v7  ;;  %v3457_v62 = vshrl.u32 %v3112_v44, 16  ;;  %v4894_v59 = vmax.bf16 %v4846_v56, %v11314_v60  ;;  %v4895_v31 = vmax.bf16 %v4847_v51, %v11320_v58  ;;  %v4048_v54 = vld [vmem:[#allocation2 + $0x100] sm:$0x1] }
 0x23e   : > { %v11367_v63 = vmax.bf16 %v4599_v47, %v4431_v46  ;;  %8863 = vmatprep.mubr.bf16.mxu1 %v8362_v28  ;;  %v3462_v35 = vshll.u32 %v3113_v9, 16  ;;  %v3466_v55 = vshrl.u32 %v3113_v9, 16  ;;  %v3472_v24 = vshll.u32 %v11360_v36, 16 }
 0x23f   : > { %v4941_v43 = vmax.bf16 %v4893_v22, %v11347_v39  ;;  %8864 = vmatmul.mubr.bf16.vlgmr.msra.gmra.mrb[0].mxu1 %v8363_v2  ;;  %v3476_v42 = vshrl.u32 %v11360_v36, 16  ;;  %v4942_v11 = vmax.bf16 %v4894_v59, %v11362_v52  ;;  %v3876_v5 = vrot.slane %v3113_v9, 5 }
 0x240   : > { %v4943_v26 = vmax.bf16 %v4895_v31, %v11367_v63  ;;  %v3464_v37 = vrot.slane %v3462_v35, 5  ;;  %v3468_v30 = vrot.slane %v3466_v55, 4  ;;  %v3474_v4 = vrot.slane %v3472_v24, 5 }
 0x241   : > { %v8413_v40 = vrot.slane %v4941_v43, 11  ;;  %v3478_v21 = vrot.slane %v3476_v42, 4  ;;  %v5067_v48 = vrot.slane %v4942_v11, 7  ;;  %v3877_v14 = vrot.slane %v3876_v5, 4 }
 0x242   : > { %v5070_v57 = vrot.slane %v4943_v26, 7  ;;  %v3465_v61 = vsel %vm9285_vm2, %v3457_v62, %v3464_v37  ;;  %v3469_v8 = vor.u32 %v3468_v30, %v3464_v37  ;;  %v3878_v16 = vrot.slane %v11360_v36, 5 }
 0x243   : > { %v3479_v1 = vor.u32 %v3478_v21, %v3474_v4  ;;  %v3752_v20 = vmax.bf16 %v3465_v61, %v3112_v44  ;;  %v5068_v34 = vsel %vm9848_vm14, %v8413_v40, %v5067_v48  ;;  %v5069_v12 = vrot.slane %v5067_v48, 4  ;;  %v9135_v44 = vld [vmem:[%s13086_s1 + $0xf8] sm:$0xff]   ;;  %v3116_v61 = vld [vmem:[#allocation2 + $0x10c] sm:$0xf] }
 0x244   : > { %v4224_v41 = vrot.slane %v3466_v55, 5  ;;  %v4225_v45 = vrot.slane %v3462_v35, 6  ;;  %5496 = vst [vmem:[#allocation2 + $0xbc] sm:$0xf] %v5068_v34  ;;  %v3470_v17 = vrot.slane %v3469_v8, 4  ;;  %v3879_v13 = vsel %vm9485_vm5, %v3877_v14, %v3878_v16  ;;  %8957 = vmatprep.subr.bf16.mxu0 %v9135_v44 }
 0x245   : > { %v3480_v50 = vrot.slane %v3479_v1, 4  ;;  %v3880_v47 = vrot.slane %v3878_v16, 4  ;;  %v5071_v46 = vsel %vm9848_vm14, %v5069_v12, %v5070_v57  ;;  %v4012_v56 = vmax.bf16 %v3876_v5, %v3752_v20  ;;  %8958 = vmatpush3.bf16.msra.mxu0 %v9135_v44  ;;  %v3115_v57 = vld [vmem:[#allocation2 + $0x108] sm:$0x8]  ;;  %v11408_v20 = vld [vmem:[#allocation2 + $0x110] sm:$0xf] }
 0x246   : > { %v4226_v51 = vor.u32 %v4225_v45, %v4224_v41  ;;  %v4228_v6 = vrot.slane %v3476_v42, 5  ;;  %v8445_v28 = vcombine.low %v5068_v34, %v5071_v46  ;;  %5497 = vst [vmem:[#allocation2 + $0xc0] sm:$0xf] %v5071_v46  ;;  %v3475_v22 = vsel %vm9285_vm2, %v3470_v17, %v3474_v4 }
 0x247   : > { %v3754_v3 = vmax.bf16 %v3480_v50, %v3114_v33  ;;  %v4229_v49 = vrot.slane %v3472_v24, 6  ;;  %v3753_v2 = vmax.bf16 %v3475_v22, %v3113_v9  ;;  %v4234_v59 = vshll.u32 %v4048_v54, 16 }
 0x248   : > { %v4227_v62 = vrot.slane %v4226_v51, 4  ;;  %v4432_v31 = vmax.bf16 %v4226_v51, %v4012_v56  ;;  %8924 = vmatmul.mubr.bf16.gmra.mrb[12].mxu0 %v8445_v28  ;;  %v4600_v55 = vrot.slane %v4468_v18, 6  ;;  %v4602_v42 = vrot.slane %v11360_v36, 6 }
 0x249   : > { %v4014_v35 = vmax.bf16 %v3880_v47, %v3754_v3  ;;  %v4230_v43 = vor.u32 %v4229_v49, %v4228_v6  ;;  %v4013_v11 = vmax.bf16 %v3879_v13, %v3753_v2  ;;  %v4236_v26 = vrot.slane %v4234_v59, 6 }
 0x24a   : > { %v4605_v37 = vrot.slane %v4048_v54, 6  ;;  %v4800_v5 = vmax.bf16 %v11170_v25, %v11117_v27  ;;  %v4601_v40 = vrot.slane %v4600_v55, 4  ;;  %v4604_v30 = vrot.slane %v4602_v42, 4 }
 0x24b   : > { %v4231_v24 = vsel %vm9593_vm8, %v4227_v62, %v4230_v43  ;;  %v4232_v9 = vrot.slane %v4230_v43, 4  ;;  %v11395_v21 = vmax.bf16 %v4600_v55, %v4432_v31  ;;  %v4801_v48 = vmax.bf16 %v11183_v53, %v11137_v10 }
 0x24c   : > { %v4433_v4 = vmax.bf16 %v4231_v24, %v4013_v11  ;;  %v4802_v36 = vmax.bf16 %v11186_v19, %v11143_v32  ;;  %v4603_v14 = vsel %vm9738_vm11, %v4601_v40, %v4602_v42  ;;  %v4606_v8 = vsel %vm9738_vm11, %v4604_v30, %v4605_v37 }
 0x24d   : > { %v4237_v27 = vsel %vm9593_vm8, %v4232_v9, %v4236_v26  ;;  %v4848_v1 = vmax.bf16 %v4800_v5, %v11294_v7  ;;  %v4849_v32 = vmax.bf16 %v4801_v48, %v11314_v60  ;;  %v3482_v33 = vshrl.u32 %v3115_v57, 16  ;;  %v3117_v5 = vld [vmem:[#allocation2 + $0x110] sm:$0x7]  ;;  %v4049_v9 = vld [vmem:[#allocation2 + $0x114] sm:$0x1] }
 0x24e   : > { %v4434_v16 = vmax.bf16 %v4237_v27, %v4014_v35  ;;  %v11410_v10 = vmax.bf16 %v4603_v14, %v4433_v4  ;;  %v4850_v34 = vmax.bf16 %v4802_v36, %v11320_v58  ;;  %v3487_v41 = vshll.u32 %v3116_v61, 16 }
 0x24f   : > { %v4896_v12 = vmax.bf16 %v4848_v1, %v11347_v39  ;;  %v3491_v45 = vshrl.u32 %v3116_v61, 16  ;;  %v4897_v50 = vmax.bf16 %v4849_v32, %v11362_v52  ;;  %v3497_v47 = vshll.u32 %v11408_v20, 16 }
 0x250   : > { %v11415_v17 = vmax.bf16 %v4606_v8, %v4434_v16  ;;  %v4898_v13 = vmax.bf16 %v4850_v34, %v11367_v63  ;;  %v3489_v44 = vrot.slane %v3487_v41, 5  ;;  %v3501_v56 = vshrl.u32 %v11408_v20, 16 }
 0x251   : > { %v4944_v54 = vmax.bf16 %v4896_v12, %v11395_v21  ;;  %v3493_v46 = vrot.slane %v3491_v45, 4  ;;  %v4945_v51 = vmax.bf16 %v4897_v50, %v11410_v10  ;;  %v3499_v18 = vrot.slane %v3497_v47, 5 }
 0x252   : > { %v4946_v6 = vmax.bf16 %v4898_v13, %v11415_v17  ;;  %v3881_v28 = vrot.slane %v3116_v61, 5  ;;  %v3490_v3 = vsel %vm9285_vm2, %v3482_v33, %v3489_v44  ;;  %v3503_v2 = vrot.slane %v3501_v56, 4 }
 0x253   : > { %v8414_v22 = vrot.slane %v4944_v54, 11  ;;  %v3494_v49 = vor.u32 %v3493_v46, %v3489_v44  ;;  %v5074_v62 = vrot.slane %v4945_v51, 7  ;;  %v3755_v31 = vmax.bf16 %v3490_v3, %v3115_v57  ;;  %v4469_v57 = vld [vmem:[#allocation2 + $0x10c] sm:$0xe] }
 0x254   : > { %v5077_v59 = vrot.slane %v4946_v6, 7  ;;  %v3882_v35 = vrot.slane %v3881_v28, 4  ;;  %v3504_v55 = vor.u32 %v3503_v2, %v3499_v18  ;;  %v3883_v42 = vrot.slane %v11408_v20, 5 }
 0x255   : > { %v3495_v43 = vrot.slane %v3494_v49, 4  ;;  %v4238_v11 = vrot.slane %v3491_v45, 5  ;;  %v5075_v26 = vsel %vm9848_vm14, %v8414_v22, %v5074_v62  ;;  %v5076_v37 = vrot.slane %v5074_v62, 4  ;;  %v3118_v62 = vld [vmem:[#allocation2 + $0x11c] sm:$0x8] }
 0x256   : > { %v4015_v24 = vmax.bf16 %v3881_v28, %v3755_v31  ;;  %v4239_v40 = vrot.slane %v3487_v41, 6  ;;  %5498 = vst [vmem:[#allocation2 + $0xd0] sm:$0xf] %v5075_v26  ;;  %v3505_v4 = vrot.slane %v3504_v55, 4  ;;  %v3884_v48 = vsel %vm9485_vm5, %v3882_v35, %v3883_v42 }
 0x257   : > { %v3500_v30 = vsel %vm9285_vm2, %v3495_v43, %v3499_v18  ;;  %v3885_v36 = vrot.slane %v3883_v42, 4  ;;  %v5078_v27 = vsel %vm9848_vm14, %v5076_v37, %v5077_v59  ;;  %v4242_v1 = vrot.slane %v3501_v56, 5  ;;  %v3119_v59 = vld [vmem:[#allocation2 + $0x120] sm:$0xf]  ;;  %v13314_v43 = vld [vmem:[#allocation7_spill] sm:$0xff] }
 0x258   : > { %v3756_v14 = vmax.bf16 %v3500_v30, %v3116_v61  ;;  %v4240_v8 = vor.u32 %v4239_v40, %v4238_v11  ;;  %v8446_v16 = vcombine.low %v5075_v26, %v5078_v27  ;;  %5499 = vst [vmem:[#allocation2 + $0xd4] sm:$0xf] %v5078_v27  ;;  %v3757_v32 = vmax.bf16 %v3505_v4, %v3117_v5  ;;  %v11460_v37 = vld [vmem:[#allocation2 + $0x124] sm:$0xf] }
 0x259   : > { %v4243_v34 = vrot.slane %v3497_v47, 6  ;;  %v4248_v12 = vshll.u32 %v4049_v9, 16  ;;  %v4607_v50 = vrot.slane %v4469_v57, 6  ;;  %v4609_v46 = vrot.slane %v11408_v20, 6 }
 0x25a   : > { %v4016_v33 = vmax.bf16 %v3884_v48, %v3756_v14  ;;  %v4241_v41 = vrot.slane %v4240_v8, 4  ;;  %v4435_v45 = vmax.bf16 %v4240_v8, %v4015_v24  ;;  %8927 = vmatprep.mubr.bf16.mxu0 %v8446_v16  ;;  %v4017_v13 = vmax.bf16 %v3885_v36, %v3757_v32  ;;  %v13315_v24 = vld [vmem:[#allocation10_spill] sm:$0xff] }
 0x25b   : > { %v4244_v54 = vor.u32 %v4243_v34, %v4242_v1  ;;  %v4250_v44 = vrot.slane %v4248_v12, 6  ;;  %v4608_v51 = vrot.slane %v4607_v50, 4  ;;  %v4612_v6 = vrot.slane %v4049_v9, 6  ;;  %v13316_v9 = vld [vmem:[#allocation9_spill] sm:$0xff] }
 0x25c   : > { %v11436_v61 = vmax.bf16 %v4607_v50, %v4435_v45  ;;  %v4803_v56 = vmax.bf16 %v11294_v7, %v11170_v25  ;;  %v4611_v28 = vrot.slane %v4609_v46, 4  ;;  %v4804_v22 = vmax.bf16 %v11314_v60, %v11183_v53  ;;  %v13313_v53 = vld [vmem:[#allocation8_spill] sm:$0xff] }
 0x25d   : > { %v4245_v47 = vsel %vm9593_vm8, %v4241_v41, %v4244_v54  ;;  %v4246_v18 = vrot.slane %v4244_v54, 4  ;;  %v4610_v49 = vsel %vm9738_vm11, %v4608_v51, %v4609_v46  ;;  %v4805_v20 = vmax.bf16 %v11320_v58, %v11186_v19 }
 0x25e   : > { %v4436_v3 = vmax.bf16 %v4245_v47, %v4016_v33  ;;  %v4851_v2 = vmax.bf16 %v4803_v56, %v11347_v39  ;;  %v4613_v31 = vsel %vm9738_vm11, %v4611_v28, %v4612_v6  ;;  %v4852_v35 = vmax.bf16 %v4804_v22, %v11362_v52  ;;  %v3120_v47 = vld [vmem:[#allocation2 + $0x124] sm:$0x7] }
 0x25f   : > { %v4251_v25 = vsel %vm9593_vm8, %v4246_v18, %v4250_v44  ;;  %v8364_v55 = vcombine.low %v13314_v43, %v13313_v53  ;;  %v4853_v19 = vmax.bf16 %v4805_v20, %v11367_v63  ;;  %v8365_v40 = vcombine.low %v13316_v9, %v13315_v24  ;;  %v4470_v53 = vld [vmem:[#allocation2 + $0x120] sm:$0xe] }
 0x260   : > { %v4437_v42 = vmax.bf16 %v4251_v25, %v4017_v13  ;;  %v11456_v11 = vmax.bf16 %v4610_v49, %v4436_v3  ;;  %v4899_v26 = vmax.bf16 %v4851_v2, %v11395_v21  ;;  %v4900_v5 = vmax.bf16 %v4852_v35, %v11410_v10  ;;  %v4050_v49 = vld [vmem:[#allocation2 + $0x128] sm:$0x1] }
 0x261   : > { %8867 = vmatprep.mubr.bf16.mxu1 %v8364_v55  ;;  %v3507_v30 = vshrl.u32 %v3118_v62, 16  ;;  %v3512_v4 = vshll.u32 %v3119_v59, 16  ;;  %v4901_v36 = vmax.bf16 %v4853_v19, %v11415_v17  ;;  %v3516_v27 = vshrl.u32 %v3119_v59, 16 }
 0x262   : > { %v11465_v48 = vmax.bf16 %v4613_v31, %v4437_v42  ;;  %v4947_v57 = vmax.bf16 %v4899_v26, %v11436_v61  ;;  %v4948_v14 = vmax.bf16 %v4900_v5, %v11456_v11  ;;  %8868 = vmatmul.mubr.bf16.gmra.mrb[4].mxu1 %v8365_v40  ;;  %v3522_v1 = vshll.u32 %v11460_v37, 16 }
 0x263   : > { %v3514_v8 = vrot.slane %v3512_v4, 5  ;;  %v3526_v16 = vshrl.u32 %v11460_v37, 16  ;;  %v3518_v12 = vrot.slane %v3516_v27, 4  ;;  %v3886_v33 = vrot.slane %v3119_v59, 5 }
 0x264   : > { %v4949_v32 = vmax.bf16 %v4901_v36, %v11465_v48  ;;  %v8415_v34 = vrot.slane %v4947_v57, 11  ;;  %v5081_v41 = vrot.slane %v4948_v14, 7  ;;  %v3524_v50 = vrot.slane %v3522_v1, 5 }
 0x265   : > { %v3515_v45 = vsel %vm9285_vm2, %v3507_v30, %v3514_v8  ;;  %v3528_v13 = vrot.slane %v3526_v16, 4  ;;  %v3519_v44 = vor.u32 %v3518_v12, %v3514_v8  ;;  %v3887_v51 = vrot.slane %v3886_v33, 4 }
 0x266   : > { %v5084_v54 = vrot.slane %v4949_v32, 7  ;;  %v3758_v46 = vmax.bf16 %v3515_v45, %v3118_v62  ;;  %v5082_v6 = vsel %vm9848_vm14, %v8415_v34, %v5081_v41  ;;  %v5083_v56 = vrot.slane %v5081_v41, 4  ;;  %v3122_v45 = vld [vmem:[#allocation2 + $0x134] sm:$0xf] }
 0x267   : > { %v3529_v18 = vor.u32 %v3528_v13, %v3524_v50  ;;  %v3888_v28 = vrot.slane %v11460_v37, 5  ;;  %5500 = vst [vmem:[#allocation2 + $0xe4] sm:$0xf] %v5082_v6  ;;  %v3520_v22 = vrot.slane %v3519_v44, 4  ;;  %v4252_v20 = vrot.slane %v3516_v27, 5 }
 0x268   : > { %v4018_v3 = vmax.bf16 %v3886_v33, %v3758_v46  ;;  %v4253_v2 = vrot.slane %v3512_v4, 6  ;;  %v5085_v25 = vsel %vm9848_vm14, %v5083_v56, %v5084_v54  ;;  %v4256_v19 = vrot.slane %v3526_v16, 5  ;;  %v3121_v16 = vld [vmem:[#allocation2 + $0x130] sm:$0x8]  ;;  %v11499_v46 = vld [vmem:[#allocation2 + $0x138] sm:$0xf] }
 0x269   : > { %v3530_v31 = vrot.slane %v3529_v18, 4  ;;  %v3889_v62 = vsel %vm9485_vm5, %v3887_v51, %v3888_v28  ;;  %v3890_v35 = vrot.slane %v3888_v28, 4  ;;  %v8447_v43 = vcombine.low %v5082_v6, %v5085_v25  ;;  %5501 = vst [vmem:[#allocation2 + $0xe8] sm:$0xf] %v5085_v25 }
 0x26a   : > { %v3525_v55 = vsel %vm9285_vm2, %v3520_v22, %v3524_v50  ;;  %v4254_v42 = vor.u32 %v4253_v2, %v4252_v20  ;;  %v4257_v24 = vrot.slane %v3522_v1, 6  ;;  %v4262_v9 = vshll.u32 %v4050_v49, 16 }
 0x26b   : > { %v3759_v26 = vmax.bf16 %v3525_v55, %v3119_v59  ;;  %v3760_v5 = vmax.bf16 %v3530_v31, %v3120_v47  ;;  %8928 = vmatmul.mubr.bf16.gmra.mrb[16].mxu0 %v8447_v43  ;;  %v4614_v4 = vrot.slane %v4470_v53, 6  ;;  %v4616_v36 = vrot.slane %v11460_v37, 6 }
 0x26c   : > { %v4255_v40 = vrot.slane %v4254_v42, 4  ;;  %v4438_v30 = vmax.bf16 %v4254_v42, %v4018_v3  ;;  %v4258_v14 = vor.u32 %v4257_v24, %v4256_v19  ;;  %v4264_v8 = vrot.slane %v4262_v9, 6 }
 0x26d   : > { %v4019_v57 = vmax.bf16 %v3889_v62, %v3759_v26  ;;  %v4020_v27 = vmax.bf16 %v3890_v35, %v3760_v5  ;;  %v4615_v32 = vrot.slane %v4614_v4, 4  ;;  %v4618_v34 = vrot.slane %v4616_v36, 4 }
 0x26e   : > { %v4619_v12 = vrot.slane %v4050_v49, 6  ;;  %v11485_v33 = vmax.bf16 %v4614_v4, %v4438_v30  ;;  %v4259_v59 = vsel %vm9593_vm8, %v4255_v40, %v4258_v14  ;;  %v4260_v1 = vrot.slane %v4258_v14, 4 }
 0x26f   : > { %v4806_v41 = vmax.bf16 %v11347_v39, %v11294_v7  ;;  %v4807_v37 = vmax.bf16 %v11362_v52, %v11314_v60  ;;  %v4439_v50 = vmax.bf16 %v4259_v59, %v4019_v57  ;;  %v4617_v13 = vsel %vm9738_vm11, %v4615_v32, %v4616_v36 }
 0x270   : > { %v4620_v54 = vsel %vm9738_vm11, %v4618_v34, %v4619_v12  ;;  %v4808_v44 = vmax.bf16 %v11367_v63, %v11320_v58  ;;  %v4265_v51 = vsel %vm9593_vm8, %v4260_v1, %v4264_v8  ;;  %v3532_v6 = vshrl.u32 %v3121_v16, 16  ;;  %v3123_v8 = vld [vmem:[#allocation2 + $0x138] sm:$0x7]  ;;  %v4051_v12 = vld [vmem:[#allocation2 + $0x13c] sm:$0x1] }
 0x271   : > { %v4854_v7 = vmax.bf16 %v4806_v41, %v11395_v21  ;;  %v4855_v60 = vmax.bf16 %v4807_v37, %v11410_v10  ;;  %v4440_v56 = vmax.bf16 %v4265_v51, %v4020_v27  ;;  %v11505_v47 = vmax.bf16 %v4617_v13, %v4439_v50  ;;  %v4471_v37 = vld [vmem:[#allocation2 + $0x134] sm:$0xe] }
 0x272   : > { %v4856_v18 = vmax.bf16 %v4808_v44, %v11415_v17  ;;  %v3537_v28 = vshll.u32 %v3122_v45, 16  ;;  %v3541_v3 = vshrl.u32 %v3122_v45, 16  ;;  %v3547_v49 = vshll.u32 %v11499_v46, 16 }
 0x273   : > { %v4902_v22 = vmax.bf16 %v4854_v7, %v11436_v61  ;;  %v4903_v58 = vmax.bf16 %v4855_v60, %v11456_v11  ;;  %v11511_v20 = vmax.bf16 %v4620_v54, %v4440_v56  ;;  %v3551_v31 = vshrl.u32 %v11499_v46, 16 }
 0x274   : > { %v4904_v2 = vmax.bf16 %v4856_v18, %v11465_v48  ;;  %v3539_v25 = vrot.slane %v3537_v28, 5  ;;  %v3543_v53 = vrot.slane %v3541_v3, 4  ;;  %v3549_v43 = vrot.slane %v3547_v49, 5 }
 0x275   : > { %v4950_v62 = vmax.bf16 %v4902_v22, %v11485_v33  ;;  %v4951_v35 = vmax.bf16 %v4903_v58, %v11505_v47  ;;  %v3553_v19 = vrot.slane %v3551_v31, 4  ;;  %v3891_v26 = vrot.slane %v3122_v45, 5 }
 0x276   : > { %v4952_v55 = vmax.bf16 %v4904_v2, %v11511_v20  ;;  %v3540_v42 = vsel %vm9285_vm2, %v3532_v6, %v3539_v25  ;;  %v3544_v9 = vor.u32 %v3543_v53, %v3539_v25  ;;  %v3893_v57 = vrot.slane %v11499_v46, 5 }
 0x277   : > { %v8416_v5 = vrot.slane %v4950_v62, 11  ;;  %v5088_v24 = vrot.slane %v4951_v35, 7  ;;  %v3761_v40 = vmax.bf16 %v3540_v42, %v3121_v16  ;;  %v3554_v4 = vor.u32 %v3553_v19, %v3549_v43 }
 0x278   : > { %v5091_v30 = vrot.slane %v4952_v55, 7  ;;  %v3892_v36 = vrot.slane %v3891_v26, 4  ;;  %v3545_v32 = vrot.slane %v3544_v9, 4  ;;  %v3895_v41 = vrot.slane %v3893_v57, 4 }
 0x279   : > { %v5089_v27 = vsel %vm9848_vm14, %v8416_v5, %v5088_v24  ;;  %v5090_v14 = vrot.slane %v5088_v24, 4  ;;  %v4021_v34 = vmax.bf16 %v3891_v26, %v3761_v40  ;;  %v3555_v59 = vrot.slane %v3554_v4, 4  ;;  %v3124_v5 = vld [vmem:[#allocation2 + $0x144] sm:$0x8]  ;;  %v3125_v40 = vld [vmem:[#allocation2 + $0x148] sm:$0xf] }
 0x27a   : > { %5502 = vst [vmem:[#allocation2 + $0xf8] sm:$0xf] %v5089_v27  ;;  %v3894_v1 = vsel %vm9485_vm5, %v3892_v36, %v3893_v57  ;;  %v4266_v16 = vrot.slane %v3541_v3, 5  ;;  %v3550_v13 = vsel %vm9285_vm2, %v3545_v32, %v3549_v43  ;;  %v4267_v54 = vrot.slane %v3537_v28, 6  ;;  %v13317_v57 = vld [vmem:[#allocation12_spill] sm:$0xff] }
 0x27b   : > { %v5092_v50 = vsel %vm9848_vm14, %v5090_v14, %v5091_v30  ;;  %v4270_v44 = vrot.slane %v3551_v31, 5  ;;  %v3762_v7 = vmax.bf16 %v3550_v13, %v3122_v45  ;;  %v3763_v60 = vmax.bf16 %v3555_v59, %v3123_v8 }
 0x27c   : > { %v8448_v51 = vcombine.low %v5089_v27, %v5092_v50  ;;  %5503 = vst [vmem:[#allocation2 + $0xfc] sm:$0xf] %v5092_v50  ;;  %v4271_v6 = vrot.slane %v3547_v49, 6  ;;  %v4268_v56 = vor.u32 %v4267_v54, %v4266_v16  ;;  %v4276_v18 = vshll.u32 %v4051_v12, 16  ;;  %v13318_v27 = vld [vmem:[#allocation11_spill] sm:$0xff] }
 0x27d   : > { %v4621_v22 = vrot.slane %v4471_v37, 6  ;;  %v4623_v58 = vrot.slane %v11499_v46, 6  ;;  %v4022_v3 = vmax.bf16 %v3894_v1, %v3762_v7  ;;  %v4023_v2 = vmax.bf16 %v3895_v41, %v3763_v60 }
 0x27e   : > { %8931 = vmatprep.mubr.bf16.mxu0 %v8448_v51  ;;  %v4272_v25 = vor.u32 %v4271_v6, %v4270_v44  ;;  %v4626_v62 = vrot.slane %v4051_v12, 6  ;;  %v4269_v35 = vrot.slane %v4268_v56, 4  ;;  %v4278_v53 = vrot.slane %v4276_v18, 6  ;;  %v13320_v12 = vld [vmem:[#allocation13_spill] sm:$0xff] }
 0x27f   : > { %v4441_v43 = vmax.bf16 %v4268_v56, %v4021_v34  ;;  %v4622_v28 = vrot.slane %v4621_v22, 4  ;;  %v4625_v55 = vrot.slane %v4623_v58, 4  ;;  %v4809_v45 = vmax.bf16 %v11395_v21, %v11347_v39  ;;  %v13319_v34 = vld [vmem:[#allocation14_spill] sm:$0xff] }
 0x280   : > { %v4274_v31 = vrot.slane %v4272_v25, 4  ;;  %v4810_v49 = vmax.bf16 %v11410_v10, %v11362_v52  ;;  %v4273_v46 = vsel %vm9593_vm8, %v4269_v35, %v4272_v25  ;;  %v4811_v26 = vmax.bf16 %v11415_v17, %v11367_v63  ;;  %v11551_v63 = vld [vmem:[#allocation2 + $0x14c] sm:$0xf] }
 0x281   : > { %v4624_v42 = vsel %vm9738_vm11, %v4622_v28, %v4623_v58  ;;  %v11538_v19 = vmax.bf16 %v4621_v22, %v4441_v43  ;;  %v4442_v9 = vmax.bf16 %v4273_v46, %v4022_v3  ;;  %v4627_v39 = vsel %vm9738_vm11, %v4625_v55, %v4626_v62 }
 0x282   : > { %v4279_v24 = vsel %vm9593_vm8, %v4274_v31, %v4278_v53  ;;  %v4857_v52 = vmax.bf16 %v4809_v45, %v11436_v61  ;;  %v4858_v4 = vmax.bf16 %v4810_v49, %v11456_v11  ;;  %v4859_v36 = vmax.bf16 %v4811_v26, %v11465_v48  ;;  %v3126_v49 = vld [vmem:[#allocation2 + $0x14c] sm:$0x7] }
 0x283   : > { %v4443_v30 = vmax.bf16 %v4279_v24, %v4023_v2  ;;  %v8366_v14 = vcombine.low %v13318_v27, %v13317_v57  ;;  %v11553_v8 = vmax.bf16 %v4624_v42, %v4442_v9  ;;  %v8367_v59 = vcombine.low %v13320_v12, %v13319_v34  ;;  %v4472_v57 = vld [vmem:[#allocation2 + $0x148] sm:$0xe] }
 0x284   : > { %v4905_v32 = vmax.bf16 %v4857_v52, %v11485_v33  ;;  %v3557_v1 = vshrl.u32 %v3124_v5, 16  ;;  %v4906_v16 = vmax.bf16 %v4858_v4, %v11505_v47  ;;  %v4907_v37 = vmax.bf16 %v4859_v36, %v11511_v20  ;;  %v4052_v52 = vld [vmem:[#allocation2 + $0x150] sm:$0x1] }
 0x285   : > { %v11558_v41 = vmax.bf16 %v4627_v39, %v4443_v30  ;;  %8871 = vmatprep.mubr.bf16.mxu1 %v8366_v14  ;;  %v3562_v50 = vshll.u32 %v3125_v40, 16  ;;  %v3566_v54 = vshrl.u32 %v3125_v40, 16  ;;  %v3572_v44 = vshll.u32 %v11551_v63, 16 }
 0x286   : > { %v4953_v13 = vmax.bf16 %v4905_v32, %v11538_v19  ;;  %8872 = vmatmul.mubr.bf16.gmra.mrb[8].mxu1 %v8367_v59  ;;  %v3576_v51 = vshrl.u32 %v11551_v63, 16  ;;  %v4954_v7 = vmax.bf16 %v4906_v16, %v11553_v8  ;;  %v3896_v56 = vrot.slane %v3125_v40, 5 }
 0x287   : > { %v4955_v60 = vmax.bf16 %v4907_v37, %v11558_v41  ;;  %v3564_v6 = vrot.slane %v3562_v50, 5  ;;  %v3568_v22 = vrot.slane %v3566_v54, 4  ;;  %v3574_v58 = vrot.slane %v3572_v44, 5 }
 0x288   : > { %v8417_v18 = vrot.slane %v4953_v13, 11  ;;  %v3578_v3 = vrot.slane %v3576_v51, 4  ;;  %v5095_v2 = vrot.slane %v4954_v7, 7  ;;  %v3897_v35 = vrot.slane %v3896_v56, 4 }
 0x289   : > { %v5098_v25 = vrot.slane %v4955_v60, 7  ;;  %v3565_v62 = vsel %vm9285_vm2, %v3557_v1, %v3564_v6  ;;  %v3569_v53 = vor.u32 %v3568_v22, %v3564_v6  ;;  %v3898_v31 = vrot.slane %v11551_v63, 5 }
 0x28a   : > { %v3579_v43 = vor.u32 %v3578_v3, %v3574_v58  ;;  %v3764_v28 = vmax.bf16 %v3565_v62, %v3124_v5  ;;  %v5096_v55 = vsel %vm9848_vm14, %v8417_v18, %v5095_v2  ;;  %v5097_v45 = vrot.slane %v5095_v2, 4  ;;  %v3127_v2 = vld [vmem:[#allocation2 + $0x158] sm:$0x8] }
 0x28b   : > { %v4280_v46 = vrot.slane %v3566_v54, 5  ;;  %v4281_v42 = vrot.slane %v3562_v50, 6  ;;  %5504 = vst [vmem:[#allocation2 + $0x10c] sm:$0xf] %v5096_v55  ;;  %v3570_v26 = vrot.slane %v3569_v53, 4  ;;  %v3899_v9 = vsel %vm9485_vm5, %v3897_v35, %v3898_v31 }
 0x28c   : > { %v3580_v24 = vrot.slane %v3579_v43, 4  ;;  %v3900_v39 = vrot.slane %v3898_v31, 4  ;;  %v5099_v5 = vsel %vm9848_vm14, %v5097_v45, %v5098_v25  ;;  %v4024_v30 = vmax.bf16 %v3896_v56, %v3764_v28  ;;  %v3128_v25 = vld [vmem:[#allocation2 + $0x15c] sm:$0xf]  ;;  %v11596_v43 = vld [vmem:[#allocation2 + $0x160] sm:$0xf] }
 0x28d   : > { %v4282_v4 = vor.u32 %v4281_v42, %v4280_v46  ;;  %v4284_v36 = vrot.slane %v3576_v51, 5  ;;  %v8449_v27 = vcombine.low %v5096_v55, %v5099_v5  ;;  %5505 = vst [vmem:[#allocation2 + $0x110] sm:$0xf] %v5099_v5  ;;  %v3575_v14 = vsel %vm9285_vm2, %v3570_v26, %v3574_v58 }
 0x28e   : > { %v3766_v32 = vmax.bf16 %v3580_v24, %v3126_v49  ;;  %v4285_v34 = vrot.slane %v3572_v44, 6  ;;  %v3765_v12 = vmax.bf16 %v3575_v14, %v3125_v40  ;;  %v4290_v1 = vshll.u32 %v4052_v52, 16 }
 0x28f   : > { %v4283_v59 = vrot.slane %v4282_v4, 4  ;;  %v4444_v16 = vmax.bf16 %v4282_v4, %v4024_v30  ;;  %8932 = vmatmul.mubr.bf16.gmra.mrb[20].mxu0 %v8449_v27  ;;  %v4628_v13 = vrot.slane %v4472_v57, 6  ;;  %v4630_v54 = vrot.slane %v11551_v63, 6 }
 0x290   : > { %v4026_v37 = vmax.bf16 %v3900_v39, %v3766_v32  ;;  %v4286_v50 = vor.u32 %v4285_v34, %v4284_v36  ;;  %v4025_v7 = vmax.bf16 %v3899_v9, %v3765_v12  ;;  %v4292_v51 = vrot.slane %v4290_v1, 6 }
 0x291   : > { %v4633_v60 = vrot.slane %v4052_v52, 6  ;;  %v4812_v6 = vmax.bf16 %v11436_v61, %v11395_v21  ;;  %v4629_v40 = vrot.slane %v4628_v13, 4  ;;  %v4632_v18 = vrot.slane %v4630_v54, 4 }
 0x292   : > { %v4287_v56 = vsel %vm9593_vm8, %v4283_v59, %v4286_v50  ;;  %v4288_v44 = vrot.slane %v4286_v50, 4  ;;  %v11583_v58 = vmax.bf16 %v4628_v13, %v4444_v16  ;;  %v4813_v3 = vmax.bf16 %v11456_v11, %v11410_v10 }
 0x293   : > { %v4445_v22 = vmax.bf16 %v4287_v56, %v4025_v7  ;;  %v4814_v63 = vmax.bf16 %v11465_v48, %v11415_v17  ;;  %v4631_v62 = vsel %vm9738_vm11, %v4629_v40, %v4630_v54  ;;  %v4634_v35 = vsel %vm9738_vm11, %v4632_v18, %v4633_v60 }
 0x294   : > { %v4293_v21 = vsel %vm9593_vm8, %v4288_v44, %v4292_v51  ;;  %v4860_v53 = vmax.bf16 %v4812_v6, %v11485_v33  ;;  %v4861_v17 = vmax.bf16 %v4813_v3, %v11505_v47  ;;  %v3582_v45 = vshrl.u32 %v3127_v2, 16  ;;  %v3129_v6 = vld [vmem:[#allocation2 + $0x160] sm:$0x7]  ;;  %v4053_v44 = vld [vmem:[#allocation2 + $0x164] sm:$0x1] }
 0x295   : > { %v4446_v28 = vmax.bf16 %v4293_v21, %v4026_v37  ;;  %v11598_v10 = vmax.bf16 %v4631_v62, %v4445_v22  ;;  %v4862_v31 = vmax.bf16 %v4814_v63, %v11511_v20  ;;  %v3587_v49 = vshll.u32 %v3128_v25, 16 }
 0x296   : > { %v4908_v55 = vmax.bf16 %v4860_v53, %v11538_v19  ;;  %v3591_v46 = vshrl.u32 %v3128_v25, 16  ;;  %v4909_v26 = vmax.bf16 %v4861_v17, %v11553_v8  ;;  %v3597_v9 = vshll.u32 %v11596_v43, 16 }
 0x297   : > { %v11603_v42 = vmax.bf16 %v4634_v35, %v4446_v28  ;;  %v4910_v24 = vmax.bf16 %v4862_v31, %v11558_v41  ;;  %v3589_v52 = vrot.slane %v3587_v49, 5  ;;  %v3601_v30 = vshrl.u32 %v11596_v43, 16 }
 0x298   : > { %v4956_v39 = vmax.bf16 %v4908_v55, %v11583_v58  ;;  %v3593_v5 = vrot.slane %v3591_v46, 4  ;;  %v4957_v4 = vmax.bf16 %v4909_v26, %v11598_v10  ;;  %v3599_v57 = vrot.slane %v3597_v9, 5 }
 0x299   : > { %v4958_v36 = vmax.bf16 %v4910_v24, %v11603_v42  ;;  %v3901_v27 = vrot.slane %v3128_v25, 5  ;;  %v3590_v32 = vsel %vm9285_vm2, %v3582_v45, %v3589_v52  ;;  %v3603_v12 = vrot.slane %v3601_v30, 4 }
 0x29a   : > { %v8418_v14 = vrot.slane %v4956_v39, 11  ;;  %v3594_v34 = vor.u32 %v3593_v5, %v3589_v52  ;;  %v5102_v59 = vrot.slane %v4957_v4, 7  ;;  %v3767_v16 = vmax.bf16 %v3590_v32, %v3127_v2  ;;  %v4473_v2 = vld [vmem:[#allocation2 + $0x15c] sm:$0xe] }
 0x29b   : > { %v5105_v1 = vrot.slane %v4958_v36, 7  ;;  %v3902_v37 = vrot.slane %v3901_v27, 4  ;;  %v3604_v13 = vor.u32 %v3603_v12, %v3599_v57  ;;  %v3903_v54 = vrot.slane %v11596_v43, 5 }
 0x29c   : > { %v3595_v50 = vrot.slane %v3594_v34, 4  ;;  %v4294_v7 = vrot.slane %v3591_v46, 5  ;;  %v5103_v51 = vsel %vm9848_vm14, %v8418_v14, %v5102_v59  ;;  %v5104_v60 = vrot.slane %v5102_v59, 4  ;;  %v3130_v59 = vld [vmem:[#allocation2 + $0x16c] sm:$0x8] }
 0x29d   : > { %v4027_v56 = vmax.bf16 %v3901_v27, %v3767_v16  ;;  %v4295_v40 = vrot.slane %v3587_v49, 6  ;;  %5506 = vst [vmem:[#allocation2 + $0x120] sm:$0xf] %v5103_v51  ;;  %v3605_v22 = vrot.slane %v3604_v13, 4  ;;  %v3904_v3 = vsel %vm9485_vm5, %v3902_v37, %v3903_v54 }
 0x29e   : > { %v3600_v18 = vsel %vm9285_vm2, %v3595_v50, %v3599_v57  ;;  %v3905_v63 = vrot.slane %v3903_v54, 4  ;;  %v5106_v21 = vsel %vm9848_vm14, %v5104_v60, %v5105_v1  ;;  %v4298_v53 = vrot.slane %v3601_v30, 5  ;;  %v3131_v1 = vld [vmem:[#allocation2 + $0x170] sm:$0xf]  ;;  %v11648_v60 = vld [vmem:[#allocation2 + $0x174] sm:$0xf] }
 0x29f   : > { %v3768_v62 = vmax.bf16 %v3600_v18, %v3128_v25  ;;  %v4296_v35 = vor.u32 %v4295_v40, %v4294_v7  ;;  %v8450_v28 = vcombine.low %v5103_v51, %v5106_v21  ;;  %5507 = vst [vmem:[#allocation2 + $0x124] sm:$0xf] %v5106_v21  ;;  %v3769_v17 = vmax.bf16 %v3605_v22, %v3129_v6  ;;  %v13322_v50 = vld [vmem:[#allocation15_spill] sm:$0xff] }
 0x2a0   : > { %v4299_v31 = vrot.slane %v3597_v9, 6  ;;  %v4304_v55 = vshll.u32 %v4053_v44, 16  ;;  %v4635_v26 = vrot.slane %v4473_v2, 6  ;;  %v4637_v5 = vrot.slane %v11596_v43, 6 }
 0x2a1   : > { %v4028_v45 = vmax.bf16 %v3904_v3, %v3768_v62  ;;  %v4297_v49 = vrot.slane %v4296_v35, 4  ;;  %v4447_v46 = vmax.bf16 %v4296_v35, %v4027_v56  ;;  %8935 = vmatprep.mubr.bf16.mxu0 %v8450_v28  ;;  %v4029_v24 = vmax.bf16 %v3905_v63, %v3769_v17  ;;  %v13323_v56 = vld [vmem:[#allocation18_spill] sm:$0xff] }
 0x2a2   : > { %v4300_v39 = vor.u32 %v4299_v31, %v4298_v53  ;;  %v4306_v52 = vrot.slane %v4304_v55, 6  ;;  %v4636_v4 = vrot.slane %v4635_v26, 4  ;;  %v4640_v36 = vrot.slane %v4053_v44, 6  ;;  %v13324_v44 = vld [vmem:[#allocation17_spill] sm:$0xff] }
 0x2a3   : > { %v11624_v25 = vmax.bf16 %v4635_v26, %v4447_v46  ;;  %v4815_v30 = vmax.bf16 %v11485_v33, %v11436_v61  ;;  %v4639_v27 = vrot.slane %v4637_v5, 4  ;;  %v4816_v14 = vmax.bf16 %v11505_v47, %v11456_v11  ;;  %v13321_v11 = vld [vmem:[#allocation16_spill] sm:$0xff] }
 0x2a4   : > { %v4301_v9 = vsel %vm9593_vm8, %v4297_v49, %v4300_v39  ;;  %v4302_v57 = vrot.slane %v4300_v39, 4  ;;  %v4638_v34 = vsel %vm9738_vm11, %v4636_v4, %v4637_v5  ;;  %v4817_v43 = vmax.bf16 %v11511_v20, %v11465_v48 }
 0x2a5   : > { %v4448_v32 = vmax.bf16 %v4301_v9, %v4028_v45  ;;  %v4863_v12 = vmax.bf16 %v4815_v30, %v11538_v19  ;;  %v4641_v16 = vsel %vm9738_vm11, %v4639_v27, %v4640_v36  ;;  %v4864_v37 = vmax.bf16 %v4816_v14, %v11553_v8  ;;  %v3132_v9 = vld [vmem:[#allocation2 + $0x174] sm:$0x7] }
 0x2a6   : > { %v4307_v61 = vsel %vm9593_vm8, %v4302_v57, %v4306_v52  ;;  %v8368_v13 = vcombine.low %v13322_v50, %v13321_v11  ;;  %v4865_v48 = vmax.bf16 %v4817_v43, %v11558_v41  ;;  %v8369_v40 = vcombine.low %v13324_v44, %v13323_v56  ;;  %v4474_v11 = vld [vmem:[#allocation2 + $0x170] sm:$0xe] }
 0x2a7   : > { %v4449_v54 = vmax.bf16 %v4307_v61, %v4029_v24  ;;  %v11644_v7 = vmax.bf16 %v4638_v34, %v4448_v32  ;;  %v4911_v51 = vmax.bf16 %v4863_v12, %v11583_v58  ;;  %v4912_v6 = vmax.bf16 %v4864_v37, %v11598_v10  ;;  %v4054_v34 = vld [vmem:[#allocation2 + $0x178] sm:$0x1] }
 0x2a8   : > { %8875 = vmatprep.mubr.bf16.mxu1 %v8368_v13  ;;  %v3607_v18 = vshrl.u32 %v3130_v59, 16  ;;  %v3612_v22 = vshll.u32 %v3131_v1, 16  ;;  %v4913_v63 = vmax.bf16 %v4865_v48, %v11603_v42  ;;  %v3616_v21 = vshrl.u32 %v3131_v1, 16 }
 0x2a9   : > { %v11653_v3 = vmax.bf16 %v4641_v16, %v4449_v54  ;;  %v4959_v2 = vmax.bf16 %v4911_v51, %v11624_v25  ;;  %v4960_v62 = vmax.bf16 %v4912_v6, %v11644_v7  ;;  %8876 = vmatmul.mubr.bf16.gmra.mrb[12].mxu1 %v8369_v40  ;;  %v3622_v53 = vshll.u32 %v11648_v60, 16 }
 0x2aa   : > { %v3614_v35 = vrot.slane %v3612_v22, 5  ;;  %v3626_v28 = vshrl.u32 %v11648_v60, 16  ;;  %v3618_v55 = vrot.slane %v3616_v21, 4  ;;  %v3906_v45 = vrot.slane %v3131_v1, 5 }
 0x2ab   : > { %v4961_v17 = vmax.bf16 %v4913_v63, %v11653_v3  ;;  %v8419_v31 = vrot.slane %v4959_v2, 11  ;;  %v5109_v49 = vrot.slane %v4960_v62, 7  ;;  %v3624_v26 = vrot.slane %v3622_v53, 5 }
 0x2ac   : > { %v3615_v46 = vsel %vm9285_vm2, %v3607_v18, %v3614_v35  ;;  %v3628_v24 = vrot.slane %v3626_v28, 4  ;;  %v3619_v52 = vor.u32 %v3618_v55, %v3614_v35  ;;  %v3907_v4 = vrot.slane %v3906_v45, 4 }
 0x2ad   : > { %v5112_v39 = vrot.slane %v4961_v17, 7  ;;  %v3770_v5 = vmax.bf16 %v3615_v46, %v3130_v59  ;;  %v5110_v36 = vsel %vm9848_vm14, %v8419_v31, %v5109_v49  ;;  %v5111_v30 = vrot.slane %v5109_v49, 4  ;;  %v3134_v46 = vld [vmem:[#allocation2 + $0x184] sm:$0xf] }
 0x2ae   : > { %v3629_v57 = vor.u32 %v3628_v24, %v3624_v26  ;;  %v3908_v27 = vrot.slane %v11648_v60, 5  ;;  %5508 = vst [vmem:[#allocation2 + $0x134] sm:$0xf] %v5110_v36  ;;  %v3620_v14 = vrot.slane %v3619_v52, 4  ;;  %v4308_v43 = vrot.slane %v3616_v21, 5 }
 0x2af   : > { %v4030_v32 = vmax.bf16 %v3906_v45, %v3770_v5  ;;  %v4309_v12 = vrot.slane %v3612_v22, 6  ;;  %v5113_v61 = vsel %vm9848_vm14, %v5111_v30, %v5112_v39  ;;  %v4312_v48 = vrot.slane %v3626_v28, 5  ;;  %v3133_v28 = vld [vmem:[#allocation2 + $0x180] sm:$0x8]  ;;  %v11687_v5 = vld [vmem:[#allocation2 + $0x188] sm:$0xf] }
 0x2b0   : > { %v3630_v16 = vrot.slane %v3629_v57, 4  ;;  %v3909_v59 = vsel %vm9485_vm5, %v3907_v4, %v3908_v27  ;;  %v3910_v37 = vrot.slane %v3908_v27, 4  ;;  %v8451_v50 = vcombine.low %v5110_v36, %v5113_v61  ;;  %5509 = vst [vmem:[#allocation2 + $0x138] sm:$0xf] %v5113_v61 }
 0x2b1   : > { %v3625_v13 = vsel %vm9285_vm2, %v3620_v14, %v3624_v26  ;;  %v4310_v54 = vor.u32 %v4309_v12, %v4308_v43  ;;  %v4313_v56 = vrot.slane %v3622_v53, 6  ;;  %v4318_v44 = vshll.u32 %v4054_v34, 16 }
 0x2b2   : > { %v3771_v51 = vmax.bf16 %v3625_v13, %v3131_v1  ;;  %v3772_v6 = vmax.bf16 %v3630_v16, %v3132_v9  ;;  %8936 = vmatmul.mubr.bf16.gmra.mrb[24].mxu0 %v8451_v50  ;;  %v4642_v22 = vrot.slane %v4474_v11, 6  ;;  %v4644_v63 = vrot.slane %v11648_v60, 6 }
 0x2b3   : > { %v4311_v40 = vrot.slane %v4310_v54, 4  ;;  %v4450_v18 = vmax.bf16 %v4310_v54, %v4030_v32  ;;  %v4314_v62 = vor.u32 %v4313_v56, %v4312_v48  ;;  %v4320_v35 = vrot.slane %v4318_v44, 6 }
 0x2b4   : > { %v4031_v2 = vmax.bf16 %v3909_v59, %v3771_v51  ;;  %v4032_v21 = vmax.bf16 %v3910_v37, %v3772_v6  ;;  %v4643_v17 = vrot.slane %v4642_v22, 4  ;;  %v4646_v31 = vrot.slane %v4644_v63, 4 }
 0x2b5   : > { %v4647_v55 = vrot.slane %v4054_v34, 6  ;;  %v11673_v45 = vmax.bf16 %v4642_v22, %v4450_v18  ;;  %v4315_v1 = vsel %vm9593_vm8, %v4311_v40, %v4314_v62  ;;  %v4316_v53 = vrot.slane %v4314_v62, 4 }
 0x2b6   : > { %v4818_v49 = vmax.bf16 %v11538_v19, %v11485_v33  ;;  %v4819_v60 = vmax.bf16 %v11553_v8, %v11505_v47  ;;  %v4451_v26 = vmax.bf16 %v4315_v1, %v4031_v2  ;;  %v4645_v24 = vsel %vm9738_vm11, %v4643_v17, %v4644_v63 }
 0x2b7   : > { %v4648_v39 = vsel %vm9738_vm11, %v4646_v31, %v4647_v55  ;;  %v4820_v52 = vmax.bf16 %v11558_v41, %v11511_v20  ;;  %v4321_v4 = vsel %vm9593_vm8, %v4316_v53, %v4320_v35  ;;  %v3632_v36 = vshrl.u32 %v3133_v28, 16  ;;  %v3135_v35 = vld [vmem:[#allocation2 + $0x188] sm:$0x7]  ;;  %v4055_v55 = vld [vmem:[#allocation2 + $0x18c] sm:$0x1] }
 0x2b8   : > { %v4866_v33 = vmax.bf16 %v4818_v49, %v11583_v58  ;;  %v4867_v47 = vmax.bf16 %v4819_v60, %v11598_v10  ;;  %v4452_v30 = vmax.bf16 %v4321_v4, %v4032_v21  ;;  %v11693_v9 = vmax.bf16 %v4645_v24, %v4451_v26  ;;  %v4475_v60 = vld [vmem:[#allocation2 + $0x184] sm:$0xe] }
 0x2b9   : > { %v4868_v57 = vmax.bf16 %v4820_v52, %v11603_v42  ;;  %v3637_v27 = vshll.u32 %v3134_v46, 16  ;;  %v3641_v32 = vshrl.u32 %v3134_v46, 16  ;;  %v3647_v34 = vshll.u32 %v11687_v5, 16 }
 0x2ba   : > { %v4914_v14 = vmax.bf16 %v4866_v33, %v11624_v25  ;;  %v4915_v20 = vmax.bf16 %v4867_v47, %v11644_v7  ;;  %v11699_v43 = vmax.bf16 %v4648_v39, %v4452_v30  ;;  %v3651_v16 = vshrl.u32 %v11687_v5, 16 }
 0x2bb   : > { %v4916_v12 = vmax.bf16 %v4868_v57, %v11653_v3  ;;  %v3639_v61 = vrot.slane %v3637_v27, 5  ;;  %v3643_v11 = vrot.slane %v3641_v32, 4  ;;  %v3649_v50 = vrot.slane %v3647_v34, 5 }
 0x2bc   : > { %v4962_v59 = vmax.bf16 %v4914_v14, %v11673_v45  ;;  %v4963_v37 = vmax.bf16 %v4915_v20, %v11693_v9  ;;  %v3653_v48 = vrot.slane %v3651_v16, 4  ;;  %v3911_v51 = vrot.slane %v3134_v46, 5 }
 0x2bd   : > { %v4964_v13 = vmax.bf16 %v4916_v12, %v11699_v43  ;;  %v3640_v54 = vsel %vm9285_vm2, %v3632_v36, %v3639_v61  ;;  %v3644_v44 = vor.u32 %v3643_v11, %v3639_v61  ;;  %v3913_v2 = vrot.slane %v11687_v5, 5 }
 0x2be   : > { %v8420_v6 = vrot.slane %v4962_v59, 11  ;;  %v5116_v56 = vrot.slane %v4963_v37, 7  ;;  %v3773_v40 = vmax.bf16 %v3640_v54, %v3133_v28  ;;  %v3654_v22 = vor.u32 %v3653_v48, %v3649_v50 }
 0x2bf   : > { %v5119_v18 = vrot.slane %v4964_v13, 7  ;;  %v3912_v63 = vrot.slane %v3911_v51, 4  ;;  %v3645_v17 = vrot.slane %v3644_v44, 4  ;;  %v3915_v49 = vrot.slane %v3913_v2, 4 }
 0x2c0   : > { %v5117_v21 = vsel %vm9848_vm14, %v8420_v6, %v5116_v56  ;;  %v5118_v62 = vrot.slane %v5116_v56, 4  ;;  %v4033_v31 = vmax.bf16 %v3911_v51, %v3773_v40  ;;  %v3655_v1 = vrot.slane %v3654_v22, 4  ;;  %v11728_v6 = vld [vmem:[#allocation2 + $0x4] sm:$0x8]  ;;  %v13325_v22 = vld [vmem:[#allocation20_spill] sm:$0xff] }
 0x2c1   : > { %5510 = vst [vmem:[#allocation2 + $0x148] sm:$0xf] %v5117_v21  ;;  %v3914_v53 = vsel %vm9485_vm5, %v3912_v63, %v3913_v2  ;;  %v4322_v28 = vrot.slane %v3641_v32, 5  ;;  %v3650_v24 = vsel %vm9285_vm2, %v3645_v17, %v3649_v50  ;;  %v4323_v39 = vrot.slane %v3637_v27, 6  ;;  %v11741_v63 = vld [vmem:[#allocation2 + $0xc] sm:$0xf] }
 0x2c2   : > { %v5120_v26 = vsel %vm9848_vm14, %v5118_v62, %v5119_v18  ;;  %v4326_v52 = vrot.slane %v3651_v16, 5  ;;  %v3774_v33 = vmax.bf16 %v3650_v24, %v3134_v46  ;;  %v3775_v47 = vmax.bf16 %v3655_v1, %v3135_v35  ;;  %v13327_v62 = vld [vmem:[#allocation22_spill] sm:$0xff]  ;;  %v13328_v35 = vld [vmem:[#allocation21_spill] sm:$0xff] }
 0x2c3   : > { %v8452_v4 = vcombine.low %v5117_v21, %v5120_v26  ;;  %5511 = vst [vmem:[#allocation2 + $0x14c] sm:$0xf] %v5120_v26  ;;  %v4327_v36 = vrot.slane %v3647_v34, 6  ;;  %v4324_v30 = vor.u32 %v4323_v39, %v4322_v28  ;;  %v4332_v57 = vshll.u32 %v4055_v55, 16  ;;  %v11757_v39 = vld [vmem:[#allocation2 + $0x20] sm:$0xf] }
 0x2c4   : > { %v4649_v14 = vrot.slane %v4475_v60, 6  ;;  %v4651_v20 = vrot.slane %v11687_v5, 6  ;;  %v4034_v32 = vmax.bf16 %v3914_v53, %v3774_v33  ;;  %v4035_v12 = vmax.bf16 %v3915_v49, %v3775_v47  ;;  %v11752_v49 = vld [vmem:[#allocation2 + $0x1c] sm:$0xf] }
 0x2c5   : > { %8939 = vmatprep.mubr.bf16.mxu0 %v8452_v4  ;;  %v4328_v61 = vor.u32 %v4327_v36, %v4326_v52  ;;  %v4654_v59 = vrot.slane %v4055_v55, 6  ;;  %v4325_v37 = vrot.slane %v4324_v30, 4  ;;  %v4334_v11 = vrot.slane %v4332_v57, 6 }
 0x2c6   : > { %v4453_v50 = vmax.bf16 %v4324_v30, %v4033_v31  ;;  %v4650_v27 = vrot.slane %v4649_v14, 4  ;;  %v4653_v13 = vrot.slane %v4651_v20, 4  ;;  %v4821_v46 = vmax.bf16 %v11583_v58, %v11538_v19  ;;  %v11735_v58 = vld [vmem:[#allocation2 + $0x8] sm:$0xf]  ;;  %v11746_v31 = vld [vmem:[#allocation2 + $0x18] sm:$0x8] }
 0x2c7   : > { %v4330_v16 = vrot.slane %v4328_v61, 4  ;;  %v4822_v34 = vmax.bf16 %v11598_v10, %v11553_v8  ;;  %v4329_v5 = vsel %vm9593_vm8, %v4325_v37, %v4328_v61  ;;  %v4823_v51 = vmax.bf16 %v11603_v42, %v11558_v41  ;;  %v13326_v41 = vld [vmem:[#allocation19_spill] sm:$0xff] }
 0x2c8   : > { %v4652_v54 = vsel %vm9738_vm11, %v4650_v27, %v4651_v20  ;;  %v4773_v48 = vmax.bf16 %v4649_v14, %v4453_v50  ;;  %v4454_v44 = vmax.bf16 %v4329_v5, %v4034_v32  ;;  %v4655_v19 = vsel %vm9738_vm11, %v4653_v13, %v4654_v59  ;;  %v11775_v20 = vld [vmem:[#allocation2 + $0x2c] sm:$0x8]  ;;  %v11782_v50 = vld [vmem:[#allocation2 + $0x30] sm:$0xf]  ;;  %v11787_v13 = vld [vmem:[#allocation2 + $0x34] sm:$0xf] }
 0x2c9   : > { %v4335_v56 = vsel %vm9593_vm8, %v4330_v16, %v4334_v11  ;;  %v4869_v8 = vmax.bf16 %v4821_v46, %v11624_v25  ;;  %v4870_v40 = vmax.bf16 %v4822_v34, %v11644_v7  ;;  %v4871_v18 = vmax.bf16 %v4823_v51, %v11653_v3  ;;  %v11801_v51 = vld [vmem:[#allocation2 + $0x40] sm:$0x8] }
 0x2ca   : > { %v4455_v10 = vmax.bf16 %v4335_v56, %v4035_v12  ;;  %v8370_v42 = vcombine.low %v13326_v41, %v13325_v22  ;;  %v4774_v2 = vmax.bf16 %v4652_v54, %v4454_v44  ;;  %v8371_v17 = vcombine.low %v13328_v35, %v13327_v62  ;;  %v11803_v56 = vld [vmem:[#allocation2 + $0x44] sm:$0xf]  ;;  %v11817_v41 = vld [vmem:[#allocation2 + $0x58] sm:$0xf]  ;;  %v11823_v35 = vld [vmem:[#allocation2 + $0x48] sm:$0xf] }
 0x2cb   : > { %v4917_v21 = vmax.bf16 %v4869_v8, %v11673_v45  ;;  %v5595_v25 = vshrl.u32 %v11728_v6, 16  ;;  %v4918_v7 = vmax.bf16 %v4870_v40, %v11693_v9  ;;  %v4919_v3 = vmax.bf16 %v4871_v18, %v11699_v43 }
 0x2cc   : > { %v4775_v55 = vmax.bf16 %v4655_v19, %v4455_v10  ;;  %8879 = vmatprep.mubr.bf16.mxu1 %v8370_v42  ;;  %v5600_v1 = vshll.u32 %v11735_v58, 16  ;;  %v5604_v45 = vshrl.u32 %v11735_v58, 16  ;;  %v5610_v28 = vshll.u32 %v11741_v63, 16 }
 0x2cd   : > { %v4965_v53 = vmax.bf16 %v4917_v21, %v4773_v48  ;;  %8880 = vmatmul.mubr.bf16.gmra.mrb[16].mxu1 %v8371_v17  ;;  %v5614_v60 = vshrl.u32 %v11741_v63, 16  ;;  %v4966_v26 = vmax.bf16 %v4918_v7, %v4774_v2  ;;  %v5620_v43 = vshrl.u32 %v11746_v31, 16 }
 0x2ce   : > { %v4967_v24 = vmax.bf16 %v4919_v3, %v4775_v55  ;;  %v5602_v9 = vrot.slane %v5600_v1, 5  ;;  %v5606_v4 = vrot.slane %v5604_v45, 4  ;;  %v11766_v33 = vrot.slane %v5610_v28, 5  ;;  %v11829_v3 = vld [vmem:[#allocation2 + $0x54] sm:$0x8] }
 0x2cf   : > { %v8421_v52 = vrot.slane %v4965_v53, 11  ;;  %v5616_v47 = vrot.slane %v5614_v60, 4  ;;  %v5123_v36 = vrot.slane %v4966_v26, 7  ;;  %v5625_v14 = vshll.u32 %v11752_v49, 16 }
 0x2d0   : > { %v5126_v30 = vrot.slane %v4967_v24, 7  ;;  %v11772_v57 = vsel %vm9285_vm2, %v5595_v25, %v5602_v9  ;;  %v5607_v32 = vor.u32 %v5606_v4, %v5602_v9  ;;  %v5629_v61 = vshrl.u32 %v11752_v49, 16 }
 0x2d1   : > { %v5617_v12 = vor.u32 %v5616_v47, %v11766_v33  ;;  %v5635_v59 = vshll.u32 %v11757_v39, 16  ;;  %v5124_v37 = vsel %vm9848_vm14, %v8421_v52, %v5123_v36  ;;  %v5125_v11 = vrot.slane %v5123_v36, 4  ;;  %v11849_v47 = vld [vmem:[#allocation2 + $0x5c] sm:$0xf] }
 0x2d2   : > { %v5627_v27 = vrot.slane %v5625_v14, 5  ;;  %v5639_v16 = vshrl.u32 %v11757_v39, 16  ;;  %5512 = vst [vmem:[#allocation2 + $0x15c] sm:$0xf] %v5124_v37  ;;  %v11789_v46 = vrot.slane %v5607_v32, 4  ;;  %v5631_v5 = vrot.slane %v5629_v61, 4 }
 0x2d3   : > { %v11791_v34 = vrot.slane %v5617_v12, 4  ;;  %v11797_v54 = vrot.slane %v5635_v59, 5  ;;  %v5127_v48 = vsel %vm9848_vm14, %v5125_v11, %v5126_v30  ;;  %v5645_v8 = vshrl.u32 %v11775_v20, 16 }
 0x2d4   : > { %v11807_v44 = vsel %vm9285_vm2, %v5620_v43, %v5627_v27  ;;  %v5641_v19 = vrot.slane %v5639_v16, 4  ;;  %v8453_v10 = vcombine.low %v5124_v37, %v5127_v48  ;;  %5513 = vst [vmem:[#allocation2 + $0x160] sm:$0xf] %v5127_v48  ;;  %v5613_v40 = vsel %vm9285_vm2, %v11789_v46, %v11766_v33 }
 0x2d5   : > { %v5632_v18 = vor.u32 %v5631_v5, %v5627_v27  ;;  %v5650_v22 = vshll.u32 %v11782_v50, 16  ;;  %v5654_v2 = vshrl.u32 %v11782_v50, 16  ;;  %v13190_v21 = vshll.u32 %v11787_v13, 16 }
 0x2d6   : > { %v5642_v42 = vor.u32 %v5641_v19, %v11797_v54  ;;  %v13191_v62 = vshrl.u32 %v11787_v13, 16  ;;  %8940 = vmatmul.mubr.bf16.gmra.mrb[28].mxu0 %v8453_v10  ;;  %v5670_v55 = vshrl.u32 %v11801_v51, 16  ;;  %v13188_v7 = vshll.u32 %v11803_v56, 16 }
 0x2d7   : > { %v5633_v17 = vrot.slane %v5632_v18, 4  ;;  %v5652_v25 = vrot.slane %v5650_v22, 5  ;;  %v5656_v26 = vrot.slane %v5654_v2, 4  ;;  %v5662_v24 = vrot.slane %v13190_v21, 5 }
 0x2d8   : > { %v11831_v53 = vrot.slane %v5642_v42, 4  ;;  %v5666_v9 = vrot.slane %v13191_v62, 4  ;;  %v5677_v4 = vrot.slane %v13188_v7, 5  ;;  %v13189_v33 = vshrl.u32 %v11803_v56, 16 }
 0x2d9   : > { %v5638_v43 = vsel %vm9285_vm2, %v5633_v17, %v11797_v54  ;;  %v11844_v52 = vsel %vm9285_vm2, %v5645_v8, %v5652_v25  ;;  %v5657_v36 = vor.u32 %v5656_v26, %v5652_v25  ;;  %v13183_v32 = vshll.u32 %v11823_v35, 16  ;;  %v11867_v8 = vld [vmem:[#allocation2 + $0xc] sm:$0x7] }
 0x2da   : > { %v5667_v30 = vor.u32 %v5666_v9, %v5662_v24  ;;  %v13187_v12 = vshrl.u32 %v11823_v35, 16  ;;  %v11855_v37 = vsel %vm9285_vm2, %v5670_v55, %v5677_v4  ;;  %v5681_v11 = vrot.slane %v13189_v33, 4 }
 0x2db   : > { %v5695_v27 = vshrl.u32 %v11829_v3, 16  ;;  %v13182_v46 = vshll.u32 %v11817_v41, 16  ;;  %v5658_v5 = vrot.slane %v5657_v36, 4  ;;  %v5687_v48 = vrot.slane %v13183_v32, 5  ;;  %v5519_v36 = vld [vmem:[#allocation2 + $0x20] sm:$0x7] }
 0x2dc   : > { %v11861_v54 = vrot.slane %v5667_v30, 4  ;;  %v5691_v19 = vrot.slane %v13187_v12, 4  ;;  %v5682_v10 = vor.u32 %v5681_v11, %v5677_v4  ;;  %v13184_v42 = vshrl.u32 %v11817_v41, 16  ;;  %v5522_v32 = vld [vmem:[#allocation2 + $0x34] sm:$0x7] }
 0x2dd   : > { %v5702_v18 = vrot.slane %v13182_v46, 5  ;;  %v13185_v17 = vshll.u32 %v11849_v47, 16  ;;  %v5663_v25 = vsel %vm9285_vm2, %v5658_v5, %v5662_v24  ;;  %v13186_v26 = vshrl.u32 %v11849_v47, 16 }
 0x2de   : > { %v5692_v55 = vor.u32 %v5691_v19, %v5687_v48  ;;  %v6154_v9 = vmax.bf16 %v11772_v57, %v11728_v6  ;;  %v5683_v30 = vrot.slane %v5682_v10, 4  ;;  %v5706_v11 = vrot.slane %v13184_v42, 4  ;;  %v5525_v57 = vld [vmem:[#allocation2 + $0x48] sm:$0x7] }
 0x2df   : > { %v11880_v4 = vsel %vm9285_vm2, %v5695_v27, %v5702_v18  ;;  %v5712_v46 = vrot.slane %v13185_v17, 5  ;;  %v5716_v5 = vrot.slane %v13186_v26, 4  ;;  %v11889_v19 = vmax.bf16 %v5613_v40, %v11735_v58 }
 0x2e0   : > { %v5693_v24 = vrot.slane %v5692_v55, 4  ;;  %v6156_v6 = vmax.bf16 %v11791_v34, %v11867_v8  ;;  %v5688_v27 = vsel %vm9285_vm2, %v5683_v30, %v5687_v48  ;;  %v5707_v10 = vor.u32 %v5706_v11, %v5702_v18  ;;  %v5528_v34 = vld [vmem:[#allocation2 + $0x5c] sm:$0x7] }
 0x2e1   : > { %v6157_v42 = vmax.bf16 %v11807_v44, %v11746_v31  ;;  %v11898_v17 = vmax.bf16 %v5638_v43, %v11752_v49  ;;  %v5717_v55 = vor.u32 %v5716_v5, %v5712_v46  ;;  %v6159_v26 = vmax.bf16 %v11831_v53, %v5519_v36 }
 0x2e2   : > { %v6160_v40 = vmax.bf16 %v11844_v52, %v11775_v20  ;;  %v11904_v12 = vmax.bf16 %v5663_v25, %v11782_v50  ;;  %v5708_v8 = vrot.slane %v5707_v10, 4  ;;  %v6162_v48 = vmax.bf16 %v11861_v54, %v5522_v32 }
 0x2e3   : > { %v6163_v18 = vmax.bf16 %v11855_v37, %v11801_v51  ;;  %v11910_v31 = vmax.bf16 %v5688_v27, %v11803_v56  ;;  %v5718_v44 = vrot.slane %v5717_v55, 4  ;;  %v6165_v43 = vmax.bf16 %v5693_v24, %v5525_v57 }
 0x2e4   : > { %v6166_v53 = vmax.bf16 %v11880_v4, %v11829_v3  ;;  %v6254_v20 = vrot.slane %v11735_v58, 5  ;;  %v5713_v52 = vsel %vm9285_vm2, %v5708_v8, %v5712_v46  ;;  %v6256_v25 = vrot.slane %v11741_v63, 5 }
 0x2e5   : > { %v6259_v32 = vrot.slane %v11752_v49, 5  ;;  %v6261_v54 = vrot.slane %v11757_v39, 5  ;;  %v11921_v51 = vmax.bf16 %v5713_v52, %v11817_v41  ;;  %v6168_v37 = vmax.bf16 %v5718_v44, %v5528_v34 }
 0x2e6   : > { %v6255_v36 = vrot.slane %v6254_v20, 4  ;;  %v6264_v30 = vrot.slane %v11782_v50, 5  ;;  %v6258_v11 = vrot.slane %v6256_v25, 4  ;;  %v6266_v24 = vrot.slane %v11787_v13, 5 }
 0x2e7   : > { %v6260_v3 = vrot.slane %v6259_v32, 4  ;;  %v6263_v4 = vrot.slane %v6261_v54, 4  ;;  %v6269_v57 = vrot.slane %v11803_v56, 5  ;;  %v6271_v27 = vrot.slane %v11823_v35, 5 }
 0x2e8   : > { %v11927_v46 = vsel %vm9485_vm5, %v6255_v36, %v6256_v25  ;;  %v6265_v5 = vrot.slane %v6264_v30, 4  ;;  %v6268_v55 = vrot.slane %v6266_v24, 4  ;;  %v6274_v34 = vrot.slane %v11817_v41, 5 }
 0x2e9   : > { %v11933_v10 = vsel %vm9485_vm5, %v6260_v3, %v6261_v54  ;;  %v6276_v8 = vrot.slane %v11849_v47, 5  ;;  %v6270_v52 = vrot.slane %v6269_v57, 4  ;;  %v6273_v25 = vrot.slane %v6271_v27, 4 }
 0x2ea   : > { %v11939_v44 = vsel %vm9485_vm5, %v6265_v5, %v6266_v24  ;;  %v11941_v36 = vmax.bf16 %v6254_v20, %v6154_v9  ;;  %v6275_v7 = vrot.slane %v6274_v34, 4  ;;  %v11945_v54 = vmax.bf16 %v6258_v11, %v6156_v6 }
 0x2eb   : > { %v6278_v33 = vrot.slane %v6276_v8, 4  ;;  %v11949_v3 = vsel %vm9485_vm5, %v6270_v52, %v6271_v27  ;;  %v11951_v62 = vmax.bf16 %v6259_v32, %v6157_v42  ;;  %v11955_v5 = vmax.bf16 %v6263_v4, %v6159_v26  ;;  %v11967_v27 = vld [vmem:[#allocation2 + $0x10] sm:$0x1] }
 0x2ec   : > { %v11959_v9 = vsel %vm9485_vm5, %v6275_v7, %v6276_v8  ;;  %v11961_v20 = vmax.bf16 %v6264_v30, %v6160_v40  ;;  %v11965_v11 = vmax.bf16 %v6268_v55, %v6162_v48  ;;  %v11969_v42 = vmax.bf16 %v6269_v57, %v6163_v18  ;;  %v11981_v30 = vld [vmem:[#allocation2 + $0x24] sm:$0x1]  ;;  %v12005_v8 = vld [vmem:[#allocation2 + $0x38] sm:$0x1] }
 0x2ed   : > { %v11973_v26 = vmax.bf16 %v6273_v25, %v6165_v43  ;;  %v11975_v4 = vmax.bf16 %v6274_v34, %v6166_v53  ;;  %v11979_v40 = vmax.bf16 %v6278_v33, %v6168_v37  ;;  %v6494_v48 = vrot.slane %v5604_v45, 5 }
 0x2ee   : > { %v6495_v18 = vrot.slane %v5600_v1, 6  ;;  %v6498_v57 = vrot.slane %v5614_v60, 5  ;;  %v6499_v43 = vrot.slane %v5610_v28, 6  ;;  %v6504_v53 = vshll.u32 %v11967_v27, 16 }
 0x2ef   : > { %v6508_v33 = vrot.slane %v5629_v61, 5  ;;  %v6509_v55 = vrot.slane %v5625_v14, 6  ;;  %v6512_v58 = vrot.slane %v5639_v16, 5  ;;  %v6513_v1 = vrot.slane %v5635_v59, 6 }
 0x2f0   : > { %v11994_v37 = vor.u32 %v6495_v18, %v6494_v48  ;;  %v6500_v45 = vor.u32 %v6499_v43, %v6498_v57  ;;  %v6506_v60 = vrot.slane %v6504_v53, 6  ;;  %v6518_v28 = vshll.u32 %v11981_v30, 16 }
 0x2f1   : > { %v6522_v34 = vrot.slane %v5654_v2, 5  ;;  %v12008_v52 = vor.u32 %v6509_v55, %v6508_v33  ;;  %v6514_v49 = vor.u32 %v6513_v1, %v6512_v58  ;;  %v6523_v14 = vrot.slane %v5650_v22, 6  ;;  %v12021_v55 = vld [vmem:[#allocation2 + $0x4c] sm:$0x1] }
 0x2f2   : > { %v6497_v61 = vrot.slane %v11994_v37, 4  ;;  %v6502_v16 = vrot.slane %v6500_v45, 4  ;;  %v6520_v25 = vrot.slane %v6518_v28, 6  ;;  %v13329_v59 = vshrl.u32 %v11787_v13, 16 }
 0x2f3   : > { %v13330_v18 = vshll.u32 %v11787_v13, 16  ;;  %v6511_v43 = vrot.slane %v12008_v52, 4  ;;  %v6516_v53 = vrot.slane %v6514_v49, 4  ;;  %v12019_v33 = vor.u32 %v6523_v14, %v6522_v34 }
 0x2f4   : > { %v6526_v48 = vrot.slane %v13329_v59, 5  ;;  %v6501_v2 = vsel %vm9593_vm8, %v6497_v61, %v6500_v45  ;;  %v12025_v50 = vsel %vm9593_vm8, %v6502_v16, %v6506_v60  ;;  %v6532_v58 = vshll.u32 %v12005_v8, 16  ;;  %v12039_v60 = vld [vmem:[#allocation2 + $0x60] sm:$0x1] }
 0x2f5   : > { %v6527_v57 = vrot.slane %v13330_v18, 6  ;;  %v13331_v1 = vshrl.u32 %v11803_v56, 16  ;;  %v6515_v45 = vsel %vm9593_vm8, %v6511_v43, %v6514_v49  ;;  %v12034_v61 = vsel %vm9593_vm8, %v6516_v53, %v6520_v25 }
 0x2f6   : > { %v6525_v34 = vrot.slane %v12019_v33, 4  ;;  %v13332_v14 = vshll.u32 %v11803_v56, 16  ;;  %v13333_v18 = vshrl.u32 %v11823_v35, 16  ;;  %v6546_v43 = vshll.u32 %v12021_v55, 16 }
 0x2f7   : > { %v6528_v22 = vor.u32 %v6527_v57, %v6526_v48  ;;  %v6536_v28 = vrot.slane %v13331_v1, 5  ;;  %v6534_v48 = vrot.slane %v6532_v58, 6  ;;  %v13334_v1 = vshll.u32 %v11823_v35, 16 }
 0x2f8   : > { %v6537_v59 = vrot.slane %v13332_v14, 6  ;;  %v6540_v57 = vrot.slane %v13333_v18, 5  ;;  %v13335_v56 = vshrl.u32 %v11817_v41, 16  ;;  %v13336_v18 = vshll.u32 %v11817_v41, 16 }
 0x2f9   : > { %v6530_v16 = vrot.slane %v6528_v22, 4  ;;  %v6541_v7 = vrot.slane %v13334_v1, 6  ;;  %v6529_v49 = vsel %vm9593_vm8, %v6525_v34, %v6528_v22  ;;  %v13337_v1 = vshrl.u32 %v11849_v47, 16 }
 0x2fa   : > { %v12047_v25 = vor.u32 %v6537_v59, %v6536_v28  ;;  %v6550_v53 = vrot.slane %v13335_v56, 5  ;;  %v6551_v32 = vrot.slane %v13336_v18, 6  ;;  %v6548_v28 = vrot.slane %v6546_v43, 6 }
 0x2fb   : > { %v12054_v14 = vsel %vm9593_vm8, %v6530_v16, %v6534_v48  ;;  %v6542_v58 = vor.u32 %v6541_v7, %v6540_v57  ;;  %v6554_v6 = vrot.slane %v13337_v1, 5  ;;  %v13338_v34 = vshll.u32 %v11849_v47, 16 }
 0x2fc   : > { %v6539_v22 = vrot.slane %v12047_v25, 4  ;;  %v6560_v24 = vshll.u32 %v12039_v60, 16  ;;  %v12064_v21 = vor.u32 %v6551_v32, %v6550_v53  ;;  %v6834_v7 = vmax.bf16 %v11994_v37, %v11941_v36 }
 0x2fd   : > { %v6555_v59 = vrot.slane %v13338_v34, 6  ;;  %v6544_v56 = vrot.slane %v6542_v58, 4  ;;  %v13339_v41 = vmax.bf16 %v11927_v46, %v11889_v19  ;;  %v6836_v18 = vmax.bf16 %v12025_v50, %v11945_v54  ;;  %v6894_v50 = vld [vmem:[#allocation2 + $0x8] sm:$0xe] }
 0x2fe   : > { %v6543_v48 = vsel %vm9593_vm8, %v6539_v22, %v6542_v58  ;;  %v6562_v43 = vrot.slane %v6560_v24, 6  ;;  %v6553_v53 = vrot.slane %v12064_v21, 4  ;;  %v6837_v36 = vmax.bf16 %v12008_v52, %v11951_v62  ;;  %v6895_v52 = vld [vmem:[#allocation2 + $0x1c] sm:$0xe] }
 0x2ff   : > { %v12071_v16 = vmax.bf16 %v6501_v2, %v13339_v41  ;;  %v6556_v57 = vor.u32 %v6555_v59, %v6554_v6  ;;  %v12079_v32 = vsel %vm9593_vm8, %v6544_v56, %v6548_v28  ;;  %v13340_v19 = vmax.bf16 %v11933_v10, %v11898_v17 }
 0x300   : > { %v6839_v24 = vmax.bf16 %v12034_v61, %v11955_v5  ;;  %v6840_v54 = vmax.bf16 %v12019_v33, %v11961_v20  ;;  %v13341_v6 = vmax.bf16 %v11939_v44, %v11904_v12  ;;  %v6842_v62 = vmax.bf16 %v12054_v14, %v11965_v11  ;;  %v6896_v20 = vld [vmem:[#allocation2 + $0x30] sm:$0xe]  ;;  %v6897_v61 = vld [vmem:[#allocation2 + $0x44] sm:$0xe] }
 0x301   : > { %v6838_v46 = vmax.bf16 %v6515_v45, %v13340_v19  ;;  %v6558_v37 = vrot.slane %v6556_v57, 4  ;;  %v6557_v58 = vsel %vm9593_vm8, %v6553_v53, %v6556_v57  ;;  %v6843_v17 = vmax.bf16 %v12047_v25, %v11969_v42 }
 0x302   : > { %v6841_v2 = vmax.bf16 %v6529_v49, %v13341_v6  ;;  %v13342_v10 = vmax.bf16 %v11949_v3, %v11910_v31  ;;  %v6845_v44 = vmax.bf16 %v12079_v32, %v11973_v26  ;;  %v6846_v33 = vmax.bf16 %v12064_v21, %v11975_v4 }
 0x303   : > { %v6563_v12 = vsel %vm9593_vm8, %v6558_v37, %v6562_v43  ;;  %v13343_v11 = vmax.bf16 %v11959_v9, %v11921_v51  ;;  %v6954_v31 = vrot.slane %v6894_v50, 6  ;;  %v6956_v3 = vrot.slane %v11741_v63, 6  ;;  %v6898_v9 = vld [vmem:[#allocation2 + $0x58] sm:$0xe] }
 0x304   : > { %v6844_v5 = vmax.bf16 %v6543_v48, %v13342_v10  ;;  %v6848_v42 = vmax.bf16 %v6563_v12, %v11979_v40  ;;  %v6959_v49 = vrot.slane %v11967_v27, 6  ;;  %v6961_v25 = vrot.slane %v6895_v52, 6 }
 0x305   : > { %v6847_v45 = vmax.bf16 %v6557_v58, %v13343_v11  ;;  %v6963_v14 = vrot.slane %v11757_v39, 6  ;;  %v6966_v26 = vrot.slane %v11981_v30, 6  ;;  %v6968_v1 = vrot.slane %v6896_v20, 6 }
 0x306   : > { %v6955_v22 = vrot.slane %v6954_v31, 4  ;;  %v6958_v21 = vrot.slane %v6956_v3, 4  ;;  %v6970_v4 = vrot.slane %v11787_v13, 6  ;;  %v6973_v51 = vrot.slane %v12005_v8, 6 }
 0x307   : > { %v6962_v40 = vrot.slane %v6961_v25, 4  ;;  %v6965_v28 = vrot.slane %v6963_v14, 4  ;;  %v6969_v34 = vrot.slane %v6968_v1, 4  ;;  %v6975_v59 = vrot.slane %v6897_v61, 6  ;;  %v5530_v61 = vld [vmem:[#allocation2 + $0x6c] sm:$0xf] }
 0x308   : > { %v6957_v63 = vsel %vm9738_vm11, %v6955_v22, %v6956_v3  ;;  %v6960_v39 = vsel %vm9738_vm11, %v6958_v21, %v6959_v49  ;;  %v6972_v27 = vrot.slane %v6970_v4, 4  ;;  %v6977_v30 = vrot.slane %v11823_v35, 6 }
 0x309   : > { %v6964_v56 = vsel %vm9738_vm11, %v6962_v40, %v6963_v14  ;;  %v6967_v13 = vsel %vm9738_vm11, %v6965_v28, %v6966_v26  ;;  %v6971_v8 = vsel %vm9738_vm11, %v6969_v34, %v6970_v4  ;;  %v6976_v41 = vrot.slane %v6975_v59, 4 }
 0x30a   : > { %v6974_v48 = vsel %vm9738_vm11, %v6972_v27, %v6973_v51  ;;  %v6979_v57 = vrot.slane %v6977_v30, 4  ;;  %v6980_v43 = vrot.slane %v12021_v55, 6  ;;  %v6982_v32 = vrot.slane %v6898_v9, 6 }
 0x30b   : > { %v6978_v35 = vsel %vm9738_vm11, %v6976_v41, %v6977_v30  ;;  %v6984_v53 = vrot.slane %v11849_v47, 6  ;;  %v6987_v19 = vrot.slane %v12039_v60, 6  ;;  %v7154_v37 = vmax.bf16 %v6954_v31, %v6834_v7 }
 0x30c   : > { %v6981_v6 = vsel %vm9738_vm11, %v6979_v57, %v6980_v43  ;;  %v6983_v50 = vrot.slane %v6982_v32, 4  ;;  %v7155_v58 = vmax.bf16 %v6957_v63, %v12071_v16  ;;  %v7156_v10 = vmax.bf16 %v6960_v39, %v6836_v18  ;;  %v5531_v57 = vld [vmem:[#allocation2 + $0x70] sm:$0x7] }
 0x30d   : > { %v6986_v52 = vrot.slane %v6984_v53, 4  ;;  %v12140_v20 = vmax.bf16 %v6961_v25, %v6837_v36  ;;  %v12142_v55 = vmax.bf16 %v6964_v56, %v6838_v46  ;;  %v12144_v12 = vmax.bf16 %v6967_v13, %v6839_v24  ;;  %v5529_v24 = vld [vmem:[#allocation2 + $0x68] sm:$0x8] }
 0x30e   : > { %v6985_v47 = vsel %vm9738_vm11, %v6983_v50, %v6984_v53  ;;  %v12148_v11 = vmax.bf16 %v6968_v1, %v6840_v54  ;;  %v12150_v60 = vmax.bf16 %v6971_v8, %v6841_v2  ;;  %v12152_v7 = vmax.bf16 %v6974_v48, %v6842_v62  ;;  %v12169_v62 = vld [vmem:[#allocation2 + $0x70] sm:$0xf]  ;;  %v6479_v50 = vld [vmem:[#allocation2 + $0x74] sm:$0x1] }
 0x30f   : > { %v6988_v16 = vsel %vm9738_vm11, %v6986_v52, %v6987_v19  ;;  %v12156_v18 = vmax.bf16 %v6975_v59, %v6843_v17  ;;  %v12158_v36 = vmax.bf16 %v6978_v35, %v6844_v5  ;;  %v12160_v46 = vmax.bf16 %v6981_v6, %v6845_v44 }
 0x310   : > { %v12162_v31 = vmax.bf16 %v6982_v32, %v6846_v33  ;;  %v12164_v3 = vmax.bf16 %v6985_v47, %v6847_v45  ;;  %v12166_v54 = vmax.bf16 %v6988_v16, %v6848_v42  ;;  %v7214_v2 = vmax.bf16 %v12140_v20, %v7154_v37  ;;  %v6899_v16 = vld [vmem:[#allocation2 + $0x6c] sm:$0xe] }
 0x311   : > { %v7215_v49 = vmax.bf16 %v12142_v55, %v7155_v58  ;;  %v7216_v17 = vmax.bf16 %v12144_v12, %v7156_v10  ;;  %v7217_v5 = vmax.bf16 %v12148_v11, %v12140_v20  ;;  %v7218_v44 = vmax.bf16 %v12150_v60, %v12142_v55 }
 0x312   : > { %v7219_v33 = vmax.bf16 %v12152_v7, %v12144_v12  ;;  %v7262_v45 = vmax.bf16 %v7214_v2, %v12148_v11  ;;  %v5720_v42 = vshrl.u32 %v5529_v24, 16  ;;  %v5725_v25 = vshll.u32 %v5530_v61, 16 }
 0x313   : > { %v7263_v14 = vmax.bf16 %v7215_v49, %v12150_v60  ;;  %v7264_v26 = vmax.bf16 %v7216_v17, %v12152_v7  ;;  %v5729_v1 = vshrl.u32 %v5530_v61, 16  ;;  %v5735_v22 = vshll.u32 %v12169_v62, 16 }
 0x314   : > { %v7310_v21 = vmax.bf16 %v7262_v45, %v12156_v18  ;;  %v5727_v4 = vrot.slane %v5725_v25, 5  ;;  %v5739_v51 = vshrl.u32 %v12169_v62, 16  ;;  %v6279_v9 = vrot.slane %v5530_v61, 5 }
 0x315   : > { %v7311_v40 = vmax.bf16 %v7263_v14, %v12158_v36  ;;  %v7312_v28 = vmax.bf16 %v7264_v26, %v12160_v46  ;;  %v5731_v34 = vrot.slane %v5729_v1, 4  ;;  %v5737_v59 = vrot.slane %v5735_v22, 5 }
 0x316   : > { %v7358_v63 = vmax.bf16 %v7310_v21, %v12162_v31  ;;  %v5728_v39 = vsel %vm9285_vm2, %v5720_v42, %v5727_v4  ;;  %v5741_v27 = vrot.slane %v5739_v51, 4  ;;  %v6280_v30 = vrot.slane %v6279_v9, 4 }
 0x317   : > { %v7359_v56 = vmax.bf16 %v7311_v40, %v12164_v3  ;;  %v7360_v13 = vmax.bf16 %v7312_v28, %v12166_v54  ;;  %v5732_v8 = vor.u32 %v5731_v34, %v5727_v4  ;;  %v6169_v41 = vmax.bf16 %v5728_v39, %v5529_v24 }
 0x318   : > { %v8482_v48 = vrot.slane %v7358_v63, 11  ;;  %v5742_v43 = vor.u32 %v5741_v27, %v5737_v59  ;;  %v6281_v32 = vrot.slane %v12169_v62, 5  ;;  %v6564_v35 = vrot.slane %v5729_v1, 5 }
 0x319   : > { %v7456_v53 = vrot.slane %v7359_v56, 7  ;;  %v7459_v19 = vrot.slane %v7360_v13, 7  ;;  %v5733_v37 = vrot.slane %v5732_v8, 4  ;;  %v6429_v6 = vmax.bf16 %v6279_v9, %v6169_v41 }
 0x31a   : > { %v5743_v58 = vrot.slane %v5742_v43, 4  ;;  %v6282_v10 = vsel %vm9485_vm5, %v6280_v30, %v6281_v32  ;;  %v6283_v52 = vrot.slane %v6281_v32, 4  ;;  %v6565_v47 = vrot.slane %v5725_v25, 6 }
 0x31b   : > { %v7457_v24 = vsel %vm9848_vm14, %v8482_v48, %v7456_v53  ;;  %v7458_v2 = vrot.slane %v7456_v53, 4  ;;  %v5738_v49 = vsel %vm9285_vm2, %v5733_v37, %v5737_v59  ;;  %v6568_v17 = vrot.slane %v5739_v51, 5  ;;  %v13345_v53 = vld [vmem:[#allocation23_spill] sm:$0xff]  ;;  %v13346_v37 = vld [vmem:[#allocation26_spill] sm:$0xff] }
 0x31c   : > { %v6170_v45 = vmax.bf16 %v5738_v49, %v5530_v61  ;;  %v6171_v42 = vmax.bf16 %v5743_v58, %v5531_v57  ;;  %v6566_v14 = vor.u32 %v6565_v47, %v6564_v35  ;;  %v6569_v26 = vrot.slane %v5735_v22, 6  ;;  %v12223_v57 = vld [vmem:[#allocation2 + $0x84] sm:$0xf]  ;;  %v13344_v35 = vld [vmem:[#allocation24_spill] sm:$0xff] }
 0x31d   : > { %v7460_v1 = vsel %vm9848_vm14, %v7458_v2, %v7459_v19  ;;  %v6574_v21 = vshll.u32 %v6479_v50, 16  ;;  %v6989_v4 = vrot.slane %v6899_v16, 6  ;;  %v6991_v25 = vrot.slane %v12169_v62, 6 }
 0x31e   : > { %v8514_v9 = vcombine.low %v7457_v24, %v7460_v1  ;;  %v6430_v40 = vmax.bf16 %v6282_v10, %v6170_v45  ;;  %v6431_v28 = vmax.bf16 %v6283_v52, %v6171_v42  ;;  %v6567_v34 = vrot.slane %v6566_v14, 4 }
 0x31f   : > { %v6570_v63 = vor.u32 %v6569_v26, %v6568_v17  ;;  %v6576_v39 = vrot.slane %v6574_v21, 6  ;;  %v6849_v27 = vmax.bf16 %v6566_v14, %v6429_v6  ;;  %v6990_v59 = vrot.slane %v6989_v4, 4  ;;  %v13347_v6 = vld [vmem:[#allocation25_spill] sm:$0xff] }
 0x320   : > { %8959 = vmatprep.mubr.bf16.mxu0 %v8514_v9  ;;  %v6993_v61 = vrot.slane %v6991_v25, 4  ;;  %v6994_v51 = vrot.slane %v6479_v50, 6  ;;  %v7265_v22 = vmax.bf16 %v7217_v5, %v12156_v18  ;;  %v7266_v62 = vmax.bf16 %v7218_v44, %v12158_v36  ;;  %v5532_v5 = vld [vmem:[#allocation2 + $0x7c] sm:$0x8]  ;;  %v5533_v44 = vld [vmem:[#allocation2 + $0x80] sm:$0xf] }
 0x321   : > { %v6571_v30 = vsel %vm9593_vm8, %v6567_v34, %v6570_v63  ;;  %v6572_v56 = vrot.slane %v6570_v63, 4  ;;  %v6992_v13 = vsel %vm9738_vm11, %v6990_v59, %v6991_v25  ;;  %v12214_v8 = vmax.bf16 %v6989_v4, %v6849_v27 }
 0x322   : > { %v6850_v41 = vmax.bf16 %v6571_v30, %v6430_v40  ;;  %v6995_v48 = vsel %vm9738_vm11, %v6993_v61, %v6994_v51  ;;  %v7267_v20 = vmax.bf16 %v7219_v33, %v12160_v46  ;;  %v7313_v55 = vmax.bf16 %v7265_v22, %v12162_v31  ;;  %v5534_v51 = vld [vmem:[#allocation2 + $0x84] sm:$0x7] }
 0x323   : > { %v6577_v43 = vsel %vm9593_vm8, %v6572_v56, %v6576_v39  ;;  %v7314_v32 = vmax.bf16 %v7266_v62, %v12164_v3  ;;  %v8372_v19 = vcombine.low %v13345_v53, %v13344_v35  ;;  %v8373_v50 = vcombine.low %v13347_v6, %v13346_v37 }
 0x324   : > { %v6851_v58 = vmax.bf16 %v6577_v43, %v6431_v28  ;;  %v12232_v12 = vmax.bf16 %v6992_v13, %v6850_v41  ;;  %v7315_v33 = vmax.bf16 %v7267_v20, %v12166_v54  ;;  %v7361_v10 = vmax.bf16 %v7313_v55, %v12214_v8  ;;  %v6480_v13 = vld [vmem:[#allocation2 + $0x88] sm:$0x1]  ;;  %v6900_v43 = vld [vmem:[#allocation2 + $0x80] sm:$0xe] }
 0x325   : > { %8883 = vmatprep.mubr.bf16.mxu1 %v8372_v19  ;;  %v5745_v52 = vshrl.u32 %v5532_v5, 16  ;;  %v5750_v47 = vshll.u32 %v5533_v44, 16  ;;  %v5754_v16 = vshrl.u32 %v5533_v44, 16  ;;  %v5760_v24 = vshll.u32 %v12223_v57, 16 }
 0x326   : > { %v12237_v2 = vmax.bf16 %v6995_v48, %v6851_v58  ;;  %v7362_v49 = vmax.bf16 %v7314_v32, %v12232_v12  ;;  %v8483_v17 = vrot.slane %v7361_v10, 11  ;;  %8884 = vmatmul.mubr.bf16.gmra.mrb[20].mxu1 %v8373_v50  ;;  %v5764_v45 = vshrl.u32 %v12223_v57, 16 }
 0x327   : > { %v5752_v42 = vrot.slane %v5750_v47, 5  ;;  %v5756_v14 = vrot.slane %v5754_v16, 4  ;;  %v5762_v26 = vrot.slane %v5760_v24, 5  ;;  %v6284_v1 = vrot.slane %v5533_v44, 5 }
 0x328   : > { %v7363_v21 = vmax.bf16 %v7315_v33, %v12237_v2  ;;  %v7463_v4 = vrot.slane %v7362_v49, 7  ;;  %v5766_v25 = vrot.slane %v5764_v45, 4  ;;  %v6286_v9 = vrot.slane %v12223_v57, 5 }
 0x329   : > { %v5753_v40 = vsel %vm9285_vm2, %v5745_v52, %v5752_v42  ;;  %v5757_v28 = vor.u32 %v5756_v14, %v5752_v42  ;;  %v6285_v34 = vrot.slane %v6284_v1, 4  ;;  %v6578_v63 = vrot.slane %v5754_v16, 5 }
 0x32a   : > { %v7464_v39 = vsel %vm9848_vm14, %v8483_v17, %v7463_v4  ;;  %v7465_v27 = vrot.slane %v7463_v4, 4  ;;  %v7466_v59 = vrot.slane %v7363_v21, 7  ;;  %v5767_v61 = vor.u32 %v5766_v25, %v5762_v26  ;;  %v5535_v21 = vld [vmem:[#allocation2 + $0x90] sm:$0x8]  ;;  %v5536_v4 = vld [vmem:[#allocation2 + $0x94] sm:$0xf] }
 0x32b   : > { %v5758_v22 = vrot.slane %v5757_v28, 4  ;;  %v6172_v62 = vmax.bf16 %v5753_v40, %v5532_v5  ;;  %v6287_v30 = vsel %vm9485_vm5, %v6285_v34, %v6286_v9  ;;  %v6288_v56 = vrot.slane %v6286_v9, 4 }
 0x32c   : > { %v7467_v41 = vsel %vm9848_vm14, %v7465_v27, %v7466_v59  ;;  %v5768_v48 = vrot.slane %v5767_v61, 4  ;;  %v6579_v20 = vrot.slane %v5750_v47, 6  ;;  %v6582_v55 = vrot.slane %v5764_v45, 5 }
 0x32d   : > { %v8515_v32 = vcombine.low %v7464_v39, %v7467_v41  ;;  %v5763_v35 = vsel %vm9285_vm2, %v5758_v22, %v5762_v26  ;;  %v6432_v53 = vmax.bf16 %v6284_v1, %v6172_v62  ;;  %v6583_v19 = vrot.slane %v5760_v24, 6 }
 0x32e   : > { %v6173_v37 = vmax.bf16 %v5763_v35, %v5533_v44  ;;  %v6174_v5 = vmax.bf16 %v5768_v48, %v5534_v51  ;;  %v6580_v6 = vor.u32 %v6579_v20, %v6578_v63  ;;  %v6588_v50 = vshll.u32 %v6480_v13, 16 }
 0x32f   : > { %8960 = vmatmul.mubr.bf16.vlgmr.msra.gmra.mrb[0].mxu0 %v8515_v32  ;;  %v6584_v58 = vor.u32 %v6583_v19, %v6582_v55  ;;  %v6996_v33 = vrot.slane %v6900_v43, 6  ;;  %v6998_v10 = vrot.slane %v12223_v57, 6  ;;  %v7001_v52 = vrot.slane %v6480_v13, 6 }
 0x330   : > { %v6433_v16 = vmax.bf16 %v6287_v30, %v6173_v37  ;;  %v6434_v47 = vmax.bf16 %v6288_v56, %v6174_v5  ;;  %v6581_v49 = vrot.slane %v6580_v6, 4  ;;  %v6590_v17 = vrot.slane %v6588_v50, 6 }
 0x331   : > { %v6586_v45 = vrot.slane %v6584_v58, 4  ;;  %v6852_v42 = vmax.bf16 %v6580_v6, %v6432_v53  ;;  %v6997_v14 = vrot.slane %v6996_v33, 4  ;;  %v7000_v26 = vrot.slane %v6998_v10, 4 }
 0x332   : > { %v6585_v44 = vsel %vm9593_vm8, %v6581_v49, %v6584_v58  ;;  %v7220_v24 = vmax.bf16 %v12156_v18, %v12148_v11  ;;  %v7221_v1 = vmax.bf16 %v12158_v36, %v12150_v60  ;;  %v7222_v57 = vmax.bf16 %v12160_v46, %v12152_v7  ;;  %v12272_v7 = vld [vmem:[#allocation2 + $0x98] sm:$0xf] }
 0x333   : > { %v6591_v25 = vsel %vm9593_vm8, %v6586_v45, %v6590_v17  ;;  %v6853_v9 = vmax.bf16 %v6585_v44, %v6433_v16  ;;  %v6999_v40 = vsel %vm9738_vm11, %v6997_v14, %v6998_v10  ;;  %v7002_v28 = vsel %vm9738_vm11, %v7000_v26, %v7001_v52  ;;  %v5537_v17 = vld [vmem:[#allocation2 + $0x98] sm:$0x7]  ;;  %v6481_v14 = vld [vmem:[#allocation2 + $0x9c] sm:$0x1] }
 0x334   : > { %v6854_v34 = vmax.bf16 %v6591_v25, %v6434_v47  ;;  %v12268_v11 = vmax.bf16 %v6996_v33, %v6852_v42  ;;  %v7268_v60 = vmax.bf16 %v7220_v24, %v12162_v31  ;;  %v7269_v63 = vmax.bf16 %v7221_v1, %v12164_v3 }
 0x335   : > { %v12274_v39 = vmax.bf16 %v6999_v40, %v6853_v9  ;;  %v7270_v27 = vmax.bf16 %v7222_v57, %v12166_v54  ;;  %v5770_v59 = vshrl.u32 %v5535_v21, 16  ;;  %v5775_v61 = vshll.u32 %v5536_v4, 16  ;;  %v6901_v57 = vld [vmem:[#allocation2 + $0x94] sm:$0xe] }
 0x336   : > { %v12277_v51 = vmax.bf16 %v7002_v28, %v6854_v34  ;;  %v7316_v22 = vmax.bf16 %v7268_v60, %v12214_v8  ;;  %v7317_v62 = vmax.bf16 %v7269_v63, %v12232_v12  ;;  %v5779_v30 = vshrl.u32 %v5536_v4, 16 }
 0x337   : > { %v7318_v56 = vmax.bf16 %v7270_v27, %v12237_v2  ;;  %v5777_v13 = vrot.slane %v5775_v61, 5  ;;  %v5785_v41 = vshll.u32 %v12272_v7, 16  ;;  %v5789_v48 = vshrl.u32 %v12272_v7, 16 }
 0x338   : > { %v7364_v20 = vmax.bf16 %v7316_v22, %v12268_v11  ;;  %v7365_v55 = vmax.bf16 %v7317_v62, %v12274_v39  ;;  %v5781_v43 = vrot.slane %v5779_v30, 4  ;;  %v6289_v32 = vrot.slane %v5536_v4, 5 }
 0x339   : > { %v7366_v35 = vmax.bf16 %v7318_v56, %v12277_v51  ;;  %v5778_v53 = vsel %vm9285_vm2, %v5770_v59, %v5777_v13  ;;  %v5787_v19 = vrot.slane %v5785_v41, 5  ;;  %v5791_v37 = vrot.slane %v5789_v48, 4 }
 0x33a   : > { %v8484_v5 = vrot.slane %v7364_v20, 11  ;;  %v7470_v6 = vrot.slane %v7365_v55, 7  ;;  %v5782_v50 = vor.u32 %v5781_v43, %v5777_v13  ;;  %v6175_v58 = vmax.bf16 %v5778_v53, %v5535_v21 }
 0x33b   : > { %v7473_v33 = vrot.slane %v7366_v35, 7  ;;  %v5792_v10 = vor.u32 %v5791_v37, %v5787_v19  ;;  %v6290_v52 = vrot.slane %v6289_v32, 4  ;;  %v6291_v16 = vrot.slane %v12272_v7, 5 }
 0x33c   : > { %v7471_v47 = vsel %vm9848_vm14, %v8484_v5, %v7470_v6  ;;  %v7472_v49 = vrot.slane %v7470_v6, 4  ;;  %v5783_v45 = vrot.slane %v5782_v50, 4  ;;  %v6435_v42 = vmax.bf16 %v6289_v32, %v6175_v58  ;;  %v5538_v5 = vld [vmem:[#allocation2 + $0xa4] sm:$0x8]  ;;  %v5539_v58 = vld [vmem:[#allocation2 + $0xa8] sm:$0xf] }
 0x33d   : > { %v5793_v26 = vrot.slane %v5792_v10, 4  ;;  %v6292_v44 = vsel %vm9485_vm5, %v6290_v52, %v6291_v16  ;;  %v6293_v24 = vrot.slane %v6291_v16, 4  ;;  %v6592_v1 = vrot.slane %v5779_v30, 5  ;;  %v13348_v16 = vld [vmem:[#allocation28_spill] sm:$0xff] }
 0x33e   : > { %v7474_v21 = vsel %vm9848_vm14, %v7472_v49, %v7473_v33  ;;  %v5788_v25 = vsel %vm9285_vm2, %v5783_v45, %v5787_v19  ;;  %v6593_v9 = vrot.slane %v5775_v61, 6  ;;  %v6596_v40 = vrot.slane %v5789_v48, 5 }
 0x33f   : > { %v8516_v28 = vcombine.low %v7471_v47, %v7474_v21  ;;  %v6176_v34 = vmax.bf16 %v5788_v25, %v5536_v4  ;;  %v6177_v60 = vmax.bf16 %v5793_v26, %v5537_v17  ;;  %v6597_v63 = vrot.slane %v5785_v41, 6  ;;  %v13349_v47 = vld [vmem:[#allocation27_spill] sm:$0xff] }
 0x340   : > { %v6594_v27 = vor.u32 %v6593_v9, %v6592_v1  ;;  %v6602_v59 = vshll.u32 %v6481_v14, 16  ;;  %v7003_v22 = vrot.slane %v6901_v57, 6  ;;  %v7005_v62 = vrot.slane %v12272_v7, 6 }
 0x341   : > { %8963 = vmatprep.mubr.bf16.mxu0 %v8516_v28  ;;  %v6436_v30 = vmax.bf16 %v6292_v44, %v6176_v34  ;;  %v6437_v56 = vmax.bf16 %v6293_v24, %v6177_v60  ;;  %v6598_v13 = vor.u32 %v6597_v63, %v6596_v40  ;;  %v7008_v20 = vrot.slane %v6481_v14, 6  ;;  %v13351_v14 = vld [vmem:[#allocation31_spill] sm:$0xff] }
 0x342   : > { %v6595_v55 = vrot.slane %v6594_v27, 4  ;;  %v6604_v43 = vrot.slane %v6602_v59, 6  ;;  %v6855_v32 = vmax.bf16 %v6594_v27, %v6435_v42  ;;  %v7004_v35 = vrot.slane %v7003_v22, 4  ;;  %v13350_v42 = vld [vmem:[#allocation32_spill] sm:$0xff] }
 0x343   : > { %v6600_v61 = vrot.slane %v6598_v13, 4  ;;  %v7007_v48 = vrot.slane %v7005_v62, 4  ;;  %v7223_v4 = vmax.bf16 %v12162_v31, %v12156_v18  ;;  %v7224_v41 = vmax.bf16 %v12164_v3, %v12158_v36 }
 0x344   : > { %v6599_v7 = vsel %vm9593_vm8, %v6595_v55, %v6598_v13  ;;  %v7006_v53 = vsel %vm9738_vm11, %v7004_v35, %v7005_v62  ;;  %v12307_v19 = vmax.bf16 %v7003_v22, %v6855_v32  ;;  %v7225_v37 = vmax.bf16 %v12166_v54, %v12160_v46  ;;  %v12320_v46 = vld [vmem:[#allocation2 + $0xac] sm:$0xf] }
 0x345   : > { %v6605_v6 = vsel %vm9593_vm8, %v6600_v61, %v6604_v43  ;;  %v6856_v50 = vmax.bf16 %v6599_v7, %v6436_v30  ;;  %v7009_v18 = vsel %vm9738_vm11, %v7007_v48, %v7008_v20  ;;  %v7271_v36 = vmax.bf16 %v7223_v4, %v12214_v8 }
 0x346   : > { %v6857_v33 = vmax.bf16 %v6605_v6, %v6437_v56  ;;  %v7272_v10 = vmax.bf16 %v7224_v41, %v12232_v12  ;;  %v7273_v52 = vmax.bf16 %v7225_v37, %v12237_v2  ;;  %v8374_v49 = vcombine.low %v13349_v47, %v13348_v16  ;;  %v5540_v41 = vld [vmem:[#allocation2 + $0xac] sm:$0x7]  ;;  %v6902_v16 = vld [vmem:[#allocation2 + $0xa8] sm:$0xe] }
 0x347   : > { %v12322_v17 = vmax.bf16 %v7006_v53, %v6856_v50  ;;  %v7319_v45 = vmax.bf16 %v7271_v36, %v12268_v11  ;;  %v8375_v26 = vcombine.low %v13351_v14, %v13350_v42  ;;  %v5795_v44 = vshrl.u32 %v5538_v5, 16  ;;  %v6482_v36 = vld [vmem:[#allocation2 + $0xb0] sm:$0x1] }
 0x348   : > { %v12327_v24 = vmax.bf16 %v7009_v18, %v6857_v33  ;;  %v7320_v1 = vmax.bf16 %v7272_v10, %v12274_v39  ;;  %v7321_v57 = vmax.bf16 %v7273_v52, %v12277_v51  ;;  %8887 = vmatprep.mubr.bf16.mxu1 %v8374_v49  ;;  %v5800_v21 = vshll.u32 %v5539_v58, 16 }
 0x349   : > { %v7367_v25 = vmax.bf16 %v7319_v45, %v12307_v19  ;;  %8888 = vmatmul.mubr.bf16.gmra.mrb[24].mxu1 %v8375_v26  ;;  %v5804_v9 = vshrl.u32 %v5539_v58, 16  ;;  %v5810_v40 = vshll.u32 %v12320_v46, 16  ;;  %v5814_v28 = vshrl.u32 %v12320_v46, 16 }
 0x34a   : > { %v7368_v34 = vmax.bf16 %v7320_v1, %v12322_v17  ;;  %v7369_v60 = vmax.bf16 %v7321_v57, %v12327_v24  ;;  %v5802_v63 = vrot.slane %v5800_v21, 5  ;;  %v6294_v27 = vrot.slane %v5539_v58, 5 }
 0x34b   : > { %v8485_v59 = vrot.slane %v7367_v25, 11  ;;  %v5806_v22 = vrot.slane %v5804_v9, 4  ;;  %v5812_v62 = vrot.slane %v5810_v40, 5  ;;  %v5816_v30 = vrot.slane %v5814_v28, 4 }
 0x34c   : > { %v7477_v56 = vrot.slane %v7368_v34, 7  ;;  %v7480_v13 = vrot.slane %v7369_v60, 7  ;;  %v5803_v20 = vsel %vm9285_vm2, %v5795_v44, %v5802_v63  ;;  %v6295_v55 = vrot.slane %v6294_v27, 4 }
 0x34d   : > { %v5807_v43 = vor.u32 %v5806_v22, %v5802_v63  ;;  %v5817_v32 = vor.u32 %v5816_v30, %v5812_v62  ;;  %v6178_v35 = vmax.bf16 %v5803_v20, %v5538_v5  ;;  %v6296_v61 = vrot.slane %v12320_v46, 5 }
 0x34e   : > { %v7478_v48 = vsel %vm9848_vm14, %v8485_v59, %v7477_v56  ;;  %v7479_v4 = vrot.slane %v7477_v56, 4  ;;  %v6606_v7 = vrot.slane %v5804_v9, 5  ;;  %v6607_v53 = vrot.slane %v5800_v21, 6  ;;  %v5541_v56 = vld [vmem:[#allocation2 + $0xb8] sm:$0x8] }
 0x34f   : > { %v5808_v37 = vrot.slane %v5807_v43, 4  ;;  %v5818_v6 = vrot.slane %v5817_v32, 4  ;;  %v6297_v50 = vsel %vm9485_vm5, %v6295_v55, %v6296_v61  ;;  %v6298_v18 = vrot.slane %v6296_v61, 4  ;;  %v12365_v32 = vld [vmem:[#allocation2 + $0xc0] sm:$0xf] }
 0x350   : > { %v7481_v33 = vsel %vm9848_vm14, %v7479_v4, %v7480_v13  ;;  %v6438_v5 = vmax.bf16 %v6294_v27, %v6178_v35  ;;  %v6608_v10 = vor.u32 %v6607_v53, %v6606_v7  ;;  %v6610_v52 = vrot.slane %v5814_v28, 5  ;;  %v5542_v13 = vld [vmem:[#allocation2 + $0xbc] sm:$0xf] }
 0x351   : > { %v8517_v47 = vcombine.low %v7478_v48, %v7481_v33  ;;  %v5813_v49 = vsel %vm9285_vm2, %v5808_v37, %v5812_v62  ;;  %v6180_v45 = vmax.bf16 %v5818_v6, %v5540_v41  ;;  %v6611_v42 = vrot.slane %v5810_v40, 6 }
 0x352   : > { %v6179_v14 = vmax.bf16 %v5813_v49, %v5539_v58  ;;  %v6609_v26 = vrot.slane %v6608_v10, 4  ;;  %v6616_v44 = vshll.u32 %v6482_v36, 16  ;;  %v6858_v1 = vmax.bf16 %v6608_v10, %v6438_v5 }
 0x353   : > { %8964 = vmatmul.mubr.bf16.gmra.mrb[4].mxu0 %v8517_v47  ;;  %v6440_v57 = vmax.bf16 %v6298_v18, %v6180_v45  ;;  %v6612_v21 = vor.u32 %v6611_v42, %v6610_v52  ;;  %v7010_v25 = vrot.slane %v6902_v16, 6  ;;  %v7012_v9 = vrot.slane %v12320_v46, 6 }
 0x354   : > { %v6439_v34 = vmax.bf16 %v6297_v50, %v6179_v14  ;;  %v6618_v60 = vrot.slane %v6616_v44, 6  ;;  %v7015_v28 = vrot.slane %v6482_v36, 6  ;;  %v7226_v63 = vmax.bf16 %v12214_v8, %v12162_v31 }
 0x355   : > { %v6613_v27 = vsel %vm9593_vm8, %v6609_v26, %v6612_v21  ;;  %v6614_v40 = vrot.slane %v6612_v21, 4  ;;  %v7011_v58 = vrot.slane %v7010_v25, 4  ;;  %v7014_v59 = vrot.slane %v7012_v9, 4 }
 0x356   : > { %v6859_v22 = vmax.bf16 %v6613_v27, %v6439_v34  ;;  %v12352_v62 = vmax.bf16 %v7010_v25, %v6858_v1  ;;  %v7227_v30 = vmax.bf16 %v12232_v12, %v12164_v3  ;;  %v7228_v46 = vmax.bf16 %v12237_v2, %v12166_v54 }
 0x357   : > { %v6619_v31 = vsel %vm9593_vm8, %v6614_v40, %v6618_v60  ;;  %v7013_v20 = vsel %vm9738_vm11, %v7011_v58, %v7012_v9  ;;  %v7016_v55 = vsel %vm9738_vm11, %v7014_v59, %v7015_v28  ;;  %v7274_v43 = vmax.bf16 %v7226_v63, %v12268_v11  ;;  %v5543_v63 = vld [vmem:[#allocation2 + $0xc0] sm:$0x7]  ;;  %v6483_v40 = vld [vmem:[#allocation2 + $0xc4] sm:$0x1] }
 0x358   : > { %v6860_v35 = vmax.bf16 %v6619_v31, %v6440_v57  ;;  %v12367_v3 = vmax.bf16 %v7013_v20, %v6859_v22  ;;  %v7275_v54 = vmax.bf16 %v7227_v30, %v12274_v39  ;;  %v7276_v61 = vmax.bf16 %v7228_v46, %v12277_v51 }
 0x359   : > { %v7322_v48 = vmax.bf16 %v7274_v43, %v12307_v19  ;;  %v5820_v4 = vshrl.u32 %v5541_v56, 16  ;;  %v5825_v41 = vshll.u32 %v5542_v13, 16  ;;  %v5829_v7 = vshrl.u32 %v5542_v13, 16 }
 0x35a   : > { %v12372_v53 = vmax.bf16 %v7016_v55, %v6860_v35  ;;  %v7323_v37 = vmax.bf16 %v7275_v54, %v12322_v17  ;;  %v7324_v6 = vmax.bf16 %v7276_v61, %v12327_v24  ;;  %v5835_v50 = vshll.u32 %v12365_v32, 16 }
 0x35b   : > { %v7370_v18 = vmax.bf16 %v7322_v48, %v12352_v62  ;;  %v5827_v36 = vrot.slane %v5825_v41, 5  ;;  %v5831_v33 = vrot.slane %v5829_v7, 4  ;;  %v5839_v5 = vshrl.u32 %v12365_v32, 16 }
 0x35c   : > { %v7371_v10 = vmax.bf16 %v7323_v37, %v12367_v3  ;;  %v7372_v52 = vmax.bf16 %v7324_v6, %v12372_v53  ;;  %v5837_v16 = vrot.slane %v5835_v50, 5  ;;  %v6299_v47 = vrot.slane %v5542_v13, 5 }
 0x35d   : > { %v8486_v49 = vrot.slane %v7370_v18, 11  ;;  %v5828_v45 = vsel %vm9285_vm2, %v5820_v4, %v5827_v36  ;;  %v5832_v42 = vor.u32 %v5831_v33, %v5827_v36  ;;  %v5841_v14 = vrot.slane %v5839_v5, 4 }
 0x35e   : > { %v7484_v26 = vrot.slane %v7371_v10, 7  ;;  %v7487_v44 = vrot.slane %v7372_v52, 7  ;;  %v6181_v1 = vmax.bf16 %v5828_v45, %v5541_v56  ;;  %v6300_v57 = vrot.slane %v6299_v47, 4  ;;  %v6903_v56 = vld [vmem:[#allocation2 + $0xbc] sm:$0xe] }
 0x35f   : > { %v5833_v21 = vrot.slane %v5832_v42, 4  ;;  %v5842_v25 = vor.u32 %v5841_v14, %v5837_v16  ;;  %v6301_v9 = vrot.slane %v12365_v32, 5  ;;  %v6620_v34 = vrot.slane %v5829_v7, 5 }
 0x360   : > { %v7485_v60 = vsel %vm9848_vm14, %v8486_v49, %v7484_v26  ;;  %v7486_v28 = vrot.slane %v7484_v26, 4  ;;  %v6441_v27 = vmax.bf16 %v6299_v47, %v6181_v1  ;;  %v6621_v58 = vrot.slane %v5825_v41, 6  ;;  %v5544_v26 = vld [vmem:[#allocation2 + $0xcc] sm:$0x8] }
 0x361   : > { %v5838_v59 = vsel %vm9285_vm2, %v5833_v21, %v5837_v16  ;;  %v5843_v22 = vrot.slane %v5842_v25, 4  ;;  %v6302_v30 = vsel %vm9485_vm5, %v6300_v57, %v6301_v9  ;;  %v6303_v46 = vrot.slane %v6301_v9, 4  ;;  %v13353_v21 = vld [vmem:[#allocation42_spill] sm:$0xff] }
 0x362   : > { %v7488_v31 = vsel %vm9848_vm14, %v7486_v28, %v7487_v44  ;;  %v6182_v20 = vmax.bf16 %v5838_v59, %v5542_v13  ;;  %v6622_v55 = vor.u32 %v6621_v58, %v6620_v34  ;;  %v6624_v43 = vrot.slane %v5839_v5, 5  ;;  %v5545_v44 = vld [vmem:[#allocation2 + $0xd0] sm:$0xf]  ;;  %v12417_v28 = vld [vmem:[#allocation2 + $0xd4] sm:$0xf] }
 0x363   : > { %v8518_v35 = vcombine.low %v7485_v60, %v7488_v31  ;;  %v6183_v54 = vmax.bf16 %v5843_v22, %v5543_v63  ;;  %v6625_v61 = vrot.slane %v5835_v50, 6  ;;  %v6630_v48 = vshll.u32 %v6483_v40, 16 }
 0x364   : > { %v6442_v4 = vmax.bf16 %v6302_v30, %v6182_v20  ;;  %v6623_v41 = vrot.slane %v6622_v55, 4  ;;  %v6861_v7 = vmax.bf16 %v6622_v55, %v6441_v27  ;;  %v7017_v37 = vrot.slane %v6903_v56, 6  ;;  %v13354_v27 = vld [vmem:[#allocation45_spill] sm:$0xff] }
 0x365   : > { %8967 = vmatprep.mubr.bf16.mxu0 %v8518_v35  ;;  %v6443_v6 = vmax.bf16 %v6303_v46, %v6183_v54  ;;  %v6626_v18 = vor.u32 %v6625_v61, %v6624_v43  ;;  %v6632_v36 = vrot.slane %v6630_v48, 6  ;;  %v7019_v33 = vrot.slane %v12365_v32, 6 }
 0x366   : > { %v7018_v10 = vrot.slane %v7017_v37, 4  ;;  %v7022_v52 = vrot.slane %v6483_v40, 6  ;;  %v12393_v16 = vmax.bf16 %v7017_v37, %v6861_v7  ;;  %v7229_v13 = vmax.bf16 %v12268_v11, %v12214_v8  ;;  %v13355_v40 = vld [vmem:[#allocation44_spill] sm:$0xff] }
 0x367   : > { %v6627_v50 = vsel %vm9593_vm8, %v6623_v41, %v6626_v18  ;;  %v6628_v5 = vrot.slane %v6626_v18, 4  ;;  %v7021_v47 = vrot.slane %v7019_v33, 4  ;;  %v7230_v49 = vmax.bf16 %v12274_v39, %v12232_v12  ;;  %v13352_v12 = vld [vmem:[#allocation43_spill] sm:$0xff] }
 0x368   : > { %v6862_v45 = vmax.bf16 %v6627_v50, %v6442_v4  ;;  %v7020_v42 = vsel %vm9738_vm11, %v7018_v10, %v7019_v33  ;;  %v7231_v32 = vmax.bf16 %v12277_v51, %v12237_v2  ;;  %v7277_v14 = vmax.bf16 %v7229_v13, %v12307_v19  ;;  %v5546_v50 = vld [vmem:[#allocation2 + $0xd4] sm:$0x7] }
 0x369   : > { %v6633_v8 = vsel %vm9593_vm8, %v6628_v5, %v6632_v36  ;;  %v7023_v1 = vsel %vm9738_vm11, %v7021_v47, %v7022_v52  ;;  %v7278_v57 = vmax.bf16 %v7230_v49, %v12322_v17  ;;  %v8376_v25 = vcombine.low %v13353_v21, %v13352_v12  ;;  %v6904_v12 = vld [vmem:[#allocation2 + $0xd0] sm:$0xe] }
 0x36a   : > { %v6863_v9 = vmax.bf16 %v6633_v8, %v6443_v6  ;;  %v12413_v34 = vmax.bf16 %v7020_v42, %v6862_v45  ;;  %v7279_v2 = vmax.bf16 %v7231_v32, %v12327_v24  ;;  %v7325_v60 = vmax.bf16 %v7277_v14, %v12352_v62  ;;  %v6484_v42 = vld [vmem:[#allocation2 + $0xd8] sm:$0x1] }
 0x36b   : > { %v7326_v63 = vmax.bf16 %v7278_v57, %v12367_v3  ;;  %8891 = vmatprep.mubr.bf16.mxu1 %v8376_v25  ;;  %v8377_v58 = vcombine.low %v13355_v40, %v13354_v27  ;;  %v5845_v59 = vshrl.u32 %v5544_v26, 16  ;;  %v5850_v22 = vshll.u32 %v5545_v44, 16 }
 0x36c   : > { %v12422_v30 = vmax.bf16 %v7023_v1, %v6863_v9  ;;  %v7327_v46 = vmax.bf16 %v7279_v2, %v12372_v53  ;;  %v7373_v56 = vmax.bf16 %v7325_v60, %v12393_v16  ;;  %v5854_v31 = vshrl.u32 %v5545_v44, 16 }
 0x36d   : > { %v7374_v20 = vmax.bf16 %v7326_v63, %v12413_v34  ;;  %8892 = vmatmul.mubr.bf16.gmra.mrb[28].mxu1 %v8377_v58  ;;  %v5852_v55 = vrot.slane %v5850_v22, 5  ;;  %v5860_v43 = vshll.u32 %v12417_v28, 16  ;;  %v5864_v35 = vshrl.u32 %v12417_v28, 16 }
 0x36e   : > { %v7375_v54 = vmax.bf16 %v7327_v46, %v12422_v30  ;;  %v8487_v61 = vrot.slane %v7373_v56, 11  ;;  %v5856_v48 = vrot.slane %v5854_v31, 4  ;;  %v6304_v4 = vrot.slane %v5545_v44, 5 }
 0x36f   : > { %v7491_v41 = vrot.slane %v7374_v20, 7  ;;  %v5853_v7 = vsel %vm9285_vm2, %v5845_v59, %v5852_v55  ;;  %v5862_v37 = vrot.slane %v5860_v43, 5  ;;  %v5866_v6 = vrot.slane %v5864_v35, 4 }
 0x370   : > { %v7494_v18 = vrot.slane %v7375_v54, 7  ;;  %v5857_v36 = vor.u32 %v5856_v48, %v5852_v55  ;;  %v6184_v33 = vmax.bf16 %v5853_v7, %v5544_v26  ;;  %v6305_v10 = vrot.slane %v6304_v4, 4  ;;  %v5548_v7 = vld [vmem:[#allocation2 + $0xe4] sm:$0xf] }
 0x371   : > { %v7492_v52 = vsel %vm9848_vm14, %v8487_v61, %v7491_v41  ;;  %v7493_v13 = vrot.slane %v7491_v41, 4  ;;  %v5867_v5 = vor.u32 %v5866_v6, %v5862_v37  ;;  %v6306_v47 = vrot.slane %v12417_v28, 5 }
 0x372   : > { %v5858_v49 = vrot.slane %v5857_v36, 4  ;;  %v6444_v45 = vmax.bf16 %v6304_v4, %v6184_v33  ;;  %v6634_v32 = vrot.slane %v5854_v31, 5  ;;  %v6635_v14 = vrot.slane %v5850_v22, 6  ;;  %v12456_v33 = vld [vmem:[#allocation2 + $0xe8] sm:$0xf] }
 0x373   : > { %v7495_v8 = vsel %vm9848_vm14, %v7493_v13, %v7494_v18  ;;  %v5868_v1 = vrot.slane %v5867_v5, 4  ;;  %v6307_v26 = vsel %vm9485_vm5, %v6305_v10, %v6306_v47  ;;  %v6308_v57 = vrot.slane %v6306_v47, 4 }
 0x374   : > { %v8519_v21 = vcombine.low %v7492_v52, %v7495_v8  ;;  %v5863_v25 = vsel %vm9285_vm2, %v5858_v49, %v5862_v37  ;;  %v6636_v9 = vor.u32 %v6635_v14, %v6634_v32  ;;  %v6638_v2 = vrot.slane %v5864_v35, 5  ;;  %v5547_v35 = vld [vmem:[#allocation2 + $0xe0] sm:$0x8] }
 0x375   : > { %v6185_v60 = vmax.bf16 %v5863_v25, %v5545_v44  ;;  %v6186_v63 = vmax.bf16 %v5868_v1, %v5546_v50  ;;  %v6639_v27 = vrot.slane %v5860_v43, 6  ;;  %v6644_v40 = vshll.u32 %v6484_v42, 16 }
 0x376   : > { %8968 = vmatmul.mubr.bf16.gmra.mrb[8].mxu0 %v8519_v21  ;;  %v6637_v58 = vrot.slane %v6636_v9, 4  ;;  %v6864_v59 = vmax.bf16 %v6636_v9, %v6444_v45  ;;  %v7024_v22 = vrot.slane %v6904_v12, 6  ;;  %v7026_v46 = vrot.slane %v12417_v28, 6 }
 0x377   : > { %v6445_v56 = vmax.bf16 %v6307_v26, %v6185_v60  ;;  %v6446_v31 = vmax.bf16 %v6308_v57, %v6186_v63  ;;  %v6640_v20 = vor.u32 %v6639_v27, %v6638_v2  ;;  %v6646_v55 = vrot.slane %v6644_v40, 6 }
 0x378   : > { %v7025_v54 = vrot.slane %v7024_v22, 4  ;;  %v7028_v61 = vrot.slane %v7026_v46, 4  ;;  %v7029_v48 = vrot.slane %v6484_v42, 6  ;;  %v12442_v4 = vmax.bf16 %v7024_v22, %v6864_v59 }
 0x379   : > { %v6641_v44 = vsel %vm9593_vm8, %v6637_v58, %v6640_v20  ;;  %v6642_v43 = vrot.slane %v6640_v20, 4  ;;  %v7232_v41 = vmax.bf16 %v12307_v19, %v12268_v11  ;;  %v7233_v28 = vmax.bf16 %v12322_v17, %v12274_v39 }
 0x37a   : > { %v6865_v37 = vmax.bf16 %v6641_v44, %v6445_v56  ;;  %v7027_v6 = vsel %vm9738_vm11, %v7025_v54, %v7026_v46  ;;  %v7030_v18 = vsel %vm9738_vm11, %v7028_v61, %v7029_v48  ;;  %v7234_v36 = vmax.bf16 %v12327_v24, %v12277_v51  ;;  %v6485_v48 = vld [vmem:[#allocation2 + $0xec] sm:$0x1] }
 0x37b   : > { %v6647_v10 = vsel %vm9593_vm8, %v6642_v43, %v6646_v55  ;;  %v7280_v11 = vmax.bf16 %v7232_v41, %v12352_v62  ;;  %v7281_v39 = vmax.bf16 %v7233_v28, %v12367_v3  ;;  %v5870_v52 = vshrl.u32 %v5547_v35, 16  ;;  %v5549_v55 = vld [vmem:[#allocation2 + $0xe8] sm:$0x7] }
 0x37c   : > { %v6866_v13 = vmax.bf16 %v6647_v10, %v6446_v31  ;;  %v12462_v50 = vmax.bf16 %v7027_v6, %v6865_v37  ;;  %v7282_v5 = vmax.bf16 %v7234_v36, %v12372_v53  ;;  %v5875_v47 = vshll.u32 %v5548_v7, 16 }
 0x37d   : > { %v7328_v49 = vmax.bf16 %v7280_v11, %v12393_v16  ;;  %v7329_v51 = vmax.bf16 %v7281_v39, %v12413_v34  ;;  %v5879_v45 = vshrl.u32 %v5548_v7, 16  ;;  %v5885_v42 = vshll.u32 %v12456_v33, 16 }
 0x37e   : > { %v12468_v32 = vmax.bf16 %v7030_v18, %v6866_v13  ;;  %v7330_v14 = vmax.bf16 %v7282_v5, %v12422_v30  ;;  %v5877_v8 = vrot.slane %v5875_v47, 5  ;;  %v5889_v1 = vshrl.u32 %v12456_v33, 16 }
 0x37f   : > { %v7376_v26 = vmax.bf16 %v7328_v49, %v12442_v4  ;;  %v7377_v57 = vmax.bf16 %v7329_v51, %v12462_v50  ;;  %v5881_v12 = vrot.slane %v5879_v45, 4  ;;  %v5887_v21 = vrot.slane %v5885_v42, 5 }
 0x380   : > { %v7378_v25 = vmax.bf16 %v7330_v14, %v12468_v32  ;;  %v5878_v9 = vsel %vm9285_vm2, %v5870_v52, %v5877_v8  ;;  %v5891_v2 = vrot.slane %v5889_v1, 4  ;;  %v6309_v60 = vrot.slane %v5548_v7, 5 }
 0x381   : > { %v8488_v63 = vrot.slane %v7376_v26, 11  ;;  %v7498_v27 = vrot.slane %v7377_v57, 7  ;;  %v5882_v40 = vor.u32 %v5881_v12, %v5877_v8  ;;  %v6187_v58 = vmax.bf16 %v5878_v9, %v5547_v35  ;;  %v6905_v35 = vld [vmem:[#allocation2 + $0xe4] sm:$0xe]  ;;  %v5550_v9 = vld [vmem:[#allocation2 + $0xf4] sm:$0x8] }
 0x382   : > { %v7501_v59 = vrot.slane %v7378_v25, 7  ;;  %v5892_v22 = vor.u32 %v5891_v2, %v5887_v21  ;;  %v6310_v46 = vrot.slane %v6309_v60, 4  ;;  %v6311_v56 = vrot.slane %v12456_v33, 5 }
 0x383   : > { %v7499_v31 = vsel %vm9848_vm14, %v8488_v63, %v7498_v27  ;;  %v7500_v20 = vrot.slane %v7498_v27, 4  ;;  %v5883_v54 = vrot.slane %v5882_v40, 4  ;;  %v6447_v61 = vmax.bf16 %v6309_v60, %v6187_v58  ;;  %v5551_v27 = vld [vmem:[#allocation2 + $0xf8] sm:$0xf] }
 0x384   : > { %v5893_v44 = vrot.slane %v5892_v22, 4  ;;  %v6312_v43 = vsel %vm9485_vm5, %v6310_v46, %v6311_v56  ;;  %v6313_v41 = vrot.slane %v6311_v56, 4  ;;  %v6648_v28 = vrot.slane %v5879_v45, 5 }
 0x385   : > { %v7502_v37 = vsel %vm9848_vm14, %v7500_v20, %v7501_v59  ;;  %v5888_v6 = vsel %vm9285_vm2, %v5883_v54, %v5887_v21  ;;  %v6649_v18 = vrot.slane %v5875_v47, 6  ;;  %v6652_v36 = vrot.slane %v5889_v1, 5  ;;  %v12504_v59 = vld [vmem:[#allocation2 + $0xfc] sm:$0xf] }
 0x386   : > { %v8520_v10 = vcombine.low %v7499_v31, %v7502_v37  ;;  %v6188_v11 = vmax.bf16 %v5888_v6, %v5548_v7  ;;  %v6189_v39 = vmax.bf16 %v5893_v44, %v5549_v55  ;;  %v6653_v52 = vrot.slane %v5885_v42, 6 }
 0x387   : > { %v6650_v13 = vor.u32 %v6649_v18, %v6648_v28  ;;  %v6658_v5 = vshll.u32 %v6485_v48, 16  ;;  %v7031_v49 = vrot.slane %v6905_v35, 6  ;;  %v7033_v51 = vrot.slane %v12456_v33, 6 }
 0x388   : > { %8971 = vmatprep.mubr.bf16.mxu0 %v8520_v10  ;;  %v6448_v45 = vmax.bf16 %v6312_v43, %v6188_v11  ;;  %v6449_v14 = vmax.bf16 %v6313_v41, %v6189_v39  ;;  %v6654_v8 = vor.u32 %v6653_v52, %v6652_v36  ;;  %v7036_v26 = vrot.slane %v6485_v48, 6 }
 0x389   : > { %v6651_v57 = vrot.slane %v6650_v13, 4  ;;  %v6660_v12 = vrot.slane %v6658_v5, 6  ;;  %v6867_v25 = vmax.bf16 %v6650_v13, %v6447_v61  ;;  %v7032_v21 = vrot.slane %v7031_v49, 4 }
 0x38a   : > { %v6656_v47 = vrot.slane %v6654_v8, 4  ;;  %v7035_v1 = vrot.slane %v7033_v51, 4  ;;  %v7235_v7 = vmax.bf16 %v12352_v62, %v12307_v19  ;;  %v7236_v42 = vmax.bf16 %v12367_v3, %v12322_v17 }
 0x38b   : > { %v6655_v33 = vsel %vm9593_vm8, %v6651_v57, %v6654_v8  ;;  %v7034_v2 = vsel %vm9738_vm11, %v7032_v21, %v7033_v51  ;;  %v12495_v60 = vmax.bf16 %v7031_v49, %v6867_v25  ;;  %v7237_v63 = vmax.bf16 %v12372_v53, %v12327_v24  ;;  %v5552_v21 = vld [vmem:[#allocation2 + $0xfc] sm:$0x7] }
 0x38c   : > { %v6661_v40 = vsel %vm9593_vm8, %v6656_v47, %v6660_v12  ;;  %v6868_v19 = vmax.bf16 %v6655_v33, %v6448_v45  ;;  %v7037_v17 = vsel %vm9738_vm11, %v7035_v1, %v7036_v26  ;;  %v7283_v58 = vmax.bf16 %v7235_v7, %v12393_v16  ;;  %v6486_v1 = vld [vmem:[#allocation2 + $0x100] sm:$0x1] }
 0x38d   : > { %v6869_v22 = vmax.bf16 %v6661_v40, %v6449_v14  ;;  %v7284_v46 = vmax.bf16 %v7236_v42, %v12413_v34  ;;  %v7285_v56 = vmax.bf16 %v7237_v63, %v12422_v30  ;;  %v5895_v31 = vshrl.u32 %v5550_v9, 16  ;;  %v6906_v63 = vld [vmem:[#allocation2 + $0xf8] sm:$0xe] }
 0x38e   : > { %v12508_v20 = vmax.bf16 %v7034_v2, %v6868_v19  ;;  %v7331_v24 = vmax.bf16 %v7283_v58, %v12442_v4  ;;  %v5900_v55 = vshll.u32 %v5551_v27, 16  ;;  %v5904_v54 = vshrl.u32 %v5551_v27, 16 }
 0x38f   : > { %v12511_v61 = vmax.bf16 %v7037_v17, %v6869_v22  ;;  %v7332_v48 = vmax.bf16 %v7284_v46, %v12462_v50  ;;  %v7333_v44 = vmax.bf16 %v7285_v56, %v12468_v32  ;;  %v5910_v43 = vshll.u32 %v12504_v59, 16 }
 0x390   : > { %v7379_v41 = vmax.bf16 %v7331_v24, %v12495_v60  ;;  %v5902_v28 = vrot.slane %v5900_v55, 5  ;;  %v5906_v35 = vrot.slane %v5904_v54, 4  ;;  %v5914_v37 = vshrl.u32 %v12504_v59, 16 }
 0x391   : > { %v7380_v6 = vmax.bf16 %v7332_v48, %v12508_v20  ;;  %v7381_v18 = vmax.bf16 %v7333_v44, %v12511_v61  ;;  %v5912_v36 = vrot.slane %v5910_v43, 5  ;;  %v6314_v10 = vrot.slane %v5551_v27, 5 }
 0x392   : > { %v8489_v11 = vrot.slane %v7379_v41, 11  ;;  %v5903_v39 = vsel %vm9285_vm2, %v5895_v31, %v5902_v28  ;;  %v5907_v52 = vor.u32 %v5906_v35, %v5902_v28  ;;  %v5916_v13 = vrot.slane %v5914_v37, 4 }
 0x393   : > { %v7505_v5 = vrot.slane %v7380_v6, 7  ;;  %v7508_v49 = vrot.slane %v7381_v18, 7  ;;  %v6190_v51 = vmax.bf16 %v5903_v39, %v5550_v9  ;;  %v6315_v45 = vrot.slane %v6314_v10, 4 }
 0x394   : > { %v5908_v14 = vrot.slane %v5907_v52, 4  ;;  %v5917_v8 = vor.u32 %v5916_v13, %v5912_v36  ;;  %v6316_v26 = vrot.slane %v12504_v59, 5  ;;  %v6662_v57 = vrot.slane %v5904_v54, 5 }
 0x395   : > { %v7506_v12 = vsel %vm9848_vm14, %v8489_v11, %v7505_v5  ;;  %v7507_v25 = vrot.slane %v7505_v5, 4  ;;  %v6450_v47 = vmax.bf16 %v6314_v10, %v6190_v51  ;;  %v6663_v7 = vrot.slane %v5900_v55, 6 }
 0x396   : > { %v5913_v42 = vsel %vm9285_vm2, %v5908_v14, %v5912_v36  ;;  %v5918_v33 = vrot.slane %v5917_v8, 4  ;;  %v6317_v9 = vsel %vm9485_vm5, %v6315_v45, %v6316_v26  ;;  %v6318_v2 = vrot.slane %v6316_v26, 4 }
 0x397   : > { %v7509_v40 = vsel %vm9848_vm14, %v7507_v25, %v7508_v49  ;;  %v6191_v19 = vmax.bf16 %v5913_v42, %v5551_v27  ;;  %v6664_v17 = vor.u32 %v6663_v7, %v6662_v57  ;;  %v6666_v58 = vrot.slane %v5914_v37, 5  ;;  %v5553_v37 = vld [vmem:[#allocation2 + $0x108] sm:$0x8]  ;;  %v5554_v49 = vld [vmem:[#allocation2 + $0x10c] sm:$0xf] }
 0x398   : > { %v8521_v22 = vcombine.low %v7506_v12, %v7509_v40  ;;  %v6192_v46 = vmax.bf16 %v5918_v33, %v5552_v21  ;;  %v6667_v56 = vrot.slane %v5910_v43, 6  ;;  %v6672_v31 = vshll.u32 %v6486_v1, 16 }
 0x399   : > { %v6451_v24 = vmax.bf16 %v6317_v9, %v6191_v19  ;;  %v6665_v55 = vrot.slane %v6664_v17, 4  ;;  %v6870_v54 = vmax.bf16 %v6664_v17, %v6450_v47  ;;  %v7038_v48 = vrot.slane %v6906_v63, 6 }
 0x39a   : > { %8972 = vmatmul.mubr.bf16.gmra.mrb[12].mxu0 %v8521_v22  ;;  %v6452_v44 = vmax.bf16 %v6318_v2, %v6192_v46  ;;  %v6668_v41 = vor.u32 %v6667_v56, %v6666_v58  ;;  %v6674_v28 = vrot.slane %v6672_v31, 6  ;;  %v7040_v35 = vrot.slane %v12504_v59, 6 }
 0x39b   : > { %v7039_v6 = vrot.slane %v7038_v48, 4  ;;  %v7043_v18 = vrot.slane %v6486_v1, 6  ;;  %v12532_v36 = vmax.bf16 %v7038_v48, %v6870_v54  ;;  %v7238_v27 = vmax.bf16 %v12393_v16, %v12352_v62  ;;  %v12545_v62 = vld [vmem:[#allocation2 + $0x110] sm:$0xf] }
 0x39c   : > { %v6669_v43 = vsel %vm9593_vm8, %v6665_v55, %v6668_v41  ;;  %v6670_v10 = vrot.slane %v6668_v41, 4  ;;  %v7042_v11 = vrot.slane %v7040_v35, 4  ;;  %v7239_v39 = vmax.bf16 %v12413_v34, %v12367_v3  ;;  %v5555_v54 = vld [vmem:[#allocation2 + $0x110] sm:$0x7] }
 0x39d   : > { %v6871_v52 = vmax.bf16 %v6669_v43, %v6451_v24  ;;  %v7041_v59 = vsel %vm9738_vm11, %v7039_v6, %v7040_v35  ;;  %v7240_v13 = vmax.bf16 %v12422_v30, %v12372_v53  ;;  %v7286_v5 = vmax.bf16 %v7238_v27, %v12442_v4  ;;  %v6487_v27 = vld [vmem:[#allocation2 + $0x114] sm:$0x1]  ;;  %v12570_v43 = vpop.f32.mrb[0].mxu1 }
 0x39e   : > { %v6675_v51 = vsel %vm9593_vm8, %v6670_v10, %v6674_v28  ;;  %v7044_v45 = vsel %vm9738_vm11, %v7042_v11, %v7043_v18  ;;  %v7287_v3 = vmax.bf16 %v7239_v39, %v12462_v50  ;;  %v5920_v14 = vshrl.u32 %v5553_v37, 16 }
 0x39f   : > { %v6872_v8 = vmax.bf16 %v6675_v51, %v6452_v44  ;;  %v12552_v26 = vmax.bf16 %v7041_v59, %v6871_v52  ;;  %v7288_v57 = vmax.bf16 %v7240_v13, %v12468_v32  ;;  %v7334_v53 = vmax.bf16 %v7286_v5, %v12495_v60  ;;  %v6907_v59 = vld [vmem:[#allocation2 + $0x10c] sm:$0xe]  ;;  %v12574_v13 = vpop.f32.mrb[1].mxu1 }
 0x3a0   : > { %v7335_v12 = vmax.bf16 %v7287_v3, %v12508_v20  ;;  %v5925_v25 = vshll.u32 %v5554_v49, 16  ;;  %v5929_v21 = vshrl.u32 %v5554_v49, 16  ;;  %v5935_v47 = vshll.u32 %v12545_v62, 16  ;;  %v12580_v3 = vpop.f32.mrb[2].mxu1 }
 0x3a1   : > { %v12558_v1 = vmax.bf16 %v7044_v45, %v6872_v8  ;;  %v7336_v7 = vmax.bf16 %v7288_v57, %v12511_v61  ;;  %v7382_v42 = vmax.bf16 %v7334_v53, %v12532_v36  ;;  %v5939_v33 = vshrl.u32 %v12545_v62, 16 }
 0x3a2   : > { %v7383_v9 = vmax.bf16 %v7335_v12, %v12552_v26  ;;  %v5927_v2 = vrot.slane %v5925_v25, 5  ;;  %v5931_v63 = vrot.slane %v5929_v21, 4  ;;  %v5937_v40 = vrot.slane %v5935_v47, 5  ;;  %v12582_v12 = vpop.f32.mrb[3].mxu1 }
 0x3a3   : > { %v7384_v19 = vmax.bf16 %v7336_v7, %v12558_v1  ;;  %v8490_v17 = vrot.slane %v7382_v42, 11  ;;  %v5941_v58 = vrot.slane %v5939_v33, 4  ;;  %v6319_v22 = vrot.slane %v5554_v49, 5 }
 0x3a4   : > { %v7512_v46 = vrot.slane %v7383_v9, 7  ;;  %v5928_v56 = vsel %vm9285_vm2, %v5920_v14, %v5927_v2  ;;  %v5932_v31 = vor.u32 %v5931_v63, %v5927_v2  ;;  %v6321_v24 = vrot.slane %v12545_v62, 5  ;;  %v12585_v2 = vpop.f32.mrb[4].mxu1 }
 0x3a5   : > { %v7515_v55 = vrot.slane %v7384_v19, 7  ;;  %v5942_v48 = vor.u32 %v5941_v58, %v5937_v40  ;;  %v6193_v44 = vmax.bf16 %v5928_v56, %v5553_v37  ;;  %v6320_v41 = vrot.slane %v6319_v22, 4  ;;  %v12587_v19 = vpop.f32.mrb[5].mxu1 }
 0x3a6   : > { %v7513_v28 = vsel %vm9848_vm14, %v8490_v17, %v7512_v46  ;;  %v7514_v35 = vrot.slane %v7512_v46, 4  ;;  %v5933_v6 = vrot.slane %v5932_v31, 4  ;;  %v6323_v18 = vrot.slane %v6321_v24, 4 }
 0x3a7   : > { %v5943_v10 = vrot.slane %v5942_v48, 4  ;;  %v6322_v11 = vsel %vm9485_vm5, %v6320_v41, %v6321_v24  ;;  %v6453_v39 = vmax.bf16 %v6319_v22, %v6193_v44  ;;  %v6676_v52 = vrot.slane %v5929_v21, 5  ;;  %v12589_v22 = vpop.f32.mrb[6].mxu1  ;;  %v5556_v24 = vld [vmem:[#allocation2 + $0x11c] sm:$0x8] }
 0x3a8   : > { %v7516_v37 = vsel %vm9848_vm14, %v7514_v35, %v7515_v55  ;;  %v5938_v5 = vsel %vm9285_vm2, %v5933_v6, %v5937_v40  ;;  %v6677_v51 = vrot.slane %v5925_v25, 6  ;;  %v6680_v45 = vrot.slane %v5939_v33, 5  ;;  %v12595_v55 = vpop.f32.mrb[7].mxu1 }
 0x3a9   : > { %v8522_v14 = vcombine.low %v7513_v28, %v7516_v37  ;;  %v6194_v8 = vmax.bf16 %v5938_v5, %v5554_v49  ;;  %v6195_v57 = vmax.bf16 %v5943_v10, %v5555_v54  ;;  %v6681_v53 = vrot.slane %v5935_v47, 6  ;;  %v12605_v28 = vld [vmem:[#allocation2 + $0x120] sm:$0xf] }
 0x3aa   : > { %v6678_v21 = vor.u32 %v6677_v51, %v6676_v52  ;;  %v6686_v7 = vshll.u32 %v6487_v27, 16  ;;  %v7045_v42 = vrot.slane %v6907_v59, 6  ;;  %v7047_v9 = vrot.slane %v12545_v62, 6 }
 0x3ab   : > { %8975 = vmatprep.mubr.bf16.mxu0 %v8522_v14  ;;  %v6454_v63 = vmax.bf16 %v6322_v11, %v6194_v8  ;;  %v6455_v40 = vmax.bf16 %v6323_v18, %v6195_v57  ;;  %v6682_v25 = vor.u32 %v6681_v53, %v6680_v45  ;;  %v7050_v33 = vrot.slane %v6487_v27, 6  ;;  %v12614_v27 = vld [vmem:[#allocation2 + $0x124] sm:$0xf] }
 0x3ac   : > { %v6679_v17 = vrot.slane %v6678_v21, 4  ;;  %v6688_v49 = vrot.slane %v6686_v7, 6  ;;  %v6873_v58 = vmax.bf16 %v6678_v21, %v6453_v39  ;;  %v7046_v47 = vrot.slane %v7045_v42, 4 }
 0x3ad   : > { %v6684_v46 = vrot.slane %v6682_v25, 4  ;;  %v7049_v56 = vrot.slane %v7047_v9, 4  ;;  %v7241_v62 = vmax.bf16 %v12442_v4, %v12393_v16  ;;  %v7242_v31 = vmax.bf16 %v12462_v50, %v12413_v34  ;;  %v12607_v16 = vpop.f32.mrb[8].mxu1 }
 0x3ae   : > { %v6683_v54 = vsel %vm9593_vm8, %v6679_v17, %v6682_v25  ;;  %v7048_v48 = vsel %vm9738_vm11, %v7046_v47, %v7047_v9  ;;  %v12601_v44 = vmax.bf16 %v7045_v42, %v6873_v58  ;;  %v7243_v41 = vmax.bf16 %v12468_v32, %v12422_v30  ;;  %v12616_v10 = vpop.f32.mrb[9].mxu1 }
 0x3af   : > { %v6689_v34 = vsel %vm9593_vm8, %v6684_v46, %v6688_v49  ;;  %v6874_v35 = vmax.bf16 %v6683_v54, %v6454_v63  ;;  %v7051_v6 = vsel %vm9738_vm11, %v7049_v56, %v7050_v33  ;;  %v7289_v18 = vmax.bf16 %v7241_v62, %v12495_v60  ;;  %v12620_v59 = vpop.f32.mrb[10].mxu1 }
 0x3b0   : > { %v6875_v11 = vmax.bf16 %v6689_v34, %v6455_v40  ;;  %v7290_v30 = vmax.bf16 %v7242_v31, %v12508_v20  ;;  %v7291_v39 = vmax.bf16 %v7243_v41, %v12511_v61  ;;  %v5945_v52 = vshrl.u32 %v5556_v24, 16  ;;  %13356 = vst [vmem:[#allocation33_spill] sm:$0xff] %v12620_v59  ;;  %v12627_v14 = vpop.f32.mrb[11].mxu1 }
 0x3b1   : > { %v12622_v37 = vmax.bf16 %v7048_v48, %v6874_v35  ;;  %v7337_v5 = vmax.bf16 %v7289_v18, %v12532_v36  ;;  %v5950_v51 = vshll.u32 %v12605_v28, 16  ;;  %v5954_v45 = vshrl.u32 %v12605_v28, 16  ;;  %13357 = vst [vmem:[#allocation29_spill] sm:$0xff] %v12627_v14  ;;  %v12634_v7 = vpop.f32.mrb[12].mxu1  ;;  %v5558_v18 = vld [vmem:[#allocation2 + $0x124] sm:$0x7] }
 0x3b2   : > { %v12629_v8 = vmax.bf16 %v7051_v6, %v6875_v11  ;;  %v7338_v57 = vmax.bf16 %v7290_v30, %v12552_v26  ;;  %v7339_v53 = vmax.bf16 %v7291_v39, %v12558_v1  ;;  %v5960_v21 = vshll.u32 %v12614_v27, 16  ;;  %13358 = vst [vmem:[#allocation34_spill] sm:$0xff] %v12634_v7  ;;  %v12638_v25 = vpop.f32.mrb[13].mxu1 }
 0x3b3   : > { %v7385_v42 = vmax.bf16 %v7337_v5, %v12601_v44  ;;  %v5952_v9 = vrot.slane %v5950_v51, 5  ;;  %v5956_v63 = vrot.slane %v5954_v45, 4  ;;  %v5964_v40 = vshrl.u32 %v12614_v27, 16  ;;  %13359 = vst [vmem:[#allocation30_spill] sm:$0xff] %v12638_v25  ;;  %v12643_v47 = vpop.f32.mrb[14].mxu1 }
 0x3b4   : > { %v7386_v33 = vmax.bf16 %v7338_v57, %v12622_v37  ;;  %v7387_v17 = vmax.bf16 %v7339_v53, %v12629_v8  ;;  %v5962_v49 = vrot.slane %v5960_v21, 5  ;;  %v6324_v58 = vrot.slane %v12605_v28, 5  ;;  %13360 = vst [vmem:[#allocation35_spill] sm:$0xff] %v12643_v47  ;;  %v12647_v54 = vpop.f32.mrb[15].mxu1 }
 0x3b5   : > { %v8491_v46 = vrot.slane %v7385_v42, 11  ;;  %v5953_v56 = vsel %vm9285_vm2, %v5945_v52, %v5952_v9  ;;  %v5957_v62 = vor.u32 %v5956_v63, %v5952_v9  ;;  %v5966_v31 = vrot.slane %v5964_v40, 4  ;;  %13361 = vst [vmem:[#allocation36_spill] sm:$0xff] %v12647_v54  ;;  %v12649_v6 = vpop.f32.mrb[16].mxu1  ;;  %v6488_v9 = vld [vmem:[#allocation2 + $0x128] sm:$0x1] }
 0x3b6   : > { %v7519_v48 = vrot.slane %v7386_v33, 7  ;;  %v7522_v41 = vrot.slane %v7387_v17, 7  ;;  %v6196_v34 = vmax.bf16 %v5953_v56, %v5556_v24  ;;  %v6325_v35 = vrot.slane %v6324_v58, 4  ;;  %13362 = vst [vmem:[#allocation37_spill] sm:$0xff] %v12649_v6  ;;  %v12652_v57 = vpop.f32.mrb[17].mxu1 }
 0x3b7   : > { %v5958_v11 = vrot.slane %v5957_v62, 4  ;;  %v5967_v30 = vor.u32 %v5966_v31, %v5962_v49  ;;  %v6326_v39 = vrot.slane %v12614_v27, 5  ;;  %v6690_v5 = vrot.slane %v5954_v45, 5  ;;  %13363 = vst [vmem:[#allocation38_spill] sm:$0xff] %v12652_v57  ;;  %v12656_v33 = vpop.f32.mrb[18].mxu1 }
 0x3b8   : > { %v7520_v52 = vsel %vm9848_vm14, %v8491_v46, %v7519_v48  ;;  %v7521_v53 = vrot.slane %v7519_v48, 4  ;;  %v6456_v42 = vmax.bf16 %v6324_v58, %v6196_v34  ;;  %v6691_v63 = vrot.slane %v5950_v51, 6  ;;  %13364 = vst [vmem:[#allocation39_spill] sm:$0xff] %v12656_v33  ;;  %v6908_v45 = vld [vmem:[#allocation2 + $0x120] sm:$0xe]  ;;  %v12662_v31 = vpop.f32.mrb[19].mxu1 }
 0x3b9   : > { %v5963_v24 = vsel %vm9285_vm2, %v5958_v11, %v5962_v49  ;;  %v5968_v17 = vrot.slane %v5967_v30, 4  ;;  %v6327_v56 = vsel %vm9485_vm5, %v6325_v35, %v6326_v39  ;;  %v6328_v62 = vrot.slane %v6326_v39, 4  ;;  %13365 = vst [vmem:[#allocation40_spill] sm:$0xff] %v12662_v31 }
 0x3ba   : > { %v7523_v46 = vsel %vm9848_vm14, %v7521_v53, %v7522_v41  ;;  %v6197_v58 = vmax.bf16 %v5963_v24, %v12605_v28  ;;  %v6692_v48 = vor.u32 %v6691_v63, %v6690_v5  ;;  %v6694_v51 = vrot.slane %v5964_v40, 5  ;;  %v5559_v40 = vld [vmem:[#allocation2 + $0x130] sm:$0x8] }
 0x3bb   : > { %v8523_v34 = vcombine.low %v7520_v52, %v7523_v46  ;;  %v6198_v33 = vmax.bf16 %v5968_v17, %v5558_v18  ;;  %v6695_v57 = vrot.slane %v5960_v21, 6  ;;  %v6700_v6 = vshll.u32 %v6488_v9, 16 }
 0x3bc   : > { %v6457_v49 = vmax.bf16 %v6327_v56, %v6197_v58  ;;  %v6693_v11 = vrot.slane %v6692_v48, 4  ;;  %v6876_v30 = vmax.bf16 %v6692_v48, %v6456_v42  ;;  %v7052_v54 = vrot.slane %v6908_v45, 6  ;;  %v5560_v42 = vld [vmem:[#allocation2 + $0x134] sm:$0xf] }
 0x3bd   : > { %8976 = vmatmul.mubr.bf16.gmra.mrb[16].mxu0 %v8523_v34  ;;  %v6458_v35 = vmax.bf16 %v6328_v62, %v6198_v33  ;;  %v6696_v39 = vor.u32 %v6695_v57, %v6694_v51  ;;  %v6702_v47 = vrot.slane %v6700_v6, 6  ;;  %v7054_v31 = vrot.slane %v12614_v27, 6 }
 0x3be   : > { %v7053_v25 = vrot.slane %v7052_v54, 4  ;;  %v7057_v41 = vrot.slane %v6488_v9, 6  ;;  %v12668_v53 = vmax.bf16 %v7052_v54, %v6876_v30  ;;  %v7244_v28 = vmax.bf16 %v12495_v60, %v12442_v4  ;;  %v12681_v4 = vld [vmem:[#allocation2 + $0x138] sm:$0xf] }
 0x3bf   : > { %v6697_v21 = vsel %vm9593_vm8, %v6693_v11, %v6696_v39  ;;  %v6698_v18 = vrot.slane %v6696_v39, 4  ;;  %v7056_v5 = vrot.slane %v7054_v31, 4  ;;  %v7245_v52 = vmax.bf16 %v12508_v20, %v12462_v50 }
 0x3c0   : > { %v6877_v57 = vmax.bf16 %v6697_v21, %v6457_v49  ;;  %v7055_v27 = vsel %vm9738_vm11, %v7053_v25, %v7054_v31  ;;  %v7246_v54 = vmax.bf16 %v12511_v61, %v12468_v32  ;;  %v7292_v6 = vmax.bf16 %v7244_v28, %v12532_v36 }
 0x3c1   : > { %v6703_v9 = vsel %vm9593_vm8, %v6698_v18, %v6702_v47  ;;  %v7058_v63 = vsel %vm9738_vm11, %v7056_v5, %v7057_v41  ;;  %v7293_v50 = vmax.bf16 %v7245_v52, %v12552_v26  ;;  %v5970_v33 = vshrl.u32 %v5559_v40, 16 }
 0x3c2   : > { %v6878_v24 = vmax.bf16 %v6703_v9, %v6458_v35  ;;  %v12688_v17 = vmax.bf16 %v7055_v27, %v6877_v57  ;;  %v7294_v25 = vmax.bf16 %v7246_v54, %v12558_v1  ;;  %v7340_v32 = vmax.bf16 %v7292_v6, %v12601_v44 }
 0x3c3   : > { %v7341_v56 = vmax.bf16 %v7293_v50, %v12622_v37  ;;  %v5975_v62 = vshll.u32 %v5560_v42, 16  ;;  %v5979_v45 = vshrl.u32 %v5560_v42, 16  ;;  %v5985_v31 = vshll.u32 %v12681_v4, 16 }
 0x3c4   : > { %v12694_v47 = vmax.bf16 %v7058_v63, %v6878_v24  ;;  %v7342_v46 = vmax.bf16 %v7294_v25, %v12629_v8  ;;  %v7388_v58 = vmax.bf16 %v7340_v32, %v12668_v53  ;;  %v5989_v48 = vshrl.u32 %v12681_v4, 16  ;;  %v5561_v63 = vld [vmem:[#allocation2 + $0x138] sm:$0x7] }
 0x3c5   : > { %v7389_v51 = vmax.bf16 %v7341_v56, %v12688_v17  ;;  %v5977_v34 = vrot.slane %v5975_v62, 5  ;;  %v5981_v49 = vrot.slane %v5979_v45, 4  ;;  %v5987_v11 = vrot.slane %v5985_v31, 5 }
 0x3c6   : > { %v7390_v30 = vmax.bf16 %v7342_v46, %v12694_v47  ;;  %v8492_v35 = vrot.slane %v7388_v58, 11  ;;  %v5991_v39 = vrot.slane %v5989_v48, 4  ;;  %v6329_v41 = vrot.slane %v5560_v42, 5  ;;  %v6909_v58 = vld [vmem:[#allocation2 + $0x134] sm:$0xe] }
 0x3c7   : > { %v7526_v28 = vrot.slane %v7389_v51, 7  ;;  %v5978_v21 = vsel %vm9285_vm2, %v5970_v33, %v5977_v34  ;;  %v5982_v18 = vor.u32 %v5981_v49, %v5977_v34  ;;  %v6331_v5 = vrot.slane %v12681_v4, 5  ;;  %v6489_v33 = vld [vmem:[#allocation2 + $0x13c] sm:$0x1] }
 0x3c8   : > { %v7529_v52 = vrot.slane %v7390_v30, 7  ;;  %v5992_v57 = vor.u32 %v5991_v39, %v5987_v11  ;;  %v6199_v27 = vmax.bf16 %v5978_v21, %v5559_v40  ;;  %v6330_v54 = vrot.slane %v6329_v41, 4 }
 0x3c9   : > { %v7527_v6 = vsel %vm9848_vm14, %v8492_v35, %v7526_v28  ;;  %v7528_v9 = vrot.slane %v7526_v28, 4  ;;  %v5983_v50 = vrot.slane %v5982_v18, 4  ;;  %v6333_v24 = vrot.slane %v6331_v5, 4 }
 0x3ca   : > { %v5993_v25 = vrot.slane %v5992_v57, 4  ;;  %v6332_v32 = vsel %vm9485_vm5, %v6330_v54, %v6331_v5  ;;  %v6459_v56 = vmax.bf16 %v6329_v41, %v6199_v27  ;;  %v6704_v46 = vrot.slane %v5979_v45, 5 }
 0x3cb   : > { %v7530_v51 = vsel %vm9848_vm14, %v7528_v9, %v7529_v52  ;;  %v5988_v40 = vsel %vm9285_vm2, %v5983_v50, %v5987_v11  ;;  %v6705_v34 = vrot.slane %v5975_v62, 6  ;;  %v6708_v49 = vrot.slane %v5989_v48, 5 }
 0x3cc   : > { %v8524_v30 = vcombine.low %v7527_v6, %v7530_v51  ;;  %v6200_v35 = vmax.bf16 %v5988_v40, %v5560_v42  ;;  %v6201_v39 = vmax.bf16 %v5993_v25, %v5561_v63  ;;  %v6709_v28 = vrot.slane %v5985_v31, 6  ;;  %v5562_v6 = vld [vmem:[#allocation2 + $0x144] sm:$0x8]  ;;  %v5563_v25 = vld [vmem:[#allocation2 + $0x148] sm:$0xf] }
 0x3cd   : > { %v6706_v21 = vor.u32 %v6705_v34, %v6704_v46  ;;  %v6714_v18 = vshll.u32 %v6489_v33, 16  ;;  %v7059_v57 = vrot.slane %v6909_v58, 6  ;;  %v7061_v41 = vrot.slane %v12681_v4, 6 }
 0x3ce   : > { %8979 = vmatprep.mubr.bf16.mxu0 %v8524_v30  ;;  %v6460_v45 = vmax.bf16 %v6332_v32, %v6200_v35  ;;  %v6461_v5 = vmax.bf16 %v6333_v24, %v6201_v39  ;;  %v6710_v27 = vor.u32 %v6709_v28, %v6708_v49  ;;  %v7064_v54 = vrot.slane %v6489_v33, 6  ;;  %v12730_v33 = vld [vmem:[#allocation2 + $0x14c] sm:$0xf] }
 0x3cf   : > { %v6707_v52 = vrot.slane %v6706_v21, 4  ;;  %v6716_v9 = vrot.slane %v6714_v18, 6  ;;  %v6879_v7 = vmax.bf16 %v6706_v21, %v6459_v56  ;;  %v7060_v11 = vrot.slane %v7059_v57, 4 }
 0x3d0   : > { %v6712_v62 = vrot.slane %v6710_v27, 4  ;;  %v7063_v48 = vrot.slane %v7061_v41, 4  ;;  %v7247_v42 = vmax.bf16 %v12532_v36, %v12495_v60  ;;  %v7248_v31 = vmax.bf16 %v12552_v26, %v12508_v20 }
 0x3d1   : > { %v6711_v4 = vsel %vm9593_vm8, %v6707_v52, %v6710_v27  ;;  %v7062_v63 = vsel %vm9738_vm11, %v7060_v11, %v7061_v41  ;;  %v12721_v50 = vmax.bf16 %v7059_v57, %v6879_v7  ;;  %v7249_v24 = vmax.bf16 %v12558_v1, %v12511_v61 }
 0x3d2   : > { %v6717_v32 = vsel %vm9593_vm8, %v6712_v62, %v6716_v9  ;;  %v6880_v60 = vmax.bf16 %v6711_v4, %v6460_v45  ;;  %v7065_v20 = vsel %vm9738_vm11, %v7063_v48, %v7064_v54  ;;  %v7295_v56 = vmax.bf16 %v7247_v42, %v12601_v44 }
 0x3d3   : > { %v6881_v46 = vmax.bf16 %v6717_v32, %v6461_v5  ;;  %v7296_v58 = vmax.bf16 %v7248_v31, %v12622_v37  ;;  %v7297_v7 = vmax.bf16 %v7249_v24, %v12629_v8  ;;  %v5995_v51 = vshrl.u32 %v5562_v6, 16 }
 0x3d4   : > { %v12734_v40 = vmax.bf16 %v7062_v63, %v6880_v60  ;;  %v7343_v61 = vmax.bf16 %v7295_v56, %v12668_v53  ;;  %v6000_v34 = vshll.u32 %v5563_v25, 16  ;;  %v6004_v49 = vshrl.u32 %v5563_v25, 16 }
 0x3d5   : > { %v12737_v30 = vmax.bf16 %v7065_v20, %v6881_v46  ;;  %v7344_v35 = vmax.bf16 %v7296_v58, %v12688_v17  ;;  %v7345_v39 = vmax.bf16 %v7297_v7, %v12694_v47  ;;  %v6010_v28 = vshll.u32 %v12730_v33, 16  ;;  %v5564_v46 = vld [vmem:[#allocation2 + $0x14c] sm:$0x7]  ;;  %v6490_v7 = vld [vmem:[#allocation2 + $0x150] sm:$0x1] }
 0x3d6   : > { %v7391_v21 = vmax.bf16 %v7343_v61, %v12721_v50  ;;  %v6002_v18 = vrot.slane %v6000_v34, 5  ;;  %v6006_v57 = vrot.slane %v6004_v49, 4  ;;  %v6014_v41 = vshrl.u32 %v12730_v33, 16 }
 0x3d7   : > { %v7392_v45 = vmax.bf16 %v7344_v35, %v12734_v40  ;;  %v7393_v5 = vmax.bf16 %v7345_v39, %v12737_v30  ;;  %v6012_v27 = vrot.slane %v6010_v28, 5  ;;  %v6334_v54 = vrot.slane %v5563_v25, 5 }
 0x3d8   : > { %v8493_v52 = vrot.slane %v7391_v21, 11  ;;  %v6003_v9 = vsel %vm9285_vm2, %v5995_v51, %v6002_v18  ;;  %v6007_v11 = vor.u32 %v6006_v57, %v6002_v18  ;;  %v6016_v62 = vrot.slane %v6014_v41, 4  ;;  %v6910_v21 = vld [vmem:[#allocation2 + $0x148] sm:$0xe] }
 0x3d9   : > { %v7533_v48 = vrot.slane %v7392_v45, 7  ;;  %v7536_v42 = vrot.slane %v7393_v5, 7  ;;  %v6202_v31 = vmax.bf16 %v6003_v9, %v5562_v6  ;;  %v6335_v4 = vrot.slane %v6334_v54, 4 }
 0x3da   : > { %v6008_v63 = vrot.slane %v6007_v11, 4  ;;  %v6017_v24 = vor.u32 %v6016_v62, %v6012_v27  ;;  %v6336_v32 = vrot.slane %v12730_v33, 5  ;;  %v6718_v60 = vrot.slane %v6004_v49, 5 }
 0x3db   : > { %v7534_v20 = vsel %vm9848_vm14, %v8493_v52, %v7533_v48  ;;  %v7535_v56 = vrot.slane %v7533_v48, 4  ;;  %v6462_v58 = vmax.bf16 %v6334_v54, %v6202_v31  ;;  %v6719_v61 = vrot.slane %v6000_v34, 6 }
 0x3dc   : > { %v6013_v51 = vsel %vm9285_vm2, %v6008_v63, %v6012_v27  ;;  %v6018_v35 = vrot.slane %v6017_v24, 4  ;;  %v6337_v6 = vsel %vm9485_vm5, %v6335_v4, %v6336_v32  ;;  %v6338_v39 = vrot.slane %v6336_v32, 4 }
 0x3dd   : > { %v7537_v49 = vsel %vm9848_vm14, %v7535_v56, %v7536_v42  ;;  %v6203_v18 = vmax.bf16 %v6013_v51, %v5563_v25  ;;  %v6720_v57 = vor.u32 %v6719_v61, %v6718_v60  ;;  %v6722_v45 = vrot.slane %v6014_v41, 5  ;;  %v5565_v41 = vld [vmem:[#allocation2 + $0x158] sm:$0x8]  ;;  %v5566_v61 = vld [vmem:[#allocation2 + $0x15c] sm:$0xf] }
 0x3de   : > { %v8525_v5 = vcombine.low %v7534_v20, %v7537_v49  ;;  %v6204_v52 = vmax.bf16 %v6018_v35, %v5564_v46  ;;  %v6723_v54 = vrot.slane %v6010_v28, 6  ;;  %v6728_v9 = vshll.u32 %v6490_v7, 16 }
 0x3df   : > { %v6463_v34 = vmax.bf16 %v6337_v6, %v6203_v18  ;;  %v6721_v11 = vrot.slane %v6720_v57, 4  ;;  %v6882_v62 = vmax.bf16 %v6720_v57, %v6462_v58  ;;  %v7066_v27 = vrot.slane %v6910_v21, 6 }
 0x3e0   : > { %8980 = vmatmul.mubr.bf16.gmra.mrb[20].mxu0 %v8525_v5  ;;  %v6464_v48 = vmax.bf16 %v6338_v39, %v6204_v52  ;;  %v6724_v31 = vor.u32 %v6723_v54, %v6722_v45  ;;  %v6730_v4 = vrot.slane %v6728_v9, 6  ;;  %v7068_v63 = vrot.slane %v12730_v33, 6 }
 0x3e1   : > { %v7067_v24 = vrot.slane %v7066_v27, 4  ;;  %v7071_v32 = vrot.slane %v6490_v7, 6  ;;  %v12758_v42 = vmax.bf16 %v7066_v27, %v6882_v62  ;;  %v7250_v25 = vmax.bf16 %v12601_v44, %v12532_v36  ;;  %v12771_v36 = vld [vmem:[#allocation2 + $0x160] sm:$0xf] }
 0x3e2   : > { %v6725_v28 = vsel %vm9593_vm8, %v6721_v11, %v6724_v31  ;;  %v6726_v60 = vrot.slane %v6724_v31, 4  ;;  %v7070_v20 = vrot.slane %v7068_v63, 4  ;;  %v7251_v56 = vmax.bf16 %v12622_v37, %v12552_v26 }
 0x3e3   : > { %v6883_v46 = vmax.bf16 %v6725_v28, %v6463_v34  ;;  %v7069_v33 = vsel %vm9738_vm11, %v7067_v24, %v7068_v63  ;;  %v7252_v58 = vmax.bf16 %v12629_v8, %v12558_v1  ;;  %v7298_v7 = vmax.bf16 %v7250_v25, %v12668_v53 }
 0x3e4   : > { %v6731_v51 = vsel %vm9593_vm8, %v6726_v60, %v6730_v4  ;;  %v7072_v35 = vsel %vm9738_vm11, %v7070_v20, %v7071_v32  ;;  %v7299_v26 = vmax.bf16 %v7251_v56, %v12688_v17  ;;  %v6020_v6 = vshrl.u32 %v5565_v41, 16 }
 0x3e5   : > { %v6884_v39 = vmax.bf16 %v6731_v51, %v6464_v48  ;;  %v12778_v21 = vmax.bf16 %v7069_v33, %v6883_v46  ;;  %v7300_v49 = vmax.bf16 %v7252_v58, %v12694_v47  ;;  %v7346_v1 = vmax.bf16 %v7298_v7, %v12721_v50  ;;  %v5567_v51 = vld [vmem:[#allocation2 + $0x160] sm:$0x7] }
 0x3e6   : > { %v7347_v18 = vmax.bf16 %v7299_v26, %v12734_v40  ;;  %v6025_v57 = vshll.u32 %v5566_v61, 16  ;;  %v6029_v45 = vshrl.u32 %v5566_v61, 16  ;;  %v6035_v5 = vshll.u32 %v12771_v36, 16 }
 0x3e7   : > { %v12784_v52 = vmax.bf16 %v7072_v35, %v6884_v39  ;;  %v7348_v54 = vmax.bf16 %v7300_v49, %v12737_v30  ;;  %v7394_v9 = vmax.bf16 %v7346_v1, %v12758_v42  ;;  %v6039_v34 = vshrl.u32 %v12771_v36, 16 }
 0x3e8   : > { %v7395_v11 = vmax.bf16 %v7347_v18, %v12778_v21  ;;  %v6027_v62 = vrot.slane %v6025_v57, 5  ;;  %v6031_v27 = vrot.slane %v6029_v45, 4  ;;  %v6037_v48 = vrot.slane %v6035_v5, 5 }
 0x3e9   : > { %v7396_v31 = vmax.bf16 %v7348_v54, %v12784_v52  ;;  %v8494_v4 = vrot.slane %v7394_v9, 11  ;;  %v6041_v63 = vrot.slane %v6039_v34, 4  ;;  %v6339_v24 = vrot.slane %v5566_v61, 5  ;;  %v6911_v54 = vld [vmem:[#allocation2 + $0x15c] sm:$0xe] }
 0x3ea   : > { %v7540_v32 = vrot.slane %v7395_v11, 7  ;;  %v6028_v25 = vsel %vm9285_vm2, %v6020_v6, %v6027_v62  ;;  %v6032_v28 = vor.u32 %v6031_v27, %v6027_v62  ;;  %v6341_v60 = vrot.slane %v12771_v36, 5  ;;  %v6491_v6 = vld [vmem:[#allocation2 + $0x164] sm:$0x1] }
 0x3eb   : > { %v7543_v20 = vrot.slane %v7396_v31, 7  ;;  %v6042_v56 = vor.u32 %v6041_v63, %v6037_v48  ;;  %v6205_v46 = vmax.bf16 %v6028_v25, %v5565_v41  ;;  %v6340_v33 = vrot.slane %v6339_v24, 4 }
 0x3ec   : > { %v7541_v58 = vsel %vm9848_vm14, %v8494_v4, %v7540_v32  ;;  %v7542_v7 = vrot.slane %v7540_v32, 4  ;;  %v6033_v35 = vrot.slane %v6032_v28, 4  ;;  %v6343_v26 = vrot.slane %v6341_v60, 4 }
 0x3ed   : > { %v6043_v39 = vrot.slane %v6042_v56, 4  ;;  %v6342_v49 = vsel %vm9485_vm5, %v6340_v33, %v6341_v60  ;;  %v6465_v1 = vmax.bf16 %v6339_v24, %v6205_v46  ;;  %v6732_v18 = vrot.slane %v6029_v45, 5 }
 0x3ee   : > { %v7544_v9 = vsel %vm9848_vm14, %v7542_v7, %v7543_v20  ;;  %v6038_v41 = vsel %vm9285_vm2, %v6033_v35, %v6037_v48  ;;  %v6733_v11 = vrot.slane %v6025_v57, 6  ;;  %v6736_v62 = vrot.slane %v6039_v34, 5 }
 0x3ef   : > { %v8526_v27 = vcombine.low %v7541_v58, %v7544_v9  ;;  %v6206_v31 = vmax.bf16 %v6038_v41, %v5566_v61  ;;  %v6207_v4 = vmax.bf16 %v6043_v39, %v5567_v51  ;;  %v6737_v63 = vrot.slane %v6035_v5, 6  ;;  %v5568_v58 = vld [vmem:[#allocation2 + $0x16c] sm:$0x8]  ;;  %v5569_v39 = vld [vmem:[#allocation2 + $0x170] sm:$0xf] }
 0x3f0   : > { %v6734_v32 = vor.u32 %v6733_v11, %v6732_v18  ;;  %v6742_v25 = vshll.u32 %v6491_v6, 16  ;;  %v7073_v28 = vrot.slane %v6911_v54, 6  ;;  %v7075_v24 = vrot.slane %v12771_v36, 6 }
 0x3f1   : > { %8983 = vmatprep.mubr.bf16.mxu0 %v8526_v27  ;;  %v6466_v45 = vmax.bf16 %v6342_v49, %v6206_v31  ;;  %v6467_v60 = vmax.bf16 %v6343_v26, %v6207_v4  ;;  %v6738_v56 = vor.u32 %v6737_v63, %v6736_v62  ;;  %v7078_v46 = vrot.slane %v6491_v6, 6  ;;  %v12820_v6 = vld [vmem:[#allocation2 + $0x174] sm:$0xf] }
 0x3f2   : > { %v6735_v20 = vrot.slane %v6734_v32, 4  ;;  %v6744_v33 = vrot.slane %v6742_v25, 6  ;;  %v6885_v7 = vmax.bf16 %v6734_v32, %v6465_v1  ;;  %v7074_v48 = vrot.slane %v7073_v28, 4 }
 0x3f3   : > { %v6740_v57 = vrot.slane %v6738_v56, 4  ;;  %v7077_v34 = vrot.slane %v7075_v24, 4  ;;  %v7253_v61 = vmax.bf16 %v12668_v53, %v12601_v44  ;;  %v7254_v5 = vmax.bf16 %v12688_v17, %v12622_v37 }
 0x3f4   : > { %v6739_v36 = vsel %vm9593_vm8, %v6735_v20, %v6738_v56  ;;  %v7076_v51 = vsel %vm9738_vm11, %v7074_v48, %v7075_v24  ;;  %v12811_v35 = vmax.bf16 %v7073_v28, %v6885_v7  ;;  %v7255_v26 = vmax.bf16 %v12694_v47, %v12629_v8 }
 0x3f5   : > { %v6745_v49 = vsel %vm9593_vm8, %v6740_v57, %v6744_v33  ;;  %v6886_v44 = vmax.bf16 %v6739_v36, %v6466_v45  ;;  %v7079_v37 = vsel %vm9738_vm11, %v7077_v34, %v7078_v46  ;;  %v7301_v1 = vmax.bf16 %v7253_v61, %v12721_v50 }
 0x3f6   : > { %v6887_v18 = vmax.bf16 %v6745_v49, %v6467_v60  ;;  %v7302_v54 = vmax.bf16 %v7254_v5, %v12734_v40  ;;  %v7303_v9 = vmax.bf16 %v7255_v26, %v12737_v30  ;;  %v6045_v41 = vshrl.u32 %v5568_v58, 16 }
 0x3f7   : > { %v12824_v11 = vmax.bf16 %v7076_v51, %v6886_v44  ;;  %v7349_v8 = vmax.bf16 %v7301_v1, %v12758_v42  ;;  %v6050_v62 = vshll.u32 %v5569_v39, 16  ;;  %v6054_v27 = vshrl.u32 %v5569_v39, 16 }
 0x3f8   : > { %v12827_v31 = vmax.bf16 %v7079_v37, %v6887_v18  ;;  %v7350_v4 = vmax.bf16 %v7302_v54, %v12778_v21  ;;  %v7351_v63 = vmax.bf16 %v7303_v9, %v12784_v52  ;;  %v6060_v32 = vshll.u32 %v12820_v6, 16 }
 0x3f9   : > { %v7397_v25 = vmax.bf16 %v7349_v8, %v12811_v35  ;;  %v6052_v28 = vrot.slane %v6050_v62, 5  ;;  %v6056_v24 = vrot.slane %v6054_v27, 4  ;;  %v6064_v45 = vshrl.u32 %v12820_v6, 16  ;;  %v12834_v60 = vpop.f32.mrb[20].mxu1 }
 0x3fa   : > { %13366 = vst [vmem:[#allocation41_spill] sm:$0xff] %v12834_v60  ;;  %v7398_v56 = vmax.bf16 %v7350_v4, %v12824_v11  ;;  %v7399_v46 = vmax.bf16 %v7351_v63, %v12827_v31  ;;  %v6062_v20 = vrot.slane %v6060_v32, 5  ;;  %v6344_v33 = vrot.slane %v5569_v39, 5  ;;  %v12838_v7 = vpop.f32.mrb[21].mxu1  ;;  %v6492_v63 = vld [vmem:[#allocation2 + $0x178] sm:$0x1] }
 0x3fb   : > { %13367 = vst [vmem:[#allocation4_spill] sm:$0xff] %v12838_v7  ;;  %v8495_v48 = vrot.slane %v7397_v25, 11  ;;  %v6053_v57 = vsel %vm9285_vm2, %v6045_v41, %v6052_v28  ;;  %v6057_v34 = vor.u32 %v6056_v24, %v6052_v28  ;;  %v6066_v61 = vrot.slane %v6064_v45, 4  ;;  %v12842_v5 = vpop.f32.mrb[22].mxu1  ;;  %v5570_v41 = vld [vmem:[#allocation2 + $0x174] sm:$0x7] }
 0x3fc   : > { %13368 = vst [vmem:[#allocation3_spill] sm:$0xff] %v12842_v5  ;;  %v7547_v36 = vrot.slane %v7398_v56, 7  ;;  %v7550_v51 = vrot.slane %v7399_v46, 7  ;;  %v6208_v26 = vmax.bf16 %v6053_v57, %v5568_v58  ;;  %v6345_v49 = vrot.slane %v6344_v33, 4  ;;  %v12844_v44 = vpop.f32.mrb[23].mxu1 }
 0x3fd   : > { %13369 = vst [vmem:[#allocation6_spill] sm:$0xff] %v12844_v44  ;;  %v6058_v37 = vrot.slane %v6057_v34, 4  ;;  %v6067_v1 = vor.u32 %v6066_v61, %v6062_v20  ;;  %v6346_v18 = vrot.slane %v12820_v6, 5  ;;  %v6746_v54 = vrot.slane %v6054_v27, 5  ;;  %v6912_v46 = vld [vmem:[#allocation2 + $0x170] sm:$0xe] }
 0x3fe   : > { %v7548_v9 = vsel %vm9848_vm14, %v8495_v48, %v7547_v36  ;;  %v7549_v8 = vrot.slane %v7547_v36, 4  ;;  %v6468_v4 = vmax.bf16 %v6344_v33, %v6208_v26  ;;  %v6747_v25 = vrot.slane %v6050_v62, 6 }
 0x3ff   : > { %v6063_v28 = vsel %vm9285_vm2, %v6058_v37, %v6062_v20  ;;  %v6068_v58 = vrot.slane %v6067_v1, 4  ;;  %v6347_v24 = vsel %vm9485_vm5, %v6345_v49, %v6346_v18  ;;  %v6348_v56 = vrot.slane %v6346_v18, 4 }
 0x400   : > { %v7551_v27 = vsel %vm9848_vm14, %v7549_v8, %v7550_v51  ;;  %v6209_v57 = vmax.bf16 %v6063_v28, %v5569_v39  ;;  %v6748_v34 = vor.u32 %v6747_v25, %v6746_v54  ;;  %v6750_v48 = vrot.slane %v6064_v45, 5 }
 0x401   : > { %v8527_v61 = vcombine.low %v7548_v9, %v7551_v27  ;;  %v6210_v36 = vmax.bf16 %v6068_v58, %v5570_v41  ;;  %v6751_v33 = vrot.slane %v6060_v32, 6  ;;  %v6756_v26 = vshll.u32 %v6492_v63, 16  ;;  %v5571_v9 = vld [vmem:[#allocation2 + $0x180] sm:$0x8] }
 0x402   : > { %v6469_v62 = vmax.bf16 %v6347_v24, %v6209_v57  ;;  %v6749_v44 = vrot.slane %v6748_v34, 4  ;;  %v6888_v5 = vmax.bf16 %v6748_v34, %v6468_v4  ;;  %v7080_v20 = vrot.slane %v6912_v46, 6  ;;  %v12855_v37 = vpop.f32.mrb[0].mxu0  ;;  %v5572_v24 = vld [vmem:[#allocation2 + $0x184] sm:$0xf] }
 0x403   : > { %8984 = vmatmul.mubr.bf16.gmra.mrb[24].mxu0 %v8527_v61  ;;  %v6470_v49 = vmax.bf16 %v6348_v56, %v6210_v36  ;;  %v6752_v1 = vor.u32 %v6751_v33, %v6750_v48  ;;  %v6758_v18 = vrot.slane %v6756_v26, 6  ;;  %v7082_v7 = vrot.slane %v12820_v6, 6  ;;  %v12858_v51 = vpop.f32.mrb[1].mxu0  ;;  %v12877_v56 = vld [vmem:[#allocation2 + $0x188] sm:$0xf] }
 0x404   : > { %v7081_v39 = vrot.slane %v7080_v20, 4  ;;  %v7085_v45 = vrot.slane %v6492_v63, 6  ;;  %v12860_v54 = vmax.bf16 %v7080_v20, %v6888_v5  ;;  %v7256_v32 = vmax.bf16 %v12721_v50, %v12668_v53  ;;  %v12864_v8 = vpop.f32.mrb[2].mxu0 }
 0x405   : > { %v6753_v41 = vsel %vm9593_vm8, %v6749_v44, %v6752_v1  ;;  %v6754_v4 = vrot.slane %v6752_v1, 4  ;;  %v7084_v25 = vrot.slane %v7082_v7, 4  ;;  %v7257_v6 = vmax.bf16 %v12734_v40, %v12688_v17  ;;  %v12870_v28 = vpop.f32.mrb[3].mxu0 }
 0x406   : > { %v6889_v58 = vmax.bf16 %v6753_v41, %v6469_v62  ;;  %v7083_v5 = vsel %vm9738_vm11, %v7081_v39, %v7082_v7  ;;  %v7258_v53 = vmax.bf16 %v12737_v30, %v12694_v47  ;;  %v7304_v63 = vmax.bf16 %v7256_v32, %v12758_v42 }
 0x407   : > { %v6759_v44 = vsel %vm9593_vm8, %v6754_v4, %v6758_v18  ;;  %v7086_v17 = vsel %vm9738_vm11, %v7084_v25, %v7085_v45  ;;  %v7305_v46 = vmax.bf16 %v7257_v6, %v12778_v21  ;;  %v6070_v27 = vshrl.u32 %v5571_v9, 16 }
 0x408   : > { %v6890_v57 = vmax.bf16 %v6759_v44, %v6470_v49  ;;  %v12884_v34 = vmax.bf16 %v7083_v5, %v6889_v58  ;;  %v7306_v7 = vmax.bf16 %v7258_v53, %v12784_v52  ;;  %v7352_v47 = vmax.bf16 %v7304_v63, %v12811_v35 }
 0x409   : > { %v7353_v48 = vmax.bf16 %v7305_v46, %v12824_v11  ;;  %v6075_v61 = vshll.u32 %v5572_v24, 16  ;;  %v6079_v36 = vshrl.u32 %v5572_v24, 16  ;;  %v6085_v33 = vshll.u32 %v12877_v56, 16 }
 0x40a   : > { %v12890_v26 = vmax.bf16 %v7086_v17, %v6890_v57  ;;  %v7354_v62 = vmax.bf16 %v7306_v7, %v12827_v31  ;;  %v7400_v20 = vmax.bf16 %v7352_v47, %v12860_v54  ;;  %v6089_v49 = vshrl.u32 %v12877_v56, 16  ;;  %v5573_v47 = vld [vmem:[#allocation2 + $0x188] sm:$0x7] }
 0x40b   : > { %v7401_v1 = vmax.bf16 %v7353_v48, %v12884_v34  ;;  %v6077_v18 = vrot.slane %v6075_v61, 5  ;;  %v6081_v39 = vrot.slane %v6079_v36, 4  ;;  %v6087_v45 = vrot.slane %v6085_v33, 5 }
 0x40c   : > { %v7402_v32 = vmax.bf16 %v7354_v62, %v12890_v26  ;;  %v8496_v41 = vrot.slane %v7400_v20, 11  ;;  %v6091_v4 = vrot.slane %v6089_v49, 4  ;;  %v6349_v25 = vrot.slane %v5572_v24, 5 }
 0x40d   : > { %v7554_v6 = vrot.slane %v7401_v1, 7  ;;  %v6078_v58 = vsel %vm9285_vm2, %v6070_v27, %v6077_v18  ;;  %v6082_v5 = vor.u32 %v6081_v39, %v6077_v18  ;;  %v6351_v53 = vrot.slane %v12877_v56, 5  ;;  %v6493_v27 = vld [vmem:[#allocation2 + $0x18c] sm:$0x1]  ;;  %v6913_v39 = vld [vmem:[#allocation2 + $0x184] sm:$0xe] }
 0x40e   : > { %v7557_v63 = vrot.slane %v7402_v32, 7  ;;  %v6092_v44 = vor.u32 %v6091_v4, %v6087_v45  ;;  %v6211_v17 = vmax.bf16 %v6078_v58, %v5571_v9  ;;  %v6350_v46 = vrot.slane %v6349_v25, 4 }
 0x40f   : > { %v7555_v57 = vsel %vm9848_vm14, %v8496_v41, %v7554_v6  ;;  %v7556_v7 = vrot.slane %v7554_v6, 4  ;;  %v6083_v48 = vrot.slane %v6082_v5, 4  ;;  %v6353_v62 = vrot.slane %v6351_v53, 4 }
 0x410   : > { %v6093_v20 = vrot.slane %v6092_v44, 4  ;;  %v6352_v1 = vsel %vm9485_vm5, %v6350_v46, %v6351_v53  ;;  %v6471_v60 = vmax.bf16 %v6349_v25, %v6211_v17  ;;  %v6760_v18 = vrot.slane %v6079_v36, 5 }
 0x411   : > { %v7558_v32 = vsel %vm9848_vm14, %v7556_v7, %v7557_v63  ;;  %v6088_v9 = vsel %vm9285_vm2, %v6083_v48, %v6087_v45  ;;  %v6761_v4 = vrot.slane %v6075_v61, 6  ;;  %v6764_v41 = vrot.slane %v6089_v49, 5 }
 0x412   : > { %v8528_v6 = vcombine.low %v7555_v57, %v7558_v32  ;;  %v6212_v58 = vmax.bf16 %v6088_v9, %v5572_v24  ;;  %v6213_v5 = vmax.bf16 %v6093_v20, %v5573_v47  ;;  %v6765_v14 = vrot.slane %v6085_v33, 6 }
 0x413   : > { %v6762_v44 = vor.u32 %v6761_v4, %v6760_v18  ;;  %v6770_v59 = vshll.u32 %v6493_v27, 16  ;;  %v7087_v15 = vrot.slane %v6913_v39, 6  ;;  %v7089_v25 = vrot.slane %v12877_v56, 6 }
 0x414   : > { %8987 = vmatprep.mubr.bf16.mxu0 %v8528_v6  ;;  %v6472_v36 = vmax.bf16 %v6352_v1, %v6212_v58  ;;  %v6473_v53 = vmax.bf16 %v6353_v62, %v6213_v5  ;;  %v6766_v17 = vor.u32 %v6765_v14, %v6764_v41  ;;  %v7092_v46 = vrot.slane %v6493_v27, 6 }
 0x415   : > { %v6763_v63 = vrot.slane %v6762_v44, 4  ;;  %v6772_v7 = vrot.slane %v6770_v59, 6  ;;  %v6891_v29 = vmax.bf16 %v6762_v44, %v6471_v60  ;;  %v7088_v45 = vrot.slane %v7087_v15, 4 }
 0x416   : > { %v6768_v61 = vrot.slane %v6766_v17, 4  ;;  %v7091_v49 = vrot.slane %v7089_v25, 4  ;;  %v7259_v24 = vmax.bf16 %v12758_v42, %v12721_v50  ;;  %v7260_v33 = vmax.bf16 %v12778_v21, %v12734_v40  ;;  %v12927_v40 = vld [vmem:[%s13087_s2] ss:$0 sm:$0xff] }
 0x417   : > { %v6767_v56 = vsel %vm9593_vm8, %v6763_v63, %v6766_v17  ;;  %v7090_v57 = vsel %vm9738_vm11, %v7088_v45, %v7089_v25  ;;  %v7211_v14 = vmax.bf16 %v7087_v15, %v6891_v29  ;;  %v7261_v59 = vmax.bf16 %v12784_v52, %v12737_v30 }
 0x418   : > { %v6773_v60 = vsel %vm9593_vm8, %v6768_v61, %v6772_v7  ;;  %v6892_v47 = vmax.bf16 %v6767_v56, %v6472_v36  ;;  %v7093_v50 = vsel %vm9738_vm11, %v7091_v49, %v7092_v46  ;;  %v7307_v42 = vmax.bf16 %v7259_v24, %v12811_v35 }
 0x419   : > { %v6893_v21 = vmax.bf16 %v6773_v60, %v6473_v53  ;;  %v7308_v48 = vmax.bf16 %v7260_v33, %v12824_v11  ;;  %v7309_v62 = vmax.bf16 %v7261_v59, %v12827_v31  ;;  %v8991_v23 = vadd.f32 %v12855_v37, %v12570_v43 }
 0x41a   : > { %v7212_v30 = vmax.bf16 %v7090_v57, %v6892_v47  ;;  %v7355_v52 = vmax.bf16 %v7307_v42, %v12860_v54  ;;  %v8992_v35 = vadd.f32 %v12858_v51, %v12574_v13  ;;  %v8993_v20 = vadd.f32 %v12864_v8, %v12580_v3 }
 0x41b   : > { %v7213_v11 = vmax.bf16 %v7093_v50, %v6893_v21  ;;  %v7356_v31 = vmax.bf16 %v7308_v48, %v12884_v34  ;;  %v7357_v1 = vmax.bf16 %v7309_v62, %v12890_v26  ;;  %v7897_v43 = vmul.f32 %v8991_v23, %v12927_v40 }
 0x41c   : > { %v7403_v37 = vmax.bf16 %v7355_v52, %v7211_v14  ;;  %v7895_v54 = vmul.f32 %v8992_v35, %v12927_v40  ;;  %v7898_v27 = vmul.f32 %v8993_v20, %v12927_v40  ;;  %v8994_v18 = vadd.f32 %v12870_v28, %v12582_v12  ;;  %v12950_v39 = vpop.f32.mrb[24].mxu1 }
 0x41d   : > { %v7404_v13 = vmax.bf16 %v7356_v31, %v7212_v30  ;;  %v7405_v51 = vmax.bf16 %v7357_v1, %v7213_v11  ;;  %v7936_v3 = vadd.f32 %v12937_v0, %v7897_v43  ;;  %v12953_v8 = vpop.f32.mrb[25].mxu1 }
 0x41e   : > { %v8497_v34 = vrot.slane %v7403_v37, 11  ;;  %v7934_v26 = vadd.f32 %v12937_v0, %v7895_v54  ;;  %v7937_v32 = vadd.f32 %v12937_v0, %v7898_v27  ;;  %v7896_v9 = vmul.f32 %v8994_v18, %v12927_v40  ;;  %v12958_v4 = vpop.f32.mrb[26].mxu1 }
 0x41f   : > { %v7561_v41 = vrot.slane %v7404_v13, 7  ;;  %v7564_v12 = vrot.slane %v7405_v51, 7  ;;  %vm7968_vm15 = vcmp.gt.f32.partialorder %v7936_v3, 0.0  ;;  %v8000_v28 = vmul.f32 0.1, %v7936_v3  ;;  %v12960_v6 = vpop.f32.mrb[27].mxu1 }
 0x420   : > { %vm7969_vm0 = vcmp.gt.f32.partialorder %v7937_v32, 0.0  ;;  %v8001_v58 = vmul.f32 0.1, %v7937_v32  ;;  %v7998_v15 = vmul.f32 0.1, %v7934_v26  ;;  %v7935_v25 = vadd.f32 %v12937_v0, %v7896_v9 }
 0x421   : > { %v7562_v5 = vsel %vm9848_vm14, %v8497_v34, %v7561_v41  ;;  %v7563_v44 = vrot.slane %v7561_v41, 4  ;;  %v8032_v36 = vsel %vm7968_vm15, %v7936_v3, %v8000_v28  ;;  %vm7966_vm1 = vcmp.gt.f32.partialorder %v7934_v26, 0.0 }
 0x422   : > { %v8033_v53 = vsel %vm7969_vm0, %v7937_v32, %v8001_v58  ;;  %vm7967_vm2 = vcmp.gt.f32.partialorder %v7935_v25, 0.0  ;;  %v7999_v63 = vmul.f32 0.1, %v7935_v25  ;;  %v8030_v29 = vsel %vm7966_vm1, %v7934_v26, %v7998_v15  ;;  %v13370_v26 = vld [vmem:[#allocation33_spill] sm:$0xff] }
 0x423   : > { %v7565_v17 = vsel %vm9848_vm14, %v7563_v44, %v7564_v12  ;;  %v8616_v46 = vpack.c.bf16 %v8033_v53, %v8032_v36  ;;  %v13371_v12 = vld [vmem:[#allocation29_spill] sm:$0xff] }
 0x424   : > { %v8529_v7 = vcombine.low %v7562_v5, %v7565_v17  ;;  %v8031_v45 = vsel %vm7967_vm2, %v7935_v25, %v7999_v63 }
 0x425   : > { %8688 = vst [vmem:[%s12970_s24 + $0x8] sm:$0xff] %v8616_v46   ;;  %v8611_v61 = vpack.c.bf16 %v8031_v45, %v8030_v29 }
 0x426   : > { %8988 = vmatmul.mubr.bf16.gmra.mrb[28].mxu0 %v8529_v7  ;;  %v8965_v49 = vpop.f32.mrb[4].mxu0 }
 0x427   : > { %v8995_v24 = vadd.f32 %v8965_v49, %v12585_v2  ;;  %v7745_v33 = vpop.f32.mrb[5].mxu0  ;;  %8612 = vst [vmem:[%s12970_s24] sm:$0xff] %v8611_v61  }
 0x428   : > { %v8996_v56 = vadd.f32 %v7745_v33, %v12587_v19  ;;  %v8966_v57 = vpop.f32.mrb[6].mxu0 }
 0x429   : > { %v7901_v38 = vmul.f32 %v8995_v24, %v12927_v40  ;;  %v8997_v14 = vadd.f32 %v8966_v57, %v12589_v22  ;;  %v7748_v59 = vpop.f32.mrb[7].mxu0  ;;  %v13372_v24 = vld [vmem:[#allocation34_spill] sm:$0xff] }
 0x42a   : > { %v7899_v60 = vmul.f32 %v8996_v56, %v12927_v40  ;;  %v8998_v47 = vadd.f32 %v7748_v59, %v12595_v55  ;;  %v13373_v57 = vld [vmem:[#allocation30_spill] sm:$0xff] }
 0x42b   : > { %v7940_v50 = vadd.f32 %v12937_v0, %v7901_v38  ;;  %v7902_v42 = vmul.f32 %v8997_v14, %v12927_v40 }
 0x42c   : > { %v7938_v2 = vadd.f32 %v12937_v0, %v7899_v60  ;;  %v7900_v21 = vmul.f32 %v8998_v47, %v12927_v40  ;;  %v13374_v60 = vld [vmem:[#allocation35_spill] sm:$0xff] }
 0x42d   : > { %v8004_v48 = vmul.f32 0.1, %v7940_v50  ;;  %v7941_v19 = vadd.f32 %v12937_v0, %v7902_v42  ;;  %vm7972_vm3 = vcmp.gt.f32.partialorder %v7940_v50, 0.0 }
 0x42e   : > { %v8002_v22 = vmul.f32 0.1, %v7938_v2  ;;  %v7939_v62 = vadd.f32 %v12937_v0, %v7900_v21  ;;  %vm7970_vm4 = vcmp.gt.f32.partialorder %v7938_v2, 0.0 }
 0x42f   : > { %vm7973_vm5 = vcmp.gt.f32.partialorder %v7941_v19, 0.0  ;;  %v8005_v55 = vmul.f32 0.1, %v7941_v19  ;;  %v8036_v30 = vsel %vm7972_vm3, %v7940_v50, %v8004_v48 }
 0x430   : > { %vm7971_vm6 = vcmp.gt.f32.partialorder %v7939_v62, 0.0  ;;  %v8003_v23 = vmul.f32 0.1, %v7939_v62  ;;  %v8034_v35 = vsel %vm7970_vm4, %v7938_v2, %v8002_v22  ;;  %v13375_v2 = vld [vmem:[#allocation36_spill] sm:$0xff] }
 0x431   : > { %v8037_v52 = vsel %vm7973_vm5, %v7941_v19, %v8005_v55 }
 0x432   : > { %v8626_v20 = vpack.c.bf16 %v8037_v52, %v8036_v30  ;;  %v8035_v11 = vsel %vm7971_vm6, %v7939_v62, %v8003_v23 }
 0x433   : > { %v8621_v31 = vpack.c.bf16 %v8035_v11, %v8034_v35 }
 0x434   : > { %8690 = vst [vmem:[%s12970_s24 + $0x18] sm:$0xff] %v8626_v20  }
 0x435   : > { %8689 = vst [vmem:[%s12970_s24 + $0x10] sm:$0xff] %v8621_v31  }
 0x440   : > { %v12990_v1 = vpop.f32.mrb[28].mxu1 }
 0x441   : > { %v12992_v43 = vpop.f32.mrb[29].mxu1 }
 0x442   : > { %v12994_v37 = vpop.f32.mrb[30].mxu1 }
 0x443   : > { %v12996_v54 = vpop.f32.mrb[31].mxu1 }
 0x449   : > { %v8969_v27 = vpop.f32.mrb[8].mxu0 }
 0x44a   : > { %v8999_v18 = vadd.f32 %v8969_v27, %v12607_v16  ;;  %v7761_v13 = vpop.f32.mrb[9].mxu0 }
 0x44b   : > { %v9000_v51 = vadd.f32 %v7761_v13, %v12616_v10  ;;  %v8970_v3 = vpop.f32.mrb[10].mxu0 }
 0x44c   : > { %v7905_v34 = vmul.f32 %v8999_v18, %v12927_v40  ;;  %v9001_v32 = vadd.f32 %v8970_v3, %v13370_v26  ;;  %v7764_v9 = vpop.f32.mrb[11].mxu0 }
 0x44d   : > { %v7903_v41 = vmul.f32 %v9000_v51, %v12927_v40  ;;  %v9002_v28 = vadd.f32 %v7764_v9, %v13371_v12  ;;  %v13377_v9 = vld [vmem:[#allocation38_spill] sm:$0xff] }
 0x44e   : > { %v7944_v58 = vadd.f32 %v12937_v0, %v7905_v34  ;;  %v7906_v5 = vmul.f32 %v9001_v32, %v12927_v40  ;;  %v13376_v34 = vld [vmem:[#allocation37_spill] sm:$0xff] }
 0x44f   : > { %v7942_v44 = vadd.f32 %v12937_v0, %v7903_v41  ;;  %v7904_v16 = vmul.f32 %v9002_v28, %v12927_v40 }
 0x450   : > { %v8008_v15 = vmul.f32 0.1, %v7944_v58  ;;  %v7945_v10 = vadd.f32 %v12937_v0, %v7906_v5  ;;  %vm7976_vm7 = vcmp.gt.f32.partialorder %v7944_v58, 0.0 }
 0x451   : > { %v8006_v25 = vmul.f32 0.1, %v7942_v44  ;;  %v7943_v36 = vadd.f32 %v12937_v0, %v7904_v16  ;;  %vm7974_vm8 = vcmp.gt.f32.partialorder %v7942_v44, 0.0 }
 0x452   : > { %vm7977_vm9 = vcmp.gt.f32.partialorder %v7945_v10, 0.0  ;;  %v8009_v53 = vmul.f32 0.1, %v7945_v10  ;;  %v8040_v46 = vsel %vm7976_vm7, %v7944_v58, %v8008_v15  ;;  %v13378_v58 = vld [vmem:[#allocation39_spill] sm:$0xff]  ;;  %v13379_v15 = vld [vmem:[#allocation40_spill] sm:$0xff] }
 0x453   : > { %vm7975_vm10 = vcmp.gt.f32.partialorder %v7943_v36, 0.0  ;;  %v8007_v17 = vmul.f32 0.1, %v7943_v36  ;;  %v8038_v7 = vsel %vm7974_vm8, %v7942_v44, %v8006_v25 }
 0x454   : > { %v8041_v63 = vsel %vm7977_vm9, %v7945_v10, %v8009_v53 }
 0x455   : > { %v8636_v29 = vpack.c.bf16 %v8041_v63, %v8040_v46  ;;  %v8039_v45 = vsel %vm7975_vm10, %v7943_v36, %v8007_v17 }
 0x456   : > { %v8631_v61 = vpack.c.bf16 %v8039_v45, %v8038_v7 }
 0x457   : > { %8692 = vst [vmem:[%s12970_s24 + $0x28] sm:$0xff] %v8636_v29  }
 0x458   : > { %8691 = vst [vmem:[%s12970_s24 + $0x20] sm:$0xff] %v8631_v61  }
 0x46d   : > { %v8973_v49 = vpop.f32.mrb[12].mxu0 }
 0x46e   : > { %v9003_v33 = vadd.f32 %v8973_v49, %v13372_v24  ;;  %v7777_v56 = vpop.f32.mrb[13].mxu0 }
 0x46f   : > { %v9004_v38 = vadd.f32 %v7777_v56, %v13373_v57  ;;  %v8974_v14 = vpop.f32.mrb[14].mxu0 }
 0x470   : > { %v7909_v59 = vmul.f32 %v9003_v33, %v12927_v40  ;;  %v9005_v47 = vadd.f32 %v8974_v14, %v13374_v60  ;;  %v7780_v50 = vpop.f32.mrb[15].mxu0 }
 0x471   : > { %v7907_v42 = vmul.f32 %v9004_v38, %v12927_v40  ;;  %v9006_v21 = vadd.f32 %v7780_v50, %v13375_v2  ;;  %v13381_v50 = vld [vmem:[#allocation4_spill] sm:$0xff] }
 0x472   : > { %v7948_v48 = vadd.f32 %v12937_v0, %v7909_v59  ;;  %v7910_v19 = vmul.f32 %v9005_v47, %v12927_v40  ;;  %v13380_v59 = vld [vmem:[#allocation41_spill] sm:$0xff] }
 0x473   : > { %v7946_v22 = vadd.f32 %v12937_v0, %v7907_v42  ;;  %v7908_v62 = vmul.f32 %v9006_v21, %v12927_v40 }
 0x474   : > { %v8012_v55 = vmul.f32 0.1, %v7948_v48  ;;  %v7949_v23 = vadd.f32 %v12937_v0, %v7910_v19  ;;  %vm7980_vm11 = vcmp.gt.f32.partialorder %v7948_v48, 0.0 }
 0x475   : > { %v8010_v30 = vmul.f32 0.1, %v7946_v22  ;;  %v7947_v52 = vadd.f32 %v12937_v0, %v7908_v62  ;;  %vm7978_vm12 = vcmp.gt.f32.partialorder %v7946_v22, 0.0 }
 0x476   : > { %vm7981_vm13 = vcmp.gt.f32.partialorder %v7949_v23, 0.0  ;;  %v8013_v35 = vmul.f32 0.1, %v7949_v23  ;;  %v8044_v11 = vsel %vm7980_vm11, %v7948_v48, %v8012_v55  ;;  %v13382_v48 = vld [vmem:[#allocation3_spill] sm:$0xff]  ;;  %v13383_v55 = vld [vmem:[#allocation6_spill] sm:$0xff] }
 0x477   : > { %vm7979_vm14 = vcmp.gt.f32.partialorder %v7947_v52, 0.0  ;;  %v8011_v20 = vmul.f32 0.1, %v7947_v52  ;;  %v8042_v27 = vsel %vm7978_vm12, %v7946_v22, %v8010_v30 }
 0x478   : > { %v8045_v31 = vsel %vm7981_vm13, %v7949_v23, %v8013_v35 }
 0x479   : > { %v8646_v18 = vpack.c.bf16 %v8045_v31, %v8044_v11  ;;  %v8043_v13 = vsel %vm7979_vm14, %v7947_v52, %v8011_v20 }
 0x47a   : > { %v8641_v51 = vpack.c.bf16 %v8043_v13, %v8042_v27 }
 0x47b   : > { %8694 = vst [vmem:[%s12970_s24 + $0x38] sm:$0xff] %v8646_v18  }
 0x47c   : > { %8693 = vst [vmem:[%s12970_s24 + $0x30] sm:$0xff] %v8641_v51  }
 0x490   : > { %v8977_v3 = vpop.f32.mrb[16].mxu0 }
 0x491   : > { %v9007_v26 = vadd.f32 %v8977_v3, %v13376_v34  ;;  %v7793_v32 = vpop.f32.mrb[17].mxu0 }
 0x492   : > { %v9008_v41 = vadd.f32 %v7793_v32, %v13377_v9  ;;  %v8978_v12 = vpop.f32.mrb[18].mxu0 }
 0x493   : > { %v7913_v28 = vmul.f32 %v9007_v26, %v12927_v40  ;;  %v9009_v5 = vadd.f32 %v8978_v12, %v13378_v58  ;;  %v7796_v44 = vpop.f32.mrb[19].mxu0 }
 0x494   : > { %v7911_v16 = vmul.f32 %v9008_v41, %v12927_v40  ;;  %v9010_v10 = vadd.f32 %v7796_v44, %v13379_v15 }
 0x495   : > { %v7952_v25 = vadd.f32 %v12937_v0, %v7913_v28  ;;  %v7914_v36 = vmul.f32 %v9009_v5, %v12927_v40 }
 0x496   : > { %v7950_v53 = vadd.f32 %v12937_v0, %v7911_v16  ;;  %v7912_v17 = vmul.f32 %v9010_v10, %v12927_v40 }
 0x497   : > { %v8016_v46 = vmul.f32 0.1, %v7952_v25  ;;  %v7953_v63 = vadd.f32 %v12937_v0, %v7914_v36  ;;  %vm7984_vm15 = vcmp.gt.f32.partialorder %v7952_v25, 0.0 }
 0x498   : > { %v8014_v7 = vmul.f32 0.1, %v7950_v53  ;;  %v7951_v29 = vadd.f32 %v12937_v0, %v7912_v17  ;;  %vm7982_vm0 = vcmp.gt.f32.partialorder %v7950_v53, 0.0 }
 0x499   : > { %vm7985_vm1 = vcmp.gt.f32.partialorder %v7953_v63, 0.0  ;;  %v8017_v45 = vmul.f32 0.1, %v7953_v63  ;;  %v8048_v49 = vsel %vm7984_vm15, %v7952_v25, %v8016_v46 }
 0x49a   : > { %vm7983_vm2 = vcmp.gt.f32.partialorder %v7951_v29, 0.0  ;;  %v8015_v61 = vmul.f32 0.1, %v7951_v29  ;;  %v8046_v33 = vsel %vm7982_vm0, %v7950_v53, %v8014_v7 }
 0x49b   : > { %v8049_v24 = vsel %vm7985_vm1, %v7953_v63, %v8017_v45 }
 0x49c   : > { %v8656_v56 = vpack.c.bf16 %v8049_v24, %v8048_v49  ;;  %v8047_v57 = vsel %vm7983_vm2, %v7951_v29, %v8015_v61 }
 0x49d   : > { %v8651_v38 = vpack.c.bf16 %v8047_v57, %v8046_v33 }
 0x49e   : > { %8696 = vst [vmem:[%s12970_s24 + $0x48] sm:$0xff] %v8656_v56  }
 0x49f   : > { %8695 = vst [vmem:[%s12970_s24 + $0x40] sm:$0xff] %v8651_v38  }
 0x4b3   : > { %v8981_v14 = vpop.f32.mrb[20].mxu0 }
 0x4b4   : > { %v9011_v60 = vadd.f32 %v8981_v14, %v13380_v59  ;;  %v7809_v47 = vpop.f32.mrb[21].mxu0 }
 0x4b5   : > { %v9012_v42 = vadd.f32 %v7809_v47, %v13381_v50  ;;  %v8982_v2 = vpop.f32.mrb[22].mxu0 }
 0x4b6   : > { %v7917_v21 = vmul.f32 %v9011_v60, %v12927_v40  ;;  %v9013_v19 = vadd.f32 %v8982_v2, %v13382_v48  ;;  %v7812_v22 = vpop.f32.mrb[23].mxu0 }
 0x4b7   : > { %v7915_v62 = vmul.f32 %v9012_v42, %v12927_v40  ;;  %v9014_v23 = vadd.f32 %v7812_v22, %v13383_v55 }
 0x4b8   : > { %v7956_v30 = vadd.f32 %v12937_v0, %v7917_v21  ;;  %v7918_v52 = vmul.f32 %v9013_v19, %v12927_v40 }
 0x4b9   : > { %v7954_v35 = vadd.f32 %v12937_v0, %v7915_v62  ;;  %v7916_v20 = vmul.f32 %v9014_v23, %v12927_v40 }
 0x4ba   : > { %v8020_v11 = vmul.f32 0.1, %v7956_v30  ;;  %v7957_v31 = vadd.f32 %v12937_v0, %v7918_v52  ;;  %vm7988_vm3 = vcmp.gt.f32.partialorder %v7956_v30, 0.0 }
 0x4bb   : > { %v8018_v27 = vmul.f32 0.1, %v7954_v35  ;;  %v7955_v18 = vadd.f32 %v12937_v0, %v7916_v20  ;;  %vm7986_vm4 = vcmp.gt.f32.partialorder %v7954_v35, 0.0 }
 0x4bc   : > { %vm7989_vm5 = vcmp.gt.f32.partialorder %v7957_v31, 0.0  ;;  %v8021_v13 = vmul.f32 0.1, %v7957_v31  ;;  %v8052_v3 = vsel %vm7988_vm3, %v7956_v30, %v8020_v11 }
 0x4bd   : > { %vm7987_vm6 = vcmp.gt.f32.partialorder %v7955_v18, 0.0  ;;  %v8019_v51 = vmul.f32 0.1, %v7955_v18  ;;  %v8050_v26 = vsel %vm7986_vm4, %v7954_v35, %v8018_v27 }
 0x4be   : > { %v8053_v34 = vsel %vm7989_vm5, %v7957_v31, %v8021_v13 }
 0x4bf   : > { %v8666_v32 = vpack.c.bf16 %v8053_v34, %v8052_v3  ;;  %v8051_v9 = vsel %vm7987_vm6, %v7955_v18, %v8019_v51 }
 0x4c0   : > { %v8661_v41 = vpack.c.bf16 %v8051_v9, %v8050_v26 }
 0x4c1   : > { %8698 = vst [vmem:[%s12970_s24 + $0x58] sm:$0xff] %v8666_v32  }
 0x4c2   : > { %8697 = vst [vmem:[%s12970_s24 + $0x50] sm:$0xff] %v8661_v41  }
 0x4d6   : > { %v8985_v12 = vpop.f32.mrb[24].mxu0 }
 0x4d7   : > { %v9015_v28 = vadd.f32 %v8985_v12, %v12950_v39  ;;  %v7825_v58 = vpop.f32.mrb[25].mxu0 }
 0x4d8   : > { %v9016_v5 = vadd.f32 %v7825_v58, %v12953_v8  ;;  %v8986_v44 = vpop.f32.mrb[26].mxu0 }
 0x4d9   : > { %v7921_v16 = vmul.f32 %v9015_v28, %v12927_v40  ;;  %v9017_v15 = vadd.f32 %v8986_v44, %v12958_v4  ;;  %v7828_v10 = vpop.f32.mrb[27].mxu0 }
 0x4da   : > { %v7919_v25 = vmul.f32 %v9016_v5, %v12927_v40  ;;  %v9018_v36 = vadd.f32 %v7828_v10, %v12960_v6 }
 0x4db   : > { %v7960_v53 = vadd.f32 %v12937_v0, %v7921_v16  ;;  %v7922_v17 = vmul.f32 %v9017_v15, %v12927_v40 }
 0x4dc   : > { %v7958_v46 = vadd.f32 %v12937_v0, %v7919_v25  ;;  %v7920_v39 = vmul.f32 %v9018_v36, %v12927_v40 }
 0x4dd   : > { %v8024_v63 = vmul.f32 0.1, %v7960_v53  ;;  %v7961_v8 = vadd.f32 %v12937_v0, %v7922_v17  ;;  %vm7992_vm7 = vcmp.gt.f32.partialorder %v7960_v53, 0.0 }
 0x4de   : > { %v8022_v4 = vmul.f32 0.1, %v7958_v46  ;;  %v7959_v7 = vadd.f32 %v12937_v0, %v7920_v39  ;;  %vm7990_vm8 = vcmp.gt.f32.partialorder %v7958_v46, 0.0 }
 0x4df   : > { %vm7993_vm9 = vcmp.gt.f32.partialorder %v7961_v8, 0.0  ;;  %v8025_v6 = vmul.f32 0.1, %v7961_v8  ;;  %v8056_v45 = vsel %vm7992_vm7, %v7960_v53, %v8024_v63 }
 0x4e0   : > { %vm7991_vm10 = vcmp.gt.f32.partialorder %v7959_v7, 0.0  ;;  %v8023_v29 = vmul.f32 0.1, %v7959_v7  ;;  %v8054_v49 = vsel %vm7990_vm8, %v7958_v46, %v8022_v4 }
 0x4e1   : > { %v8057_v61 = vsel %vm7993_vm9, %v7961_v8, %v8025_v6 }
 0x4e2   : > { %v8676_v24 = vpack.c.bf16 %v8057_v61, %v8056_v45  ;;  %v8055_v33 = vsel %vm7991_vm10, %v7959_v7, %v8023_v29 }
 0x4e3   : > { %v8671_v56 = vpack.c.bf16 %v8055_v33, %v8054_v49 }
 0x4e4   : > { %8700 = vst [vmem:[%s12970_s24 + $0x68] sm:$0xff] %v8676_v24  }
 0x4e5   : > { %8699 = vst [vmem:[%s12970_s24 + $0x60] sm:$0xff] %v8671_v56  }
 0x4f9   : > { %v8989_v57 = vpop.f32.mrb[28].mxu0 }
 0x4fa   : > { %v9019_v38 = vadd.f32 %v8989_v57, %v12990_v1  ;;  %v7841_v14 = vpop.f32.mrb[29].mxu0 }
 0x4fb   : > { %v9020_v59 = vadd.f32 %v7841_v14, %v12992_v43  ;;  %v8990_v60 = vpop.f32.mrb[30].mxu0 }
 0x4fc   : > { %v7925_v47 = vmul.f32 %v9019_v38, %v12927_v40  ;;  %v9021_v50 = vadd.f32 %v8990_v60, %v12994_v37  ;;  %v7844_v42 = vpop.f32.mrb[31].mxu0 }
 0x4fd   : > { %v7923_v2 = vmul.f32 %v9020_v59, %v12927_v40  ;;  %v9022_v21 = vadd.f32 %v7844_v42, %v12996_v54 }
 0x4fe   : > { %v7964_v48 = vadd.f32 %v12937_v0, %v7925_v47  ;;  %v7926_v19 = vmul.f32 %v9021_v50, %v12927_v40 }
 0x4ff   : > { %v7962_v22 = vadd.f32 %v12937_v0, %v7923_v2  ;;  %v7924_v1 = vmul.f32 %v9022_v21, %v12927_v40 }
 0x500   : > { %v8028_v62 = vmul.f32 0.1, %v7964_v48  ;;  %v7965_v43 = vadd.f32 %v12937_v0, %v7926_v19  ;;  %vm7996_vm11 = vcmp.gt.f32.partialorder %v7964_v48, 0.0 }
 0x501   : > { %v8026_v37 = vmul.f32 0.1, %v7962_v22  ;;  %v7963_v55 = vadd.f32 %v12937_v0, %v7924_v1  ;;  %vm7994_vm12 = vcmp.gt.f32.partialorder %v7962_v22, 0.0 }
 0x502   : > { %vm7997_vm13 = vcmp.gt.f32.partialorder %v7965_v43, 0.0  ;;  %v8029_v54 = vmul.f32 0.1, %v7965_v43  ;;  %v8060_v30 = vsel %vm7996_vm11, %v7964_v48, %v8028_v62 }
 0x503   : > { %vm7995_vm14 = vcmp.gt.f32.partialorder %v7963_v55, 0.0  ;;  %v8027_v23 = vmul.f32 0.1, %v7963_v55  ;;  %v8058_v35 = vsel %vm7994_vm12, %v7962_v22, %v8026_v37 }
 0x504   : > { %v8061_v52 = vsel %vm7997_vm13, %v7965_v43, %v8029_v54 }
 0x505   : > { %v8686_v20 = vpack.c.bf16 %v8061_v52, %v8060_v30  ;;  %v8059_v11 = vsel %vm7995_vm14, %v7963_v55, %v8027_v23 }
 0x506   : > { %v8681_v40 = vpack.c.bf16 %v8059_v11, %v8058_v35 }
 0x507   : > { %8702 = vst [vmem:[%s12970_s24 + $0x78] sm:$0xff] %v8686_v20  }
 0x508   : > { %8701 = vst [vmem:[%s12970_s24 + $0x70] sm:$0xff] %v8681_v40  }
 0x509 PF: > { %s14_s15 = sadd.s32 1, %s9151_s15  }
 0x50a   : > { %p11_p4 = scmp.ge.s32.totalorder %s14_s15, 4  }
 0x50c   :  { %13 = sbr.rel (!%p11_p4) target bundleno = 1 (0x1), region = 71 }

</bundles_post_ra>
